<compile_context>
chip_gen: v7x
topology: tpu7x:2x2x1
jax: 0.10.0
libtpu: 0.0.40
codegen_flags: <defaults>
</compile_context>

<pallas_src>
import functools

import jax
import jax.numpy as jnp
from jax import lax
from jax.experimental import pallas as pl
from jax.experimental.pallas import tpu as pltpu

EPS = 1e-5
LEAKY_SLOPE = 0.2

COL0 = 8      # image starts at this sublane-aligned column inside the xp scratch
PAD_R = 8     # right halo block width (keeps the right zero-strip store aligned)


def _chunked(total_rows, chunk_rows, body, init):
    """Run body(r0, rows, carry) -> carry over row chunks: fori_loop over full chunks
    of size `chunk_rows` plus one statically-sized tail chunk."""
    n_full = total_rows // chunk_rows
    tail = total_rows - n_full * chunk_rows
    carry = init
    if n_full:
        def loop_body(ci, c):
            return body(pl.multiple_of(ci * chunk_rows, chunk_rows), chunk_rows, c)
        carry = lax.fori_loop(0, n_full, loop_body, carry, unroll=n_full <= 4)
    if tail:
        carry = body(n_full * chunk_rows, tail, carry)
    return carry


def _resnet_block_kernel(x_ref, w1_ref, w2_ref, o_ref, xp_ref, conv_ref,
                         *, H, W, C, TH, grouped):
    """Fused ResNetBlock forward for one batch element (NHWC, channels on lanes)."""
    f32 = jnp.float32
    inv_hw = 1.0 / float(H * W)
    Wp = W + COL0 + PAD_R

    # ---- Build H-padded bf16 copy of x; image at columns [COL0, COL0+W). Only the halo
    #      strips are zeroed (top/bottom rows + the two 8-wide column blocks). -------------
    xp_ref[0:1, :, :] = jnp.zeros((1, Wp, C), xp_ref.dtype)
    xp_ref[H + 1:H + 2, :, :] = jnp.zeros((1, Wp, C), xp_ref.dtype)

    def fill_chunk(r0, rows, carry):
        xp_ref[pl.ds(r0 + 1, rows), 0:COL0, :] = jnp.zeros((rows, COL0, C), xp_ref.dtype)
        xp_ref[pl.ds(r0 + 1, rows), COL0 + W:Wp, :] = jnp.zeros((rows, PAD_R, C), xp_ref.dtype)
        xp_ref[pl.ds(r0 + 1, rows), COL0:COL0 + W, :] = (
            x_ref[0, pl.ds(r0, rows), :, :].astype(xp_ref.dtype))
        return carry

    _chunked(H, TH, fill_chunk, 0)

    # ---- 3x3 'valid' conv over xp -> raw f32 conv_ref, with one-pass per-channel stats. ----
    def conv3x3(w_ref):
        def chunk(r0, rows, carry):
            sums, ssqs = carry
            m = rows * W

            def tap(dy, dx):
                c0 = COL0 - 1 + dx          # zero halo columns make the shift "free" math-wise
                return xp_ref[pl.ds(r0 + dy, rows), c0:c0 + W, :].reshape(m, C)

            if grouped:
                # Per-dy grouped matmul (K = 3C), accumulated through VMEM (conv_ref) so the
                # f32 accumulator never has to live in vregs across matmuls.
                def dy_term(dy):
                    patch = jnp.concatenate([tap(dy, 0), tap(dy, 1), tap(dy, 2)], axis=-1)
                    return jnp.dot(patch, w_ref[dy], preferred_element_type=f32)

                conv_ref[pl.ds(r0, rows), :, :] = dy_term(0).reshape(rows, W, C)
                conv_ref[pl.ds(r0, rows), :, :] = (
                    conv_ref[pl.ds(r0, rows), :, :] + dy_term(1).reshape(rows, W, C))
                out = conv_ref[pl.ds(r0, rows), :, :].reshape(m, C) + dy_term(2)
            else:
                # C not lane-aligned: accumulate 9 taps in a small chunk-local f32 block.
                out = jnp.zeros((m, C), f32)
                for dy in range(3):
                    wd = w_ref[dy]                                   # (3C, C) bf16
                    for dx in range(3):
                        out = out + jnp.dot(tap(dy, dx), wd[dx * C:(dx + 1) * C, :],
                                            preferred_element_type=f32)

            conv_ref[pl.ds(r0, rows), :, :] = out.reshape(rows, W, C)
            sums = sums + jnp.sum(out, axis=0, keepdims=True)
            ssqs = ssqs + jnp.sum(out * out, axis=0, keepdims=True)
            return sums, ssqs

        zero = jnp.zeros((1, C), f32)
        sums, ssqs = _chunked(H, TH, chunk, (zero, zero))
        # One-pass E[x^2]-mean^2 in f32 (clamped). Conv outputs here are O(1) and (for conv2)
        # near zero-mean, so cancellation is mild.
        # TODO(synk): shifted two-pass variance if a config with |mean| >> std shows drift.
        mean = sums * inv_hw
        var = jnp.maximum(ssqs * inv_hw - mean * mean, 0.0)
        inv_std = lax.rsqrt(var + EPS)
        return mean.reshape(1, 1, C), inv_std.reshape(1, 1, C)

    # ---- ConvBlock1: conv -> InstanceNorm -> LeakyReLU(0.2); y1 -> xp interior (aligned). ----
    mean1, istd1 = conv3x3(w1_ref)

    def norm_act_chunk(r0, rows, carry):
        y = (conv_ref[pl.ds(r0, rows), :, :] - mean1) * istd1
        y = jnp.where(y >= 0, y, LEAKY_SLOPE * y)
        xp_ref[pl.ds(r0 + 1, rows), COL0:COL0 + W, :] = y.astype(xp_ref.dtype)
        return carry

    _chunked(H, TH, norm_act_chunk, 0)

    # ---- ConvBlock2: conv -> InstanceNorm (no activation); + residual x -> output. ----
    mean2, istd2 = conv3x3(w2_ref)

    def out_chunk(r0, rows, carry):
        y = (conv_ref[pl.ds(r0, rows), :, :] - mean2) * istd2
        y = y + x_ref[0, pl.ds(r0, rows), :, :].astype(f32)
        o_ref[0, pl.ds(r0, rows), :, :] = y.astype(o_ref.dtype)
        return carry

    _chunked(H, TH, out_chunk, 0)


def _pick_row_chunk(H, W, C, override=None):
    """Row-chunk height: target M = TH*W ~= 2048, bounded by a ~6 MiB chunk working set.
    A static tail chunk handles H % TH != 0 (no degradation to TH=1)."""
    if override is not None:
        return max(1, min(H, int(override)))
    per_row_bytes = W * C * (3 * 2 + 3 * 4)          # bf16 per-dy patch + f32 out/acc per row
    budget_rows = max(1, (6 << 20) // max(per_row_bytes, 1))
    target_rows = max(1, -(-2048 // W))              # ceil(2048 / W)
    return max(1, min(H, budget_rows, target_rows))


def _vmem_limit_bytes(H, W, C, TH):
    f32, bf16 = 4, 2
    io = 2 * 2 * (H * W * C * f32)                        # x + out blocks, double-buffered
    wts = 2 * 2 * (9 * C * C * bf16)                      # two weight blocks, double-buffered
    scratch = (H + 2) * (W + COL0 + PAD_R) * C * bf16 + H * W * C * f32
    chunk = TH * W * C * (3 * bf16 + 4 * f32)             # per-dy patch + f32 temporaries
    need = int(1.3 * (io + wts + scratch + chunk)) + (4 << 20)
    try:
        phys = int(getattr(pltpu.get_tpu_info(), "vmem_capacity_bytes", 64 << 20))
    except Exception:  # pragma: no cover - conservative fallback
        phys = 64 << 20
    cap = max(32 << 20, int(phys * 0.9))                  # ~115 MiB on v5e/v6e, ~57 MiB on v7x
    return max(32 << 20, min(need, cap))


def resnet_block_pallas(x_nhwc, w1, b1, w2, b2, *, max_rows_per_chunk=None):
    """Fused ResNetBlock forward. x_nhwc: (N,H,W,C); w*: (3,3,Cin,Cout); b*: (C,).

    b1/b2 are accepted for interface fidelity but unused: InstanceNorm2d(affine=False)
    subtracts the per-channel mean, which cancels a conv bias exactly (lossless). If the
    model config ever enables affine or running stats, the bias must be re-introduced.
    """
    del b1, b2
    N, H, W, C = x_nhwc.shape
    TH = _pick_row_chunk(H, W, C, max_rows_per_chunk)
    grouped = (C % 128 == 0)

    # (3,3,Cin,Cout) -> (3, 3*Cin, Cout); bf16 operands (MXU fast path), f32 accumulation.
    w1_m = w1.reshape(3, 3 * C, C).astype(jnp.bfloat16)
    w2_m = w2.reshape(3, 3 * C, C).astype(jnp.bfloat16)

    kernel = functools.partial(_resnet_block_kernel, H=H, W=W, C=C, TH=TH, grouped=grouped)

    return pl.pallas_call(
        kernel,
        out_shape=jax.ShapeDtypeStruct((N, H, W, C), x_nhwc.dtype),
        grid_spec=pltpu.PrefetchScalarGridSpec(
            num_scalar_prefetch=0,
            grid=(N,),
            in_specs=[
                pl.BlockSpec((1, H, W, C), lambda n: (n, 0, 0, 0)),
                pl.BlockSpec((3, 3 * C, C), lambda n: (0, 0, 0)),
                pl.BlockSpec((3, 3 * C, C), lambda n: (0, 0, 0)),
            ],
            out_specs=pl.BlockSpec((1, H, W, C), lambda n: (n, 0, 0, 0)),
            scratch_shapes=[
                pltpu.VMEM((H + 2, W + COL0 + PAD_R, C), jnp.bfloat16),  # padded x, then y1
                pltpu.VMEM((H, W, C), jnp.float32),                      # raw conv output
            ],
        ),
        compiler_params=pltpu.CompilerParams(
            dimension_semantics=("parallel",),
            vmem_limit_bytes=_vmem_limit_bytes(H, W, C, TH),
        ),
    )(x_nhwc, w1_m, w2_m)


def init_resnet_block_params(key, n_channels):
    """Deterministic synthetic params matching ResNetBlock(n_channels) shapes.

    PyTorch Conv2d weight is (Cout, Cin, kh, kw); we store (kh, kw, Cin, Cout) (HWIO).
    """
    k1, k2, k3, k4 = jax.random.split(key, 4)
    fan_in = n_channels * 3 * 3
    scale = 1.0 / jnp.sqrt(jnp.float32(fan_in))
    return {
        "w1": jax.random.normal(k1, (3, 3, n_channels, n_channels), jnp.float32) * scale,
        "b1": jax.random.normal(k2, (n_channels,), jnp.float32) * scale,
        "w2": jax.random.normal(k3, (3, 3, n_channels, n_channels), jnp.float32) * scale,
        "b2": jax.random.normal(k4, (n_channels,), jnp.float32) * scale,
    }


@functools.partial(jax.jit, static_argnames=("max_rows_per_chunk",))
def resnet_block_forward(x_nchw, params, max_rows_per_chunk=None):
    """ResNetBlock.forward: output_activation(x + net(x)) with identity output act (NCHW API).

    NOTE: the two transposes below are pure layout plumbing (extra HBM passes); a full
    network should keep activations NHWC and call resnet_block_pallas directly.
    """
    x = jnp.transpose(x_nchw, (0, 2, 3, 1))            # NCHW -> NHWC (channels on lanes)
    out = resnet_block_pallas(x, params["w1"], params["b1"], params["w2"], params["b2"],
                              max_rows_per_chunk=max_rows_per_chunk)
    return jnp.transpose(out, (0, 3, 1, 2))            # back to NCHW


def _reference_forward(x_nchw, params):
    """Pure-JAX reference (weights bf16-rounded to match kernel matmul operands)."""
    x = jnp.transpose(x_nchw, (0, 2, 3, 1)).astype(jnp.float32)

    def conv_block(h, w, b, act):
        w = w.astype(jnp.bfloat16).astype(jnp.float32)
        y = lax.conv_general_dilated(
            h, w, window_strides=(1, 1), padding=((1, 1), (1, 1)),
            dimension_numbers=("NHWC", "HWIO", "NHWC"))
        y = y + b.reshape(1, 1, 1, -1)                 # bias kept here (it cancels below)
        mean = jnp.mean(y, axis=(1, 2), keepdims=True)
        var = jnp.mean(jnp.square(y - mean), axis=(1, 2), keepdims=True)
        y = (y - mean) * lax.rsqrt(var + EPS)
        if act:
            y = jnp.where(y >= 0, y, LEAKY_SLOPE * y)
        return y

    y1 = conv_block(x, params["w1"], params["b1"], True)
    y2 = conv_block(y1, params["w2"], params["b2"], False)
    return jnp.transpose(x + y2, (0, 3, 1, 2))


if __name__ == "__main__":
    key = jax.random.PRNGKey(0)
    k1, k2, k3, k4, k5, k6 = jax.random.split(key, 6)

    # Case 1: small config (C < 128 -> per-tap accumulation path), single chunk.
    N, C, H, W = 2, 4, 16, 16
    x = jax.random.normal(k1, (N, C, H, W), jnp.float32)
    params = init_resnet_block_params(k2, C)
    out = resnet_block_forward(x, params)
    jax.block_until_ready(out)
    assert out.shape == (N, C, H, W), out.shape
    err = float(jnp.max(jnp.abs(out - _reference_forward(x, params))))
    assert jnp.all(jnp.isfinite(out)) and err < 0.15, err

    # Case 2: lane-aligned channels (C % 128 == 0) -> per-dy grouped im2col path.
    N2, C2, H2, W2 = 1, 128, 8, 8
    x2 = jax.random.normal(k3, (N2, C2, H2, W2), jnp.float32)
    params2 = init_resnet_block_params(k4, C2)
    out2 = resnet_block_forward(x2, params2)
    jax.block_until_ready(out2)
    err2 = float(jnp.max(jnp.abs(out2 - _reference_forward(x2, params2))))
    assert out2.shape == (N2, C2, H2, W2) and jnp.all(jnp.isfinite(out2)) and err2 < 0.15, err2

    # Case 3: force multi-chunk + static tail chunk (H=20, 8-row chunks -> 8,8,4).
    N3, C3, H3, W3 = 1, 8, 20, 16
    x3 = jax.random.normal(k5, (N3, C3, H3, W3), jnp.float32)
    params3 = init_resnet_block_params(k6, C3)
    out3 = resnet_block_forward(x3, params3, max_rows_per_chunk=8)
    jax.block_until_ready(out3)
    err3 = float(jnp.max(jnp.abs(out3 - _reference_forward(x3, params3))))
    assert out3.shape == (N3, C3, H3, W3) and jnp.all(jnp.isfinite(out3)) and err3 < 0.15, err3

    print("KERNEL_OK")
</pallas_src>

<mosaic_0001>
module attributes {stable_mosaic.version = 11 : i64} {
  func.func @_resnet_block_kernel(%arg0: i32, %arg1: memref<1x16x16x4xf32, #tpu.memory_space<vmem>>, %arg2: memref<3x12x4xbf16, #tpu.memory_space<vmem>>, %arg3: memref<3x12x4xbf16, #tpu.memory_space<vmem>>, %arg4: memref<1x16x16x4xf32, #tpu.memory_space<vmem>>, %arg5: memref<18x32x4xbf16, #tpu.memory_space<vmem>>, %arg6: memref<16x16x4xf32, #tpu.memory_space<vmem>>) attributes {dimension_semantics = [#tpu.dimension_semantics<parallel>], iteration_bounds = array<i64: 2>, scalar_prefetch = 0 : i64, scratch_operands = 2 : i64, tpu.core_type = #tpu.core_type<tc>, window_params = [{transform_indices = @transform_0, window_bounds = array<i64: 1, 16, 16, 4>}, {pipeline_mode = #tpu.pipeline_mode<synchronous>, transform_indices = @transform_1, window_bounds = array<i64: 3, 12, 4>}, {pipeline_mode = #tpu.pipeline_mode<synchronous>, transform_indices = @transform_2, window_bounds = array<i64: 3, 12, 4>}, {transform_indices = @transform_3, window_bounds = array<i64: 1, 16, 16, 4>}]} {
    %cst = arith.constant 0.000000e+00 : bf16
    %0 = vector.broadcast %cst : bf16 to vector<1x32x4xbf16>
    %c0 = arith.constant 0 : index
    %c0_0 = arith.constant 0 : index
    %c0_1 = arith.constant 0 : index
    %1 = vector.load %arg5[%c0, %c0_0, %c0_1] : memref<18x32x4xbf16, #tpu.memory_space<vmem>>, vector<1x32x4xbf16>
    tpu.vector_store %arg5[%c0, %c0_0, %c0_1], %0 {strides = array<i32>} : memref<18x32x4xbf16, #tpu.memory_space<vmem>>, vector<1x32x4xbf16>,
    %cst_2 = arith.constant 0.000000e+00 : bf16
    %2 = vector.broadcast %cst_2 : bf16 to vector<1x32x4xbf16>
    %c17 = arith.constant 17 : index
    %c0_3 = arith.constant 0 : index
    %c0_4 = arith.constant 0 : index
    %3 = vector.load %arg5[%c17, %c0_3, %c0_4] : memref<18x32x4xbf16, #tpu.memory_space<vmem>>, vector<1x32x4xbf16>
    tpu.vector_store %arg5[%c17, %c0_3, %c0_4], %2 {strides = array<i32>} : memref<18x32x4xbf16, #tpu.memory_space<vmem>>, vector<1x32x4xbf16>,
    %c0_i32 = arith.constant 0 : i32
    %c16_i32 = arith.constant 16 : i32
    %4 = arith.muli %c0_i32, %c16_i32 : i32
    %5 = tpu.assume_multiple %4, 16 : i32
    %cst_5 = arith.constant 0.000000e+00 : bf16
    %6 = vector.broadcast %cst_5 : bf16 to vector<16x8x4xbf16>
    %c1_i32 = arith.constant 1 : i32
    %7 = arith.addi %5, %c1_i32 : i32
    %8 = arith.index_cast %7 : i32 to index
    %c0_6 = arith.constant 0 : index
    %c0_7 = arith.constant 0 : index
    %9 = vector.load %arg5[%8, %c0_6, %c0_7] : memref<18x32x4xbf16, #tpu.memory_space<vmem>>, vector<16x8x4xbf16>
    tpu.vector_store %arg5[%8, %c0_6, %c0_7], %6 {strides = array<i32>} : memref<18x32x4xbf16, #tpu.memory_space<vmem>>, vector<16x8x4xbf16>,
    %cst_8 = arith.constant 0.000000e+00 : bf16
    %10 = vector.broadcast %cst_8 : bf16 to vector<16x8x4xbf16>
    %c1_i32_9 = arith.constant 1 : i32
    %11 = arith.addi %5, %c1_i32_9 : i32
    %12 = arith.index_cast %11 : i32 to index
    %c24 = arith.constant 24 : index
    %c0_10 = arith.constant 0 : index
    %13 = vector.load %arg5[%12, %c24, %c0_10] : memref<18x32x4xbf16, #tpu.memory_space<vmem>>, vector<16x8x4xbf16>
    tpu.vector_store %arg5[%12, %c24, %c0_10], %10 {strides = array<i32>} : memref<18x32x4xbf16, #tpu.memory_space<vmem>>, vector<16x8x4xbf16>,
    %c0_11 = arith.constant 0 : index
    %14 = arith.index_cast %5 : i32 to index
    %c0_12 = arith.constant 0 : index
    %c0_13 = arith.constant 0 : index
    %15 = vector.load %arg1[%c0_11, %14, %c0_12, %c0_13] : memref<1x16x16x4xf32, #tpu.memory_space<vmem>>, vector<1x16x16x4xf32>
    %16 = vector.shape_cast %15 : vector<1x16x16x4xf32> to vector<16x16x4xf32>
    %17 = arith.truncf %16 : vector<16x16x4xf32> to vector<16x16x4xbf16>
    %c1_i32_14 = arith.constant 1 : i32
    %18 = arith.addi %5, %c1_i32_14 : i32
    %19 = arith.index_cast %18 : i32 to index
    %c8 = arith.constant 8 : index
    %c0_15 = arith.constant 0 : index
    %20 = vector.load %arg5[%19, %c8, %c0_15] : memref<18x32x4xbf16, #tpu.memory_space<vmem>>, vector<16x16x4xbf16>
    tpu.vector_store %arg5[%19, %c8, %c0_15], %17 {strides = array<i32>} : memref<18x32x4xbf16, #tpu.memory_space<vmem>>, vector<16x16x4xbf16>,
    %c1_i32_16 = arith.constant 1 : i32
    %cst_17 = arith.constant 0.000000e+00 : f32
    %21 = vector.broadcast %cst_17 : f32 to vector<1x4xf32>
    %c0_i32_18 = arith.constant 0 : i32
    %c16_i32_19 = arith.constant 16 : i32
    %22 = arith.muli %c0_i32_18, %c16_i32_19 : i32
    %23 = tpu.assume_multiple %22, 16 : i32
    %cst_20 = arith.constant 0.000000e+00 : f32
    %24 = vector.broadcast %cst_20 : f32 to vector<256x4xf32>
    %c0_21 = arith.constant 0 : index
    %c0_22 = arith.constant 0 : index
    %c0_23 = arith.constant 0 : index
    %25 = vector.load %arg2[%c0_21, %c0_22, %c0_23] : memref<3x12x4xbf16, #tpu.memory_space<vmem>>, vector<1x12x4xbf16>
    %26 = vector.shape_cast %25 : vector<1x12x4xbf16> to vector<12x4xbf16>
    %c0_i32_24 = arith.constant 0 : i32
    %27 = arith.addi %23, %c0_i32_24 : i32
    %28 = arith.index_cast %27 : i32 to index
    %c7 = arith.constant 7 : index
    %c0_25 = arith.constant 0 : index
    %29 = vector.load %arg5[%28, %c7, %c0_25] : memref<18x32x4xbf16, #tpu.memory_space<vmem>>, vector<16x16x4xbf16>
    %30 = vector.shape_cast %29 : vector<16x16x4xbf16> to vector<256x4xbf16>
    %31 = vector.extract_strided_slice %26 {offsets = [0, 0], sizes = [4, 4], strides = [1, 1]} : vector<12x4xbf16> to vector<4x4xbf16>
    %cst_26 = arith.constant dense<0.000000e+00> : vector<256x4xf32>
    %32 = tpu.matmul %30, %31, %cst_26 {dimension_numbers = #tpu.dot_dimension_numbers<[1], [0], [0], [1], [0, 0, 1, 1], [], []>} : vector<256x4xbf16>, vector<4x4xbf16>, vector<256x4xf32> -> vector<256x4xf32>
    %33 = arith.addf %24, %32 : vector<256x4xf32>
    %c0_i32_27 = arith.constant 0 : i32
    %34 = arith.addi %23, %c0_i32_27 : i32
    %35 = arith.index_cast %34 : i32 to index
    %c8_28 = arith.constant 8 : index
    %c0_29 = arith.constant 0 : index
    %36 = vector.load %arg5[%35, %c8_28, %c0_29] : memref<18x32x4xbf16, #tpu.memory_space<vmem>>, vector<16x16x4xbf16>
    %37 = vector.shape_cast %36 : vector<16x16x4xbf16> to vector<256x4xbf16>
    %38 = vector.extract_strided_slice %26 {offsets = [4, 0], sizes = [4, 4], strides = [1, 1]} : vector<12x4xbf16> to vector<4x4xbf16>
    %cst_30 = arith.constant dense<0.000000e+00> : vector<256x4xf32>
    %39 = tpu.matmul %37, %38, %cst_30 {dimension_numbers = #tpu.dot_dimension_numbers<[1], [0], [0], [1], [0, 0, 1, 1], [], []>} : vector<256x4xbf16>, vector<4x4xbf16>, vector<256x4xf32> -> vector<256x4xf32>
    %40 = arith.addf %33, %39 : vector<256x4xf32>
    %c0_i32_31 = arith.constant 0 : i32
    %41 = arith.addi %23, %c0_i32_31 : i32
    %42 = arith.index_cast %41 : i32 to index
    %c9 = arith.constant 9 : index
    %c0_32 = arith.constant 0 : index
    %43 = vector.load %arg5[%42, %c9, %c0_32] : memref<18x32x4xbf16, #tpu.memory_space<vmem>>, vector<16x16x4xbf16>
    %44 = vector.shape_cast %43 : vector<16x16x4xbf16> to vector<256x4xbf16>
    %45 = vector.extract_strided_slice %26 {offsets = [8, 0], sizes = [4, 4], strides = [1, 1]} : vector<12x4xbf16> to vector<4x4xbf16>
    %cst_33 = arith.constant dense<0.000000e+00> : vector<256x4xf32>
    %46 = tpu.matmul %44, %45, %cst_33 {dimension_numbers = #tpu.dot_dimension_numbers<[1], [0], [0], [1], [0, 0, 1, 1], [], []>} : vector<256x4xbf16>, vector<4x4xbf16>, vector<256x4xf32> -> vector<256x4xf32>
    %47 = arith.addf %40, %46 : vector<256x4xf32>
    %c1 = arith.constant 1 : index
    %c0_34 = arith.constant 0 : index
    %c0_35 = arith.constant 0 : index
    %48 = vector.load %arg2[%c1, %c0_34, %c0_35] : memref<3x12x4xbf16, #tpu.memory_space<vmem>>, vector<1x12x4xbf16>
    %49 = vector.shape_cast %48 : vector<1x12x4xbf16> to vector<12x4xbf16>
    %c1_i32_36 = arith.constant 1 : i32
    %50 = arith.addi %23, %c1_i32_36 : i32
    %51 = arith.index_cast %50 : i32 to index
    %c7_37 = arith.constant 7 : index
    %c0_38 = arith.constant 0 : index
    %52 = vector.load %arg5[%51, %c7_37, %c0_38] : memref<18x32x4xbf16, #tpu.memory_space<vmem>>, vector<16x16x4xbf16>
    %53 = vector.shape_cast %52 : vector<16x16x4xbf16> to vector<256x4xbf16>
    %54 = vector.extract_strided_slice %49 {offsets = [0, 0], sizes = [4, 4], strides = [1, 1]} : vector<12x4xbf16> to vector<4x4xbf16>
    %cst_39 = arith.constant dense<0.000000e+00> : vector<256x4xf32>
    %55 = tpu.matmul %53, %54, %cst_39 {dimension_numbers = #tpu.dot_dimension_numbers<[1], [0], [0], [1], [0, 0, 1, 1], [], []>} : vector<256x4xbf16>, vector<4x4xbf16>, vector<256x4xf32> -> vector<256x4xf32>
    %56 = arith.addf %47, %55 : vector<256x4xf32>
    %c1_i32_40 = arith.constant 1 : i32
    %57 = arith.addi %23, %c1_i32_40 : i32
    %58 = arith.index_cast %57 : i32 to index
    %c8_41 = arith.constant 8 : index
    %c0_42 = arith.constant 0 : index
    %59 = vector.load %arg5[%58, %c8_41, %c0_42] : memref<18x32x4xbf16, #tpu.memory_space<vmem>>, vector<16x16x4xbf16>
    %60 = vector.shape_cast %59 : vector<16x16x4xbf16> to vector<256x4xbf16>
    %61 = vector.extract_strided_slice %49 {offsets = [4, 0], sizes = [4, 4], strides = [1, 1]} : vector<12x4xbf16> to vector<4x4xbf16>
    %cst_43 = arith.constant dense<0.000000e+00> : vector<256x4xf32>
    %62 = tpu.matmul %60, %61, %cst_43 {dimension_numbers = #tpu.dot_dimension_numbers<[1], [0], [0], [1], [0, 0, 1, 1], [], []>} : vector<256x4xbf16>, vector<4x4xbf16>, vector<256x4xf32> -> vector<256x4xf32>
    %63 = arith.addf %56, %62 : vector<256x4xf32>
    %c1_i32_44 = arith.constant 1 : i32
    %64 = arith.addi %23, %c1_i32_44 : i32
    %65 = arith.index_cast %64 : i32 to index
    %c9_45 = arith.constant 9 : index
    %c0_46 = arith.constant 0 : index
    %66 = vector.load %arg5[%65, %c9_45, %c0_46] : memref<18x32x4xbf16, #tpu.memory_space<vmem>>, vector<16x16x4xbf16>
    %67 = vector.shape_cast %66 : vector<16x16x4xbf16> to vector<256x4xbf16>
    %68 = vector.extract_strided_slice %49 {offsets = [8, 0], sizes = [4, 4], strides = [1, 1]} : vector<12x4xbf16> to vector<4x4xbf16>
    %cst_47 = arith.constant dense<0.000000e+00> : vector<256x4xf32>
    %69 = tpu.matmul %67, %68, %cst_47 {dimension_numbers = #tpu.dot_dimension_numbers<[1], [0], [0], [1], [0, 0, 1, 1], [], []>} : vector<256x4xbf16>, vector<4x4xbf16>, vector<256x4xf32> -> vector<256x4xf32>
    %70 = arith.addf %63, %69 : vector<256x4xf32>
    %c2 = arith.constant 2 : index
    %c0_48 = arith.constant 0 : index
    %c0_49 = arith.constant 0 : index
    %71 = vector.load %arg2[%c2, %c0_48, %c0_49] : memref<3x12x4xbf16, #tpu.memory_space<vmem>>, vector<1x12x4xbf16>
    %72 = vector.shape_cast %71 : vector<1x12x4xbf16> to vector<12x4xbf16>
    %c2_i32 = arith.constant 2 : i32
    %73 = arith.addi %23, %c2_i32 : i32
    %74 = arith.index_cast %73 : i32 to index
    %c7_50 = arith.constant 7 : index
    %c0_51 = arith.constant 0 : index
    %75 = vector.load %arg5[%74, %c7_50, %c0_51] : memref<18x32x4xbf16, #tpu.memory_space<vmem>>, vector<16x16x4xbf16>
    %76 = vector.shape_cast %75 : vector<16x16x4xbf16> to vector<256x4xbf16>
    %77 = vector.extract_strided_slice %72 {offsets = [0, 0], sizes = [4, 4], strides = [1, 1]} : vector<12x4xbf16> to vector<4x4xbf16>
    %cst_52 = arith.constant dense<0.000000e+00> : vector<256x4xf32>
    %78 = tpu.matmul %76, %77, %cst_52 {dimension_numbers = #tpu.dot_dimension_numbers<[1], [0], [0], [1], [0, 0, 1, 1], [], []>} : vector<256x4xbf16>, vector<4x4xbf16>, vector<256x4xf32> -> vector<256x4xf32>
    %79 = arith.addf %70, %78 : vector<256x4xf32>
    %c2_i32_53 = arith.constant 2 : i32
    %80 = arith.addi %23, %c2_i32_53 : i32
    %81 = arith.index_cast %80 : i32 to index
    %c8_54 = arith.constant 8 : index
    %c0_55 = arith.constant 0 : index
    %82 = vector.load %arg5[%81, %c8_54, %c0_55] : memref<18x32x4xbf16, #tpu.memory_space<vmem>>, vector<16x16x4xbf16>
    %83 = vector.shape_cast %82 : vector<16x16x4xbf16> to vector<256x4xbf16>
    %84 = vector.extract_strided_slice %72 {offsets = [4, 0], sizes = [4, 4], strides = [1, 1]} : vector<12x4xbf16> to vector<4x4xbf16>
    %cst_56 = arith.constant dense<0.000000e+00> : vector<256x4xf32>
    %85 = tpu.matmul %83, %84, %cst_56 {dimension_numbers = #tpu.dot_dimension_numbers<[1], [0], [0], [1], [0, 0, 1, 1], [], []>} : vector<256x4xbf16>, vector<4x4xbf16>, vector<256x4xf32> -> vector<256x4xf32>
    %86 = arith.addf %79, %85 : vector<256x4xf32>
    %c2_i32_57 = arith.constant 2 : i32
    %87 = arith.addi %23, %c2_i32_57 : i32
    %88 = arith.index_cast %87 : i32 to index
    %c9_58 = arith.constant 9 : index
    %c0_59 = arith.constant 0 : index
    %89 = vector.load %arg5[%88, %c9_58, %c0_59] : memref<18x32x4xbf16, #tpu.memory_space<vmem>>, vector<16x16x4xbf16>
    %90 = vector.shape_cast %89 : vector<16x16x4xbf16> to vector<256x4xbf16>
    %91 = vector.extract_strided_slice %72 {offsets = [8, 0], sizes = [4, 4], strides = [1, 1]} : vector<12x4xbf16> to vector<4x4xbf16>
    %cst_60 = arith.constant dense<0.000000e+00> : vector<256x4xf32>
    %92 = tpu.matmul %90, %91, %cst_60 {dimension_numbers = #tpu.dot_dimension_numbers<[1], [0], [0], [1], [0, 0, 1, 1], [], []>} : vector<256x4xbf16>, vector<4x4xbf16>, vector<256x4xf32> -> vector<256x4xf32>
    %93 = arith.addf %86, %92 : vector<256x4xf32>
    %94 = vector.shape_cast %93 : vector<256x4xf32> to vector<16x16x4xf32>
    %95 = arith.index_cast %23 : i32 to index
    %c0_61 = arith.constant 0 : index
    %c0_62 = arith.constant 0 : index
    %96 = vector.load %arg6[%95, %c0_61, %c0_62] : memref<16x16x4xf32, #tpu.memory_space<vmem>>, vector<16x16x4xf32>
    tpu.vector_store %arg6[%95, %c0_61, %c0_62], %94 {strides = array<i32>} : memref<16x16x4xf32, #tpu.memory_space<vmem>>, vector<16x16x4xf32>,
    %cst_63 = arith.constant dense<0.000000e+00> : vector<4xf32>
    %97 = vector.multi_reduction <add>, %93, %cst_63 [0] : vector<256x4xf32> to vector<4xf32>
    %98 = vector.shape_cast %97 : vector<4xf32> to vector<1x4xf32>
    %99 = arith.addf %21, %98 : vector<1x4xf32>
    %100 = arith.mulf %93, %93 : vector<256x4xf32>
    %cst_64 = arith.constant dense<0.000000e+00> : vector<4xf32>
    %101 = vector.multi_reduction <add>, %100, %cst_64 [0] : vector<256x4xf32> to vector<4xf32>
    %102 = vector.shape_cast %101 : vector<4xf32> to vector<1x4xf32>
    %103 = arith.addf %21, %102 : vector<1x4xf32>
    %c1_i32_65 = arith.constant 1 : i32
    %cst_66 = arith.constant 3.906250e-03 : f32
    %104 = vector.broadcast %cst_66 : f32 to vector<1x4xf32>
    %105 = arith.mulf %99, %104 : vector<1x4xf32>
    %cst_67 = arith.constant 3.906250e-03 : f32
    %106 = vector.broadcast %cst_67 : f32 to vector<1x4xf32>
    %107 = arith.mulf %103, %106 : vector<1x4xf32>
    %108 = arith.mulf %105, %105 : vector<1x4xf32>
    %109 = arith.subf %107, %108 : vector<1x4xf32>
    %cst_68 = arith.constant 0.000000e+00 : f32
    %110 = vector.broadcast %cst_68 : f32 to vector<1x4xf32>
    %111 = arith.maximumf %109, %110 : vector<1x4xf32>
    %cst_69 = arith.constant 9.99999974E-6 : f32
    %112 = vector.broadcast %cst_69 : f32 to vector<1x4xf32>
    %113 = arith.addf %111, %112 : vector<1x4xf32>
    %114 = math.rsqrt %113 : vector<1x4xf32>
    %115 = vector.shape_cast %105 : vector<1x4xf32> to vector<1x1x4xf32>
    %116 = vector.shape_cast %114 : vector<1x4xf32> to vector<1x1x4xf32>
    %c0_i32_70 = arith.constant 0 : i32
    %c16_i32_71 = arith.constant 16 : i32
    %117 = arith.muli %c0_i32_70, %c16_i32_71 : i32
    %118 = tpu.assume_multiple %117, 16 : i32
    %119 = arith.index_cast %118 : i32 to index
    %c0_72 = arith.constant 0 : index
    %c0_73 = arith.constant 0 : index
    %120 = vector.load %arg6[%119, %c0_72, %c0_73] : memref<16x16x4xf32, #tpu.memory_space<vmem>>, vector<16x16x4xf32>
    %121 = vector.broadcast %115 : vector<1x1x4xf32> to vector<16x16x4xf32>
    %122 = arith.subf %120, %121 : vector<16x16x4xf32>
    %123 = vector.broadcast %116 : vector<1x1x4xf32> to vector<16x16x4xf32>
    %124 = arith.mulf %122, %123 : vector<16x16x4xf32>
    %cst_74 = arith.constant 0.000000e+00 : f32
    %125 = vector.broadcast %cst_74 : f32 to vector<16x16x4xf32>
    %126 = arith.cmpf oge, %124, %125 : vector<16x16x4xf32>
    %cst_75 = arith.constant 2.000000e-01 : f32
    %127 = vector.broadcast %cst_75 : f32 to vector<16x16x4xf32>
    %128 = arith.mulf %127, %124 : vector<16x16x4xf32>
    %129 = arith.select %126, %124, %128 : vector<16x16x4xi1>, vector<16x16x4xf32>
    %130 = arith.truncf %129 : vector<16x16x4xf32> to vector<16x16x4xbf16>
    %c1_i32_76 = arith.constant 1 : i32
    %131 = arith.addi %118, %c1_i32_76 : i32
    %132 = arith.index_cast %131 : i32 to index
    %c8_77 = arith.constant 8 : index
    %c0_78 = arith.constant 0 : index
    %133 = vector.load %arg5[%132, %c8_77, %c0_78] : memref<18x32x4xbf16, #tpu.memory_space<vmem>>, vector<16x16x4xbf16>
    tpu.vector_store %arg5[%132, %c8_77, %c0_78], %130 {strides = array<i32>} : memref<18x32x4xbf16, #tpu.memory_space<vmem>>, vector<16x16x4xbf16>,
    %c1_i32_79 = arith.constant 1 : i32
    %cst_80 = arith.constant 0.000000e+00 : f32
    %134 = vector.broadcast %cst_80 : f32 to vector<1x4xf32>
    %c0_i32_81 = arith.constant 0 : i32
    %c16_i32_82 = arith.constant 16 : i32
    %135 = arith.muli %c0_i32_81, %c16_i32_82 : i32
    %136 = tpu.assume_multiple %135, 16 : i32
    %cst_83 = arith.constant 0.000000e+00 : f32
    %137 = vector.broadcast %cst_83 : f32 to vector<256x4xf32>
    %c0_84 = arith.constant 0 : index
    %c0_85 = arith.constant 0 : index
    %c0_86 = arith.constant 0 : index
    %138 = vector.load %arg3[%c0_84, %c0_85, %c0_86] : memref<3x12x4xbf16, #tpu.memory_space<vmem>>, vector<1x12x4xbf16>
    %139 = vector.shape_cast %138 : vector<1x12x4xbf16> to vector<12x4xbf16>
    %c0_i32_87 = arith.constant 0 : i32
    %140 = arith.addi %136, %c0_i32_87 : i32
    %141 = arith.index_cast %140 : i32 to index
    %c7_88 = arith.constant 7 : index
    %c0_89 = arith.constant 0 : index
    %142 = vector.load %arg5[%141, %c7_88, %c0_89] : memref<18x32x4xbf16, #tpu.memory_space<vmem>>, vector<16x16x4xbf16>
    %143 = vector.shape_cast %142 : vector<16x16x4xbf16> to vector<256x4xbf16>
    %144 = vector.extract_strided_slice %139 {offsets = [0, 0], sizes = [4, 4], strides = [1, 1]} : vector<12x4xbf16> to vector<4x4xbf16>
    %cst_90 = arith.constant dense<0.000000e+00> : vector<256x4xf32>
    %145 = tpu.matmul %143, %144, %cst_90 {dimension_numbers = #tpu.dot_dimension_numbers<[1], [0], [0], [1], [0, 0, 1, 1], [], []>} : vector<256x4xbf16>, vector<4x4xbf16>, vector<256x4xf32> -> vector<256x4xf32>
    %146 = arith.addf %137, %145 : vector<256x4xf32>
    %c0_i32_91 = arith.constant 0 : i32
    %147 = arith.addi %136, %c0_i32_91 : i32
    %148 = arith.index_cast %147 : i32 to index
    %c8_92 = arith.constant 8 : index
    %c0_93 = arith.constant 0 : index
    %149 = vector.load %arg5[%148, %c8_92, %c0_93] : memref<18x32x4xbf16, #tpu.memory_space<vmem>>, vector<16x16x4xbf16>
    %150 = vector.shape_cast %149 : vector<16x16x4xbf16> to vector<256x4xbf16>
    %151 = vector.extract_strided_slice %139 {offsets = [4, 0], sizes = [4, 4], strides = [1, 1]} : vector<12x4xbf16> to vector<4x4xbf16>
    %cst_94 = arith.constant dense<0.000000e+00> : vector<256x4xf32>
    %152 = tpu.matmul %150, %151, %cst_94 {dimension_numbers = #tpu.dot_dimension_numbers<[1], [0], [0], [1], [0, 0, 1, 1], [], []>} : vector<256x4xbf16>, vector<4x4xbf16>, vector<256x4xf32> -> vector<256x4xf32>
    %153 = arith.addf %146, %152 : vector<256x4xf32>
    %c0_i32_95 = arith.constant 0 : i32
    %154 = arith.addi %136, %c0_i32_95 : i32
    %155 = arith.index_cast %154 : i32 to index
    %c9_96 = arith.constant 9 : index
    %c0_97 = arith.constant 0 : index
    %156 = vector.load %arg5[%155, %c9_96, %c0_97] : memref<18x32x4xbf16, #tpu.memory_space<vmem>>, vector<16x16x4xbf16>
    %157 = vector.shape_cast %156 : vector<16x16x4xbf16> to vector<256x4xbf16>
    %158 = vector.extract_strided_slice %139 {offsets = [8, 0], sizes = [4, 4], strides = [1, 1]} : vector<12x4xbf16> to vector<4x4xbf16>
    %cst_98 = arith.constant dense<0.000000e+00> : vector<256x4xf32>
    %159 = tpu.matmul %157, %158, %cst_98 {dimension_numbers = #tpu.dot_dimension_numbers<[1], [0], [0], [1], [0, 0, 1, 1], [], []>} : vector<256x4xbf16>, vector<4x4xbf16>, vector<256x4xf32> -> vector<256x4xf32>
    %160 = arith.addf %153, %159 : vector<256x4xf32>
    %c1_99 = arith.constant 1 : index
    %c0_100 = arith.constant 0 : index
    %c0_101 = arith.constant 0 : index
    %161 = vector.load %arg3[%c1_99, %c0_100, %c0_101] : memref<3x12x4xbf16, #tpu.memory_space<vmem>>, vector<1x12x4xbf16>
    %162 = vector.shape_cast %161 : vector<1x12x4xbf16> to vector<12x4xbf16>
    %c1_i32_102 = arith.constant 1 : i32
    %163 = arith.addi %136, %c1_i32_102 : i32
    %164 = arith.index_cast %163 : i32 to index
    %c7_103 = arith.constant 7 : index
    %c0_104 = arith.constant 0 : index
    %165 = vector.load %arg5[%164, %c7_103, %c0_104] : memref<18x32x4xbf16, #tpu.memory_space<vmem>>, vector<16x16x4xbf16>
    %166 = vector.shape_cast %165 : vector<16x16x4xbf16> to vector<256x4xbf16>
    %167 = vector.extract_strided_slice %162 {offsets = [0, 0], sizes = [4, 4], strides = [1, 1]} : vector<12x4xbf16> to vector<4x4xbf16>
    %cst_105 = arith.constant dense<0.000000e+00> : vector<256x4xf32>
    %168 = tpu.matmul %166, %167, %cst_105 {dimension_numbers = #tpu.dot_dimension_numbers<[1], [0], [0], [1], [0, 0, 1, 1], [], []>} : vector<256x4xbf16>, vector<4x4xbf16>, vector<256x4xf32> -> vector<256x4xf32>
    %169 = arith.addf %160, %168 : vector<256x4xf32>
    %c1_i32_106 = arith.constant 1 : i32
    %170 = arith.addi %136, %c1_i32_106 : i32
    %171 = arith.index_cast %170 : i32 to index
    %c8_107 = arith.constant 8 : index
    %c0_108 = arith.constant 0 : index
    %172 = vector.load %arg5[%171, %c8_107, %c0_108] : memref<18x32x4xbf16, #tpu.memory_space<vmem>>, vector<16x16x4xbf16>
    %173 = vector.shape_cast %172 : vector<16x16x4xbf16> to vector<256x4xbf16>
    %174 = vector.extract_strided_slice %162 {offsets = [4, 0], sizes = [4, 4], strides = [1, 1]} : vector<12x4xbf16> to vector<4x4xbf16>
    %cst_109 = arith.constant dense<0.000000e+00> : vector<256x4xf32>
    %175 = tpu.matmul %173, %174, %cst_109 {dimension_numbers = #tpu.dot_dimension_numbers<[1], [0], [0], [1], [0, 0, 1, 1], [], []>} : vector<256x4xbf16>, vector<4x4xbf16>, vector<256x4xf32> -> vector<256x4xf32>
    %176 = arith.addf %169, %175 : vector<256x4xf32>
    %c1_i32_110 = arith.constant 1 : i32
    %177 = arith.addi %136, %c1_i32_110 : i32
    %178 = arith.index_cast %177 : i32 to index
    %c9_111 = arith.constant 9 : index
    %c0_112 = arith.constant 0 : index
    %179 = vector.load %arg5[%178, %c9_111, %c0_112] : memref<18x32x4xbf16, #tpu.memory_space<vmem>>, vector<16x16x4xbf16>
    %180 = vector.shape_cast %179 : vector<16x16x4xbf16> to vector<256x4xbf16>
    %181 = vector.extract_strided_slice %162 {offsets = [8, 0], sizes = [4, 4], strides = [1, 1]} : vector<12x4xbf16> to vector<4x4xbf16>
    %cst_113 = arith.constant dense<0.000000e+00> : vector<256x4xf32>
    %182 = tpu.matmul %180, %181, %cst_113 {dimension_numbers = #tpu.dot_dimension_numbers<[1], [0], [0], [1], [0, 0, 1, 1], [], []>} : vector<256x4xbf16>, vector<4x4xbf16>, vector<256x4xf32> -> vector<256x4xf32>
    %183 = arith.addf %176, %182 : vector<256x4xf32>
    %c2_114 = arith.constant 2 : index
    %c0_115 = arith.constant 0 : index
    %c0_116 = arith.constant 0 : index
    %184 = vector.load %arg3[%c2_114, %c0_115, %c0_116] : memref<3x12x4xbf16, #tpu.memory_space<vmem>>, vector<1x12x4xbf16>
    %185 = vector.shape_cast %184 : vector<1x12x4xbf16> to vector<12x4xbf16>
    %c2_i32_117 = arith.constant 2 : i32
    %186 = arith.addi %136, %c2_i32_117 : i32
    %187 = arith.index_cast %186 : i32 to index
    %c7_118 = arith.constant 7 : index
    %c0_119 = arith.constant 0 : index
    %188 = vector.load %arg5[%187, %c7_118, %c0_119] : memref<18x32x4xbf16, #tpu.memory_space<vmem>>, vector<16x16x4xbf16>
    %189 = vector.shape_cast %188 : vector<16x16x4xbf16> to vector<256x4xbf16>
    %190 = vector.extract_strided_slice %185 {offsets = [0, 0], sizes = [4, 4], strides = [1, 1]} : vector<12x4xbf16> to vector<4x4xbf16>
    %cst_120 = arith.constant dense<0.000000e+00> : vector<256x4xf32>
    %191 = tpu.matmul %189, %190, %cst_120 {dimension_numbers = #tpu.dot_dimension_numbers<[1], [0], [0], [1], [0, 0, 1, 1], [], []>} : vector<256x4xbf16>, vector<4x4xbf16>, vector<256x4xf32> -> vector<256x4xf32>
    %192 = arith.addf %183, %191 : vector<256x4xf32>
    %c2_i32_121 = arith.constant 2 : i32
    %193 = arith.addi %136, %c2_i32_121 : i32
    %194 = arith.index_cast %193 : i32 to index
    %c8_122 = arith.constant 8 : index
    %c0_123 = arith.constant 0 : index
    %195 = vector.load %arg5[%194, %c8_122, %c0_123] : memref<18x32x4xbf16, #tpu.memory_space<vmem>>, vector<16x16x4xbf16>
    %196 = vector.shape_cast %195 : vector<16x16x4xbf16> to vector<256x4xbf16>
    %197 = vector.extract_strided_slice %185 {offsets = [4, 0], sizes = [4, 4], strides = [1, 1]} : vector<12x4xbf16> to vector<4x4xbf16>
    %cst_124 = arith.constant dense<0.000000e+00> : vector<256x4xf32>
    %198 = tpu.matmul %196, %197, %cst_124 {dimension_numbers = #tpu.dot_dimension_numbers<[1], [0], [0], [1], [0, 0, 1, 1], [], []>} : vector<256x4xbf16>, vector<4x4xbf16>, vector<256x4xf32> -> vector<256x4xf32>
    %199 = arith.addf %192, %198 : vector<256x4xf32>
    %c2_i32_125 = arith.constant 2 : i32
    %200 = arith.addi %136, %c2_i32_125 : i32
    %201 = arith.index_cast %200 : i32 to index
    %c9_126 = arith.constant 9 : index
    %c0_127 = arith.constant 0 : index
    %202 = vector.load %arg5[%201, %c9_126, %c0_127] : memref<18x32x4xbf16, #tpu.memory_space<vmem>>, vector<16x16x4xbf16>
    %203 = vector.shape_cast %202 : vector<16x16x4xbf16> to vector<256x4xbf16>
    %204 = vector.extract_strided_slice %185 {offsets = [8, 0], sizes = [4, 4], strides = [1, 1]} : vector<12x4xbf16> to vector<4x4xbf16>
    %cst_128 = arith.constant dense<0.000000e+00> : vector<256x4xf32>
    %205 = tpu.matmul %203, %204, %cst_128 {dimension_numbers = #tpu.dot_dimension_numbers<[1], [0], [0], [1], [0, 0, 1, 1], [], []>} : vector<256x4xbf16>, vector<4x4xbf16>, vector<256x4xf32> -> vector<256x4xf32>
    %206 = arith.addf %199, %205 : vector<256x4xf32>
    %207 = vector.shape_cast %206 : vector<256x4xf32> to vector<16x16x4xf32>
    %208 = arith.index_cast %136 : i32 to index
    %c0_129 = arith.constant 0 : index
    %c0_130 = arith.constant 0 : index
    %209 = vector.load %arg6[%208, %c0_129, %c0_130] : memref<16x16x4xf32, #tpu.memory_space<vmem>>, vector<16x16x4xf32>
    tpu.vector_store %arg6[%208, %c0_129, %c0_130], %207 {strides = array<i32>} : memref<16x16x4xf32, #tpu.memory_space<vmem>>, vector<16x16x4xf32>,
    %cst_131 = arith.constant dense<0.000000e+00> : vector<4xf32>
    %210 = vector.multi_reduction <add>, %206, %cst_131 [0] : vector<256x4xf32> to vector<4xf32>
    %211 = vector.shape_cast %210 : vector<4xf32> to vector<1x4xf32>
    %212 = arith.addf %134, %211 : vector<1x4xf32>
    %213 = arith.mulf %206, %206 : vector<256x4xf32>
    %cst_132 = arith.constant dense<0.000000e+00> : vector<4xf32>
    %214 = vector.multi_reduction <add>, %213, %cst_132 [0] : vector<256x4xf32> to vector<4xf32>
    %215 = vector.shape_cast %214 : vector<4xf32> to vector<1x4xf32>
    %216 = arith.addf %134, %215 : vector<1x4xf32>
    %c1_i32_133 = arith.constant 1 : i32
    %cst_134 = arith.constant 3.906250e-03 : f32
    %217 = vector.broadcast %cst_134 : f32 to vector<1x4xf32>
    %218 = arith.mulf %212, %217 : vector<1x4xf32>
    %cst_135 = arith.constant 3.906250e-03 : f32
    %219 = vector.broadcast %cst_135 : f32 to vector<1x4xf32>
    %220 = arith.mulf %216, %219 : vector<1x4xf32>
    %221 = arith.mulf %218, %218 : vector<1x4xf32>
    %222 = arith.subf %220, %221 : vector<1x4xf32>
    %cst_136 = arith.constant 0.000000e+00 : f32
    %223 = vector.broadcast %cst_136 : f32 to vector<1x4xf32>
    %224 = arith.maximumf %222, %223 : vector<1x4xf32>
    %cst_137 = arith.constant 9.99999974E-6 : f32
    %225 = vector.broadcast %cst_137 : f32 to vector<1x4xf32>
    %226 = arith.addf %224, %225 : vector<1x4xf32>
    %227 = math.rsqrt %226 : vector<1x4xf32>
    %228 = vector.shape_cast %218 : vector<1x4xf32> to vector<1x1x4xf32>
    %229 = vector.shape_cast %227 : vector<1x4xf32> to vector<1x1x4xf32>
    %c0_i32_138 = arith.constant 0 : i32
    %c16_i32_139 = arith.constant 16 : i32
    %230 = arith.muli %c0_i32_138, %c16_i32_139 : i32
    %231 = tpu.assume_multiple %230, 16 : i32
    %232 = arith.index_cast %231 : i32 to index
    %c0_140 = arith.constant 0 : index
    %c0_141 = arith.constant 0 : index
    %233 = vector.load %arg6[%232, %c0_140, %c0_141] : memref<16x16x4xf32, #tpu.memory_space<vmem>>, vector<16x16x4xf32>
    %234 = vector.broadcast %228 : vector<1x1x4xf32> to vector<16x16x4xf32>
    %235 = arith.subf %233, %234 : vector<16x16x4xf32>
    %236 = vector.broadcast %229 : vector<1x1x4xf32> to vector<16x16x4xf32>
    %237 = arith.mulf %235, %236 : vector<16x16x4xf32>
    %c0_142 = arith.constant 0 : index
    %238 = arith.index_cast %231 : i32 to index
    %c0_143 = arith.constant 0 : index
    %c0_144 = arith.constant 0 : index
    %239 = vector.load %arg1[%c0_142, %238, %c0_143, %c0_144] : memref<1x16x16x4xf32, #tpu.memory_space<vmem>>, vector<1x16x16x4xf32>
    %240 = vector.shape_cast %239 : vector<1x16x16x4xf32> to vector<16x16x4xf32>
    %241 = arith.addf %237, %240 : vector<16x16x4xf32>
    %c0_145 = arith.constant 0 : index
    %242 = arith.index_cast %231 : i32 to index
    %c0_146 = arith.constant 0 : index
    %c0_147 = arith.constant 0 : index
    %243 = vector.load %arg4[%c0_145, %242, %c0_146, %c0_147] : memref<1x16x16x4xf32, #tpu.memory_space<vmem>>, vector<1x16x16x4xf32>
    %244 = vector.shape_cast %243 : vector<1x16x16x4xf32> to vector<16x16x4xf32>
    %245 = vector.shape_cast %241 : vector<16x16x4xf32> to vector<1x16x16x4xf32>
    tpu.vector_store %arg4[%c0_145, %242, %c0_146, %c0_147], %245 {strides = array<i32>} : memref<1x16x16x4xf32, #tpu.memory_space<vmem>>, vector<1x16x16x4xf32>,
    %c1_i32_148 = arith.constant 1 : i32
    return
  }
  func.func @transform_0(%arg0: i32) -> (i32, i32, i32, i32) {
    %c0_i32 = arith.constant 0 : i32
    %c0_i32_0 = arith.constant 0 : i32
    %c0_i32_1 = arith.constant 0 : i32
    %c0_i32_2 = arith.constant 0 : i32
    return %arg0, %c0_i32, %c0_i32_0, %c0_i32_1 : i32, i32, i32, i32
  }
  func.func @transform_1(%arg0: i32) -> (i32, i32, i32) {
    %c0_i32 = arith.constant 0 : i32
    %c0_i32_0 = arith.constant 0 : i32
    %c0_i32_1 = arith.constant 0 : i32
    %c0_i32_2 = arith.constant 0 : i32
    return %c0_i32, %c0_i32_0, %c0_i32_1 : i32, i32, i32
  }
  func.func @transform_2(%arg0: i32) -> (i32, i32, i32) {
    %c0_i32 = arith.constant 0 : i32
    %c0_i32_0 = arith.constant 0 : i32
    %c0_i32_1 = arith.constant 0 : i32
    %c0_i32_2 = arith.constant 0 : i32
    return %c0_i32, %c0_i32_0, %c0_i32_1 : i32, i32, i32
  }
  func.func @transform_3(%arg0: i32) -> (i32, i32, i32, i32) {
    %c0_i32 = arith.constant 0 : i32
    %c0_i32_0 = arith.constant 0 : i32
    %c0_i32_1 = arith.constant 0 : i32
    %c0_i32_2 = arith.constant 0 : i32
    return %arg0, %c0_i32, %c0_i32_0, %c0_i32_1 : i32, i32, i32, i32
  }
}

</mosaic_0001>

<bundles_post_ra>
// kernel: resnet_block_forward.1
= control target key start
LH: loop header
LB: loop body
LE: loop exit
PB: predicated region body
PF: predicated region fallthrough
CT: control target
= control target key end

     0   :  { %s11563_s12 = smov 0   ;;  %s14166_s0 = inlined_call_operand.vmem [shape: f32[2,16,16,4], index: 0, kind: input, shape index: {}]   ;;  %s14167_s1 = inlined_call_operand.vmem [shape: bf16[3,12,4], index: 1, kind: input, shape index: {}]   ;;  %s14168_s2 = inlined_call_operand.vmem [shape: bf16[3,12,4], index: 2, kind: input, shape index: {}]   ;;  %s14169_s3 = inlined_call_operand.vmem [shape: f32[2,16,16,4], index: 3, kind: output, shape index: {}]  }
   0x1 LB: > { %s9750_s13 = sadd.s32 4294967295, %s11540_s12   ;;  %p9754_p0 = scmp.ge.s32.totalorder %s11540_s12, 1  ;;  %s11540_s12 = sphi %s11563_s12, %s13_s12  }
   0x2   : > { %p137_p1 = scmp.lt.s32.totalorder %s11540_s12, 3 }
   0x4   : > { %p138_p2 = pnand %p9754_p0, %p137_p1 }
   0x6   : > { %141 = sbr.rel (%p138_p2) target bundleno = 1807 (0x70f), region = 32 }
   0xd   : > { %v11574_v0 = vld [vmem:[%s14167_s1] sm:$0xf]  ;;  %vm14172_vm0 = vcmask 31744   ;;  %v11542_v2 = vmov 0   ;;  %p11584_p3 = scmp.lt.s32.totalorder %s9750_s13, 1  ;;  %vm14175_vm1 = vcmask 27648  }
   0xe   : > { %v9759_v1 = vcombine.low %v11574_v0, %v11574_v0  ;;  %173 = vst.msk [vmem:[#allocation2] sm:$0xff] %vm14172_vm0, %v11542_v2  ;;  %174 = vst.msk [vmem:[#allocation2 + $0x8] sm:$0xff] %vm14172_vm0, %v11542_v2  ;;  %vm14176_vm2 = vcmask 31748   ;;  %vm14174_vm3 = vcmask 1041408   ;;  %vm14173_vm4 = vcmask 1043456  }
   0xf   : > { %176 = vst.msk [vmem:[#allocation2 + $0x110] sm:$0xff] %vm14172_vm0, %v11542_v2  ;;  %177 = vst.msk [vmem:[#allocation2 + $0x118] sm:$0xff] %vm14172_vm0, %v11542_v2  ;;  %s14630_s13 = smov (!%p11584_p3, %s9750_s13), 1  ;;  %vm14171_vm5 = vsmask.f32 4352 }
  0x10   : > { %183 = vst.msk [vmem:[#allocation2 + $0x10] sm:$0xf] %vm14175_vm1, %v11542_v2  ;;  %184 = vst.msk [vmem:[#allocation2 + $0x20] sm:$0xf] %vm14175_vm1, %v11542_v2  ;;  %v756_v3 = vrot.slane %v9759_v1, 2  ;;  %s10063_s17 = sshll.u32 %s14630_s13, 8 }
  0x11   : > { %185 = vst.msk [vmem:[#allocation2 + $0x30] sm:$0xf] %vm14175_vm1, %v11542_v2  ;;  %186 = vst.msk [vmem:[#allocation2 + $0x40] sm:$0xf] %vm14175_vm1, %v11542_v2  ;;  %s11634_s20 = scalar_lea.vmem %s14166_s0, %s10063_s17  ;;  %vm14170_vm6 = vsmask.f32 3328  ;;  %s14051_s22 = scalar_lea.vmem %s14169_s3, %s10063_s17 }
  0x12   : > { %187 = vst.msk [vmem:[#allocation2 + $0x50] sm:$0xf] %vm14175_vm1, %v11542_v2  ;;  %188 = vst.msk [vmem:[#allocation2 + $0x60] sm:$0xf] %vm14175_vm1, %v11542_v2  ;;  %11495 = vmatprep.subr.msk.bf16.mxu0 %vm14174_vm3, %v756_v3  ;;  %v807_v4 = vsel %vm14174_vm3, %v756_v3, 0  ;;  %v218_v5 = vld [vmem:[%s11634_s20] sm:$0xff] }
  0x13   : > { %189 = vst.msk [vmem:[#allocation2 + $0x70] sm:$0xf] %vm14175_vm1, %v11542_v2  ;;  %190 = vst.msk [vmem:[#allocation2 + $0x80] sm:$0xf] %vm14175_vm1, %v11542_v2  ;;  %10372 = vmatpush3.bf16.msra.mxu0 %v807_v4  ;;  %v219_v6 = vld [vmem:[%s11634_s20 + $0x8] sm:$0xff]  ;;  %v220_v7 = vld [vmem:[%s11634_s20 + $0x10] sm:$0xff] }
  0x14   : > { %191 = vst.msk [vmem:[#allocation2 + $0x90] sm:$0xf] %vm14175_vm1, %v11542_v2  ;;  %192 = vst.msk [vmem:[#allocation2 + $0xa0] sm:$0xf] %vm14175_vm1, %v11542_v2  ;;  %11496 = vmatprep.subr.msk.bf16.mxu0 %vm14174_vm3, %v11574_v0  ;;  %v250_v10 = vpack.c.bf16 %v219_v6, %v218_v5  ;;  %v221_v11 = vld [vmem:[%s11634_s20 + $0x18] sm:$0xff]  ;;  %v222_v14 = vld [vmem:[%s11634_s20 + $0x20] sm:$0xff] }
  0x15   : > { %193 = vst.msk [vmem:[#allocation2 + $0xb0] sm:$0xf] %vm14175_vm1, %v11542_v2  ;;  %194 = vst.msk [vmem:[#allocation2 + $0xc0] sm:$0xf] %vm14175_vm1, %v11542_v2  ;;  %v11641_v8 = vld [vmem:[#allocation2 + $0x8] sm:$0xf]  ;;  %v251_v17 = vpack.c.bf16 %v221_v11, %v220_v7 }
  0x16   : > { %195 = vst.msk [vmem:[#allocation2 + $0xd0] sm:$0xf] %vm14175_vm1, %v11542_v2  ;;  %196 = vst.msk [vmem:[#allocation2 + $0xe0] sm:$0xf] %vm14175_vm1, %v11542_v2  ;;  %v11643_v9 = vld [vmem:[#allocation2] sm:$0xf0] }
  0x17   : > { %197 = vst.msk [vmem:[#allocation2 + $0xf0] sm:$0xf] %vm14175_vm1, %v11542_v2  ;;  %198 = vst.msk [vmem:[#allocation2 + $0x100] sm:$0xf] %vm14175_vm1, %v11542_v2  ;;  %v705_v12 = vrot.slane %v11643_v9, 4  ;;  %v706_v13 = vrot.slane %v11641_v8, 4 }
  0x18   : > { %200 = vst.msk [vmem:[#allocation2 + $0x18] sm:$0xf0] %vm14176_vm2, %v11542_v2  ;;  %201 = vst.msk [vmem:[#allocation2 + $0x28] sm:$0xf0] %vm14176_vm2, %v11542_v2  ;;  %v223_v15 = vld [vmem:[%s11634_s20 + $0x28] sm:$0xff]  ;;  %v282_v16 = vrot.slane %v250_v10, 4 }
  0x19   : > { %202 = vst.msk [vmem:[#allocation2 + $0x38] sm:$0xf0] %vm14176_vm2, %v11542_v2  ;;  %203 = vst.msk [vmem:[#allocation2 + $0x48] sm:$0xf0] %vm14176_vm2, %v11542_v2  ;;  %v224_v18 = vld [vmem:[%s11634_s20 + $0x30] sm:$0xff]  ;;  %v225_v19 = vld [vmem:[%s11634_s20 + $0x38] sm:$0xff]  ;;  %v707_v21 = vsel %vm14173_vm4, %v705_v12, %v706_v13  ;;  %v252_v22 = vpack.c.bf16 %v223_v15, %v222_v14 }
  0x1a   : > { %204 = vst.msk [vmem:[#allocation2 + $0x58] sm:$0xf0] %vm14176_vm2, %v11542_v2  ;;  %205 = vst.msk [vmem:[#allocation2 + $0x68] sm:$0xf0] %vm14176_vm2, %v11542_v2  ;;  %v226_v20 = vld [vmem:[%s11634_s20 + $0x40] sm:$0xff]  ;;  %v253_v23 = vpack.c.bf16 %v225_v19, %v224_v18  ;;  %v227_v24 = vld [vmem:[%s11634_s20 + $0x48] sm:$0xff]  ;;  %10373 = vmatprep.mubr.msk.bf16.mxu0 %vm14172_vm0, %v707_v21 }
  0x1b   : > { %206 = vst.msk [vmem:[#allocation2 + $0x78] sm:$0xf0] %vm14176_vm2, %v11542_v2  ;;  %207 = vst.msk [vmem:[#allocation2 + $0x88] sm:$0xf0] %vm14176_vm2, %v11542_v2  ;;  %v228_v25 = vld [vmem:[%s11634_s20 + $0x50] sm:$0xff]  ;;  %v229_v26 = vld [vmem:[%s11634_s20 + $0x58] sm:$0xff]  ;;  %v254_v28 = vpack.c.bf16 %v227_v24, %v226_v20 }
  0x1c   : > { %208 = vst.msk [vmem:[#allocation2 + $0x98] sm:$0xf0] %vm14176_vm2, %v11542_v2  ;;  %209 = vst.msk [vmem:[#allocation2 + $0xa8] sm:$0xf0] %vm14176_vm2, %v11542_v2  ;;  %v283_v27 = vrot.slane %v251_v17, 4  ;;  %v255_v29 = vpack.c.bf16 %v229_v26, %v228_v25  ;;  %v230_v30 = vld [vmem:[%s11634_s20 + $0x60] sm:$0xff] }
  0x1d   : > { %210 = vst.msk [vmem:[#allocation2 + $0xb8] sm:$0xf0] %vm14176_vm2, %v11542_v2  ;;  %211 = vst.msk [vmem:[#allocation2 + $0xc8] sm:$0xf0] %vm14176_vm2, %v11542_v2  ;;  %v231_v31 = vld [vmem:[%s11634_s20 + $0x68] sm:$0xff]  ;;  %v232_v32 = vld [vmem:[%s11634_s20 + $0x70] sm:$0xff] }
  0x1e   : > { %212 = vst.msk [vmem:[#allocation2 + $0xd8] sm:$0xf0] %vm14176_vm2, %v11542_v2  ;;  %213 = vst.msk [vmem:[#allocation2 + $0xe8] sm:$0xf0] %vm14176_vm2, %v11542_v2  ;;  %v284_v33 = vrot.slane %v252_v22, 4  ;;  %v285_v34 = vrot.slane %v253_v23, 4  ;;  %v256_v35 = vpack.c.bf16 %v231_v31, %v230_v30 }
  0x1f   : > { %214 = vst.msk [vmem:[#allocation2 + $0xf8] sm:$0xf0] %vm14176_vm2, %v11542_v2  ;;  %215 = vst.msk [vmem:[#allocation2 + $0x108] sm:$0xf0] %vm14176_vm2, %v11542_v2  ;;  %v233_v36 = vld [vmem:[%s11634_s20 + $0x78] sm:$0xff]  ;;  %v234_v37 = vld [vmem:[%s11634_s20 + $0x80] sm:$0xff] }
  0x20   : > { %314 = vst.msk [vmem:[#allocation2 + $0x10] sm:$0xf0] %vm14176_vm2, %v282_v16  ;;  %v235_v38 = vld [vmem:[%s11634_s20 + $0x88] sm:$0xff]  ;;  %316 = vst.msk [vmem:[#allocation2 + $0x20] sm:$0xf0] %vm14176_vm2, %v283_v27  ;;  %v286_v39 = vrot.slane %v254_v28, 4  ;;  %v257_v41 = vpack.c.bf16 %v233_v36, %v232_v32 }
  0x21   : > { %315 = vst.msk [vmem:[#allocation2 + $0x18] sm:$0xf] %vm14175_vm1, %v282_v16  ;;  %317 = vst.msk [vmem:[#allocation2 + $0x28] sm:$0xf] %vm14175_vm1, %v283_v27  ;;  %v287_v40 = vrot.slane %v255_v29, 4  ;;  %v258_v42 = vpack.c.bf16 %v235_v38, %v234_v37  ;;  %v236_v43 = vld [vmem:[%s11634_s20 + $0x90] sm:$0xff] }
  0x22   : > { %v237_v44 = vld [vmem:[%s11634_s20 + $0x98] sm:$0xff]  ;;  %v238_v45 = vld [vmem:[%s11634_s20 + $0xa0] sm:$0xff]  ;;  %318 = vst.msk [vmem:[#allocation2 + $0x30] sm:$0xf0] %vm14176_vm2, %v284_v33  ;;  %320 = vst.msk [vmem:[#allocation2 + $0x40] sm:$0xf0] %vm14176_vm2, %v285_v34 }
  0x23   : > { %319 = vst.msk [vmem:[#allocation2 + $0x38] sm:$0xf] %vm14175_vm1, %v284_v33  ;;  %321 = vst.msk [vmem:[#allocation2 + $0x48] sm:$0xf] %vm14175_vm1, %v285_v34  ;;  %v288_v46 = vrot.slane %v256_v35, 4  ;;  %v259_v47 = vpack.c.bf16 %v237_v44, %v236_v43  ;;  %v239_v48 = vld [vmem:[%s11634_s20 + $0xa8] sm:$0xff] }
  0x24   : > { %v240_v49 = vld [vmem:[%s11634_s20 + $0xb0] sm:$0xff]  ;;  %v241_v50 = vld [vmem:[%s11634_s20 + $0xb8] sm:$0xff]  ;;  %322 = vst.msk [vmem:[#allocation2 + $0x50] sm:$0xf0] %vm14176_vm2, %v286_v39  ;;  %324 = vst.msk [vmem:[#allocation2 + $0x60] sm:$0xf0] %vm14176_vm2, %v287_v40  ;;  %v260_v53 = vpack.c.bf16 %v239_v48, %v238_v45 }
  0x25   : > { %323 = vst.msk [vmem:[#allocation2 + $0x58] sm:$0xf] %vm14175_vm1, %v286_v39  ;;  %325 = vst.msk [vmem:[#allocation2 + $0x68] sm:$0xf] %vm14175_vm1, %v287_v40  ;;  %v289_v51 = vrot.slane %v257_v41, 4  ;;  %v290_v52 = vrot.slane %v258_v42, 4  ;;  %v261_v54 = vpack.c.bf16 %v241_v50, %v240_v49 }
  0x26   : > { %v242_v55 = vld [vmem:[%s11634_s20 + $0xc0] sm:$0xff]  ;;  %v243_v56 = vld [vmem:[%s11634_s20 + $0xc8] sm:$0xff]  ;;  %v244_v57 = vld [vmem:[%s11634_s20 + $0xd0] sm:$0xff]  ;;  %326 = vst.msk [vmem:[#allocation2 + $0x70] sm:$0xf0] %vm14176_vm2, %v288_v46  ;;  %v291_v58 = vrot.slane %v259_v47, 4 }
  0x27   : > { %327 = vst.msk [vmem:[#allocation2 + $0x78] sm:$0xf] %vm14175_vm1, %v288_v46  ;;  %v262_v59 = vpack.c.bf16 %v243_v56, %v242_v55  ;;  %v245_v60 = vld [vmem:[%s11634_s20 + $0xd8] sm:$0xff]  ;;  %v246_v61 = vld [vmem:[%s11634_s20 + $0xe0] sm:$0xff]  ;;  %v247_v62 = vld [vmem:[%s11634_s20 + $0xe8] sm:$0xff]  ;;  %v292_v63 = vrot.slane %v260_v53, 4 }
  0x28   : > { %328 = vst.msk [vmem:[#allocation2 + $0x80] sm:$0xf0] %vm14176_vm2, %v289_v51  ;;  %330 = vst.msk [vmem:[#allocation2 + $0x90] sm:$0xf0] %vm14176_vm2, %v290_v52  ;;  %v293_v1 = vrot.slane %v261_v54, 4  ;;  %v263_v2 = vpack.c.bf16 %v245_v60, %v244_v57  ;;  %v264_v3 = vpack.c.bf16 %v247_v62, %v246_v61  ;;  %v1019_v6 = vsel %vm14174_vm3, %v11574_v0, 0 }
  0x29   : > { %329 = vst.msk [vmem:[#allocation2 + $0x88] sm:$0xf] %vm14175_vm1, %v289_v51  ;;  %331 = vst.msk [vmem:[#allocation2 + $0x98] sm:$0xf] %vm14175_vm1, %v290_v52  ;;  %v11694_v4 = vld [vmem:[#allocation2 + $0x18] sm:$0xf] }
  0x2a   : > { %v11696_v5 = vld [vmem:[#allocation2 + $0x10] sm:$0xf0]  ;;  %332 = vst.msk [vmem:[#allocation2 + $0xa0] sm:$0xf0] %vm14176_vm2, %v291_v58  ;;  %v294_v7 = vrot.slane %v262_v59, 4  ;;  %v709_v11 = vrot.slane %v11694_v4, 4 }
  0x2b   : > { %333 = vst.msk [vmem:[#allocation2 + $0xa8] sm:$0xf] %vm14175_vm1, %v291_v58  ;;  %v708_v10 = vrot.slane %v11696_v5, 4  ;;  %335 = vst.msk [vmem:[#allocation2 + $0xb8] sm:$0xf] %vm14175_vm1, %v292_v63  ;;  %v295_v12 = vrot.slane %v263_v2, 4 }
  0x2c   : > { %334 = vst.msk [vmem:[#allocation2 + $0xb0] sm:$0xf0] %vm14176_vm2, %v292_v63  ;;  %336 = vst.msk [vmem:[#allocation2 + $0xc0] sm:$0xf0] %vm14176_vm2, %v293_v1  ;;  %v296_v13 = vrot.slane %v264_v3, 4 }
  0x2d   : > { %337 = vst.msk [vmem:[#allocation2 + $0xc8] sm:$0xf] %vm14175_vm1, %v293_v1  ;;  %v11708_v0 = vld [vmem:[#allocation2 + $0x28] sm:$0xf]  ;;  %v11710_v14 = vld [vmem:[#allocation2 + $0x20] sm:$0xf0]  ;;  %v710_v16 = vsel %vm14173_vm4, %v708_v10, %v709_v11 }
  0x2e   : > { %338 = vst.msk [vmem:[#allocation2 + $0xd0] sm:$0xf0] %vm14176_vm2, %v294_v7  ;;  %v11717_v15 = vld [vmem:[%s14167_s1 + $0x4] sm:$0x3]  ;;  %v711_v17 = vrot.slane %v11710_v14, 4  ;;  %v712_v18 = vrot.slane %v11708_v0, 4  ;;  %10374 = vmatmul.mubr.msk.bf16.vlgmr.msra.gmra.mrb[0].mxu0 %vm14172_vm0, %v710_v16 }
  0x2f   : > { %339 = vst.msk [vmem:[#allocation2 + $0xd8] sm:$0xf] %vm14175_vm1, %v294_v7  ;;  %v11722_v19 = vld [vmem:[#allocation2 + $0x38] sm:$0xf]  ;;  %v11724_v20 = vld [vmem:[#allocation2 + $0x30] sm:$0xf0]  ;;  %10406 = vmatpush3.bf16.msra.mxu0 %v1019_v6 }
  0x30   : > { %340 = vst.msk [vmem:[#allocation2 + $0xe0] sm:$0xf0] %vm14176_vm2, %v295_v12  ;;  %342 = vst.msk [vmem:[#allocation2 + $0xf0] sm:$0xf0] %vm14176_vm2, %v296_v13  ;;  %v11731_v21 = vld [vmem:[#allocation2 + $0x48] sm:$0xf]  ;;  %v713_v23 = vsel %vm14173_vm4, %v711_v17, %v712_v18  ;;  %11497 = vmatprep.subr.msk.bf16.mxu0 %vm14174_vm3, %v11717_v15 }
  0x31   : > { %341 = vst.msk [vmem:[#allocation2 + $0xe8] sm:$0xf] %vm14175_vm1, %v295_v12  ;;  %343 = vst.msk [vmem:[#allocation2 + $0xf8] sm:$0xf] %vm14175_vm1, %v296_v13  ;;  %v11733_v22 = vld [vmem:[#allocation2 + $0x40] sm:$0xf0]  ;;  %10377 = vmatprep.mubr.msk.bf16.mxu0 %vm14172_vm0, %v713_v23 }
  0x32   : > { %v714_v24 = vrot.slane %v11724_v20, 4  ;;  %v715_v25 = vrot.slane %v11722_v19, 4  ;;  %v717_v26 = vrot.slane %v11733_v22, 4  ;;  %v718_v27 = vrot.slane %v11731_v21, 4  ;;  %v11745_v30 = vld [vmem:[#allocation2 + $0x58] sm:$0xf] }
  0x33   : > { %v11747_v31 = vld [vmem:[#allocation2 + $0x50] sm:$0xf0]  ;;  %v11749_v32 = vld [vmem:[#allocation2 + $0x68] sm:$0xf]  ;;  %v11751_v33 = vld [vmem:[#allocation2 + $0x60] sm:$0xf0] }
  0x34   : > { %v716_v28 = vsel %vm14173_vm4, %v714_v24, %v715_v25  ;;  %v719_v29 = vsel %vm14173_vm4, %v717_v26, %v718_v27  ;;  %v720_v34 = vrot.slane %v11747_v31, 4  ;;  %v721_v35 = vrot.slane %v11745_v30, 4  ;;  %v11761_v40 = vld [vmem:[#allocation2 + $0x78] sm:$0xf]  ;;  %v11763_v41 = vld [vmem:[#allocation2 + $0x70] sm:$0xf0] }
  0x35   : > { %v723_v36 = vrot.slane %v11751_v33, 4  ;;  %v724_v37 = vrot.slane %v11749_v32, 4  ;;  %v11765_v42 = vld [vmem:[#allocation2 + $0x88] sm:$0xf]  ;;  %v11767_v43 = vld [vmem:[#allocation2 + $0x80] sm:$0xf0] }
  0x36   : > { %10378 = vmatmul.mubr.msk.bf16.gmra.mrb[4].mxu0 %vm14172_vm0, %v716_v28  ;;  %v722_v38 = vsel %vm14173_vm4, %v720_v34, %v721_v35  ;;  %v726_v44 = vrot.slane %v11763_v41, 4  ;;  %v727_v45 = vrot.slane %v11761_v40, 4  ;;  %v729_v46 = vrot.slane %v11767_v43, 4  ;;  %v11777_v50 = vld [vmem:[#allocation2 + $0x98] sm:$0xf] }
  0x37   : > { %10381 = vmatprep.mubr.msk.bf16.mxu0 %vm14172_vm0, %v719_v29  ;;  %v725_v39 = vsel %vm14173_vm4, %v723_v36, %v724_v37  ;;  %v730_v47 = vrot.slane %v11765_v42, 4  ;;  %v11779_v51 = vld [vmem:[#allocation2 + $0x90] sm:$0xf0]  ;;  %v11781_v52 = vld [vmem:[#allocation2 + $0xa8] sm:$0xf]  ;;  %v733_v55 = vrot.slane %v11777_v50, 4 }
  0x38   : > { %v728_v48 = vsel %vm14173_vm4, %v726_v44, %v727_v45  ;;  %v11783_v53 = vld [vmem:[#allocation2 + $0xa0] sm:$0xf0]  ;;  %v732_v54 = vrot.slane %v11779_v51, 4  ;;  %v736_v57 = vrot.slane %v11781_v52, 4  ;;  %v11793_v60 = vld [vmem:[#allocation2 + $0xb8] sm:$0xf] }
  0x39   : > { %v731_v49 = vsel %vm14173_vm4, %v729_v46, %v730_v47  ;;  %v735_v56 = vrot.slane %v11783_v53, 4  ;;  %v11795_v61 = vld [vmem:[#allocation2 + $0xb0] sm:$0xf0]  ;;  %v11797_v62 = vld [vmem:[#allocation2 + $0xc8] sm:$0xf]  ;;  %v739_v2 = vrot.slane %v11793_v60, 4 }
  0x3a   : > { %v734_v58 = vsel %vm14173_vm4, %v732_v54, %v733_v55  ;;  %v11799_v63 = vld [vmem:[#allocation2 + $0xc0] sm:$0xf0]  ;;  %v738_v1 = vrot.slane %v11795_v61, 4  ;;  %v742_v6 = vrot.slane %v11797_v62, 4  ;;  %v11809_v11 = vld [vmem:[#allocation2 + $0xd8] sm:$0xf] }
  0x3b   : > { %v737_v59 = vsel %vm14173_vm4, %v735_v56, %v736_v57  ;;  %v741_v3 = vrot.slane %v11799_v63, 4  ;;  %v11811_v12 = vld [vmem:[#allocation2 + $0xd0] sm:$0xf0]  ;;  %v351_v13 = vld [vmem:[#allocation2] sm:$0xf8]  ;;  %v393_v18 = vshrl.u32 %v11641_v8, 16 }
  0x3c   : > { %v740_v7 = vsel %vm14173_vm4, %v738_v1, %v739_v2  ;;  %v11813_v16 = vld [vmem:[#allocation2 + $0xe8] sm:$0xf]  ;;  %v11815_v17 = vld [vmem:[#allocation2 + $0xe0] sm:$0xf0]  ;;  %v396_v23 = vshll.u32 %v11641_v8, 16  ;;  %v744_v24 = vrot.slane %v11811_v12, 4 }
  0x3d   : > { %v743_v10 = vsel %vm14173_vm4, %v741_v3, %v742_v6  ;;  %v745_v25 = vrot.slane %v11809_v11, 4  ;;  %v385_v26 = vshrl.u32 %v351_v13, 16  ;;  %v388_v27 = vshll.u32 %v351_v13, 16  ;;  %v353_v36 = vld [vmem:[#allocation2 + $0x10] sm:$0xf8] }
  0x3e   : > { %10382 = vmatmul.mubr.msk.bf16.gmra.mrb[8].mxu0 %vm14172_vm0, %v722_v38  ;;  %v747_v28 = vrot.slane %v11815_v17, 4  ;;  %v748_v29 = vrot.slane %v11813_v16, 4  ;;  %v395_v34 = vrot.slane %v393_v18, 3  ;;  %v398_v35 = vrot.slane %v396_v23, 4  ;;  %v11826_v8 = vld [vmem:[#allocation2 + $0xf8] sm:$0xf] }
  0x3f   : > { %10385 = vmatprep.mubr.msk.bf16.mxu0 %vm14172_vm0, %v725_v39  ;;  %v746_v37 = vsel %vm14173_vm4, %v744_v24, %v745_v25  ;;  %v11828_v38 = vld [vmem:[#allocation2 + $0xf0] sm:$0xf0]  ;;  %v387_v39 = vrot.slane %v385_v26, 3  ;;  %v390_v44 = vrot.slane %v388_v27, 4  ;;  %v355_v46 = vld [vmem:[#allocation2 + $0x20] sm:$0xf8] }
  0x40   : > { %v749_v45 = vsel %vm14173_vm4, %v747_v28, %v748_v29  ;;  %v750_v47 = vrot.slane %v11828_v38, 4  ;;  %v402_v54 = vshrl.u32 %v353_v36, 16  ;;  %v405_v56 = vshll.u32 %v353_v36, 16  ;;  %v357_v24 = vld [vmem:[#allocation2 + $0x30] sm:$0xf8] }
  0x41   : > { %v391_v55 = vor.u32 %v390_v44, %v387_v39  ;;  %v410_v57 = vshrl.u32 %v11694_v4, 16  ;;  %v422_v1 = vshll.u32 %v355_v46, 16  ;;  %v427_v2 = vshrl.u32 %v11708_v0, 16 }
  0x42   : > { %v430_v3 = vshll.u32 %v11708_v0, 16  ;;  %v407_v13 = vrot.slane %v405_v56, 4  ;;  %v436_v29 = vshrl.u32 %v357_v24, 16  ;;  %v444_v0 = vshrl.u32 %v11722_v19, 16 }
  0x43   : > { %v412_v18 = vrot.slane %v410_v57, 3  ;;  %v424_v26 = vrot.slane %v422_v1, 4  ;;  %v429_v27 = vrot.slane %v427_v2, 3  ;;  %v1520_v1 = vsel %vm14174_vm3, %v11717_v15, 0 }
  0x44   : > { %v432_v28 = vrot.slane %v430_v3, 4 }
  0x46   : > { %10386 = vmatmul.mubr.msk.bf16.gmra.mrb[12].mxu0 %vm14172_vm0, %v728_v48  ;;  %v751_v48 = vrot.slane %v11826_v8, 4 }
  0x47   : > { %10389 = vmatprep.mubr.msk.bf16.mxu0 %vm14172_vm0, %v731_v49  ;;  %v399_v49 = vor.u32 %v398_v35, %v395_v34  ;;  %v439_v34 = vshll.u32 %v357_v24, 16  ;;  %v447_v35 = vshll.u32 %v11722_v19, 16  ;;  %v478_v24 = vshrl.u32 %v11745_v30, 16 }
  0x48   : > { %v752_v6 = vsel %vm14173_vm4, %v750_v47, %v751_v48  ;;  %v461_v47 = vshrl.u32 %v11731_v21, 16  ;;  %v464_v48 = vshll.u32 %v11731_v21, 16  ;;  %v11854_v21 = vld [vmem:[%s14167_s1 + $0x8] sm:$0xf] }
  0x49   : > { %v449_v56 = vrot.slane %v447_v35, 4 }
  0x4a   : > { %v463_v3 = vrot.slane %v461_v47, 3 }
  0x4e   : > { %10390 = vmatmul.mubr.msk.bf16.gmra.mrb[16].mxu0 %vm14172_vm0, %v734_v58  ;;  %v413_v58 = vshll.u32 %v11694_v4, 16  ;;  %v359_v4 = vld [vmem:[#allocation2 + $0x40] sm:$0xf8] }
  0x4f   : > { %10393 = vmatprep.mubr.msk.bf16.mxu0 %vm14172_vm0, %v737_v59  ;;  %v419_v59 = vshrl.u32 %v355_v46, 16  ;;  %v453_v39 = vshrl.u32 %v359_v4, 16  ;;  %v456_v44 = vshll.u32 %v359_v4, 16  ;;  %v433_v46 = vor.u32 %v432_v28, %v429_v27 }
  0x50   : > { %v415_v23 = vrot.slane %v413_v58, 4  ;;  %v495_v4 = vshrl.u32 %v11749_v32, 16 }
  0x51   : > { %v421_v25 = vrot.slane %v419_v59, 3  ;;  %v455_v58 = vrot.slane %v453_v39, 3  ;;  %v458_v19 = vrot.slane %v456_v44, 4  ;;  %v361_v59 = vld [vmem:[#allocation2 + $0x50] sm:$0xf8] }
  0x52   : > { %v365_v44 = vld [vmem:[#allocation2 + $0x70] sm:$0xf8] }
  0x53   : > { %v459_v15 = vor.u32 %v458_v19, %v455_v58 }
  0x56   : > { %10394 = vmatmul.mubr.msk.bf16.gmra.mrb[20].mxu0 %vm14172_vm0, %v740_v7  ;;  %v404_v7 = vrot.slane %v402_v54, 3  ;;  %v441_v54 = vrot.slane %v439_v34, 4 }
  0x57   : > { %10397 = vmatprep.mubr.msk.bf16.mxu0 %vm14172_vm0, %v743_v10  ;;  %v400_v10 = vsel %vm14171_vm5, %v391_v55, %v399_v49  ;;  %v438_v49 = vrot.slane %v436_v29, 3  ;;  %v446_v55 = vrot.slane %v444_v0, 3  ;;  %v498_v29 = vshll.u32 %v11749_v32, 16 }
  0x58   : > { %v408_v36 = vor.u32 %v407_v13, %v404_v7  ;;  %v363_v7 = vld [vmem:[#allocation2 + $0x60] sm:$0xf8]  ;;  %v504_v32 = vshrl.u32 %v365_v44, 16 }
  0x59   : > { %v450_v13 = vor.u32 %v449_v56, %v446_v55  ;;  %v490_v28 = vshll.u32 %v363_v7, 16  ;;  %v500_v47 = vrot.slane %v498_v29, 4  ;;  %v515_v55 = vshll.u32 %v11761_v40, 16 }
  0x5e   : > { %10398 = vmatmul.mubr.msk.bf16.gmra.mrb[24].mxu0 %vm14172_vm0, %v746_v37  ;;  %v416_v37 = vor.u32 %v415_v23, %v412_v18  ;;  %v470_v18 = vshrl.u32 %v361_v59, 16  ;;  %v473_v23 = vshll.u32 %v361_v59, 16 }
  0x5f   : > { %10401 = vmatprep.mubr.msk.bf16.mxu0 %vm14172_vm0, %v749_v45  ;;  %v425_v45 = vor.u32 %v424_v26, %v421_v25  ;;  %v481_v25 = vshll.u32 %v11745_v30, 16  ;;  %v487_v26 = vshrl.u32 %v363_v7, 16 }
  0x60   : > { %v417_v57 = vsel %vm14171_vm5, %v408_v36, %v416_v37  ;;  %v472_v0 = vrot.slane %v470_v18, 3  ;;  %v475_v35 = vrot.slane %v473_v23, 4  ;;  %v480_v36 = vrot.slane %v478_v24, 3 }
  0x61   : > { %v434_v2 = vsel %vm14171_vm5, %v425_v45, %v433_v46  ;;  %v483_v37 = vrot.slane %v481_v25, 4  ;;  %v489_v39 = vrot.slane %v487_v26, 3  ;;  %v492_v45 = vrot.slane %v490_v28, 4 }
  0x62   : > { %v497_v46 = vrot.slane %v495_v4, 3  ;;  %v476_v56 = vor.u32 %v475_v35, %v472_v0  ;;  %v546_v0 = vshrl.u32 %v11777_v50, 16  ;;  %v549_v35 = vshll.u32 %v11777_v50, 16 }
  0x63   : > { %v493_v59 = vor.u32 %v492_v45, %v489_v39 }
  0x66   : > { %10402 = vmatmul.mubr.msk.bf16.gmra.mrb[28].mxu0 %vm14172_vm0, %v752_v6  ;;  %v466_v6 = vrot.slane %v464_v48, 4  ;;  %v367_v48 = vld [vmem:[#allocation2 + $0x80] sm:$0xf8] }
  0x67   : > { %10407 = vmatprep.mubr.msk.bf16.mxu0 %vm14172_vm0, %v400_v10  ;;  %v442_v10 = vor.u32 %v441_v54, %v438_v49  ;;  %v507_v49 = vshll.u32 %v365_v44, 16  ;;  %v512_v54 = vshrl.u32 %v11761_v40, 16  ;;  %v521_v58 = vshrl.u32 %v367_v48, 16 }
  0x68   : > { %v467_v27 = vor.u32 %v466_v6, %v463_v3  ;;  %v524_v19 = vshll.u32 %v367_v48, 16  ;;  %v532_v3 = vshll.u32 %v11765_v42, 16  ;;  %v506_v6 = vrot.slane %v504_v32, 3 }
  0x69   : > { %v451_v34 = vsel %vm14171_vm5, %v442_v10, %v450_v13  ;;  %v509_v7 = vrot.slane %v507_v49, 4  ;;  %v514_v10 = vrot.slane %v512_v54, 3  ;;  %v517_v13 = vrot.slane %v515_v55, 4  ;;  %v373_v54 = vld [vmem:[#allocation2 + $0xb0] sm:$0xf8] }
  0x6a   : > { %v468_v30 = vsel %vm14171_vm5, %v459_v15, %v467_v27  ;;  %v523_v23 = vrot.slane %v521_v58, 3  ;;  %v526_v40 = vrot.slane %v524_v19, 4  ;;  %v369_v15 = vld [vmem:[#allocation2 + $0x90] sm:$0xf8]  ;;  %v534_v26 = vrot.slane %v532_v3, 4 }
  0x6b   : > { %v371_v27 = vld [vmem:[#allocation2 + $0xa0] sm:$0xf8]  ;;  %v510_v28 = vor.u32 %v509_v7, %v506_v6  ;;  %v518_v4 = vor.u32 %v517_v13, %v514_v10  ;;  %v538_v29 = vshrl.u32 %v369_v15, 16  ;;  %v563_v44 = vshrl.u32 %v11781_v52, 16 }
  0x6c   : > { %v558_v39 = vshll.u32 %v371_v27, 16  ;;  %v548_v48 = vrot.slane %v546_v0, 3  ;;  %v551_v32 = vrot.slane %v549_v35, 4  ;;  %v375_v58 = vld [vmem:[#allocation2 + $0xc0] sm:$0xf8]  ;;  %v572_v19 = vshrl.u32 %v373_v54, 16 }
  0x6d   : > { %v519_v45 = vsel %vm14171_vm5, %v510_v28, %v518_v4  ;;  %v589_v6 = vshrl.u32 %v375_v58, 16  ;;  %v592_v7 = vshll.u32 %v375_v58, 16  ;;  %v377_v28 = vld [vmem:[#allocation2 + $0xd0] sm:$0xf8] }
  0x6e   : > { %10408 = vmatmul.mubr.msk.bf16.vlgmr.msra.gmra.mrb[0].mxu0 %vm14172_vm0, %v417_v57  ;;  %v484_v57 = vor.u32 %v483_v37, %v480_v36  ;;  %v555_v36 = vshrl.u32 %v371_v27, 16  ;;  %v552_v3 = vor.u32 %v551_v32, %v548_v48  ;;  %v634_v48 = vshll.u32 %v11813_v16, 16 }
  0x6f   : > { %10440 = vmatpush3.bf16.msra.mxu0 %v1520_v1  ;;  %10411 = vmatprep.mubr.msk.bf16.mxu0 %vm14172_vm0, %v434_v2  ;;  %v501_v1 = vor.u32 %v500_v47, %v497_v46  ;;  %v529_v2 = vshrl.u32 %v11765_v42, 16  ;;  %v541_v42 = vshll.u32 %v369_v15, 16  ;;  %v540_v46 = vrot.slane %v538_v29, 3 }
  0x70   : > { %11498 = vmatprep.subr.msk.bf16.mxu0 %vm14174_vm3, %v11854_v21  ;;  %v485_v18 = vsel %vm14171_vm5, %v476_v56, %v484_v57  ;;  %v557_v49 = vrot.slane %v555_v36, 3  ;;  %v560_v56 = vrot.slane %v558_v39, 4  ;;  %v565_v57 = vrot.slane %v563_v44, 3 }
  0x71   : > { %v502_v24 = vsel %vm14171_vm5, %v493_v59, %v501_v1  ;;  %v531_v25 = vrot.slane %v529_v2, 3  ;;  %v543_v47 = vrot.slane %v541_v42, 4  ;;  %v575_v59 = vshll.u32 %v373_v54, 16 }
  0x72   : > { %v583_v1 = vshll.u32 %v11793_v60, 16  ;;  %v561_v10 = vor.u32 %v560_v56, %v557_v49  ;;  %v591_v27 = vrot.slane %v589_v6, 3  ;;  %v606_v36 = vshrl.u32 %v377_v28, 16 }
  0x73   : > { %v535_v37 = vor.u32 %v534_v26, %v531_v25  ;;  %v544_v2 = vor.u32 %v543_v47, %v540_v46  ;;  %v577_v15 = vrot.slane %v575_v59, 4  ;;  %v614_v39 = vshrl.u32 %v11809_v11, 16 }
  0x74   : > { %v585_v25 = vrot.slane %v583_v1, 4  ;;  %v617_v44 = vshll.u32 %v11809_v11, 16  ;;  %v631_v47 = vshrl.u32 %v11813_v16, 16  ;;  %v608_v49 = vrot.slane %v606_v36, 3 }
  0x75   : > { %v553_v26 = vsel %vm14171_vm5, %v544_v2, %v552_v3  ;;  %v636_v11 = vrot.slane %v634_v48, 4  ;;  %v648_v16 = vshrl.u32 %v11826_v8, 16  ;;  %v651_v3 = vshll.u32 %v11826_v8, 16 }
  0x76   : > { %10412 = vmatmul.mubr.msk.bf16.gmra.mrb[4].mxu0 %vm14172_vm0, %v451_v34  ;;  %v527_v34 = vor.u32 %v526_v40, %v523_v23  ;;  %v600_v23 = vshll.u32 %v11797_v62, 16  ;;  %v574_v40 = vrot.slane %v572_v19, 3  ;;  %v619_v56 = vrot.slane %v617_v44, 4 }
  0x77   : > { %10415 = vmatprep.mubr.msk.bf16.mxu0 %vm14172_vm0, %v468_v30  ;;  %v566_v30 = vshll.u32 %v11781_v52, 16  ;;  %v580_v52 = vshrl.u32 %v11793_v60, 16  ;;  %v594_v60 = vrot.slane %v592_v7, 4  ;;  %v633_v59 = vrot.slane %v631_v47, 3 }
  0x78   : > { %v536_v55 = vsel %vm14171_vm5, %v527_v34, %v535_v37  ;;  %v602_v42 = vrot.slane %v600_v23, 4  ;;  %v379_v34 = vld [vmem:[#allocation2 + $0xe0] sm:$0xf8]  ;;  %v578_v0 = vor.u32 %v577_v15, %v574_v40  ;;  %v1200_v6 = vshrl.u32 %v11643_v9, 16 }
  0x79   : > { %v568_v50 = vrot.slane %v566_v30, 4  ;;  %v595_v37 = vor.u32 %v594_v60, %v591_v27  ;;  %v623_v30 = vshrl.u32 %v379_v34, 16  ;;  %v626_v46 = vshll.u32 %v379_v34, 16  ;;  %v1184_v34 = vld [vmem:[#allocation2 + $0x28] sm:$0x1f] }
  0x7a   : > { %v1203_v7 = vshll.u32 %v11643_v9, 16  ;;  %v637_v23 = vor.u32 %v636_v11, %v633_v59  ;;  %v653_v27 = vrot.slane %v651_v3, 4  ;;  %v1217_v36 = vshrl.u32 %v11696_v5, 16 }
  0x7b   : > { %v569_v13 = vor.u32 %v568_v50, %v565_v57  ;;  %v625_v57 = vrot.slane %v623_v30, 3  ;;  %v381_v50 = vld [vmem:[#allocation2 + $0xf0] sm:$0xf8]  ;;  %v628_v19 = vrot.slane %v626_v46, 4  ;;  %v1234_v44 = vshrl.u32 %v11710_v14, 16 }
  0x7c   : > { %v640_v1 = vshrl.u32 %v381_v50, 16  ;;  %v643_v2 = vshll.u32 %v381_v50, 16  ;;  %v1237_v30 = vshll.u32 %v11710_v14, 16  ;;  %v1242_v47 = vshrl.u32 %v1184_v34, 16 }
  0x7d   : > { %v570_v4 = vsel %vm14171_vm5, %v561_v10, %v569_v13  ;;  %v1245_v48 = vshll.u32 %v1184_v34, 16  ;;  %v1251_v14 = vshrl.u32 %v11724_v20, 16  ;;  %v1254_v11 = vshll.u32 %v11724_v20, 16 }
  0x7e   : > { %10416 = vmatmul.mubr.msk.bf16.gmra.mrb[8].mxu0 %vm14172_vm0, %v485_v18  ;;  %v597_v18 = vshrl.u32 %v11797_v62, 16  ;;  %v609_v62 = vshll.u32 %v377_v28, 16  ;;  %v1202_v28 = vrot.slane %v1200_v6, 4  ;;  %v1239_v50 = vrot.slane %v1237_v30, 5 }
  0x7f   : > { %10419 = vmatprep.mubr.msk.bf16.mxu0 %vm14172_vm0, %v502_v24  ;;  %v582_v24 = vrot.slane %v580_v52, 3  ;;  %v1182_v52 = vld [vmem:[#allocation2 + $0x8] sm:$0x1f]  ;;  %v1247_v59 = vrot.slane %v1245_v48, 5 }
  0x80   : > { %v599_v29 = vrot.slane %v597_v18, 3  ;;  %v611_v54 = vrot.slane %v609_v62, 4  ;;  %v629_v18 = vor.u32 %v628_v19, %v625_v57  ;;  %v1208_v40 = vshrl.u32 %v1182_v52, 16 }
  0x81   : > { %v586_v35 = vor.u32 %v585_v25, %v582_v24  ;;  %v1211_v15 = vshll.u32 %v1182_v52, 16  ;;  %v642_v24 = vrot.slane %v640_v1, 3  ;;  %v645_v25 = vrot.slane %v643_v2, 4  ;;  %v1186_v2 = vld [vmem:[#allocation2 + $0x48] sm:$0x1f] }
  0x82   : > { %v612_v10 = vor.u32 %v611_v54, %v608_v49  ;;  %v638_v8 = vsel %vm14171_vm5, %v629_v18, %v637_v23  ;;  %v1220_v62 = vshll.u32 %v11696_v5, 16  ;;  %v1219_v49 = vrot.slane %v1217_v36, 4 }
  0x83   : > { %v587_v32 = vsel %vm14171_vm5, %v578_v0, %v586_v35  ;;  %v1213_v9 = vrot.slane %v1211_v15, 5  ;;  %v646_v0 = vor.u32 %v645_v25, %v642_v24  ;;  %v1236_v57 = vrot.slane %v1234_v44, 4 }
  0x84   : > { %v1222_v54 = vrot.slane %v1220_v62, 5  ;;  %v1244_v19 = vrot.slane %v1242_v47, 4  ;;  %v1271_v18 = vshll.u32 %v11733_v22, 16  ;;  %v1276_v23 = vshrl.u32 %v1186_v2, 16 }
  0x85   : > { %v1279_v20 = vshll.u32 %v1186_v2, 16  ;;  %v1256_v15 = vrot.slane %v1254_v11, 5  ;;  %v1288_v36 = vshll.u32 %v11747_v31, 16  ;;  %v1322_v11 = vshll.u32 %v11763_v41, 16 }
  0x86   : > { %10420 = vmatmul.mubr.msk.bf16.gmra.mrb[12].mxu0 %vm14172_vm0, %v519_v45  ;;  %v603_v45 = vor.u32 %v602_v42, %v599_v29  ;;  %v1210_v29 = vrot.slane %v1208_v40, 4  ;;  %v1183_v42 = vld [vmem:[#allocation2 + $0x18] sm:$0x1f]  ;;  %v1223_v3 = vor.u32 %v1222_v54, %v1219_v49  ;;  %v1253_v40 = vrot.slane %v1251_v14, 4 }
  0x87   : > { %10423 = vmatprep.mubr.msk.bf16.mxu0 %vm14172_vm0, %v536_v55  ;;  %v616_v55 = vrot.slane %v614_v39, 3  ;;  %v1228_v39 = vshll.u32 %v1183_v42, 16  ;;  %v1290_v48 = vrot.slane %v1288_v36, 5  ;;  %v1373_v36 = vshll.u32 %v11783_v53, 16 }
  0x88   : > { %v604_v58 = vsel %vm14171_vm5, %v595_v37, %v603_v45  ;;  %v1225_v37 = vshrl.u32 %v1183_v42, 16  ;;  %v1214_v46 = vor.u32 %v1213_v9, %v1210_v29  ;;  %v1273_v29 = vrot.slane %v1271_v18, 5  ;;  %v1188_v42 = vld [vmem:[#allocation2 + $0x68] sm:$0x1f] }
  0x89   : > { %v620_v13 = vor.u32 %v619_v56, %v616_v55  ;;  %v1185_v55 = vld [vmem:[#allocation2 + $0x38] sm:$0x1f]  ;;  %v1230_v5 = vrot.slane %v1228_v39, 5  ;;  %v1278_v9 = vrot.slane %v1276_v23, 4  ;;  %v1257_v34 = vor.u32 %v1256_v15, %v1253_v40 }
  0x8a   : > { %v1227_v56 = vrot.slane %v1225_v37, 4  ;;  %v1259_v52 = vshrl.u32 %v1185_v55, 16  ;;  %v1262_v1 = vshll.u32 %v1185_v55, 16  ;;  %v1305_v39 = vshll.u32 %v11751_v33, 16 }
  0x8b   : > { %v621_v60 = vsel %vm14171_vm5, %v612_v10, %v620_v13  ;;  %v1268_v10 = vshrl.u32 %v11733_v22, 16  ;;  %v1248_v13 = vor.u32 %v1247_v59, %v1244_v19  ;;  %v1281_v22 = vrot.slane %v1279_v20, 5  ;;  %v248_v19 = vld [vmem:[%s11634_s20 + $0xf0] sm:$0xff]  ;;  %v249_v59 = vld [vmem:[%s11634_s20 + $0xf8] sm:$0xff] }
  0x8c   : > { %v1231_v6 = vor.u32 %v1230_v5, %v1227_v56  ;;  %v1261_v24 = vrot.slane %v1259_v52, 4  ;;  %v1264_v25 = vrot.slane %v1262_v1, 5  ;;  %v1310_v44 = vshrl.u32 %v1188_v42, 16 }
  0x8d   : > { %v1313_v30 = vshll.u32 %v1188_v42, 16  ;;  %v1307_v55 = vrot.slane %v1305_v39, 5  ;;  %v265_v18 = vpack.c.bf16 %v249_v59, %v248_v19  ;;  %v1324_v20 = vrot.slane %v1322_v11, 5 }
  0x8e   : > { %10424 = vmatmul.mubr.msk.bf16.gmra.mrb[16].mxu0 %vm14172_vm0, %v553_v26  ;;  %v650_v26 = vrot.slane %v648_v16, 3  ;;  %v9826_v16 = vcombine.low %v11854_v21, %v11854_v21  ;;  %v1312_v56 = vrot.slane %v1310_v44, 4  ;;  %v1356_v42 = vshll.u32 %v11779_v51, 16 }
  0x8f   : > { %10427 = vmatprep.mubr.msk.bf16.mxu0 %vm14172_vm0, %v570_v4  ;;  %v1205_v4 = vrot.slane %v1203_v7, 5  ;;  %v1240_v7 = vor.u32 %v1239_v50, %v1236_v57  ;;  %v1315_v5 = vrot.slane %v1313_v30, 5  ;;  %v1319_v50 = vshrl.u32 %v11763_v41, 16 }
  0x90   : > { %v654_v35 = vor.u32 %v653_v27, %v650_v26  ;;  %v11922_v26 = vrot.slane %v9826_v16, 2  ;;  %v1232_v27 = vsel %vm14170_vm6, %v1223_v3, %v1231_v6  ;;  %v1336_v6 = vshrl.u32 %v11767_v43, 16 }
  0x91   : > { %v1206_v45 = vor.u32 %v1205_v4, %v1202_v28  ;;  %v1270_v28 = vrot.slane %v1268_v10, 4  ;;  %v1249_v4 = vsel %vm14170_vm6, %v1240_v7, %v1248_v13  ;;  %v1316_v3 = vor.u32 %v1315_v5, %v1312_v56 }
  0x92   : > { %v1339_v7 = vshll.u32 %v11767_v43, 16  ;;  %v1321_v23 = vrot.slane %v1319_v50, 4  ;;  %v1192_v43 = vld [vmem:[#allocation2 + $0xa8] sm:$0x1f]  ;;  %v1390_v56 = vshll.u32 %v11795_v61, 16  ;;  %v1404_v19 = vshrl.u32 %v11799_v63, 16 }
  0x93   : > { %v1381_v39 = vshll.u32 %v1192_v43, 16 }
  0x96   : > { %10428 = vmatmul.mubr.msk.bf16.gmra.mrb[20].mxu0 %vm14172_vm0, %v587_v32  ;;  %v655_v32 = vsel %vm14171_vm5, %v646_v0, %v654_v35  ;;  %v1265_v0 = vor.u32 %v1264_v25, %v1261_v24  ;;  %v1285_v35 = vshrl.u32 %v11747_v31, 16  ;;  %v297_v24 = vrot.slane %v265_v18, 4 }
  0x97   : > { %10431 = vmatprep.mubr.msk.bf16.mxu0 %vm14172_vm0, %v604_v58  ;;  %v1215_v58 = vsel %vm14170_vm6, %v1206_v45, %v1214_v46  ;;  %v1274_v45 = vor.u32 %v1273_v29, %v1270_v28  ;;  %v1282_v46 = vor.u32 %v1281_v22, %v1278_v9  ;;  %v1338_v25 = vrot.slane %v1336_v6, 4 }
  0x98   : > { %v1266_v31 = vsel %vm14170_vm6, %v1257_v34, %v1265_v0  ;;  %v1287_v47 = vrot.slane %v1285_v35, 4  ;;  %344 = vst.msk [vmem:[#allocation2 + $0x100] sm:$0xf0] %vm14176_vm2, %v297_v24  ;;  %v1325_v29 = vor.u32 %v1324_v20, %v1321_v23  ;;  %v1353_v22 = vshrl.u32 %v11779_v51, 16  ;;  %v1195_v23 = vld [vmem:[#allocation2 + $0xd8] sm:$0x1f] }
  0x99   : > { %v1283_v57 = vsel %vm14170_vm6, %v1274_v45, %v1282_v46  ;;  %345 = vst.msk [vmem:[#allocation2 + $0x108] sm:$0xf] %vm14175_vm1, %v297_v24  ;;  %v1370_v35 = vshrl.u32 %v11783_v53, 16  ;;  %v1358_v45 = vrot.slane %v1356_v42, 5  ;;  %v1375_v51 = vrot.slane %v1373_v36, 5 }
  0x9a   : > { %v1291_v14 = vor.u32 %v1290_v48, %v1287_v47  ;;  %v1355_v30 = vrot.slane %v1353_v22, 4  ;;  %v1193_v48 = vld [vmem:[#allocation2 + $0xb8] sm:$0x1f]  ;;  %v1387_v53 = vshrl.u32 %v11795_v61, 16  ;;  %v1406_v6 = vrot.slane %v1404_v19, 4 }
  0x9b   : > { %v1372_v47 = vrot.slane %v1370_v35, 4  ;;  %v1395_v5 = vshrl.u32 %v1193_v48, 16  ;;  %v1196_v20 = vld [vmem:[#allocation2 + $0xe8] sm:$0x1f]  ;;  %v1424_v24 = vshll.u32 %v11811_v12, 16 }
  0x9c   : > { %v1197_v42 = vld [vmem:[#allocation2 + $0xf8] sm:$0x1f] }
  0x9d   : > { %v1426_v22 = vrot.slane %v1424_v24, 5 }
  0x9e   : > { %10432 = vmatmul.mubr.msk.bf16.gmra.mrb[24].mxu0 %vm14172_vm0, %v621_v60  ;;  %v2071_v60 = vsel %vm14174_vm3, %v11854_v21, 0  ;;  %v1302_v21 = vshrl.u32 %v11751_v33, 16  ;;  %v1189_v33 = vld [vmem:[#allocation2 + $0x78] sm:$0x1f] }
  0x9f   : > { %10435 = vmatprep.mubr.msk.bf16.mxu0 %vm14172_vm0, %v638_v8  ;;  %v1187_v8 = vld [vmem:[#allocation2 + $0x58] sm:$0x1f]  ;;  %v1327_v52 = vshrl.u32 %v1189_v33, 16  ;;  %v1330_v1 = vshll.u32 %v1189_v33, 16  ;;  %v1398_v33 = vshll.u32 %v1193_v48, 16 }
  0xa0   : > { %v1293_v62 = vshrl.u32 %v1187_v8, 16  ;;  %v1296_v37 = vshll.u32 %v1187_v8, 16  ;;  %v1304_v54 = vrot.slane %v1302_v21, 4  ;;  %v1378_v21 = vshrl.u32 %v1192_v43, 16 }
  0xa1   : > { %v1329_v40 = vrot.slane %v1327_v52, 4  ;;  %v1332_v15 = vrot.slane %v1330_v1, 5  ;;  %v1389_v1 = vrot.slane %v1387_v53, 4  ;;  %v1449_v43 = vshll.u32 %v1196_v20, 16 }
  0xa2   : > { %v1298_v49 = vrot.slane %v1296_v37, 5  ;;  %v1308_v16 = vor.u32 %v1307_v55, %v1304_v54  ;;  %v1383_v54 = vrot.slane %v1381_v39, 5  ;;  %v1194_v55 = vld [vmem:[#allocation2 + $0xc8] sm:$0x1f]  ;;  %v1458_v39 = vshll.u32 %v11828_v38, 16 }
  0xa3   : > { %v1333_v9 = vor.u32 %v1332_v15, %v1329_v40  ;;  %v1412_v11 = vshrl.u32 %v1194_v55, 16  ;;  %v1415_v52 = vshll.u32 %v1194_v55, 16  ;;  %v1421_v15 = vshrl.u32 %v11811_v12, 16 }
  0xa5   : > { %v1334_v44 = vsel %vm14170_vm6, %v1325_v29, %v1333_v9  ;;  %v1417_v18 = vrot.slane %v1415_v52, 5  ;;  %v1423_v9 = vrot.slane %v1421_v15, 4  ;;  %v11986_v52 = vld [vmem:[#allocation2 + $0x38] sm:$0xf] }
  0xa6   : > { %10436 = vmatmul.mubr.msk.bf16.gmra.mrb[28].mxu0 %vm14172_vm0, %v655_v32  ;;  %v1295_v32 = vrot.slane %v1293_v62, 4 }
  0xa7   : > { %10441 = vmatprep.mubr.msk.bf16.mxu0 %vm14172_vm0, %v1215_v58  ;;  %v1190_v58 = vld [vmem:[#allocation2 + $0x88] sm:$0x1f] }
  0xa8   : > { %v1299_v2 = vor.u32 %v1298_v49, %v1295_v32  ;;  %v1344_v10 = vshrl.u32 %v1190_v58, 16  ;;  %v1347_v13 = vshll.u32 %v1190_v58, 16  ;;  %v1380_v49 = vrot.slane %v1378_v21, 4  ;;  %v1718_v21 = vld [vmem:[#allocation2 + $0x10] sm:$0xf8] }
  0xa9   : > { %v1376_v58 = vor.u32 %v1375_v51, %v1372_v47  ;;  %v1751_v51 = vshrl.u32 %v1718_v21, 16 }
  0xaa   : > { %v1300_v41 = vsel %vm14170_vm6, %v1291_v14, %v1299_v2  ;;  %v1346_v28 = vrot.slane %v1344_v10, 4  ;;  %v1349_v8 = vrot.slane %v1347_v13, 5  ;;  %v1384_v59 = vor.u32 %v1383_v54, %v1380_v49 }
  0xab   : > { %v1407_v14 = vshll.u32 %v11799_v63, 16  ;;  %v1392_v2 = vrot.slane %v1390_v56, 5  ;;  %v1414_v13 = vrot.slane %v1412_v11, 4 }
  0xac   : > { %v1350_v37 = vor.u32 %v1349_v8, %v1346_v28 }
  0xad   : > { %v1409_v10 = vrot.slane %v1407_v14, 5  ;;  %v1393_v40 = vor.u32 %v1392_v2, %v1389_v1  ;;  %v1418_v8 = vor.u32 %v1417_v18, %v1414_v13  ;;  %v1793_v13 = vshrl.u32 %v11986_v52, 16 }
  0xae   : > { %10442 = vmatmul.mubr.msk.bf16.vlgmr.msra.gmra.mrb[0].mxu0 %vm14172_vm0, %v1232_v27  ;;  %v1317_v27 = vsel %vm14170_vm6, %v1308_v16, %v1316_v3  ;;  %v1397_v16 = vrot.slane %v1395_v5, 4  ;;  %v1400_v3 = vrot.slane %v1398_v33, 5  ;;  %v1720_v5 = vld [vmem:[#allocation2 + $0x20] sm:$0xf8]  ;;  %v1796_v18 = vshll.u32 %v11986_v52, 16 }
  0xaf   : > { %10474 = vmatpush3.bf16.msra.mxu0 %v2071_v60  ;;  %10445 = vmatprep.mubr.msk.bf16.mxu0 %vm14172_vm0, %v1249_v4  ;;  %v1341_v60 = vrot.slane %v1339_v7, 5  ;;  %v1191_v4 = vld [vmem:[#allocation2 + $0x98] sm:$0x1f]  ;;  %v1385_v7 = vsel %vm14170_vm6, %v1376_v58, %v1384_v59  ;;  %v1410_v28 = vor.u32 %v1409_v10, %v1406_v6  ;;  %v1722_v58 = vld [vmem:[#allocation2 + $0x30] sm:$0xf8] }
  0xb0   : > { %11499 = vmatprep.subr.msk.bf16.mxu0 %vm14174_vm3, %v11922_v26  ;;  %v1361_v34 = vshrl.u32 %v1191_v4, 16  ;;  %v1364_v0 = vshll.u32 %v1191_v4, 16  ;;  %v1401_v63 = vor.u32 %v1400_v3, %v1397_v16  ;;  %v1446_v4 = vshrl.u32 %v1196_v20, 16 }
  0xb1   : > { %v1342_v62 = vor.u32 %v1341_v60, %v1338_v25  ;;  %v1432_v25 = vshll.u32 %v1195_v23, 16  ;;  %v1441_v60 = vshll.u32 %v11815_v17, 16  ;;  %v1419_v36 = vsel %vm14170_vm6, %v1410_v28, %v1418_v8 }
  0xb2   : > { %v1363_v46 = vrot.slane %v1361_v34, 4  ;;  %v1402_v29 = vsel %vm14170_vm6, %v1393_v40, %v1401_v63  ;;  %v1768_v16 = vshrl.u32 %v1720_v5, 16  ;;  %v1771_v3 = vshll.u32 %v1720_v5, 16  ;;  %v12012_v5 = vld [vmem:[#allocation2 + $0x78] sm:$0xf] }
  0xb3   : > { %v1351_v32 = vsel %vm14170_vm6, %v1342_v62, %v1350_v37  ;;  %v1443_v35 = vrot.slane %v1441_v60, 5  ;;  %v1448_v62 = vrot.slane %v1446_v4, 4  ;;  %v1451_v37 = vrot.slane %v1449_v43, 5  ;;  %v11995_v4 = vld [vmem:[#allocation2 + $0x48] sm:$0xf] }
  0xb4   : > { %v1788_v10 = vshll.u32 %v1722_v58, 16  ;;  %v1770_v63 = vrot.slane %v1768_v16, 3  ;;  %v1773_v15 = vrot.slane %v1771_v3, 4  ;;  %v1795_v28 = vrot.slane %v1793_v13, 3 }
  0xb5   : > { %v1452_v48 = vor.u32 %v1451_v37, %v1448_v62  ;;  %v1798_v8 = vrot.slane %v1796_v18, 4  ;;  %v1864_v16 = vshll.u32 %v12012_v5, 16 }
  0xb6   : > { %10446 = vmatmul.mubr.msk.bf16.gmra.mrb[4].mxu0 %vm14172_vm0, %v1266_v31  ;;  %v1366_v31 = vrot.slane %v1364_v0, 5  ;;  %v1434_v0 = vrot.slane %v1432_v25, 5  ;;  %v1724_v25 = vld [vmem:[#allocation2 + $0x40] sm:$0xf8]  ;;  %v1790_v60 = vrot.slane %v1788_v10, 4 }
  0xb7   : > { %10449 = vmatprep.mubr.msk.bf16.mxu0 %vm14172_vm0, %v1283_v57  ;;  %v1359_v57 = vor.u32 %v1358_v45, %v1355_v30  ;;  %v1466_v30 = vshll.u32 %v1197_v42, 16  ;;  %v11976_v45 = vld [vmem:[#allocation2 + $0x18] sm:$0xf]  ;;  %v1799_v62 = vor.u32 %v1798_v8, %v1795_v28 }
  0xb8   : > { %v1367_v50 = vor.u32 %v1366_v31, %v1363_v46  ;;  %v1427_v46 = vor.u32 %v1426_v22, %v1423_v9  ;;  %v1759_v49 = vshrl.u32 %v11976_v45, 16  ;;  %v1762_v54 = vshll.u32 %v11976_v45, 16  ;;  %v1726_v22 = vld [vmem:[#allocation2 + $0x50] sm:$0xf8]  ;;  %v12031_v28 = vld [vmem:[#allocation2 + $0x98] sm:$0xf] }
  0xb9   : > { %v1468_v56 = vrot.slane %v1466_v30, 5  ;;  %v1805_v9 = vshll.u32 %v1724_v25, 16  ;;  %v1819_v37 = vshrl.u32 %v1726_v22, 16 }
  0xba   : > { %v1368_v61 = vsel %vm14170_vm6, %v1359_v57, %v1367_v50  ;;  %v1753_v57 = vrot.slane %v1751_v51, 3  ;;  %v11983_v50 = vld [vmem:[#allocation2 + $0x28] sm:$0xf]  ;;  %v1761_v14 = vrot.slane %v1759_v49, 3  ;;  %v1764_v11 = vrot.slane %v1762_v54, 4 }
  0xbb   : > { %v1779_v6 = vshll.u32 %v11983_v50, 16  ;;  %v1807_v30 = vrot.slane %v1805_v9, 4  ;;  %v12010_v49 = vld [vmem:[#allocation2 + $0x68] sm:$0xf]  ;;  %v1730_v54 = vld [vmem:[#allocation2 + $0x70] sm:$0xf8] }
  0xbc   : > { %v1765_v20 = vor.u32 %v1764_v11, %v1761_v14  ;;  %v1847_v14 = vshll.u32 %v12010_v49, 16  ;;  %v1853_v11 = vshrl.u32 %v1730_v54, 16 }
  0xbe   : > { %10450 = vmatmul.mubr.msk.bf16.gmra.mrb[8].mxu0 %vm14172_vm0, %v1300_v41  ;;  %v1429_v41 = vshrl.u32 %v1195_v23, 16  ;;  %v1849_v18 = vrot.slane %v1847_v14, 4 }
  0xbf   : > { %10453 = vmatprep.mubr.msk.bf16.mxu0 %vm14172_vm0, %v1317_v27  ;;  %v1438_v27 = vshrl.u32 %v11815_v17, 16  ;;  %v1455_v17 = vshrl.u32 %v11828_v38, 16  ;;  %v1460_v38 = vrot.slane %v1458_v39, 5 }
  0xc0   : > { %v1431_v34 = vrot.slane %v1429_v41, 4  ;;  %v1781_v41 = vrot.slane %v1779_v6, 4 }
  0xc1   : > { %v1440_v12 = vrot.slane %v1438_v27, 4  ;;  %v1457_v55 = vrot.slane %v1455_v17, 4 }
  0xc2   : > { %v1435_v31 = vor.u32 %v1434_v0, %v1431_v34  ;;  %v1810_v34 = vshrl.u32 %v11995_v4, 16  ;;  %v1813_v0 = vshll.u32 %v11995_v4, 16 }
  0xc3   : > { %v1444_v47 = vor.u32 %v1443_v35, %v1440_v12  ;;  %v1461_v1 = vor.u32 %v1460_v38, %v1457_v55  ;;  %v1774_v12 = vor.u32 %v1773_v15, %v1770_v63  ;;  %v1821_v55 = vrot.slane %v1819_v37, 3 }
  0xc4   : > { %v1436_v33 = vsel %vm14170_vm6, %v1427_v46, %v1435_v31  ;;  %v1812_v46 = vrot.slane %v1810_v34, 3  ;;  %v1815_v31 = vrot.slane %v1813_v0, 4  ;;  %v1866_v15 = vrot.slane %v1864_v16, 4 }
  0xc5   : > { %v1453_v19 = vsel %vm14170_vm6, %v1444_v47, %v1452_v48  ;;  %v1728_v47 = vld [vmem:[#allocation2 + $0x60] sm:$0xf8]  ;;  %v2415_v48 = vsel %vm14174_vm3, %v11922_v26, 0 }
  0xc6   : > { %10454 = vmatmul.mubr.msk.bf16.gmra.mrb[12].mxu0 %vm14172_vm0, %v1334_v44  ;;  %v1463_v44 = vshrl.u32 %v1197_v42, 16  ;;  %v11998_v42 = vld [vmem:[#allocation2 + $0x58] sm:$0xf]  ;;  %v1816_v26 = vor.u32 %v1815_v31, %v1812_v46  ;;  %v12041_v46 = vld [vmem:[#allocation2 + $0xa8] sm:$0xf] }
  0xc7   : > { %10457 = vmatprep.mubr.msk.bf16.mxu0 %vm14172_vm0, %v1351_v32  ;;  %v1754_v32 = vshll.u32 %v1718_v21, 16  ;;  %v1822_v21 = vshll.u32 %v1726_v22, 16  ;;  %v1827_v17 = vshrl.u32 %v11998_v42, 16  ;;  %v1830_v39 = vshll.u32 %v11998_v42, 16  ;;  %v1738_v31 = vld [vmem:[#allocation2 + $0xb0] sm:$0xf8] }
  0xc8   : > { %v1465_v53 = vrot.slane %v1463_v44, 4 }
  0xc9   : > { %v1756_v59 = vrot.slane %v1754_v32, 4  ;;  %v1824_v38 = vrot.slane %v1822_v21, 4 }
  0xca   : > { %v1469_v2 = vor.u32 %v1468_v56, %v1465_v53  ;;  %v1829_v53 = vrot.slane %v1827_v17, 3  ;;  %v1832_v56 = vrot.slane %v1830_v39, 4  ;;  %v1736_v39 = vld [vmem:[#allocation2 + $0xa0] sm:$0xf8] }
  0xcb   : > { %v1757_v23 = vor.u32 %v1756_v59, %v1753_v57  ;;  %v1836_v57 = vshrl.u32 %v1728_v47, 16  ;;  %v1844_v59 = vshrl.u32 %v12010_v49, 16  ;;  %v1825_v3 = vor.u32 %v1824_v38, %v1821_v55 }
  0xcc   : > { %v1470_v40 = vsel %vm14170_vm6, %v1461_v1, %v1469_v2  ;;  %v1856_v1 = vshll.u32 %v1730_v54, 16  ;;  %v1861_v2 = vshrl.u32 %v12012_v5, 16  ;;  %v12043_v54 = vld [vmem:[#allocation2 + $0xb8] sm:$0xf]  ;;  %v1904_v38 = vshrl.u32 %v1736_v39, 16 }
  0xcd   : > { %v1766_v43 = vsel %vm14171_vm5, %v1757_v23, %v1765_v20  ;;  %v1838_v6 = vrot.slane %v1836_v57, 3  ;;  %v1846_v13 = vrot.slane %v1844_v59, 3  ;;  %v1732_v23 = vld [vmem:[#allocation2 + $0x80] sm:$0xf8]  ;;  %v1855_v20 = vrot.slane %v1853_v11, 3 }
  0xce   : > { %10458 = vmatmul.mubr.msk.bf16.gmra.mrb[16].mxu0 %vm14172_vm0, %v1368_v61  ;;  %v1776_v61 = vshrl.u32 %v11983_v50, 16  ;;  %v1863_v63 = vrot.slane %v1861_v2, 3  ;;  %v1915_v57 = vshll.u32 %v12041_v46, 16  ;;  %v1929_v59 = vshrl.u32 %v12043_v54, 16 }
  0xcf   : > { %10461 = vmatprep.mubr.msk.bf16.mxu0 %vm14172_vm0, %v1385_v7  ;;  %v1785_v7 = vshrl.u32 %v1722_v58, 16  ;;  %v12017_v58 = vld [vmem:[%s14167_s1 + $0xc] sm:$0x3]  ;;  %v1850_v9 = vor.u32 %v1849_v18, %v1846_v13  ;;  %v1932_v14 = vshll.u32 %v12043_v54, 16  ;;  %v1906_v2 = vrot.slane %v1904_v38, 3 }
  0xd0   : > { %v1778_v24 = vrot.slane %v1776_v61, 3  ;;  %v1833_v61 = vor.u32 %v1832_v56, %v1829_v53  ;;  %v1867_v34 = vor.u32 %v1866_v15, %v1863_v63  ;;  %v1907_v56 = vshll.u32 %v1736_v39, 16  ;;  %v1742_v63 = vld [vmem:[#allocation2 + $0xd0] sm:$0xf8]  ;;  %v12055_v15 = vld [vmem:[#allocation2 + $0xd8] sm:$0xf] }
  0xd1   : > { %v1787_v27 = vrot.slane %v1785_v7, 3  ;;  %v1931_v13 = vrot.slane %v1929_v59, 3  ;;  %v1934_v18 = vrot.slane %v1932_v14, 4 }
  0xd2   : > { %v1782_v35 = vor.u32 %v1781_v41, %v1778_v24  ;;  %v12028_v24 = vld [vmem:[#allocation2 + $0x88] sm:$0xf]  ;;  %v1834_v41 = vsel %vm14171_vm5, %v1825_v3, %v1833_v61  ;;  %v1909_v3 = vrot.slane %v1907_v56, 4 }
  0xd3   : > { %v1878_v8 = vshrl.u32 %v12028_v24, 16 }
  0xd4   : > { %v1783_v51 = vsel %vm14171_vm5, %v1774_v12, %v1782_v35  ;;  %v1895_v35 = vshrl.u32 %v12031_v28, 16 }
  0xd5   : > { %v1880_v21 = vrot.slane %v1878_v8, 3 }
  0xd6   : > { %10462 = vmatmul.mubr.msk.bf16.gmra.mrb[20].mxu0 %vm14172_vm0, %v1402_v29  ;;  %v1802_v29 = vshrl.u32 %v1724_v25, 16  ;;  %v1870_v25 = vshrl.u32 %v1732_v23, 16 }
  0xd7   : > { %10465 = vmatprep.mubr.msk.bf16.mxu0 %vm14172_vm0, %v1419_v36  ;;  %v1791_v36 = vor.u32 %v1790_v60, %v1787_v27  ;;  %v1873_v27 = vshll.u32 %v1732_v23, 16  ;;  %v1734_v60 = vld [vmem:[#allocation2 + $0x90] sm:$0xf8]  ;;  %v1740_v23 = vld [vmem:[#allocation2 + $0xc0] sm:$0xf8] }
  0xd8   : > { %v1804_v44 = vrot.slane %v1802_v29, 3  ;;  %v1887_v0 = vshrl.u32 %v1734_v60, 16  ;;  %v1890_v12 = vshll.u32 %v1734_v60, 16  ;;  %v1941_v60 = vshll.u32 %v1740_v23, 16 }
  0xd9   : > { %v1800_v32 = vsel %vm14171_vm5, %v1791_v36, %v1799_v62  ;;  %v1898_v36 = vshll.u32 %v12031_v28, 16  ;;  %v1872_v62 = vrot.slane %v1870_v25, 3  ;;  %v1875_v37 = vrot.slane %v1873_v27, 4 }
  0xda   : > { %v1938_v27 = vshrl.u32 %v1740_v23, 16 }
  0xdb   : > { %v1876_v55 = vor.u32 %v1875_v37, %v1872_v62  ;;  %v1744_v62 = vld [vmem:[#allocation2 + $0xe0] sm:$0xf8] }
  0xdc   : > { %v1975_v38 = vshll.u32 %v1744_v62, 16 }
  0xde   : > { %10466 = vmatmul.mubr.msk.bf16.gmra.mrb[24].mxu0 %vm14172_vm0, %v1436_v33  ;;  %v1808_v33 = vor.u32 %v1807_v30, %v1804_v44 }
  0xdf   : > { %10469 = vmatprep.mubr.msk.bf16.mxu0 %vm14172_vm0, %v1453_v19  ;;  %v1839_v19 = vshll.u32 %v1728_v47, 16  ;;  %v1889_v47 = vrot.slane %v1887_v0, 3  ;;  %v1963_v0 = vshrl.u32 %v12055_v15, 16 }
  0xe0   : > { %v1817_v7 = vsel %vm14171_vm5, %v1808_v33, %v1816_v26  ;;  %v1912_v33 = vshrl.u32 %v12041_v46, 16  ;;  %v1921_v26 = vshrl.u32 %v1738_v31, 16 }
  0xe1   : > { %v1841_v10 = vrot.slane %v1839_v19, 4  ;;  %v1924_v19 = vshll.u32 %v1738_v31, 16 }
  0xe2   : > { %v1914_v61 = vrot.slane %v1912_v33, 3 }
  0xe3   : > { %v1842_v29 = vor.u32 %v1841_v10, %v1838_v6  ;;  %v1917_v6 = vrot.slane %v1915_v57, 4  ;;  %v1926_v10 = vrot.slane %v1924_v19, 4 }
  0xe5   : > { %v1851_v44 = vsel %vm14171_vm5, %v1842_v29, %v1850_v9  ;;  %v1918_v25 = vor.u32 %v1917_v6, %v1914_v61 }
  0xe6   : > { %10470 = vmatmul.mubr.msk.bf16.gmra.mrb[28].mxu0 %vm14172_vm0, %v1470_v40  ;;  %v1858_v40 = vrot.slane %v1856_v1, 4 }
  0xe7   : > { %10475 = vmatprep.mubr.msk.bf16.mxu0 %vm14172_vm0, %v1766_v43  ;;  %v1881_v43 = vshll.u32 %v12028_v24, 16 }
  0xe8   : > { %v1859_v22 = vor.u32 %v1858_v40, %v1855_v20  ;;  %v12053_v40 = vld [vmem:[#allocation2 + $0xc8] sm:$0xf] }
  0xe9   : > { %v1883_v17 = vrot.slane %v1881_v43, 4  ;;  %v1935_v43 = vor.u32 %v1934_v18, %v1931_v13  ;;  %v1946_v29 = vshrl.u32 %v12053_v40, 16  ;;  %v1949_v9 = vshll.u32 %v12053_v40, 16 }
  0xea   : > { %v1868_v30 = vsel %vm14171_vm5, %v1859_v22, %v1867_v34  ;;  %v1955_v22 = vshrl.u32 %v1742_v63, 16  ;;  %v1958_v34 = vshll.u32 %v1742_v63, 16  ;;  %v12077_v63 = vld [vmem:[#allocation2 + $0x108] sm:$0xf] }
  0xeb   : > { %v1884_v53 = vor.u32 %v1883_v17, %v1880_v21  ;;  %v1943_v21 = vrot.slane %v1941_v60, 4  ;;  %v1948_v17 = vrot.slane %v1946_v29, 3  ;;  %v1951_v39 = vrot.slane %v1949_v9, 4 }
  0xec   : > { %v1960_v31 = vrot.slane %v1958_v34, 4 }
  0xed   : > { %v1885_v16 = vsel %vm14171_vm5, %v1876_v55, %v1884_v53  ;;  %v1972_v55 = vshrl.u32 %v1744_v62, 16  ;;  %v1952_v57 = vor.u32 %v1951_v39, %v1948_v17  ;;  %v12085_v62 = vld [vmem:[#allocation2 + $0x10] sm:$0xf0]  ;;  %v2315_v39 = vrot.slane %v11976_v45, 4 }
  0xee   : > { %10476 = vmatmul.mubr.msk.bf16.vlgmr.msra.gmra.mrb[0].mxu0 %vm14172_vm0, %v1783_v51  ;;  %v1892_v51 = vrot.slane %v1890_v12, 4  ;;  %v1966_v12 = vshll.u32 %v12055_v15, 16  ;;  %v2314_v17 = vrot.slane %v12085_v62, 4  ;;  %v2321_v45 = vrot.slane %v11986_v52, 4 }
  0xef   : > { %10508 = vmatpush3.bf16.msra.mxu0 %v2415_v48  ;;  %10479 = vmatprep.mubr.msk.bf16.mxu0 %vm14172_vm0, %v1800_v32  ;;  %v1897_v48 = vrot.slane %v1895_v35, 3  ;;  %v1900_v32 = vrot.slane %v1898_v36, 4  ;;  %v1940_v36 = vrot.slane %v1938_v27, 3  ;;  %v2324_v52 = vrot.slane %v11995_v4, 4 }
  0xf0   : > { %11500 = vmatprep.subr.msk.bf16.mxu0 %vm14174_vm3, %v12017_v58  ;;  %v1893_v11 = vor.u32 %v1892_v51, %v1889_v47  ;;  %v1965_v47 = vrot.slane %v1963_v0, 3  ;;  %v1968_v51 = vrot.slane %v1966_v12, 4 }
  0xf1   : > { %v1901_v1 = vor.u32 %v1900_v32, %v1897_v48  ;;  %v1746_v48 = vld [vmem:[#allocation2 + $0xf0] sm:$0xf8]  ;;  %v12067_v32 = vld [vmem:[#allocation2 + $0xf8] sm:$0xf]  ;;  %v1944_v33 = vor.u32 %v1943_v21, %v1940_v36 }
  0xf2   : > { %v1992_v19 = vshll.u32 %v1746_v48, 16  ;;  %v1969_v14 = vor.u32 %v1968_v51, %v1965_v47  ;;  %v12093_v47 = vld [vmem:[#allocation2 + $0x20] sm:$0xf0]  ;;  %v12095_v51 = vld [vmem:[#allocation2 + $0x30] sm:$0xf0] }
  0xf3   : > { %v1902_v20 = vsel %vm14171_vm5, %v1893_v11, %v1901_v1  ;;  %v1997_v11 = vshrl.u32 %v12067_v32, 16  ;;  %v2000_v1 = vshll.u32 %v12067_v32, 16  ;;  %v1953_v6 = vsel %vm14171_vm5, %v1944_v33, %v1952_v57  ;;  %v12107_v57 = vld [vmem:[#allocation2 + $0x40] sm:$0xf0] }
  0xf5   : > { %v1999_v18 = vrot.slane %v1997_v11, 3  ;;  %v2002_v23 = vrot.slane %v2000_v1, 4  ;;  %v12126_v1 = vld [vmem:[#allocation2 + $0x60] sm:$0xf0] }
  0xf6   : > { %10480 = vmatmul.mubr.msk.bf16.gmra.mrb[4].mxu0 %vm14172_vm0, %v1817_v7  ;;  %v1923_v7 = vrot.slane %v1921_v26, 3  ;;  %v1989_v26 = vshrl.u32 %v1746_v48, 16  ;;  %v2317_v48 = vrot.slane %v12093_v47, 4  ;;  %v2329_v4 = vrot.slane %v12126_v1, 4 }
  0xf7   : > { %10483 = vmatprep.mubr.msk.bf16.mxu0 %vm14172_vm0, %v1834_v41  ;;  %v1910_v41 = vor.u32 %v1909_v3, %v1906_v2  ;;  %v1974_v2 = vrot.slane %v1972_v55, 3  ;;  %v2003_v9 = vor.u32 %v2002_v23, %v1999_v18  ;;  %v2318_v55 = vrot.slane %v11983_v50, 4 }
  0xf8   : > { %v1927_v8 = vor.u32 %v1926_v10, %v1923_v7  ;;  %v1991_v7 = vrot.slane %v1989_v26, 3  ;;  %v1994_v10 = vrot.slane %v1992_v19, 4  ;;  %v12109_v26 = vld [vmem:[#allocation2 + $0x50] sm:$0xf0]  ;;  %v12114_v19 = vld [vmem:[%s14167_s1 + $0x10] sm:$0xf] }
  0xf9   : > { %v1919_v35 = vsel %vm14171_vm5, %v1910_v41, %v1918_v25  ;;  %v2323_v50 = vrot.slane %v12107_v57, 4 }
  0xfa   : > { %v1936_v37 = vsel %vm14171_vm5, %v1927_v8, %v1935_v43  ;;  %v2014_v8 = vshrl.u32 %v12077_v63, 16  ;;  %v2017_v43 = vshll.u32 %v12077_v63, 16  ;;  %v1995_v29 = vor.u32 %v1994_v10, %v1991_v7  ;;  %v12138_v7 = vld [vmem:[#allocation2 + $0x80] sm:$0xf0]  ;;  %v12140_v10 = vld [vmem:[#allocation2 + $0x90] sm:$0xf0] }
  0xfb   : > { %v2338_v18 = vrot.slane %v12140_v10, 4 }
  0xfc   : > { %v2016_v12 = vrot.slane %v2014_v8, 3  ;;  %v2004_v36 = vsel %vm14171_vm5, %v1995_v29, %v2003_v9  ;;  %v12162_v29 = vld [vmem:[#allocation2 + $0xc0] sm:$0xf0]  ;;  %v12164_v9 = vld [vmem:[#allocation2 + $0xd0] sm:$0xf0] }
  0xfe   : > { %10484 = vmatmul.mubr.msk.bf16.gmra.mrb[8].mxu0 %vm14172_vm0, %v1851_v44  ;;  %v12065_v44 = vld [vmem:[#allocation2 + $0xe8] sm:$0xf] }
  0xff   : > { %10487 = vmatprep.mubr.msk.bf16.mxu0 %vm14172_vm0, %v1868_v30  ;;  %v1957_v30 = vrot.slane %v1955_v22, 3  ;;  %v1980_v53 = vshrl.u32 %v12065_v44, 16  ;;  %v1983_v56 = vshll.u32 %v12065_v44, 16 }
 0x101   : > { %v1961_v59 = vor.u32 %v1960_v31, %v1957_v30  ;;  %v1982_v3 = vrot.slane %v1980_v53, 3  ;;  %v1985_v61 = vrot.slane %v1983_v56, 4  ;;  %v2316_v31 = vsel %vm14173_vm4, %v2314_v17, %v2315_v39 }
 0x102   : > { %v2319_v53 = vsel %vm14173_vm4, %v2317_v48, %v2318_v55  ;;  %v2947_v56 = vsel %vm14174_vm3, %v12017_v58, 0  ;;  %v2326_v58 = vrot.slane %v12109_v26, 4  ;;  %v2627_v39 = vshrl.u32 %v12085_v62, 16  ;;  %v12186_v55 = vld [vmem:[#allocation2 + $0x100] sm:$0xf0] }
 0x103   : > { %v1970_v13 = vsel %vm14171_vm5, %v1961_v59, %v1969_v14  ;;  %v1986_v25 = vor.u32 %v1985_v61, %v1982_v3  ;;  %v2327_v59 = vrot.slane %v11998_v42, 4  ;;  %v2325_v14 = vsel %vm14173_vm4, %v2323_v50, %v2324_v52  ;;  %v2612_v52 = vld [vmem:[#allocation2 + $0x38] sm:$0x1f] }
 0x104   : > { %v2333_v3 = vrot.slane %v12012_v5, 4  ;;  %v2339_v5 = vrot.slane %v12031_v28, 4  ;;  %v2345_v28 = vrot.slane %v12043_v54, 4  ;;  %v2351_v54 = vrot.slane %v12055_v15, 4 }
 0x105   : > { %v2328_v11 = vsel %vm14173_vm4, %v2326_v58, %v2327_v59  ;;  %v2357_v15 = vrot.slane %v12067_v32, 4  ;;  %v2359_v32 = vrot.slane %v12186_v55, 4  ;;  %v2360_v58 = vrot.slane %v12077_v63, 4 }
 0x106   : > { %10488 = vmatmul.mubr.msk.bf16.gmra.mrb[12].mxu0 %vm14172_vm0, %v1885_v16  ;;  %v1977_v16 = vrot.slane %v1975_v38, 4  ;;  %v2320_v38 = vrot.slane %v12095_v51, 4  ;;  %v2647_v59 = vshll.u32 %v12093_v47, 16 }
 0x107   : > { %10491 = vmatprep.mubr.msk.bf16.mxu0 %vm14172_vm0, %v1902_v20  ;;  %v1748_v20 = vld [vmem:[#allocation2 + $0x100] sm:$0xf8]  ;;  %v2361_v63 = vsel %vm14173_vm4, %v2359_v32, %v2360_v58  ;;  %v2712_v58 = vshrl.u32 %v12126_v1, 16 }
 0x108   : > { %v1978_v41 = vor.u32 %v1977_v16, %v1974_v2  ;;  %v2006_v27 = vshrl.u32 %v1748_v20, 16  ;;  %v2009_v60 = vshll.u32 %v1748_v20, 16  ;;  %v2322_v33 = vsel %vm14173_vm4, %v2320_v38, %v2321_v45  ;;  %v12128_v2 = vld [vmem:[#allocation2 + $0x70] sm:$0xf0] }
 0x109   : > { %v2330_v16 = vrot.slane %v12010_v49, 4  ;;  %v2332_v42 = vrot.slane %v12128_v2, 4  ;;  %v2336_v49 = vrot.slane %v12028_v24, 4  ;;  %v2340_v20 = vsel %vm14173_vm4, %v2338_v18, %v2339_v5 }
 0x10a   : > { %v1987_v22 = vsel %vm14171_vm5, %v1978_v41, %v1986_v25  ;;  %v2008_v34 = vrot.slane %v2006_v27, 3  ;;  %v2011_v0 = vrot.slane %v2009_v60, 4  ;;  %v12150_v41 = vld [vmem:[#allocation2 + $0xa0] sm:$0xf0]  ;;  %v12152_v25 = vld [vmem:[#allocation2 + $0xb0] sm:$0xf0] }
 0x10b   : > { %v2331_v61 = vsel %vm14173_vm4, %v2329_v4, %v2330_v16  ;;  %v2341_v27 = vrot.slane %v12150_v41, 4  ;;  %v2342_v24 = vrot.slane %v12041_v46, 4  ;;  %v2344_v60 = vrot.slane %v12152_v25, 4 }
 0x10c   : > { %v2348_v46 = vrot.slane %v12053_v40, 4  ;;  %v2354_v40 = vrot.slane %v12065_v44, 4  ;;  %v2661_v4 = vshrl.u32 %v12095_v51, 16  ;;  %v2664_v16 = vshll.u32 %v12095_v51, 16 }
 0x10d   : > { %v2343_v8 = vsel %vm14173_vm4, %v2341_v27, %v2342_v24  ;;  %v2681_v51 = vshll.u32 %v12107_v57, 16 }
 0x10e   : > { %10492 = vmatmul.mubr.msk.bf16.gmra.mrb[16].mxu0 %vm14172_vm0, %v1919_v35  ;;  %v2019_v35 = vrot.slane %v2017_v43, 4  ;;  %v2346_v43 = vsel %vm14173_vm4, %v2344_v60, %v2345_v28  ;;  %v2678_v28 = vshrl.u32 %v12107_v57, 16 }
 0x10f   : > { %10495 = vmatprep.mubr.msk.bf16.mxu0 %vm14172_vm0, %v1936_v37  ;;  %v2012_v37 = vor.u32 %v2011_v0, %v2008_v34  ;;  %v2350_v34 = vrot.slane %v12164_v9, 4 }
 0x110   : > { %v2020_v21 = vor.u32 %v2019_v35, %v2016_v12  ;;  %v12174_v35 = vld [vmem:[#allocation2 + $0xe0] sm:$0xf0] }
 0x111   : > { %v2352_v12 = vsel %vm14173_vm4, %v2350_v34, %v2351_v54 }
 0x112   : > { %v2021_v30 = vsel %vm14171_vm5, %v2012_v37, %v2020_v21  ;;  %v2610_v37 = vld [vmem:[#allocation2 + $0x18] sm:$0x1f]  ;;  %v2353_v21 = vrot.slane %v12174_v35, 4 }
 0x113   : > { %v2638_v48 = vshll.u32 %v2610_v37, 16 }
 0x114   : > { %v2355_v38 = vsel %vm14173_vm4, %v2353_v21, %v2354_v40  ;;  %v2698_v21 = vshll.u32 %v12109_v26, 16 }
 0x115   : > { %v2640_v50 = vrot.slane %v2638_v48, 5 }
 0x116   : > { %10496 = vmatmul.mubr.msk.bf16.gmra.mrb[20].mxu0 %vm14172_vm0, %v1953_v6  ;;  %v2334_v6 = vsel %vm14173_vm4, %v2332_v42, %v2333_v3  ;;  %v2669_v42 = vshrl.u32 %v2612_v52, 16  ;;  %v2672_v3 = vshll.u32 %v2612_v52, 16 }
 0x117   : > { %10499 = vmatprep.mubr.msk.bf16.mxu0 %vm14172_vm0, %v1970_v13  ;;  %v2335_v13 = vrot.slane %v12138_v7, 4 }
 0x118   : > { %v2671_v27 = vrot.slane %v2669_v42, 4  ;;  %v2674_v24 = vrot.slane %v2672_v3, 5 }
 0x119   : > { %v2337_v23 = vsel %vm14173_vm4, %v2335_v13, %v2336_v49  ;;  %v2649_v49 = vrot.slane %v2647_v59, 5 }
 0x11e   : > { %10500 = vmatmul.mubr.msk.bf16.gmra.mrb[24].mxu0 %vm14172_vm0, %v1987_v22  ;;  %v2347_v22 = vrot.slane %v12162_v29, 4 }
 0x11f   : > { %10503 = vmatprep.mubr.msk.bf16.mxu0 %vm14172_vm0, %v2004_v36  ;;  %v12176_v36 = vld [vmem:[#allocation2 + $0xf0] sm:$0xf0] }
 0x120   : > { %v2349_v0 = vsel %vm14173_vm4, %v2347_v22, %v2348_v46  ;;  %v2356_v17 = vrot.slane %v12176_v36, 4  ;;  %v2614_v22 = vld [vmem:[#allocation2 + $0x58] sm:$0x1f]  ;;  %v9877_v46 = vcombine.low %v12114_v19, %v12114_v19 }
 0x121   : > { %v2703_v40 = vshrl.u32 %v2614_v22, 16  ;;  %v2706_v57 = vshll.u32 %v2614_v22, 16 }
 0x122   : > { %v2358_v45 = vsel %vm14173_vm4, %v2356_v17, %v2357_v15  ;;  %v2680_v17 = vrot.slane %v2678_v28, 4  ;;  %v2683_v15 = vrot.slane %v2681_v51, 5  ;;  %v2618_v28 = vld [vmem:[#allocation2 + $0x98] sm:$0x1f] }
 0x124   : > { %v2684_v52 = vor.u32 %v2683_v15, %v2680_v17  ;;  %v2619_v17 = vld [vmem:[#allocation2 + $0xa8] sm:$0x1f] }
 0x126   : > { %10504 = vmatmul.mubr.msk.bf16.gmra.mrb[28].mxu0 %vm14172_vm0, %v2021_v30  ;;  %v2630_v30 = vshll.u32 %v12085_v62, 16  ;;  %v2644_v62 = vshrl.u32 %v12093_v47, 16  ;;  %v2663_v47 = vrot.slane %v2661_v4, 4 }
 0x127   : > { %10509 = vmatprep.mubr.msk.bf16.mxu0 %vm14172_vm0, %v2316_v31  ;;  %v2635_v31 = vshrl.u32 %v2610_v37, 16  ;;  %v2695_v37 = vshrl.u32 %v12109_v26, 16  ;;  %v2708_v26 = vrot.slane %v2706_v57, 5 }
 0x128   : > { %v2646_v13 = vrot.slane %v2644_v62, 4  ;;  %v2715_v62 = vshll.u32 %v12126_v1, 16 }
 0x129   : > { %v2637_v44 = vrot.slane %v2635_v31, 4  ;;  %v12208_v31 = vrot.slane %v9877_v46, 2  ;;  %v2763_v46 = vshrl.u32 %v12140_v10, 16 }
 0x12a   : > { %v2650_v34 = vor.u32 %v2649_v49, %v2646_v13  ;;  %v2717_v1 = vrot.slane %v2715_v62, 5  ;;  %v2617_v49 = vld [vmem:[#allocation2 + $0x88] sm:$0x1f] }
 0x12b   : > { %v2765_v15 = vrot.slane %v2763_v46, 4 }
 0x12e   : > { %10510 = vmatmul.mubr.msk.bf16.vlgmr.msra.gmra.mrb[0].mxu0 %vm14172_vm0, %v2319_v53  ;;  %v2611_v53 = vld [vmem:[#allocation2 + $0x28] sm:$0x1f] }
 0x12f   : > { %10542 = vmatpush3.bf16.msra.mxu0 %v2947_v56  ;;  %10513 = vmatprep.mubr.msk.bf16.mxu0 %vm14172_vm0, %v2322_v33  ;;  %v2629_v56 = vrot.slane %v2627_v39, 4  ;;  %v2632_v33 = vrot.slane %v2630_v30, 5 }
 0x130   : > { %11501 = vmatprep.subr.msk.bf16.mxu0 %vm14174_vm3, %v12114_v19 }
 0x136   : > { %10514 = vmatmul.mubr.msk.bf16.gmra.mrb[4].mxu0 %vm14172_vm0, %v2325_v14  ;;  %v2652_v14 = vshrl.u32 %v2611_v53, 16 }
 0x137   : > { %10517 = vmatprep.mubr.msk.bf16.mxu0 %vm14172_vm0, %v2328_v11  ;;  %v2655_v11 = vshll.u32 %v2611_v53, 16  ;;  %v2615_v53 = vld [vmem:[#allocation2 + $0x68] sm:$0x1f] }
 0x138   : > { %v2654_v18 = vrot.slane %v2652_v14, 4  ;;  %v2720_v59 = vshrl.u32 %v2615_v53, 16  ;;  %v2723_v14 = vshll.u32 %v2615_v53, 16 }
 0x139   : > { %v2657_v5 = vrot.slane %v2655_v11, 5  ;;  %v2732_v11 = vshll.u32 %v12128_v2, 16 }
 0x13a   : > { %v2725_v13 = vrot.slane %v2723_v14, 5 }
 0x13b   : > { %v2658_v54 = vor.u32 %v2657_v5, %v2654_v18  ;;  %v2734_v5 = vrot.slane %v2732_v11, 5 }
 0x13d   : > { %v2659_v48 = vsel %vm14170_vm6, %v2650_v34, %v2658_v54  ;;  %v2766_v34 = vshll.u32 %v12140_v10, 16  ;;  %v2771_v54 = vshrl.u32 %v2618_v28, 16  ;;  %v2780_v10 = vshrl.u32 %v12150_v41, 16 }
 0x13e   : > { %10518 = vmatmul.mubr.msk.bf16.gmra.mrb[8].mxu0 %vm14172_vm0, %v2331_v61  ;;  %v2633_v61 = vor.u32 %v2632_v33, %v2629_v56  ;;  %v2697_v56 = vrot.slane %v2695_v37, 4  ;;  %v2700_v33 = vrot.slane %v2698_v21, 5 }
 0x13f   : > { %10521 = vmatprep.mubr.msk.bf16.mxu0 %vm14172_vm0, %v2334_v6  ;;  %v2641_v6 = vor.u32 %v2640_v50, %v2637_v44  ;;  %v2705_v44 = vrot.slane %v2703_v40, 4  ;;  %v2616_v50 = vld [vmem:[#allocation2 + $0x78] sm:$0x1f]  ;;  %v2782_v14 = vrot.slane %v2780_v10, 4 }
 0x140   : > { %v2737_v4 = vshrl.u32 %v2616_v50, 16  ;;  %v2701_v42 = vor.u32 %v2700_v33, %v2697_v56  ;;  %v2783_v56 = vshll.u32 %v12150_v41, 16  ;;  %v2788_v33 = vshrl.u32 %v2619_v17, 16 }
 0x141   : > { %v2642_v60 = vsel %vm14170_vm6, %v2633_v61, %v2641_v6  ;;  %v2709_v3 = vor.u32 %v2708_v26, %v2705_v44  ;;  %v2714_v6 = vrot.slane %v2712_v58, 4  ;;  %v2791_v44 = vshll.u32 %v2619_v17, 16 }
 0x142   : > { %v2797_v26 = vshrl.u32 %v12152_v25, 16  ;;  %v2790_v11 = vrot.slane %v2788_v33, 4  ;;  %v2865_v17 = vshrl.u32 %v12176_v36, 16 }
 0x143   : > { %v2718_v51 = vor.u32 %v2717_v1, %v2714_v6  ;;  %v2621_v6 = vld [vmem:[#allocation2 + $0xc8] sm:$0x1f]  ;;  %v2622_v1 = vld [vmem:[#allocation2 + $0xd8] sm:$0x1f] }
 0x144   : > { %v2867_v33 = vrot.slane %v2865_v17, 4 }
 0x146   : > { %10522 = vmatmul.mubr.msk.bf16.gmra.mrb[12].mxu0 %vm14172_vm0, %v2337_v23  ;;  %v2613_v23 = vld [vmem:[#allocation2 + $0x48] sm:$0x1f] }
 0x147   : > { %10525 = vmatprep.mubr.msk.bf16.mxu0 %vm14172_vm0, %v2340_v20  ;;  %v2666_v20 = vrot.slane %v2664_v16, 5  ;;  %v2740_v16 = vshll.u32 %v2616_v50, 16  ;;  %v2800_v50 = vshll.u32 %v12152_v25, 16 }
 0x149   : > { %v2802_v41 = vrot.slane %v2800_v50, 5 }
 0x14e   : > { %10526 = vmatmul.mubr.msk.bf16.gmra.mrb[16].mxu0 %vm14172_vm0, %v2343_v8  ;;  %v2686_v8 = vshrl.u32 %v2613_v23, 16 }
 0x14f   : > { %10529 = vmatprep.mubr.msk.bf16.mxu0 %vm14172_vm0, %v2346_v43  ;;  %v2689_v43 = vshll.u32 %v2613_v23, 16  ;;  %v2739_v23 = vrot.slane %v2737_v4, 4  ;;  %v2793_v4 = vrot.slane %v2791_v44, 5 }
 0x150   : > { %v2688_v39 = vrot.slane %v2686_v8, 4 }
 0x151   : > { %v2691_v30 = vrot.slane %v2689_v43, 5 }
 0x153   : > { %v2692_v32 = vor.u32 %v2691_v30, %v2688_v39  ;;  %v2768_v39 = vrot.slane %v2766_v34, 5  ;;  %v2773_v30 = vrot.slane %v2771_v54, 4 }
 0x155   : > { %v2693_v61 = vsel %vm14170_vm6, %v2684_v52, %v2692_v32  ;;  %v2769_v58 = vor.u32 %v2768_v39, %v2765_v15  ;;  %v2868_v15 = vshll.u32 %v12176_v36, 16 }
 0x156   : > { %10530 = vmatmul.mubr.msk.bf16.gmra.mrb[20].mxu0 %vm14172_vm0, %v2349_v0  ;;  %v2667_v0 = vor.u32 %v2666_v20, %v2663_v47  ;;  %v2742_v47 = vrot.slane %v2740_v16, 5  ;;  %v2746_v20 = vshrl.u32 %v12138_v7, 16  ;;  %v2799_v16 = vrot.slane %v2797_v26, 4  ;;  %v2625_v26 = vld [vmem:[#allocation2 + $0x108] sm:$0x1f] }
 0x157   : > { %10533 = vmatprep.mubr.msk.bf16.mxu0 %vm14172_vm0, %v2352_v12  ;;  %v2675_v12 = vor.u32 %v2674_v24, %v2671_v27  ;;  %v2749_v27 = vshll.u32 %v12138_v7, 16  ;;  %v2754_v24 = vshrl.u32 %v2617_v49, 16  ;;  %v2870_v44 = vrot.slane %v2868_v15, 5 }
 0x158   : > { %v2743_v22 = vor.u32 %v2742_v47, %v2739_v23  ;;  %v2822_v23 = vshrl.u32 %v2621_v6, 16  ;;  %v2825_v47 = vshll.u32 %v2621_v6, 16 }
 0x159   : > { %v2751_v37 = vrot.slane %v2749_v27, 5  ;;  %v2756_v7 = vrot.slane %v2754_v24, 4  ;;  %v2839_v27 = vshrl.u32 %v2622_v1, 16  ;;  %v2842_v24 = vshll.u32 %v2622_v1, 16 }
 0x15b   : > { %v2841_v54 = vrot.slane %v2839_v27, 4  ;;  %v3153_v27 = vld [vmem:[#allocation2 + $0x40] sm:$0xf8] }
 0x15e   : > { %10534 = vmatmul.mubr.msk.bf16.gmra.mrb[24].mxu0 %vm14172_vm0, %v2355_v38  ;;  %v3502_v38 = vsel %vm14174_vm3, %v12114_v19, 0  ;;  %v2729_v19 = vshrl.u32 %v12128_v2, 16  ;;  %v2710_v2 = vsel %vm14170_vm6, %v2701_v42, %v2709_v3 }
 0x15f   : > { %10537 = vmatprep.mubr.msk.bf16.mxu0 %vm14172_vm0, %v2358_v45  ;;  %v2676_v45 = vsel %vm14170_vm6, %v2667_v0, %v2675_v12  ;;  %v2774_v0 = vshll.u32 %v2618_v28, 16  ;;  %v2748_v12 = vrot.slane %v2746_v20, 4  ;;  %v2834_v20 = vshll.u32 %v12164_v9, 16 }
 0x160   : > { %v2731_v18 = vrot.slane %v2729_v19, 4  ;;  %v2785_v19 = vrot.slane %v2783_v56, 5 }
 0x161   : > { %v2836_v34 = vrot.slane %v2834_v20, 5  ;;  %v12266_v20 = vld [vmem:[#allocation2 + $0x38] sm:$0xf] }
 0x162   : > { %v2735_v43 = vor.u32 %v2734_v5, %v2731_v18  ;;  %v2786_v25 = vor.u32 %v2785_v19, %v2782_v14  ;;  %v2803_v18 = vor.u32 %v2802_v41, %v2799_v16  ;;  %v2882_v14 = vshrl.u32 %v12186_v55, 16 }
 0x163   : > { %v2885_v19 = vshll.u32 %v12186_v55, 16 }
 0x164   : > { %v2744_v57 = vsel %vm14170_vm6, %v2735_v43, %v2743_v22  ;;  %v2827_v22 = vrot.slane %v2825_v47, 5  ;;  %v3151_v47 = vld [vmem:[#allocation2 + $0x30] sm:$0xf8] }
 0x166   : > { %10538 = vmatmul.mubr.msk.bf16.gmra.mrb[28].mxu0 %vm14172_vm0, %v2361_v63  ;;  %v2722_v63 = vrot.slane %v2720_v59, 4 }
 0x167   : > { %10543 = vmatprep.mubr.msk.bf16.mxu0 %vm14172_vm0, %v2642_v60  ;;  %v2757_v60 = vshll.u32 %v2617_v49, 16  ;;  %v2817_v49 = vshll.u32 %v12162_v29, 16 }
 0x168   : > { %v2726_v8 = vor.u32 %v2725_v13, %v2722_v63  ;;  %v2794_v63 = vor.u32 %v2793_v4, %v2790_v11  ;;  %v2814_v13 = vshrl.u32 %v12162_v29, 16  ;;  %v2824_v29 = vrot.slane %v2822_v23, 4 }
 0x169   : > { %v2759_v21 = vrot.slane %v2757_v60, 5  ;;  %v2819_v43 = vrot.slane %v2817_v49, 5  ;;  %v2890_v11 = vshrl.u32 %v2625_v26, 16  ;;  %v2893_v4 = vshll.u32 %v2625_v26, 16 }
 0x16a   : > { %v2727_v40 = vsel %vm14170_vm6, %v2718_v51, %v2726_v8  ;;  %v2795_v60 = vsel %vm14170_vm6, %v2786_v25, %v2794_v63  ;;  %v2816_v28 = vrot.slane %v2814_v13, 4  ;;  %v2623_v51 = vld [vmem:[#allocation2 + $0xe8] sm:$0x1f]  ;;  %v2884_v25 = vrot.slane %v2882_v14, 4 }
 0x16b   : > { %v2760_v53 = vor.u32 %v2759_v21, %v2756_v7  ;;  %v2859_v7 = vshll.u32 %v2623_v51, 16  ;;  %v2624_v21 = vld [vmem:[#allocation2 + $0xf8] sm:$0x1f]  ;;  %v2887_v63 = vrot.slane %v2885_v19, 5  ;;  %v2892_v13 = vrot.slane %v2890_v11, 4 }
 0x16c   : > { %v2895_v49 = vrot.slane %v2893_v4, 5 }
 0x16d   : > { %v2861_v10 = vrot.slane %v2859_v7, 5  ;;  %v3155_v7 = vld [vmem:[#allocation2 + $0x50] sm:$0xf8] }
 0x16e   : > { %10544 = vmatmul.mubr.msk.bf16.vlgmr.msra.gmra.mrb[0].mxu0 %vm14172_vm0, %v2659_v48  ;;  %v2776_v48 = vrot.slane %v2774_v0, 5  ;;  %v2844_v0 = vrot.slane %v2842_v24, 5  ;;  %v12268_v24 = vld [vmem:[#allocation2 + $0x48] sm:$0xf] }
 0x16f   : > { %10576 = vmatpush3.bf16.msra.mxu0 %v3502_v38  ;;  %10547 = vmatprep.mubr.msk.bf16.mxu0 %vm14172_vm0, %v2676_v45  ;;  %v2620_v38 = vld [vmem:[#allocation2 + $0xb8] sm:$0x1f]  ;;  %v2752_v45 = vor.u32 %v2751_v37, %v2748_v12  ;;  %v2848_v12 = vshrl.u32 %v12174_v35, 16  ;;  %v2851_v37 = vshll.u32 %v12174_v35, 16 }
 0x170   : > { %11502 = vmatprep.subr.msk.bf16.mxu0 %vm14174_vm3, %v12208_v31  ;;  %v2805_v52 = vshrl.u32 %v2620_v38, 16  ;;  %v2808_v32 = vshll.u32 %v2620_v38, 16  ;;  %v2777_v62 = vor.u32 %v2776_v48, %v2773_v30  ;;  %v2845_v30 = vor.u32 %v2844_v0, %v2841_v54 }
 0x171   : > { %v2761_v59 = vsel %vm14170_vm6, %v2752_v45, %v2760_v53  ;;  %v2873_v48 = vshrl.u32 %v2624_v21, 16  ;;  %v2876_v38 = vshll.u32 %v2624_v21, 16  ;;  %v2850_v45 = vrot.slane %v2848_v12, 4  ;;  %v12277_v21 = vld [vmem:[#allocation2 + $0x58] sm:$0xf] }
 0x172   : > { %v2807_v42 = vrot.slane %v2805_v52, 4  ;;  %v2810_v3 = vrot.slane %v2808_v32, 5  ;;  %v2853_v53 = vrot.slane %v2851_v37, 5  ;;  %v3219_v54 = vshll.u32 %v3153_v27, 16 }
 0x173   : > { %v2875_v52 = vrot.slane %v2873_v48, 4  ;;  %v2878_v32 = vrot.slane %v2876_v38, 5  ;;  %v3224_v0 = vshrl.u32 %v12268_v24, 16  ;;  %v3227_v12 = vshll.u32 %v12268_v24, 16 }
 0x174   : > { %v2811_v5 = vor.u32 %v2810_v3, %v2807_v42  ;;  %v2854_v36 = vor.u32 %v2853_v53, %v2850_v45  ;;  %v3157_v45 = vld [vmem:[#allocation2 + $0x60] sm:$0xf8]  ;;  %v3233_v53 = vshrl.u32 %v3155_v7, 16 }
 0x175   : > { %v2879_v6 = vor.u32 %v2878_v32, %v2875_v52  ;;  %v3226_v48 = vrot.slane %v3224_v0, 3  ;;  %v3229_v38 = vrot.slane %v3227_v12, 4  ;;  %v3253_v52 = vshll.u32 %v3157_v45, 16 }
 0x176   : > { %10548 = vmatmul.mubr.msk.bf16.gmra.mrb[4].mxu0 %vm14172_vm0, %v2693_v61  ;;  %v2778_v61 = vsel %vm14170_vm6, %v2769_v58, %v2777_v62  ;;  %v2812_v8 = vsel %vm14170_vm6, %v2803_v18, %v2811_v5  ;;  %v3149_v58 = vld [vmem:[#allocation2 + $0x20] sm:$0xf8]  ;;  %v12256_v62 = vld [vmem:[#allocation2 + $0x28] sm:$0xf]  ;;  %v3235_v14 = vrot.slane %v3233_v53, 3 }
 0x177   : > { %10551 = vmatprep.mubr.msk.bf16.mxu0 %vm14172_vm0, %v2710_v2  ;;  %v2831_v2 = vshrl.u32 %v12164_v9, 16  ;;  %v2856_v9 = vshrl.u32 %v2623_v51, 16  ;;  %v3182_v16 = vshrl.u32 %v3149_v58, 16  ;;  %v3185_v41 = vshll.u32 %v3149_v58, 16 }
 0x178   : > { %v3190_v42 = vshrl.u32 %v12256_v62, 16  ;;  %v3193_v3 = vshll.u32 %v12256_v62, 16  ;;  %v3199_v51 = vshrl.u32 %v3151_v47, 16  ;;  %v3230_v58 = vor.u32 %v3229_v38, %v3226_v48 }
 0x179   : > { %v2833_v46 = vrot.slane %v2831_v2, 4  ;;  %v2858_v35 = vrot.slane %v2856_v9, 4  ;;  %v3184_v18 = vrot.slane %v3182_v16, 3  ;;  %v3187_v55 = vrot.slane %v3185_v41, 4 }
 0x17a   : > { %v3192_v5 = vrot.slane %v3190_v42, 3  ;;  %v3195_v23 = vrot.slane %v3193_v3, 4  ;;  %v3201_v9 = vrot.slane %v3199_v51, 3  ;;  %v3846_v16 = vsel %vm14174_vm3, %v12208_v31, 0  ;;  %v12299_v31 = vld [vmem:[%s14167_s1 + $0x14] sm:$0x3] }
 0x17b   : > { %v2837_v39 = vor.u32 %v2836_v34, %v2833_v46  ;;  %v3210_v46 = vshll.u32 %v12266_v20, 16  ;;  %v3216_v34 = vshrl.u32 %v3153_v27, 16  ;;  %v3255_v3 = vrot.slane %v3253_v52, 4 }
 0x17d   : > { %v2846_v50 = vsel %vm14170_vm6, %v2837_v39, %v2845_v30  ;;  %v3212_v15 = vrot.slane %v3210_v46, 4  ;;  %v3218_v39 = vrot.slane %v3216_v34, 3  ;;  %v3221_v30 = vrot.slane %v3219_v54, 4 }
 0x17e   : > { %10552 = vmatmul.mubr.msk.bf16.gmra.mrb[8].mxu0 %vm14172_vm0, %v2727_v40  ;;  %v2820_v40 = vor.u32 %v2819_v43, %v2816_v28  ;;  %v2896_v28 = vor.u32 %v2895_v49, %v2892_v13  ;;  %v3188_v43 = vor.u32 %v3187_v55, %v3184_v18  ;;  %v3161_v13 = vld [vmem:[#allocation2 + $0x80] sm:$0xf8]  ;;  %v12294_v49 = vld [vmem:[#allocation2 + $0x88] sm:$0xf] }
 0x17f   : > { %10555 = vmatprep.mubr.msk.bf16.mxu0 %vm14172_vm0, %v2744_v57  ;;  %v2828_v57 = vor.u32 %v2827_v22, %v2824_v29  ;;  %v3196_v29 = vor.u32 %v3195_v23, %v3192_v5  ;;  %v3207_v22 = vshrl.u32 %v12266_v20, 16  ;;  %v3222_v32 = vor.u32 %v3221_v30, %v3218_v39 }
 0x180   : > { %v3284_v27 = vshrl.u32 %v3161_v13, 16  ;;  %v3295_v51 = vshll.u32 %v12294_v49, 16 }
 0x181   : > { %v2829_v56 = vsel %vm14170_vm6, %v2820_v40, %v2828_v57  ;;  %v3197_v40 = vsel %vm14171_vm5, %v3188_v43, %v3196_v29  ;;  %v3209_v17 = vrot.slane %v3207_v22, 3 }
 0x182   : > { %v3286_v0 = vrot.slane %v3284_v27, 3 }
 0x183   : > { %v3213_v26 = vor.u32 %v3212_v15, %v3209_v17  ;;  %v3165_v17 = vld [vmem:[#allocation2 + $0xa0] sm:$0xf8]  ;;  %v12313_v15 = vld [vmem:[#allocation2 + $0xa8] sm:$0xf] }
 0x186   : > { %10556 = vmatmul.mubr.msk.bf16.gmra.mrb[12].mxu0 %vm14172_vm0, %v2761_v59  ;;  %v2862_v59 = vor.u32 %v2861_v10, %v2858_v35  ;;  %v3236_v35 = vshll.u32 %v3155_v7, 16  ;;  %v3241_v10 = vshrl.u32 %v12277_v21, 16  ;;  %v3163_v7 = vld [vmem:[#allocation2 + $0x90] sm:$0xf8] }
 0x187   : > { %10559 = vmatprep.mubr.msk.bf16.mxu0 %vm14172_vm0, %v2778_v61  ;;  %v2871_v61 = vor.u32 %v2870_v44, %v2867_v33  ;;  %v12282_v33 = vld [vmem:[#allocation2 + $0x68] sm:$0xf]  ;;  %v3301_v48 = vshrl.u32 %v3163_v7, 16  ;;  %v3304_v38 = vshll.u32 %v3163_v7, 16 }
 0x188   : > { %v2863_v1 = vsel %vm14170_vm6, %v2854_v36, %v2862_v59  ;;  %v3258_v36 = vshrl.u32 %v12282_v33, 16  ;;  %v3261_v59 = vshll.u32 %v12282_v33, 16  ;;  %v3238_v19 = vrot.slane %v3236_v35, 4  ;;  %v12337_v7 = vld [vmem:[#allocation2 + $0xe8] sm:$0xf] }
 0x189   : > { %v2880_v2 = vsel %vm14170_vm6, %v2871_v61, %v2879_v6  ;;  %v3243_v11 = vrot.slane %v3241_v10, 3  ;;  %v3159_v61 = vld [vmem:[#allocation2 + $0x70] sm:$0xf8]  ;;  %v12291_v6 = vld [vmem:[#allocation2 + $0x78] sm:$0xf] }
 0x18a   : > { %v3239_v18 = vor.u32 %v3238_v19, %v3235_v14  ;;  %v3267_v5 = vshrl.u32 %v3159_v61, 16  ;;  %v3270_v23 = vshll.u32 %v3159_v61, 16  ;;  %v3306_v14 = vrot.slane %v3304_v38, 4 }
 0x18c   : > { %v3269_v22 = vrot.slane %v3267_v5, 3  ;;  %v3272_v46 = vrot.slane %v3270_v23, 4 }
 0x18e   : > { %10560 = vmatmul.mubr.msk.bf16.gmra.mrb[16].mxu0 %vm14172_vm0, %v2795_v60  ;;  %v2888_v60 = vor.u32 %v2887_v63, %v2884_v25  ;;  %v3260_v25 = vrot.slane %v3258_v36, 3  ;;  %v3263_v63 = vrot.slane %v3261_v59, 4  ;;  %v3273_v39 = vor.u32 %v3272_v46, %v3269_v22  ;;  %v12322_v36 = vld [vmem:[#allocation2 + $0xb8] sm:$0xf] }
 0x18f   : > { %10563 = vmatprep.mubr.msk.bf16.mxu0 %vm14172_vm0, %v2812_v8  ;;  %v3202_v8 = vshll.u32 %v3151_v47, 16  ;;  %v3275_v47 = vshrl.u32 %v12291_v6, 16 }
 0x190   : > { %v2897_v37 = vsel %vm14170_vm6, %v2888_v60, %v2896_v28  ;;  %v3287_v60 = vshll.u32 %v3161_v13, 16  ;;  %v3292_v28 = vshrl.u32 %v12294_v49, 16  ;;  %v3264_v43 = vor.u32 %v3263_v63, %v3260_v25  ;;  %v12327_v13 = vld [vmem:[#allocation2 + $0xc8] sm:$0xf] }
 0x191   : > { %v3204_v57 = vrot.slane %v3202_v8, 4  ;;  %v3277_v34 = vrot.slane %v3275_v47, 3  ;;  %v3343_v25 = vshrl.u32 %v12322_v36, 16  ;;  %v3346_v63 = vshll.u32 %v12322_v36, 16 }
 0x192   : > { %v3289_v12 = vrot.slane %v3287_v60, 4  ;;  %v3360_v27 = vshrl.u32 %v12327_v13, 16  ;;  %v3363_v60 = vshll.u32 %v12327_v13, 16 }
 0x193   : > { %v3205_v44 = vor.u32 %v3204_v57, %v3201_v9  ;;  %v3297_v9 = vrot.slane %v3295_v51, 4  ;;  %v12311_v57 = vld [vmem:[#allocation2 + $0x98] sm:$0xf] }
 0x194   : > { %v3309_v35 = vshrl.u32 %v12311_v57, 16  ;;  %v3312_v10 = vshll.u32 %v12311_v57, 16 }
 0x195   : > { %v3214_v41 = vsel %vm14171_vm5, %v3205_v44, %v3213_v26  ;;  %v3321_v44 = vshll.u32 %v3165_v17, 16  ;;  %v3326_v26 = vshrl.u32 %v12313_v15, 16 }
 0x196   : > { %10564 = vmatmul.mubr.msk.bf16.gmra.mrb[20].mxu0 %vm14172_vm0, %v2829_v56  ;;  %v3244_v56 = vshll.u32 %v12277_v21, 16  ;;  %v3311_v19 = vrot.slane %v3309_v35, 3  ;;  %v3394_v35 = vshrl.u32 %v12337_v7, 16 }
 0x197   : > { %10567 = vmatprep.mubr.msk.bf16.mxu0 %vm14172_vm0, %v2846_v50  ;;  %v3250_v50 = vshrl.u32 %v3157_v45, 16  ;;  %v3290_v45 = vor.u32 %v3289_v12, %v3286_v0  ;;  %v3362_v12 = vrot.slane %v3360_v27, 3 }
 0x198   : > { %v3246_v4 = vrot.slane %v3244_v56, 4  ;;  %v3318_v56 = vshrl.u32 %v3165_v17, 16 }
 0x199   : > { %v3252_v42 = vrot.slane %v3250_v50, 3  ;;  %v3329_v50 = vshll.u32 %v12313_v15, 16 }
 0x19a   : > { %v3247_v55 = vor.u32 %v3246_v4, %v3243_v11  ;;  %v3314_v11 = vrot.slane %v3312_v10, 4  ;;  %v3320_v4 = vrot.slane %v3318_v56, 3  ;;  %v3397_v10 = vshll.u32 %v12337_v7, 16 }
 0x19b   : > { %v3256_v8 = vor.u32 %v3255_v3, %v3252_v42  ;;  %v3331_v42 = vrot.slane %v3329_v50, 4  ;;  %v3169_v3 = vld [vmem:[#allocation2 + $0xc0] sm:$0xf8] }
 0x19c   : > { %v3248_v29 = vsel %vm14171_vm5, %v3239_v18, %v3247_v55  ;;  %v3315_v55 = vor.u32 %v3314_v11, %v3311_v19  ;;  %v3352_v5 = vshrl.u32 %v3169_v3, 16  ;;  %v3355_v23 = vshll.u32 %v3169_v3, 16  ;;  %v12349_v3 = vld [vmem:[#allocation2 + $0x108] sm:$0xf] }
 0x19d   : > { %v3396_v11 = vrot.slane %v3394_v35, 3  ;;  %v3428_v27 = vshrl.u32 %v12349_v3, 16 }
 0x19e   : > { %10568 = vmatmul.mubr.msk.bf16.gmra.mrb[24].mxu0 %vm14172_vm0, %v2863_v1  ;;  %v3231_v1 = vsel %vm14171_vm5, %v3222_v32, %v3230_v58  ;;  %v3303_v32 = vrot.slane %v3301_v48, 3  ;;  %v3167_v58 = vld [vmem:[#allocation2 + $0xb0] sm:$0xf8]  ;;  %v3354_v22 = vrot.slane %v3352_v5, 3  ;;  %v3357_v46 = vrot.slane %v3355_v23, 4 }
 0x19f   : > { %10571 = vmatprep.mubr.msk.bf16.mxu0 %vm14172_vm0, %v2880_v2  ;;  %v3278_v2 = vshll.u32 %v12291_v6, 16  ;;  %v3335_v61 = vshrl.u32 %v3167_v58, 16 }
 0x1a0   : > { %v3307_v18 = vor.u32 %v3306_v14, %v3303_v32  ;;  %v3358_v56 = vor.u32 %v3357_v46, %v3354_v22  ;;  %v3179_v46 = vld [vmem:[#allocation2 + $0x110] sm:$0xf8] }
 0x1a1   : > { %v3280_v54 = vrot.slane %v3278_v2, 4 }
 0x1a3   : > { %v3281_v30 = vor.u32 %v3280_v54, %v3277_v34  ;;  %v3171_v34 = vld [vmem:[#allocation2 + $0xd0] sm:$0xf8]  ;;  %v12334_v54 = vld [vmem:[#allocation2 + $0xd8] sm:$0xf] }
 0x1a4   : > { %v3377_v48 = vshrl.u32 %v12334_v54, 16  ;;  %v3380_v38 = vshll.u32 %v12334_v54, 16 }
 0x1a5   : > { %v3282_v52 = vsel %vm14171_vm5, %v3273_v39, %v3281_v30  ;;  %v3369_v39 = vshrl.u32 %v3171_v34, 16  ;;  %v3372_v30 = vshll.u32 %v3171_v34, 16 }
 0x1a6   : > { %10572 = vmatmul.mubr.msk.bf16.gmra.mrb[28].mxu0 %vm14172_vm0, %v2897_v37  ;;  %v3294_v37 = vrot.slane %v3292_v28, 3  ;;  %v3337_v28 = vrot.slane %v3335_v61, 3  ;;  %v3379_v32 = vrot.slane %v3377_v48, 3 }
 0x1a7   : > { %10577 = vmatprep.mubr.msk.bf16.mxu0 %vm14172_vm0, %v3197_v40  ;;  %v3265_v40 = vsel %vm14171_vm5, %v3256_v8, %v3264_v43  ;;  %v3345_v8 = vrot.slane %v3343_v25, 3  ;;  %v3348_v43 = vrot.slane %v3346_v63, 4  ;;  %v3371_v50 = vrot.slane %v3369_v39, 3 }
 0x1a8   : > { %v3298_v53 = vor.u32 %v3297_v9, %v3294_v37  ;;  %v3365_v37 = vrot.slane %v3363_v60, 4  ;;  %v3173_v9 = vld [vmem:[#allocation2 + $0xe0] sm:$0xf8]  ;;  %v3431_v60 = vshll.u32 %v12349_v3, 16  ;;  %v3437_v39 = vshrl.u32 %v3179_v46, 16 }
 0x1a9   : > { %v3349_v17 = vor.u32 %v3348_v43, %v3345_v8 }
 0x1aa   : > { %v3299_v59 = vsel %vm14171_vm5, %v3290_v45, %v3298_v53  ;;  %v3386_v45 = vshrl.u32 %v3173_v9, 16  ;;  %v3389_v53 = vshll.u32 %v3173_v9, 16  ;;  %v12359_v9 = vld [vmem:[#allocation2 + $0x118] sm:$0xf] }
 0x1ab   : > { %v3445_v48 = vshrl.u32 %v12359_v9, 16 }
 0x1ac   : > { %v3388_v14 = vrot.slane %v3386_v45, 3  ;;  %v3391_v19 = vrot.slane %v3389_v53, 4 }
 0x1ae   : > { %10578 = vmatmul.mubr.msk.bf16.vlgmr.msra.gmra.mrb[0].mxu0 %vm14172_vm0, %v3214_v41  ;;  %v3328_v41 = vrot.slane %v3326_v26, 3  ;;  %v3392_v5 = vor.u32 %v3391_v19, %v3388_v14  ;;  %v3746_v14 = vrot.slane %v12256_v62, 4  ;;  %v3752_v62 = vrot.slane %v12268_v24, 4 }
 0x1af   : > { %10610 = vmatpush3.bf16.msra.mxu0 %v3846_v16  ;;  %10581 = vmatprep.mubr.msk.bf16.mxu0 %vm14172_vm0, %v3231_v1  ;;  %v3323_v16 = vrot.slane %v3321_v44, 4  ;;  %v3338_v1 = vshll.u32 %v3167_v58, 16  ;;  %v3366_v44 = vor.u32 %v3365_v37, %v3362_v12  ;;  %v3382_v58 = vrot.slane %v3380_v38, 4 }
 0x1b0   : > { %11503 = vmatprep.subr.msk.bf16.mxu0 %vm14174_vm3, %v12299_v31  ;;  %v3332_v2 = vor.u32 %v3331_v42, %v3328_v41  ;;  %v3177_v42 = vld [vmem:[#allocation2 + $0x100] sm:$0xf8]  ;;  %v3430_v12 = vrot.slane %v3428_v27, 3  ;;  %v3433_v37 = vrot.slane %v3431_v60, 4  ;;  %v3448_v38 = vshll.u32 %v12359_v9, 16 }
 0x1b1   : > { %v3324_v47 = vor.u32 %v3323_v16, %v3320_v4  ;;  %v3340_v51 = vrot.slane %v3338_v1, 4  ;;  %v3399_v4 = vrot.slane %v3397_v10, 4  ;;  %v12346_v16 = vld [vmem:[#allocation2 + $0xf8] sm:$0xf]  ;;  %v3367_v41 = vsel %vm14171_vm5, %v3358_v56, %v3366_v44  ;;  %v12401_v27 = vld [vmem:[#allocation2 + $0x70] sm:$0xf0] }
 0x1b2   : > { %v3411_v25 = vshrl.u32 %v12346_v16, 16  ;;  %v3414_v63 = vshll.u32 %v12346_v16, 16  ;;  %v3434_v53 = vor.u32 %v3433_v37, %v3430_v12  ;;  %v3439_v10 = vrot.slane %v3437_v39, 3  ;;  %v12403_v60 = vld [vmem:[#allocation2 + $0x80] sm:$0xf0] }
 0x1b3   : > { %v3333_v0 = vsel %vm14171_vm5, %v3324_v47, %v3332_v2  ;;  %v3400_v23 = vor.u32 %v3399_v4, %v3396_v11  ;;  %v3420_v47 = vshrl.u32 %v3177_v42, 16  ;;  %v3423_v2 = vshll.u32 %v3177_v42, 16  ;;  %v12375_v4 = vld [vmem:[#allocation2 + $0x30] sm:$0xf0] }
 0x1b4   : > { %v3413_v8 = vrot.slane %v3411_v25, 3  ;;  %v3416_v43 = vrot.slane %v3414_v63, 4  ;;  %v3447_v44 = vrot.slane %v3445_v48, 3  ;;  %v3748_v42 = vrot.slane %v12375_v4, 4  ;;  %v12425_v37 = vld [vmem:[#allocation2 + $0xb0] sm:$0xf0] }
 0x1b5   : > { %v3401_v22 = vsel %vm14171_vm5, %v3392_v5, %v3400_v23  ;;  %v3422_v34 = vrot.slane %v3420_v47, 3  ;;  %v4378_v63 = vsel %vm14174_vm3, %v12299_v31, 0  ;;  %v12391_v5 = vld [vmem:[#allocation2 + $0x60] sm:$0xf0]  ;;  %v3755_v24 = vrot.slane %v12277_v21, 4 }
 0x1b6   : > { %10582 = vmatmul.mubr.msk.bf16.gmra.mrb[4].mxu0 %vm14172_vm0, %v3248_v29  ;;  %v3316_v29 = vsel %vm14171_vm5, %v3307_v18, %v3315_v55  ;;  %v3383_v55 = vor.u32 %v3382_v58, %v3379_v32  ;;  %v3757_v23 = vrot.slane %v12391_v5, 4  ;;  %v3758_v47 = vrot.slane %v12282_v33, 4 }
 0x1b7   : > { %10585 = vmatprep.mubr.msk.bf16.mxu0 %vm14172_vm0, %v3265_v40  ;;  %v3341_v40 = vor.u32 %v3340_v51, %v3337_v28  ;;  %v3761_v21 = vrot.slane %v12291_v6, 4  ;;  %v3764_v33 = vrot.slane %v12294_v49, 4  ;;  %v3767_v6 = vrot.slane %v12311_v57, 4 }
 0x1b8   : > { %v3770_v49 = vrot.slane %v12313_v15, 4  ;;  %v3773_v57 = vrot.slane %v12322_v36, 4  ;;  %v3776_v15 = vrot.slane %v12327_v13, 4  ;;  %v3779_v36 = vrot.slane %v12334_v54, 4 }
 0x1b9   : > { %v3350_v26 = vsel %vm14171_vm5, %v3341_v40, %v3349_v17  ;;  %v3417_v17 = vor.u32 %v3416_v43, %v3413_v8  ;;  %v3782_v13 = vrot.slane %v12337_v7, 4 }
 0x1be   : > { %10586 = vmatmul.mubr.msk.bf16.gmra.mrb[8].mxu0 %vm14172_vm0, %v3282_v52  ;;  %v3374_v52 = vrot.slane %v3372_v30, 4  ;;  %v3440_v30 = vshll.u32 %v3179_v46, 16 }
 0x1bf   : > { %10589 = vmatprep.mubr.msk.bf16.mxu0 %vm14172_vm0, %v3299_v59  ;;  %v3175_v59 = vld [vmem:[#allocation2 + $0xf0] sm:$0xf8] }
 0x1c0   : > { %v3403_v61 = vshrl.u32 %v3175_v59, 16  ;;  %v3406_v1 = vshll.u32 %v3175_v59, 16  ;;  %v3375_v18 = vor.u32 %v3374_v52, %v3371_v50  ;;  %v3442_v56 = vrot.slane %v3440_v30, 4  ;;  %v12367_v52 = vld [vmem:[#allocation2 + $0x20] sm:$0xf0] }
 0x1c1   : > { %v3745_v59 = vrot.slane %v12367_v52, 4  ;;  %v4058_v54 = vshrl.u32 %v12367_v52, 16  ;;  %v4061_v7 = vshll.u32 %v12367_v52, 16  ;;  %v4078_v52 = vshll.u32 %v12375_v4, 16 }
 0x1c2   : > { %v3405_v28 = vrot.slane %v3403_v61, 3  ;;  %v3408_v51 = vrot.slane %v3406_v1, 4  ;;  %v3443_v32 = vor.u32 %v3442_v56, %v3439_v10  ;;  %v3749_v61 = vrot.slane %v12266_v20, 4  ;;  %v12448_v56 = vld [vmem:[#allocation2 + $0xf0] sm:$0xf0] }
 0x1c3   : > { %v3747_v11 = vsel %vm14173_vm4, %v3745_v59, %v3746_v14 }
 0x1c4   : > { %v3409_v40 = vor.u32 %v3408_v51, %v3405_v28  ;;  %v3750_v25 = vsel %vm14173_vm4, %v3748_v42, %v3749_v61  ;;  %v3760_v28 = vrot.slane %v12401_v27, 4  ;;  %v3763_v51 = vrot.slane %v12403_v60, 4  ;;  %v4042_v61 = vld [vmem:[#allocation2 + $0x38] sm:$0x1f] }
 0x1c6   : > { %10590 = vmatmul.mubr.msk.bf16.gmra.mrb[12].mxu0 %vm14172_vm0, %v3316_v29  ;;  %v3384_v29 = vsel %vm14171_vm5, %v3375_v18, %v3383_v55  ;;  %v3418_v35 = vsel %vm14171_vm5, %v3409_v40, %v3417_v17  ;;  %v12389_v55 = vld [vmem:[#allocation2 + $0x50] sm:$0xf0]  ;;  %v3762_v8 = vsel %vm14173_vm4, %v3760_v28, %v3761_v21  ;;  %v3765_v43 = vsel %vm14173_vm4, %v3763_v51, %v3764_v33  ;;  %v12427_v40 = vld [vmem:[#allocation2 + $0xc0] sm:$0xf0] }
 0x1c7   : > { %10593 = vmatprep.mubr.msk.bf16.mxu0 %vm14172_vm0, %v3333_v0  ;;  %v3425_v0 = vrot.slane %v3423_v2, 4  ;;  %v3754_v20 = vrot.slane %v12389_v55, 4  ;;  %v3759_v2 = vsel %vm14173_vm4, %v3757_v23, %v3758_v47  ;;  %v3772_v17 = vrot.slane %v12425_v37, 4  ;;  %v4043_v47 = vld [vmem:[#allocation2 + $0x48] sm:$0x1f] }
 0x1c8   : > { %v3775_v39 = vrot.slane %v12427_v40, 4  ;;  %v4086_v23 = vshll.u32 %v4042_v61, 16  ;;  %v4100_v33 = vshrl.u32 %v4043_v47, 16 }
 0x1c9   : > { %v3426_v45 = vor.u32 %v3425_v0, %v3422_v34  ;;  %v3756_v31 = vsel %vm14173_vm4, %v3754_v20, %v3755_v24  ;;  %v3774_v30 = vsel %vm14173_vm4, %v3772_v17, %v3773_v57  ;;  %v4075_v20 = vshrl.u32 %v12375_v4, 16 }
 0x1ca   : > { %v3777_v48 = vsel %vm14173_vm4, %v3775_v39, %v3776_v15  ;;  %v4083_v24 = vshrl.u32 %v4042_v61, 16  ;;  %v4045_v39 = vld [vmem:[#allocation2 + $0x68] sm:$0x1f] }
 0x1cb   : > { %v3435_v50 = vsel %vm14171_vm5, %v3426_v45, %v3434_v53  ;;  %v12439_v45 = vld [vmem:[#allocation2 + $0xe0] sm:$0xf0]  ;;  %v4077_v4 = vrot.slane %v4075_v20, 4 }
 0x1ce   : > { %10594 = vmatmul.mubr.msk.bf16.gmra.mrb[16].mxu0 %vm14172_vm0, %v3350_v26  ;;  %v3450_v26 = vrot.slane %v3448_v38, 4  ;;  %v12437_v38 = vld [vmem:[#allocation2 + $0xd0] sm:$0xf0] }
 0x1cf   : > { %10597 = vmatprep.mubr.msk.bf16.mxu0 %vm14172_vm0, %v3367_v41  ;;  %v12377_v41 = vld [vmem:[#allocation2 + $0x40] sm:$0xf0]  ;;  %v3778_v53 = vrot.slane %v12437_v38, 4 }
 0x1d0   : > { %v3451_v58 = vor.u32 %v3450_v26, %v3447_v44  ;;  %v3751_v1 = vrot.slane %v12377_v41, 4  ;;  %v4041_v26 = vld [vmem:[#allocation2 + $0x28] sm:$0x1f]  ;;  %v4092_v21 = vshrl.u32 %v12377_v41, 16  ;;  %v4095_v51 = vshll.u32 %v12377_v41, 16 }
 0x1d1   : > { %v3780_v10 = vsel %vm14173_vm4, %v3778_v53, %v3779_v36  ;;  %v4066_v59 = vshrl.u32 %v4041_v26, 16  ;;  %v4069_v14 = vshll.u32 %v4041_v26, 16  ;;  %v4109_v41 = vshrl.u32 %v12389_v55, 16 }
 0x1d2   : > { %v3452_v19 = vsel %vm14171_vm5, %v3443_v32, %v3451_v58  ;;  %v3753_v18 = vsel %vm14173_vm4, %v3751_v1, %v3752_v62  ;;  %v3784_v32 = vrot.slane %v12448_v56, 4  ;;  %v3785_v58 = vrot.slane %v12346_v16, 4 }
 0x1d3   : > { %v4060_v1 = vrot.slane %v4058_v54, 4  ;;  %v4063_v62 = vrot.slane %v4061_v7, 5  ;;  %v4097_v17 = vrot.slane %v4095_v51, 5  ;;  %v4111_v54 = vrot.slane %v4109_v41, 4 }
 0x1d4   : > { %v3786_v42 = vsel %vm14173_vm4, %v3784_v32, %v3785_v58 }
 0x1d6   : > { %10598 = vmatmul.mubr.msk.bf16.gmra.mrb[20].mxu0 %vm14172_vm0, %v3384_v29  ;;  %v12413_v29 = vld [vmem:[#allocation2 + $0x90] sm:$0xf0] }
 0x1d7   : > { %10601 = vmatprep.mubr.msk.bf16.mxu0 %vm14172_vm0, %v3401_v22  ;;  %v12415_v22 = vld [vmem:[#allocation2 + $0xa0] sm:$0xf0]  ;;  %v3766_v46 = vrot.slane %v12413_v29, 4 }
 0x1d8   : > { %v3769_v34 = vrot.slane %v12415_v22, 4 }
 0x1d9   : > { %v3768_v0 = vsel %vm14173_vm4, %v3766_v46, %v3767_v6  ;;  %v4085_v46 = vrot.slane %v4083_v24, 4  ;;  %v4088_v6 = vrot.slane %v4086_v23, 5 }
 0x1da   : > { %v3771_v12 = vsel %vm14173_vm4, %v3769_v34, %v3770_v49 }
 0x1de   : > { %10602 = vmatmul.mubr.msk.bf16.gmra.mrb[24].mxu0 %vm14172_vm0, %v3418_v35  ;;  %v3781_v35 = vrot.slane %v12439_v45, 4 }
 0x1df   : > { %10605 = vmatprep.mubr.msk.bf16.mxu0 %vm14172_vm0, %v3435_v50  ;;  %v12451_v50 = vld [vmem:[#allocation2 + $0x100] sm:$0xf0] }
 0x1e0   : > { %v3783_v44 = vsel %vm14173_vm4, %v3781_v35, %v3782_v13  ;;  %v4126_v35 = vshrl.u32 %v12391_v5, 16  ;;  %v4129_v13 = vshll.u32 %v12391_v5, 16  ;;  %v4146_v5 = vshll.u32 %v12401_v27, 16 }
 0x1e6   : > { %10606 = vmatmul.mubr.msk.bf16.gmra.mrb[28].mxu0 %vm14172_vm0, %v3452_v19  ;;  %v3787_v19 = vrot.slane %v12451_v50, 4 }
 0x1e7   : > { %10611 = vmatprep.mubr.msk.bf16.mxu0 %vm14172_vm0, %v3747_v11  ;;  %v3788_v11 = vrot.slane %v12349_v3, 4 }
 0x1e9   : > { %v3789_v16 = vsel %vm14173_vm4, %v3787_v19, %v3788_v11  ;;  %v4046_v19 = vld [vmem:[#allocation2 + $0x78] sm:$0x1f]  ;;  %v4131_v11 = vrot.slane %v4129_v13, 5 }
 0x1ee   : > { %10612 = vmatmul.mubr.msk.bf16.vlgmr.msra.gmra.mrb[0].mxu0 %vm14172_vm0, %v3750_v25  ;;  %v4068_v25 = vrot.slane %v4066_v59, 4 }
 0x1ef   : > { %10644 = vmatpush3.bf16.msra.mxu0 %v4378_v63  ;;  %10615 = vmatprep.mubr.msk.bf16.mxu0 %vm14172_vm0, %v3753_v18  ;;  %v4071_v63 = vrot.slane %v4069_v14, 5  ;;  %v12463_v18 = vld [vmem:[#allocation2 + $0x110] sm:$0xf0] }
 0x1f0   : > { %v3790_v3 = vrot.slane %v12463_v18, 4 }
 0x1f1   : > { %v4072_v28 = vor.u32 %v4071_v63, %v4068_v25  ;;  %v4151_v25 = vshrl.u32 %v4046_v19, 16  ;;  %v4154_v63 = vshll.u32 %v4046_v19, 16 }
 0x1f3   : > { %v4156_v51 = vrot.slane %v4154_v63, 5 }
 0x1f6   : > { %10616 = vmatmul.mubr.msk.bf16.gmra.mrb[4].mxu0 %vm14172_vm0, %v3756_v31  ;;  %v3791_v31 = vrot.slane %v12359_v9, 4  ;;  %v4102_v9 = vrot.slane %v4100_v33, 4 }
 0x1f7   : > { %10619 = vmatprep.mubr.msk.bf16.mxu0 %vm14172_vm0, %v3759_v2  ;;  %v4064_v2 = vor.u32 %v4063_v62, %v4060_v1  ;;  %v4143_v62 = vshrl.u32 %v12401_v27, 16  ;;  %v4153_v27 = vrot.slane %v4151_v25, 4 }
 0x1f8   : > { %v3792_v34 = vsel %vm14173_vm4, %v3790_v3, %v3791_v31  ;;  %v4163_v3 = vshll.u32 %v12403_v60, 16 }
 0x1f9   : > { %v4073_v49 = vsel %vm14170_vm6, %v4064_v2, %v4072_v28  ;;  %v4145_v28 = vrot.slane %v4143_v62, 4  ;;  %v4228_v62 = vshrl.u32 %v12427_v40, 16 }
 0x1fe   : > { %10620 = vmatmul.mubr.msk.bf16.gmra.mrb[8].mxu0 %vm14172_vm0, %v3762_v8  ;;  %v4103_v8 = vshll.u32 %v4043_v47, 16  ;;  %v4160_v47 = vshrl.u32 %v12403_v60, 16  ;;  %v4177_v60 = vshrl.u32 %v12413_v29, 16 }
 0x1ff   : > { %10623 = vmatprep.mubr.msk.bf16.mxu0 %vm14172_vm0, %v3765_v43  ;;  %v4080_v43 = vrot.slane %v4078_v52, 5 }
 0x200   : > { %v4105_v57 = vrot.slane %v4103_v8, 5 }
 0x201   : > { %v4081_v15 = vor.u32 %v4080_v43, %v4077_v4  ;;  %v4048_v4 = vld [vmem:[#allocation2 + $0x98] sm:$0x1f]  ;;  %v4162_v43 = vrot.slane %v4160_v47, 4 }
 0x202   : > { %v4106_v32 = vor.u32 %v4105_v57, %v4102_v9  ;;  %v4185_v9 = vshrl.u32 %v4048_v4, 16  ;;  %v4188_v57 = vshll.u32 %v4048_v4, 16  ;;  %v4052_v47 = vld [vmem:[#allocation2 + $0xd8] sm:$0x1f] }
 0x203   : > { %v4256_v4 = vshll.u32 %v4052_v47, 16 }
 0x206   : > { %10624 = vmatmul.mubr.msk.bf16.gmra.mrb[12].mxu0 %vm14172_vm0, %v3768_v0  ;;  %v4044_v0 = vld [vmem:[#allocation2 + $0x58] sm:$0x1f] }
 0x207   : > { %10627 = vmatprep.mubr.msk.bf16.mxu0 %vm14172_vm0, %v3771_v12  ;;  %v4094_v12 = vrot.slane %v4092_v21, 4  ;;  %v4117_v53 = vshrl.u32 %v4044_v0, 16  ;;  %v4120_v36 = vshll.u32 %v4044_v0, 16  ;;  %v4148_v21 = vrot.slane %v4146_v5, 5 }
 0x208   : > { %v4231_v5 = vshll.u32 %v12427_v40, 16  ;;  %v4245_v40 = vshrl.u32 %v12437_v38, 16 }
 0x209   : > { %v4098_v26 = vor.u32 %v4097_v17, %v4094_v12  ;;  %v4119_v59 = vrot.slane %v4117_v53, 4  ;;  %v4122_v14 = vrot.slane %v4120_v36, 5  ;;  %v4149_v0 = vor.u32 %v4148_v21, %v4145_v28  ;;  %v4053_v21 = vld [vmem:[#allocation2 + $0xe8] sm:$0x1f] }
 0x20a   : > { %v4157_v12 = vor.u32 %v4156_v51, %v4153_v27  ;;  %v4180_v17 = vshll.u32 %v12413_v29, 16 }
 0x20b   : > { %v4107_v1 = vsel %vm14170_vm6, %v4098_v26, %v4106_v32  ;;  %v4123_v52 = vor.u32 %v4122_v14, %v4119_v59  ;;  %v4050_v26 = vld [vmem:[#allocation2 + $0xb8] sm:$0x1f]  ;;  %v4211_v59 = vshrl.u32 %v12425_v37, 16 }
 0x20c   : > { %v4158_v36 = vsel %vm14170_vm6, %v4149_v0, %v4157_v12  ;;  %v4182_v13 = vrot.slane %v4180_v17, 5  ;;  %v4219_v14 = vshrl.u32 %v4050_v26, 16  ;;  %v4222_v19 = vshll.u32 %v4050_v26, 16 }
 0x20e   : > { %10628 = vmatmul.mubr.msk.bf16.gmra.mrb[16].mxu0 %vm14172_vm0, %v3774_v30  ;;  %v4089_v30 = vor.u32 %v4088_v6, %v4085_v46  ;;  %v4165_v46 = vrot.slane %v4163_v3, 5  ;;  %v4230_v3 = vrot.slane %v4228_v62, 4  ;;  %v4056_v62 = vld [vmem:[#allocation2 + $0x118] sm:$0x1f] }
 0x20f   : > { %10631 = vmatprep.mubr.msk.bf16.mxu0 %vm14172_vm0, %v3777_v48  ;;  %v4112_v48 = vshll.u32 %v12389_v55, 16  ;;  %v4128_v55 = vrot.slane %v4126_v35, 4  ;;  %v4179_v35 = vrot.slane %v4177_v60, 4  ;;  %v4247_v60 = vrot.slane %v4245_v40, 4 }
 0x210   : > { %v4090_v58 = vsel %vm14170_vm6, %v4081_v15, %v4089_v30  ;;  %v4197_v15 = vshll.u32 %v12415_v22, 16 }
 0x211   : > { %v4114_v7 = vrot.slane %v4112_v48, 5  ;;  %v4132_v24 = vor.u32 %v4131_v11, %v4128_v55  ;;  %v4166_v48 = vor.u32 %v4165_v46, %v4162_v43  ;;  %v4051_v55 = vld [vmem:[#allocation2 + $0xc8] sm:$0x1f]  ;;  %v4183_v11 = vor.u32 %v4182_v13, %v4179_v35 }
 0x212   : > { %v4199_v32 = vrot.slane %v4197_v15, 5  ;;  %v4236_v25 = vshrl.u32 %v4051_v55, 16  ;;  %v4239_v63 = vshll.u32 %v4051_v55, 16  ;;  %v4262_v43 = vshrl.u32 %v12439_v45, 16 }
 0x213   : > { %v4115_v20 = vor.u32 %v4114_v7, %v4111_v54  ;;  %v4265_v46 = vshll.u32 %v12439_v45, 16  ;;  %v4279_v45 = vshrl.u32 %v12448_v56, 16 }
 0x214   : > { %v4241_v28 = vrot.slane %v4239_v63, 5  ;;  %v4316_v63 = vshll.u32 %v12463_v18, 16 }
 0x215   : > { %v4124_v33 = vsel %vm14170_vm6, %v4115_v20, %v4123_v52  ;;  %v4224_v52 = vrot.slane %v4222_v19, 5 }
 0x216   : > { %10632 = vmatmul.mubr.msk.bf16.gmra.mrb[20].mxu0 %vm14172_vm0, %v3780_v10  ;;  %v4134_v10 = vshrl.u32 %v4045_v39, 16 }
 0x217   : > { %10635 = vmatprep.mubr.msk.bf16.mxu0 %vm14172_vm0, %v3783_v44  ;;  %v4137_v44 = vshll.u32 %v4045_v39, 16  ;;  %v4194_v39 = vshrl.u32 %v12415_v22, 16  ;;  %v4214_v22 = vshll.u32 %v12425_v37, 16  ;;  %v4221_v37 = vrot.slane %v4219_v14, 4 }
 0x219   : > { %v4139_v61 = vrot.slane %v4137_v44, 5  ;;  %v4190_v44 = vrot.slane %v4188_v57, 5  ;;  %v4196_v29 = vrot.slane %v4194_v39, 4  ;;  %v4216_v20 = vrot.slane %v4214_v22, 5 }
 0x21a   : > { %v4225_v51 = vor.u32 %v4224_v52, %v4221_v37  ;;  %v4258_v57 = vrot.slane %v4256_v4, 5  ;;  %v4264_v39 = vrot.slane %v4262_v43, 4 }
 0x21e   : > { %10636 = vmatmul.mubr.msk.bf16.gmra.mrb[24].mxu0 %vm14172_vm0, %v3786_v42  ;;  %v4136_v42 = vrot.slane %v4134_v10, 4  ;;  %v4187_v10 = vrot.slane %v4185_v9, 4 }
 0x21f   : > { %10639 = vmatprep.mubr.msk.bf16.mxu0 %vm14172_vm0, %v3789_v16  ;;  %v4047_v16 = vld [vmem:[#allocation2 + $0x88] sm:$0x1f] }
 0x220   : > { %v4140_v23 = vor.u32 %v4139_v61, %v4136_v42  ;;  %v4168_v31 = vshrl.u32 %v4047_v16, 16  ;;  %v4171_v2 = vshll.u32 %v4047_v16, 16  ;;  %v4191_v42 = vor.u32 %v4190_v44, %v4187_v10 }
 0x221   : > { %v4200_v61 = vor.u32 %v4199_v32, %v4196_v29  ;;  %v4213_v16 = vrot.slane %v4211_v59, 4  ;;  %v4296_v32 = vshrl.u32 %v12451_v50, 16  ;;  %v4281_v59 = vrot.slane %v4279_v45, 4 }
 0x222   : > { %v4141_v8 = vsel %vm14170_vm6, %v4132_v24, %v4140_v23  ;;  %v4170_v6 = vrot.slane %v4168_v31, 4  ;;  %v4192_v24 = vsel %vm14170_vm6, %v4183_v11, %v4191_v42  ;;  %v4233_v31 = vrot.slane %v4231_v5, 5 }
 0x223   : > { %v4217_v27 = vor.u32 %v4216_v20, %v4213_v16  ;;  %v4298_v11 = vrot.slane %v4296_v32, 4  ;;  %v4321_v16 = vshrl.u32 %v4056_v62, 16  ;;  %v4324_v20 = vshll.u32 %v4056_v62, 16 }
 0x225   : > { %v4226_v12 = vsel %vm14170_vm6, %v4217_v27, %v4225_v51 }
 0x226   : > { %10640 = vmatmul.mubr.msk.bf16.gmra.mrb[28].mxu0 %vm14172_vm0, %v3792_v34  ;;  %v4173_v34 = vrot.slane %v4171_v2, 5  ;;  %v4238_v2 = vrot.slane %v4236_v25, 4 }
 0x227   : > { %10645 = vmatprep.mubr.msk.bf16.mxu0 %vm14172_vm0, %v4073_v49  ;;  %v4049_v49 = vld [vmem:[#allocation2 + $0xa8] sm:$0x1f] }
 0x228   : > { %v4202_v30 = vshrl.u32 %v4049_v49, 16  ;;  %v4205_v41 = vshll.u32 %v4049_v49, 16  ;;  %v4174_v53 = vor.u32 %v4173_v34, %v4170_v6  ;;  %v4270_v6 = vshrl.u32 %v4053_v21, 16 }
 0x229   : > { %v4273_v34 = vshll.u32 %v4053_v21, 16  ;;  %v4234_v49 = vor.u32 %v4233_v31, %v4230_v3  ;;  %v4242_v0 = vor.u32 %v4241_v28, %v4238_v2  ;;  %v4323_v3 = vrot.slane %v4321_v16, 4 }
 0x22a   : > { %v4207_v54 = vrot.slane %v4205_v41, 5  ;;  %v4175_v7 = vsel %vm14170_vm6, %v4166_v48, %v4174_v53  ;;  %v4272_v15 = vrot.slane %v4270_v6, 4  ;;  %v4054_v41 = vld [vmem:[#allocation2 + $0xf8] sm:$0x1f]  ;;  %v4055_v53 = vld [vmem:[#allocation2 + $0x108] sm:$0x1f] }
 0x22b   : > { %v4243_v48 = vsel %vm14170_vm6, %v4234_v49, %v4242_v0  ;;  %v4287_v35 = vshrl.u32 %v4054_v41, 16  ;;  %v4290_v13 = vshll.u32 %v4054_v41, 16  ;;  %v4326_v31 = vrot.slane %v4324_v20, 5 }
 0x22d   : > { %v4289_v14 = vrot.slane %v4287_v35, 4  ;;  %v4292_v19 = vrot.slane %v4290_v13, 5  ;;  %v4327_v21 = vor.u32 %v4326_v31, %v4323_v3 }
 0x22e   : > { %10646 = vmatmul.mubr.msk.bf16.vlgmr.msra.gmra.mrb[0].mxu0 %vm14172_vm0, %v4090_v58  ;;  %v4204_v58 = vrot.slane %v4202_v30, 4  ;;  %v4275_v30 = vrot.slane %v4273_v34, 5 }
 0x22f   : > { %10649 = vmatprep.mubr.msk.bf16.mxu0 %vm14172_vm0, %v4107_v1  ;;  %v4293_v25 = vor.u32 %v4292_v19, %v4289_v14 }
 0x230   : > { %v4208_v1 = vor.u32 %v4207_v54, %v4204_v58  ;;  %v4276_v29 = vor.u32 %v4275_v30, %v4272_v15  ;;  %v4299_v58 = vshll.u32 %v12451_v50, 16  ;;  %v4304_v54 = vshrl.u32 %v4055_v53, 16 }
 0x231   : > { %v4313_v50 = vshrl.u32 %v12463_v18, 16 }
 0x232   : > { %v4209_v23 = vsel %vm14170_vm6, %v4200_v61, %v4208_v1  ;;  %v4301_v42 = vrot.slane %v4299_v58, 5  ;;  %v4306_v61 = vrot.slane %v4304_v54, 4  ;;  %v12555_v58 = vld [vmem:[%s14168_s2] sm:$0xf] }
 0x234   : > { %v4302_v37 = vor.u32 %v4301_v42, %v4298_v11 }
 0x236   : > { %10650 = vmatmul.mubr.msk.bf16.gmra.mrb[4].mxu0 %vm14172_vm0, %v4124_v33  ;;  %v4248_v33 = vshll.u32 %v12437_v38, 16  ;;  %v4267_v38 = vrot.slane %v4265_v46, 5 }
 0x237   : > { %10653 = vmatprep.mubr.msk.bf16.mxu0 %vm14172_vm0, %v4141_v8  ;;  %v4253_v8 = vshrl.u32 %v4052_v47, 16  ;;  %v4318_v47 = vrot.slane %v4316_v63, 5 }
 0x238   : > { %v4250_v17 = vrot.slane %v4248_v33, 5  ;;  %v4268_v26 = vor.u32 %v4267_v38, %v4264_v39 }
 0x239   : > { %v4255_v9 = vrot.slane %v4253_v8, 4 }
 0x23a   : > { %v4251_v10 = vor.u32 %v4250_v17, %v4247_v60  ;;  %v4277_v55 = vsel %vm14170_vm6, %v4268_v26, %v4276_v29 }
 0x23b   : > { %v4259_v44 = vor.u32 %v4258_v57, %v4255_v9 }
 0x23e   : > { %10654 = vmatmul.mubr.msk.bf16.gmra.mrb[8].mxu0 %vm14172_vm0, %v4158_v36  ;;  %v4282_v36 = vshll.u32 %v12448_v56, 16  ;;  %v4260_v56 = vsel %vm14170_vm6, %v4251_v10, %v4259_v44 }
 0x23f   : > { %10657 = vmatprep.mubr.msk.bf16.mxu0 %vm14172_vm0, %v4175_v7  ;;  %v4307_v7 = vshll.u32 %v4055_v53, 16 }
 0x240   : > { %v4284_v22 = vrot.slane %v4282_v36, 5 }
 0x241   : > { %v4309_v1 = vrot.slane %v4307_v7, 5 }
 0x242   : > { %v4285_v5 = vor.u32 %v4284_v22, %v4281_v59  ;;  %v9910_v22 = vcombine.low %v12555_v58, %v12555_v58 }
 0x243   : > { %v4310_v52 = vor.u32 %v4309_v1, %v4306_v61 }
 0x244   : > { %v5478_v61 = vrot.slane %v9910_v22, 2 }
 0x245   : > { %v4311_v2 = vsel %vm14170_vm6, %v4302_v37, %v4310_v52 }
 0x246   : > { %10658 = vmatmul.mubr.msk.bf16.gmra.mrb[12].mxu0 %vm14172_vm0, %v4192_v24  ;;  %v4294_v24 = vsel %vm14170_vm6, %v4285_v5, %v4293_v25  ;;  %11504 = vmatprep.subr.msk.bf16.mxu1 %vm14174_vm3, %v5478_v61 }
 0x247   : > { %10661 = vmatprep.mubr.msk.bf16.mxu0 %vm14172_vm0, %v4209_v23  ;;  %v4315_v23 = vrot.slane %v4313_v50, 4 }
 0x249   : > { %v4319_v28 = vor.u32 %v4318_v47, %v4315_v23  ;;  %v5528_v47 = vsel %vm14174_vm3, %v5478_v61, 0 }
 0x24a   : > { %10678 = vmatpush3.bf16.msra.mxu1 %v5528_v47 }
 0x24b   : > { %v4328_v18 = vsel %vm14170_vm6, %v4319_v28, %v4327_v21  ;;  %11505 = vmatprep.subr.msk.bf16.mxu1 %vm14174_vm3, %v12555_v58 }
 0x24e   : > { %10662 = vmatmul.mubr.msk.bf16.gmra.mrb[16].mxu0 %vm14172_vm0, %v4226_v12 }
 0x24f   : > { %10665 = vmatprep.mubr.msk.bf16.mxu0 %vm14172_vm0, %v4243_v48 }
 0x256   : > { %10666 = vmatmul.mubr.msk.bf16.gmra.mrb[20].mxu0 %vm14172_vm0, %v4260_v56  ;;  %v5076_v56 = vld [vmem:[#allocation2 + $0x8] sm:$0xf] }
 0x257   : > { %10669 = vmatprep.mubr.msk.bf16.mxu0 %vm14172_vm0, %v4277_v55  ;;  %v5379_v55 = vld [vmem:[#allocation2] sm:$0xf0]  ;;  %v5428_v50 = vrot.slane %v5076_v56, 4 }
 0x258   : > { %v5427_v25 = vrot.slane %v5379_v55, 4 }
 0x25a   : > { %v5429_v3 = vsel %vm14173_vm4, %v5427_v25, %v5428_v50 }
 0x25b   : > { %10679 = vmatprep.mubr.msk.bf16.mxu1 %vm14172_vm0, %v5429_v3 }
 0x25e   : > { %10670 = vmatmul.mubr.msk.bf16.gmra.mrb[24].mxu0 %vm14172_vm0, %v4294_v24 }
 0x25f   : > { %10673 = vmatprep.mubr.msk.bf16.mxu0 %vm14172_vm0, %v4311_v2 }
 0x266   : > { %10674 = vmatmul.mubr.msk.bf16.gmra.mrb[28].mxu0 %vm14172_vm0, %v4328_v18 }
 0x301   : > { %v10647_v27 = vpop.f32.mrb[0].mxu0 }
 0x302   : > { %4576 = vst.msk [vmem:[#allocation3 + $0x10] sm:$0xff] %vm14172_vm0, %v10647_v27  ;;  %v4414_v51 = vpop.f32.mrb[1].mxu0  ;;  %v4678_v4 = vmul.f32 %v10647_v27, %v10647_v27  ;;  %v4609_v49 = vsel %vm14172_vm0, %v10647_v27, 0.0 }
 0x303   : > { %4574 = vst.msk [vmem:[#allocation3] sm:$0xff] %vm14172_vm0, %v4414_v51  ;;  %v4676_v40 = vmul.f32 %v4414_v51, %v4414_v51  ;;  %v10648_v33 = vpop.f32.mrb[2].mxu0  ;;  %v4606_v43 = vsel %vm14172_vm0, %v4414_v51, 0.0 }
 0x304   : > { %4577 = vst.msk [vmem:[#allocation3 + $0x18] sm:$0xff] %vm14172_vm0, %v10648_v33  ;;  %v4417_v8 = vpop.f32.mrb[3].mxu0  ;;  %v4679_v12 = vmul.f32 %v10648_v33, %v10648_v33  ;;  %v4711_v57 = vsel %vm14172_vm0, %v4678_v4, 0.0  ;;  %v4611_v39 = vsel %vm14172_vm0, %v10648_v33, 0.0 }
 0x305   : > { %4575 = vst.msk [vmem:[#allocation3 + $0x8] sm:$0xff] %vm14172_vm0, %v4417_v8  ;;  %v4607_v46 = vsel %vm14172_vm0, %v4417_v8, 0.0  ;;  %v4677_v6 = vmul.f32 %v4417_v8, %v4417_v8  ;;  %v4708_v0 = vsel %vm14172_vm0, %v4676_v40, 0.0 }
 0x306   : > { %v4608_v34 = vadd.f32 %v4607_v46, %v4606_v43  ;;  %v4713_v48 = vsel %vm14172_vm0, %v4679_v12, 0.0 }
 0x307   : > { %v4709_v60 = vsel %vm14172_vm0, %v4677_v6, 0.0 }
 0x308   : > { %v4610_v17 = vadd.f32 %v4609_v49, %v4608_v34  ;;  %v4710_v9 = vadd.f32 %v4709_v60, %v4708_v0 }
 0x309   : > { %v10651_v38 = vpop.f32.mrb[4].mxu0 }
 0x30a   : > { %v4712_v15 = vadd.f32 %v4711_v57, %v4710_v9  ;;  %4580 = vst.msk [vmem:[#allocation3 + $0x30] sm:$0xff] %vm14172_vm0, %v10651_v38  ;;  %v4430_v30 = vpop.f32.mrb[5].mxu0  ;;  %v4612_v41 = vadd.f32 %v4611_v39, %v4610_v17  ;;  %v4682_v44 = vmul.f32 %v10651_v38, %v10651_v38  ;;  %v4617_v14 = vsel %vm14172_vm0, %v10651_v38, 0.0 }
 0x30b   : > { %4578 = vst.msk [vmem:[#allocation3 + $0x20] sm:$0xff] %vm14172_vm0, %v4430_v30  ;;  %v4613_v53 = vsel %vm14172_vm0, %v4430_v30, 0.0  ;;  %v4680_v45 = vmul.f32 %v4430_v30, %v4430_v30  ;;  %v10652_v36 = vpop.f32.mrb[6].mxu0 }
 0x30c   : > { %v4614_v35 = vadd.f32 %v4613_v53, %v4612_v41  ;;  %v4714_v13 = vadd.f32 %v4713_v48, %v4712_v15  ;;  %4581 = vst.msk [vmem:[#allocation3 + $0x38] sm:$0xff] %vm14172_vm0, %v10652_v36  ;;  %v4433_v10 = vpop.f32.mrb[7].mxu0  ;;  %v4683_v7 = vmul.f32 %v10652_v36, %v10652_v36  ;;  %v4719_v1 = vsel %vm14172_vm0, %v4682_v44, 0.0 }
 0x30d   : > { %v4715_v26 = vsel %vm14172_vm0, %v4680_v45, 0.0  ;;  %4579 = vst.msk [vmem:[#allocation3 + $0x28] sm:$0xff] %vm14172_vm0, %v4433_v10  ;;  %v4615_v29 = vsel %vm14172_vm0, %v4433_v10, 0.0  ;;  %v4681_v32 = vmul.f32 %v4433_v10, %v4433_v10  ;;  %v4619_v62 = vsel %vm14172_vm0, %v10652_v36, 0.0 }
 0x30e   : > { %v4716_v54 = vadd.f32 %v4715_v26, %v4714_v13  ;;  %v4616_v59 = vadd.f32 %v4615_v29, %v4614_v35  ;;  %v4721_v63 = vsel %vm14172_vm0, %v4683_v7, 0.0 }
 0x30f   : > { %v4717_v19 = vsel %vm14172_vm0, %v4681_v32, 0.0 }
 0x310   : > { %v4618_v11 = vadd.f32 %v4617_v14, %v4616_v59  ;;  %v4718_v42 = vadd.f32 %v4717_v19, %v4716_v54 }
 0x311   : > { %v10655_v5 = vpop.f32.mrb[8].mxu0 }
 0x312   : > { %v4720_v16 = vadd.f32 %v4719_v1, %v4718_v42  ;;  %4584 = vst.msk [vmem:[#allocation3 + $0x50] sm:$0xff] %vm14172_vm0, %v10655_v5  ;;  %v4446_v20 = vpop.f32.mrb[9].mxu0  ;;  %v4620_v37 = vadd.f32 %v4619_v62, %v4618_v11  ;;  %v4686_v21 = vmul.f32 %v10655_v5, %v10655_v5  ;;  %v4625_v8 = vsel %vm14172_vm0, %v10655_v5, 0.0 }
 0x313   : > { %4582 = vst.msk [vmem:[#allocation3 + $0x40] sm:$0xff] %vm14172_vm0, %v4446_v20  ;;  %v4621_v52 = vsel %vm14172_vm0, %v4446_v20, 0.0  ;;  %v4684_v24 = vmul.f32 %v4446_v20, %v4446_v20  ;;  %v10656_v23 = vpop.f32.mrb[10].mxu0 }
 0x314   : > { %v4622_v31 = vadd.f32 %v4621_v52, %v4620_v37  ;;  %v4722_v2 = vadd.f32 %v4721_v63, %v4720_v16  ;;  %4585 = vst.msk [vmem:[#allocation3 + $0x58] sm:$0xff] %vm14172_vm0, %v10656_v23  ;;  %v4449_v28 = vpop.f32.mrb[11].mxu0  ;;  %v4687_v4 = vmul.f32 %v10656_v23, %v10656_v23  ;;  %v4727_v34 = vsel %vm14172_vm0, %v4686_v21, 0.0 }
 0x315   : > { %v4723_v18 = vsel %vm14172_vm0, %v4684_v24, 0.0  ;;  %4583 = vst.msk [vmem:[#allocation3 + $0x48] sm:$0xff] %vm14172_vm0, %v4449_v28  ;;  %v4623_v27 = vsel %vm14172_vm0, %v4449_v28, 0.0  ;;  %v4685_v51 = vmul.f32 %v4449_v28, %v4449_v28  ;;  %v4627_v49 = vsel %vm14172_vm0, %v10656_v23, 0.0 }
 0x316   : > { %v4724_v40 = vadd.f32 %v4723_v18, %v4722_v2  ;;  %v4624_v33 = vadd.f32 %v4623_v27, %v4622_v31  ;;  %v4729_v9 = vsel %vm14172_vm0, %v4687_v4, 0.0 }
 0x317   : > { %v4725_v43 = vsel %vm14172_vm0, %v4685_v51, 0.0 }
 0x318   : > { %v4626_v46 = vadd.f32 %v4625_v8, %v4624_v33  ;;  %v4726_v6 = vadd.f32 %v4725_v43, %v4724_v40 }
 0x319   : > { %v10659_v0 = vpop.f32.mrb[12].mxu0 }
 0x31a   : > { %v4728_v12 = vadd.f32 %v4727_v34, %v4726_v6  ;;  %4588 = vst.msk [vmem:[#allocation3 + $0x70] sm:$0xff] %vm14172_vm0, %v10659_v0  ;;  %v4462_v60 = vpop.f32.mrb[13].mxu0  ;;  %v4628_v17 = vadd.f32 %v4627_v49, %v4626_v46  ;;  %v4690_v48 = vmul.f32 %v10659_v0, %v10659_v0  ;;  %v4633_v10 = vsel %vm14172_vm0, %v10659_v0, 0.0 }
 0x31b   : > { %4586 = vst.msk [vmem:[#allocation3 + $0x60] sm:$0xff] %vm14172_vm0, %v4462_v60  ;;  %v4629_v57 = vsel %vm14172_vm0, %v4462_v60, 0.0  ;;  %v4688_v39 = vmul.f32 %v4462_v60, %v4462_v60  ;;  %v10660_v38 = vpop.f32.mrb[14].mxu0 }
 0x31c   : > { %v4630_v15 = vadd.f32 %v4629_v57, %v4628_v17  ;;  %v4730_v30 = vadd.f32 %v4729_v9, %v4728_v12  ;;  %4589 = vst.msk [vmem:[#allocation3 + $0x78] sm:$0xff] %vm14172_vm0, %v10660_v38  ;;  %v4465_v41 = vpop.f32.mrb[15].mxu0  ;;  %v4691_v44 = vmul.f32 %v10660_v38, %v10660_v38  ;;  %v4735_v54 = vsel %vm14172_vm0, %v4690_v48, 0.0 }
 0x31d   : > { %v4731_v53 = vsel %vm14172_vm0, %v4688_v39, 0.0  ;;  %4587 = vst.msk [vmem:[#allocation3 + $0x68] sm:$0xff] %vm14172_vm0, %v4465_v41  ;;  %v4631_v45 = vsel %vm14172_vm0, %v4465_v41, 0.0  ;;  %v4689_v36 = vmul.f32 %v4465_v41, %v4465_v41  ;;  %v4635_v7 = vsel %vm14172_vm0, %v10660_v38, 0.0 }
 0x31e   : > { %v4732_v35 = vadd.f32 %v4731_v53, %v4730_v30  ;;  %v4632_v13 = vadd.f32 %v4631_v45, %v4630_v15  ;;  %v4737_v56 = vsel %vm14172_vm0, %v4691_v44, 0.0 }
 0x31f   : > { %v4733_v26 = vsel %vm14172_vm0, %v4689_v36, 0.0 }
 0x320   : > { %v4634_v29 = vadd.f32 %v4633_v10, %v4632_v13  ;;  %v4734_v32 = vadd.f32 %v4733_v26, %v4732_v35 }
 0x321   : > { %v10663_v59 = vpop.f32.mrb[16].mxu0 }
 0x322   : > { %v4736_v22 = vadd.f32 %v4735_v54, %v4734_v32  ;;  %4592 = vst.msk [vmem:[#allocation3 + $0x90] sm:$0xff] %vm14172_vm0, %v10663_v59  ;;  %v4478_v14 = vpop.f32.mrb[17].mxu0  ;;  %v4636_v19 = vadd.f32 %v4635_v7, %v4634_v29  ;;  %v4694_v5 = vmul.f32 %v10663_v59, %v10663_v59  ;;  %v4641_v37 = vsel %vm14172_vm0, %v10663_v59, 0.0 }
 0x323   : > { %4590 = vst.msk [vmem:[#allocation3 + $0x80] sm:$0xff] %vm14172_vm0, %v4478_v14  ;;  %v4637_v55 = vsel %vm14172_vm0, %v4478_v14, 0.0  ;;  %v4692_v11 = vmul.f32 %v4478_v14, %v4478_v14  ;;  %v10664_v42 = vpop.f32.mrb[18].mxu0 }
 0x324   : > { %v4638_v61 = vadd.f32 %v4637_v55, %v4636_v19  ;;  %v4738_v1 = vadd.f32 %v4737_v56, %v4736_v22  ;;  %4593 = vst.msk [vmem:[#allocation3 + $0x98] sm:$0xff] %vm14172_vm0, %v10664_v42  ;;  %v4481_v62 = vpop.f32.mrb[19].mxu0  ;;  %v4695_v52 = vmul.f32 %v10664_v42, %v10664_v42  ;;  %v4743_v3 = vsel %vm14172_vm0, %v4694_v5, 0.0 }
 0x325   : > { %v4739_v25 = vsel %vm14172_vm0, %v4692_v11, 0.0  ;;  %4591 = vst.msk [vmem:[#allocation3 + $0x88] sm:$0xff] %vm14172_vm0, %v4481_v62  ;;  %v4639_v50 = vsel %vm14172_vm0, %v4481_v62, 0.0  ;;  %v4693_v63 = vmul.f32 %v4481_v62, %v4481_v62  ;;  %v4643_v31 = vsel %vm14172_vm0, %v10664_v42, 0.0 }
 0x326   : > { %v4740_v16 = vadd.f32 %v4739_v25, %v4738_v1  ;;  %v4640_v20 = vadd.f32 %v4639_v50, %v4638_v61  ;;  %v4745_v27 = vsel %vm14172_vm0, %v4695_v52, 0.0 }
 0x327   : > { %v4741_v24 = vsel %vm14172_vm0, %v4693_v63, 0.0 }
 0x328   : > { %v4642_v23 = vadd.f32 %v4641_v37, %v4640_v20  ;;  %v4742_v47 = vadd.f32 %v4741_v24, %v4740_v16 }
 0x329   : > { %v10667_v2 = vpop.f32.mrb[20].mxu0 }
 0x32a   : > { %v4744_v28 = vadd.f32 %v4743_v3, %v4742_v47  ;;  %4596 = vst.msk [vmem:[#allocation3 + $0xb0] sm:$0xff] %vm14172_vm0, %v10667_v2  ;;  %v4494_v21 = vpop.f32.mrb[21].mxu0  ;;  %v4644_v18 = vadd.f32 %v4643_v31, %v4642_v23  ;;  %v4698_v46 = vmul.f32 %v10667_v2, %v10667_v2  ;;  %v4649_v60 = vsel %vm14172_vm0, %v10667_v2, 0.0 }
 0x32b   : > { %4594 = vst.msk [vmem:[#allocation3 + $0xa0] sm:$0xff] %vm14172_vm0, %v4494_v21  ;;  %v4645_v51 = vsel %vm14172_vm0, %v4494_v21, 0.0  ;;  %v4696_v40 = vmul.f32 %v4494_v21, %v4494_v21  ;;  %v10668_v33 = vpop.f32.mrb[22].mxu0 }
 0x32c   : > { %v4646_v8 = vadd.f32 %v4645_v51, %v4644_v18  ;;  %v4746_v4 = vadd.f32 %v4745_v27, %v4744_v28  ;;  %4597 = vst.msk [vmem:[#allocation3 + $0xb8] sm:$0xff] %vm14172_vm0, %v10668_v33  ;;  %v4497_v43 = vpop.f32.mrb[23].mxu0  ;;  %v4699_v17 = vmul.f32 %v10668_v33, %v10668_v33  ;;  %v4751_v38 = vsel %vm14172_vm0, %v4698_v46, 0.0 }
 0x32d   : > { %v4747_v6 = vsel %vm14172_vm0, %v4696_v40, 0.0  ;;  %4595 = vst.msk [vmem:[#allocation3 + $0xa8] sm:$0xff] %vm14172_vm0, %v4497_v43  ;;  %v4647_v34 = vsel %vm14172_vm0, %v4497_v43, 0.0  ;;  %v4697_v49 = vmul.f32 %v4497_v43, %v4497_v43  ;;  %v4651_v15 = vsel %vm14172_vm0, %v10668_v33, 0.0 }
 0x32e   : > { %v4748_v0 = vadd.f32 %v4747_v6, %v4746_v4  ;;  %v4648_v12 = vadd.f32 %v4647_v34, %v4646_v8  ;;  %v4753_v45 = vsel %vm14172_vm0, %v4699_v17, 0.0 }
 0x32f   : > { %v4749_v9 = vsel %vm14172_vm0, %v4697_v49, 0.0 }
 0x330   : > { %v4650_v57 = vadd.f32 %v4649_v60, %v4648_v12  ;;  %v4750_v39 = vadd.f32 %v4749_v9, %v4748_v0 }
 0x331   : > { %v10671_v30 = vpop.f32.mrb[24].mxu0 }
 0x332   : > { %v4752_v41 = vadd.f32 %v4751_v38, %v4750_v39  ;;  %4600 = vst.msk [vmem:[#allocation3 + $0xd0] sm:$0xff] %vm14172_vm0, %v10671_v30  ;;  %v4510_v48 = vpop.f32.mrb[25].mxu0  ;;  %v4652_v53 = vadd.f32 %v4651_v15, %v4650_v57  ;;  %v4702_v29 = vmul.f32 %v10671_v30, %v10671_v30  ;;  %v4657_v14 = vsel %vm14172_vm0, %v10671_v30, 0.0 }
 0x333   : > { %4598 = vst.msk [vmem:[#allocation3 + $0xc0] sm:$0xff] %vm14172_vm0, %v4510_v48  ;;  %v4653_v36 = vsel %vm14172_vm0, %v4510_v48, 0.0  ;;  %v4700_v35 = vmul.f32 %v4510_v48, %v4510_v48  ;;  %v10672_v13 = vpop.f32.mrb[26].mxu0 }
 0x334   : > { %v4654_v10 = vadd.f32 %v4653_v36, %v4652_v53  ;;  %v4754_v44 = vadd.f32 %v4753_v45, %v4752_v41  ;;  %4601 = vst.msk [vmem:[#allocation3 + $0xd8] sm:$0xff] %vm14172_vm0, %v10672_v13  ;;  %v4513_v26 = vpop.f32.mrb[27].mxu0  ;;  %v4703_v19 = vmul.f32 %v10672_v13, %v10672_v13  ;;  %v4759_v42 = vsel %vm14172_vm0, %v4702_v29, 0.0  ;;  %v12654_v29 = vld [vmem:[#allocation3 + $0x20] sm:$0xff] }
 0x335   : > { %v4755_v32 = vsel %vm14172_vm0, %v4700_v35, 0.0  ;;  %4599 = vst.msk [vmem:[#allocation3 + $0xc8] sm:$0xff] %vm14172_vm0, %v4513_v26  ;;  %v4655_v54 = vsel %vm14172_vm0, %v4513_v26, 0.0  ;;  %v4701_v7 = vmul.f32 %v4513_v26, %v4513_v26  ;;  %v4659_v61 = vsel %vm14172_vm0, %v10672_v13, 0.0  ;;  %v12646_v13 = vld [vmem:[#allocation3] sm:$0xff]  ;;  %v12652_v26 = vld [vmem:[#allocation3 + $0x8] sm:$0xff] }
 0x336   : > { %v4756_v59 = vadd.f32 %v4755_v32, %v4754_v44  ;;  %v4656_v22 = vadd.f32 %v4655_v54, %v4654_v10  ;;  %v4761_v50 = vsel %vm14172_vm0, %v4703_v19, 0.0  ;;  %v12648_v10 = vld [vmem:[#allocation3 + $0x10] sm:$0xff]  ;;  %v12650_v44 = vld [vmem:[#allocation3 + $0x18] sm:$0xff]  ;;  %v12664_v19 = vld [vmem:[#allocation3 + $0x40] sm:$0xff] }
 0x337   : > { %v4757_v56 = vsel %vm14172_vm0, %v4701_v7, 0.0  ;;  %v12656_v32 = vld [vmem:[#allocation3 + $0x30] sm:$0xff]  ;;  %v12658_v54 = vld [vmem:[#allocation3 + $0x38] sm:$0xff]  ;;  %v12660_v7 = vld [vmem:[#allocation3 + $0x28] sm:$0xff] }
 0x338   : > { %v4658_v55 = vadd.f32 %v4657_v14, %v4656_v22  ;;  %v4758_v11 = vadd.f32 %v4757_v56, %v4756_v59  ;;  %v12662_v14 = vld [vmem:[#allocation3 + $0x50] sm:$0xff]  ;;  %v12666_v56 = vld [vmem:[#allocation3 + $0x58] sm:$0xff] }
 0x339   : > { %v10675_v1 = vpop.f32.mrb[28].mxu0 }
 0x33a   : > { %v4760_v62 = vadd.f32 %v4759_v42, %v4758_v11  ;;  %4604 = vst.msk [vmem:[#allocation3 + $0xf0] sm:$0xff] %vm14172_vm0, %v10675_v1  ;;  %v4526_v5 = vpop.f32.mrb[29].mxu0  ;;  %v4660_v25 = vadd.f32 %v4659_v61, %v4658_v55  ;;  %v4706_v23 = vmul.f32 %v10675_v1, %v10675_v1  ;;  %v4665_v21 = vsel %vm14172_vm0, %v10675_v1, 0.0  ;;  %v12668_v55 = vld [vmem:[#allocation3 + $0x48] sm:$0xff] }
 0x33b   : > { %4602 = vst.msk [vmem:[#allocation3 + $0xe0] sm:$0xff] %vm14172_vm0, %v4526_v5  ;;  %v4661_v63 = vsel %vm14172_vm0, %v4526_v5, 0.0  ;;  %v4704_v16 = vmul.f32 %v4526_v5, %v4526_v5  ;;  %v10676_v20 = vpop.f32.mrb[30].mxu0  ;;  %v12678_v5 = vld [vmem:[#allocation3 + $0x60] sm:$0xff] }
 0x33c   : > { %v4662_v37 = vadd.f32 %v4661_v63, %v4660_v25  ;;  %v4762_v52 = vadd.f32 %v4761_v50, %v4760_v62  ;;  %4605 = vst.msk [vmem:[#allocation3 + $0xf8] sm:$0xff] %vm14172_vm0, %v10676_v20  ;;  %v4529_v24 = vpop.f32.mrb[31].mxu0  ;;  %v4707_v18 = vmul.f32 %v10676_v20, %v10676_v20  ;;  %v4767_v33 = vsel %vm14172_vm0, %v4706_v23, 0.0  ;;  %v12676_v62 = vld [vmem:[#allocation3 + $0x70] sm:$0xff]  ;;  %v12680_v25 = vld [vmem:[#allocation3 + $0x78] sm:$0xff] }
 0x33d   : > { %v4763_v47 = vsel %vm14172_vm0, %v4704_v16, 0.0  ;;  %4603 = vst.msk [vmem:[#allocation3 + $0xe8] sm:$0xff] %vm14172_vm0, %v4529_v24  ;;  %v4663_v3 = vsel %vm14172_vm0, %v4529_v24, 0.0  ;;  %v4705_v31 = vmul.f32 %v4529_v24, %v4529_v24  ;;  %v4667_v8 = vsel %vm14172_vm0, %v10676_v20, 0.0  ;;  %v12694_v24 = vld [vmem:[#allocation3 + $0x80] sm:$0xff] }
 0x33e   : > { %v4764_v2 = vadd.f32 %v4763_v47, %v4762_v52  ;;  %v4664_v28 = vadd.f32 %v4663_v3, %v4662_v37  ;;  %v4769_v46 = vsel %vm14172_vm0, %v4707_v18, 0.0  ;;  %v12690_v37 = vld [vmem:[#allocation3 + $0x68] sm:$0xff]  ;;  %v12692_v52 = vld [vmem:[#allocation3 + $0x90] sm:$0xff] }
 0x33f   : > { %v4765_v27 = vsel %vm14172_vm0, %v4705_v31, 0.0 }
 0x340   : > { %v4666_v51 = vadd.f32 %v4665_v21, %v4664_v28  ;;  %v4766_v40 = vadd.f32 %v4765_v27, %v4764_v2  ;;  %v12704_v2 = vld [vmem:[#allocation3 + $0x98] sm:$0xff]  ;;  %v4802_v28 = vld [vmem:[#allocation3 + $0x88] sm:$0xff]  ;;  %v12706_v21 = vld [vmem:[#allocation3 + $0xb0] sm:$0xff] }
 0x342   : > { %v4668_v4 = vadd.f32 %v4667_v8, %v4666_v51  ;;  %v4768_v43 = vadd.f32 %v4767_v33, %v4766_v40  ;;  %v4813_v59 = vld [vmem:[#allocation3 + $0xe0] sm:$0xff]  ;;  %v4808_v8 = vld [vmem:[#allocation3 + $0xb8] sm:$0xff] }
 0x343   : > { %v4805_v33 = vld [vmem:[#allocation3 + $0xa0] sm:$0xff] }
 0x344   : > { %v4669_v6 = vrot.slane %v4668_v4, 4  ;;  %v4770_v34 = vadd.f32 %v4769_v46, %v4768_v43  ;;  %v4814_v22 = vld [vmem:[#allocation3 + $0xe8] sm:$0xff] }
 0x346   : > { %v4670_v49 = vadd.f32 %v4669_v6, %v4668_v4  ;;  %v4771_v0 = vrot.slane %v4770_v34, 4  ;;  %v4806_v4 = vld [vmem:[#allocation3 + $0xa8] sm:$0xff] }
 0x348   : > { %v4671_v12 = vrot.slane %v4670_v49, 2  ;;  %v4772_v60 = vadd.f32 %v4771_v0, %v4770_v34  ;;  %v4809_v0 = vld [vmem:[#allocation3 + $0xc0] sm:$0xff] }
 0x34a   : > { %v4672_v17 = vadd.f32 %v4671_v12, %v4670_v49  ;;  %v4773_v9 = vrot.slane %v4772_v60, 2  ;;  %v4811_v49 = vld [vmem:[#allocation3 + $0xd0] sm:$0xff]  ;;  %v4810_v12 = vld [vmem:[#allocation3 + $0xc8] sm:$0xff] }
 0x34c   : > { %v4673_v57 = vrot.slane %v4672_v17, 1  ;;  %v4774_v39 = vadd.f32 %v4773_v9, %v4772_v60 }
 0x34e   : > { %v4674_v38 = vadd.f32 %v4673_v57, %v4672_v17  ;;  %v4775_v15 = vrot.slane %v4774_v39, 1 }
 0x350   : > { %v4776_v30 = vadd.f32 %v4775_v15, %v4774_v39  ;;  %v12642_v41 = vmul.f32 0.00390625, %v4674_v38  ;;  %v4812_v39 = vld [vmem:[#allocation3 + $0xd8] sm:$0xff]  ;;  %v4815_v38 = vld [vmem:[#allocation3 + $0xf0] sm:$0xff] }
 0x351   : > { %v4816_v15 = vld [vmem:[#allocation3 + $0xf8] sm:$0xff] }
 0x352   : > { %v4779_v48 = vmul.f32 0.00390625, %v4776_v30  ;;  %v4780_v53 = vmul.f32 %v12642_v41, %v12642_v41  ;;  %v4845_v11 = vsub.f32 %v4813_v59, %v12642_v41  ;;  %v4846_v42 = vsub.f32 %v4814_v22, %v12642_v41 }
 0x353   : > { %v4817_v61 = vsub.f32 %v12646_v13, %v12642_v41  ;;  %v4818_v1 = vsub.f32 %v12652_v26, %v12642_v41  ;;  %v4819_v50 = vsub.f32 %v12648_v10, %v12642_v41  ;;  %v4820_v63 = vsub.f32 %v12650_v44, %v12642_v41 }
 0x354   : > { %v4781_v45 = vsub.f32 %v4779_v48, %v4780_v53  ;;  %v4821_v16 = vsub.f32 %v12654_v29, %v12642_v41  ;;  %v4822_v20 = vsub.f32 %v12660_v7, %v12642_v41  ;;  %v4823_v23 = vsub.f32 %v12656_v32, %v12642_v41 }
 0x355   : > { %v4824_v47 = vsub.f32 %v12658_v54, %v12642_v41  ;;  %v4825_v3 = vsub.f32 %v12664_v19, %v12642_v41  ;;  %v4826_v31 = vsub.f32 %v12668_v55, %v12642_v41  ;;  %v4827_v18 = vsub.f32 %v12662_v14, %v12642_v41 }
 0x356   : > { %v4782_v36 = vmax.f32 %v4781_v45, 0.0  ;;  %v4828_v27 = vsub.f32 %v12666_v56, %v12642_v41  ;;  %v4829_v51 = vsub.f32 %v12678_v5, %v12642_v41  ;;  %v4830_v40 = vsub.f32 %v12690_v37, %v12642_v41 }
 0x357   : > { %v4831_v43 = vsub.f32 %v12676_v62, %v12642_v41  ;;  %v4832_v46 = vsub.f32 %v12680_v25, %v12642_v41  ;;  %v4833_v6 = vsub.f32 %v12694_v24, %v12642_v41  ;;  %v4834_v34 = vsub.f32 %v4802_v28, %v12642_v41 }
 0x358   : > { %v4783_v35 = vadd.f32 1e-05, %v4782_v36  ;;  %v4835_v60 = vsub.f32 %v12692_v52, %v12642_v41  ;;  %v4836_v17 = vsub.f32 %v12704_v2, %v12642_v41  ;;  %v4837_v9 = vsub.f32 %v4805_v33, %v12642_v41 }
 0x359   : > { %v4838_v57 = vsub.f32 %v4806_v4, %v12642_v41  ;;  %v4839_v30 = vsub.f32 %v12706_v21, %v12642_v41  ;;  %v4840_v48 = vsub.f32 %v4808_v8, %v12642_v41  ;;  %v4841_v53 = vsub.f32 %v4809_v0, %v12642_v41 }
 0x35a   : > { %11528 = vrsqrt.f32 %v4783_v35  ;;  %v4842_v45 = vsub.f32 %v4810_v12, %v12642_v41  ;;  %v4843_v35 = vsub.f32 %v4811_v49, %v12642_v41  ;;  %v4844_v13 = vsub.f32 %v4812_v39, %v12642_v41 }
 0x35b   : > { %v4847_v10 = vsub.f32 %v4815_v38, %v12642_v41  ;;  %v4848_v44 = vsub.f32 %v4816_v15, %v12642_v41 }
 0x364   : > { %v11529_v36 = vpop.eup %11528 }
 0x365   : > { %v4877_v26 = vmul.f32 %v11529_v36, %v4845_v11  ;;  %v4878_v29 = vmul.f32 %v11529_v36, %v4846_v42  ;;  %v12738_v32 = vmul.f32 %v11529_v36, %v4817_v61  ;;  %v12740_v54 = vmul.f32 %v11529_v36, %v4818_v1 }
 0x366   : > { %v12742_v7 = vmul.f32 %v11529_v36, %v4819_v50  ;;  %v12744_v59 = vmul.f32 %v11529_v36, %v4820_v63  ;;  %v12746_v22 = vmul.f32 %v11529_v36, %v4821_v16  ;;  %v12748_v14 = vmul.f32 %v11529_v36, %v4822_v20 }
 0x367   : > { %vm4909_vm7 = vcmp.ge.f32.partialorder %v4877_v26, 0.0  ;;  %vm4910_vm8 = vcmp.ge.f32.partialorder %v4878_v29, 0.0  ;;  %v4941_v19 = vmul.f32 0.2, %v4877_v26  ;;  %v4942_v56 = vmul.f32 0.2, %v4878_v29 }
 0x368   : > { %v12750_v55 = vmul.f32 %v11529_v36, %v4823_v23  ;;  %v12752_v41 = vmul.f32 %v11529_v36, %v4824_v47  ;;  %v12754_v11 = vmul.f32 %v11529_v36, %v4825_v3  ;;  %v12756_v42 = vmul.f32 %v11529_v36, %v4826_v31 }
 0x369   : > { %v4973_v61 = vsel %vm4909_vm7, %v4877_v26, %v4941_v19  ;;  %v4974_v1 = vsel %vm4910_vm8, %v4878_v29, %v4942_v56  ;;  %v12758_v62 = vmul.f32 %v11529_v36, %v4827_v18  ;;  %v12760_v5 = vmul.f32 %v11529_v36, %v4828_v27 }
 0x36a   : > { %v4991_v25 = vpack.c.bf16 %v4974_v1, %v4973_v61  ;;  %v12762_v50 = vmul.f32 %v11529_v36, %v4829_v51  ;;  %v12764_v63 = vmul.f32 %v11529_v36, %v4830_v40  ;;  %v12766_v16 = vmul.f32 %v11529_v36, %v4831_v43 }
 0x36b   : > { %v12768_v20 = vmul.f32 %v11529_v36, %v4832_v46  ;;  %v12770_v37 = vmul.f32 %v11529_v36, %v4833_v6  ;;  %v12772_v52 = vmul.f32 %v11529_v36, %v4834_v34  ;;  %v12774_v24 = vmul.f32 %v11529_v36, %v4835_v60 }
 0x36c   : > { %v5023_v23 = vrot.slane %v4991_v25, 4  ;;  %v12776_v47 = vmul.f32 %v11529_v36, %v4836_v17  ;;  %v12778_v3 = vmul.f32 %v11529_v36, %v4837_v9  ;;  %v12780_v31 = vmul.f32 %v11529_v36, %v4838_v57 }
 0x36d   : > { %v12782_v2 = vmul.f32 %v11529_v36, %v4839_v30  ;;  %v12784_v28 = vmul.f32 %v11529_v36, %v4840_v48  ;;  %v12786_v21 = vmul.f32 %v11529_v36, %v4841_v53  ;;  %v12788_v18 = vmul.f32 %v11529_v36, %v4842_v45 }
 0x36e   : > { %5069 = vst.msk [vmem:[#allocation2 + $0xf0] sm:$0xf0] %vm14176_vm2, %v5023_v23  ;;  %v12792_v27 = vmul.f32 %v11529_v36, %v4843_v35  ;;  %v12794_v51 = vmul.f32 %v11529_v36, %v4844_v13  ;;  %v12796_v40 = vmul.f32 %v11529_v36, %v4847_v10  ;;  %v12798_v33 = vmul.f32 %v11529_v36, %v4848_v44 }
 0x36f   : > { %5070 = vst.msk [vmem:[#allocation2 + $0xf8] sm:$0xf] %vm14175_vm1, %v5023_v23  ;;  %vm4881_vm9 = vcmp.ge.f32.partialorder %v12738_v32, 0.0  ;;  %vm4882_vm10 = vcmp.ge.f32.partialorder %v12740_v54, 0.0  ;;  %vm4883_vm11 = vcmp.ge.f32.partialorder %v12742_v7, 0.0  ;;  %vm4884_vm12 = vcmp.ge.f32.partialorder %v12744_v59, 0.0 }
 0x370   : > { %vm4885_vm13 = vcmp.ge.f32.partialorder %v12746_v22, 0.0  ;;  %vm4886_vm14 = vcmp.ge.f32.partialorder %v12748_v14, 0.0  ;;  %vm4887_vm15 = vcmp.ge.f32.partialorder %v12750_v55, 0.0  ;;  %vm4888_vm7 = vcmp.ge.f32.partialorder %v12752_v41, 0.0 }
 0x371   : > { %vm4892_vm0 = vcmp.ge.f32.partialorder %v12760_v5, 0.0  ;;  %v4913_v8 = vmul.f32 0.2, %v12738_v32  ;;  %v4914_v4 = vmul.f32 0.2, %v12740_v54  ;;  %vm4897_vm8 = vcmp.ge.f32.partialorder %v12770_v37, 0.0 }
 0x372   : > { %vm4898_vm6 = vcmp.ge.f32.partialorder %v12772_v52, 0.0  ;;  %v4915_v43 = vmul.f32 0.2, %v12742_v7  ;;  %v4916_v46 = vmul.f32 0.2, %v12744_v59  ;;  %vm4903_vm2 = vcmp.ge.f32.partialorder %v12782_v2, 0.0 }
 0x373   : > { %v4917_v6 = vmul.f32 0.2, %v12746_v22  ;;  %v4918_v34 = vmul.f32 0.2, %v12748_v14  ;;  %v4919_v49 = vmul.f32 0.2, %v12750_v55  ;;  %v12834_v12 = vsel %vm4881_vm9, %v12738_v32, %v4913_v8 }
 0x374   : > { %v4920_v0 = vmul.f32 0.2, %v12752_v41  ;;  %vm4906_vm3 = vcmp.ge.f32.partialorder %v12788_v18, 0.0  ;;  %vm4907_vm4 = vcmp.ge.f32.partialorder %v12792_v27, 0.0  ;;  %v4921_v60 = vmul.f32 0.2, %v12754_v11 }
 0x375   : > { %v4922_v17 = vmul.f32 0.2, %v12756_v42  ;;  %v4923_v9 = vmul.f32 0.2, %v12758_v62  ;;  %v12846_v57 = vsel %vm4882_vm10, %v12740_v54, %v4914_v4  ;;  %vm4908_vm9 = vcmp.ge.f32.partialorder %v12794_v51, 0.0 }
 0x376   : > { %vm4911_vm5 = vcmp.ge.f32.partialorder %v12796_v40, 0.0  ;;  %vm4912_vm1 = vcmp.ge.f32.partialorder %v12798_v33, 0.0  ;;  %v4924_v39 = vmul.f32 0.2, %v12760_v5  ;;  %v4925_v38 = vmul.f32 0.2, %v12762_v50 }
 0x377   : > { %v4926_v15 = vmul.f32 0.2, %v12764_v63  ;;  %v4947_v30 = vsel %vm4883_vm11, %v12742_v7, %v4915_v43  ;;  %v4927_v48 = vmul.f32 0.2, %v12766_v16  ;;  %v4928_v53 = vmul.f32 0.2, %v12768_v20 }
 0x378   : > { %v4929_v45 = vmul.f32 0.2, %v12770_v37  ;;  %v4948_v36 = vsel %vm4884_vm12, %v12744_v59, %v4916_v46  ;;  %v4930_v35 = vmul.f32 0.2, %v12772_v52  ;;  %v4931_v13 = vmul.f32 0.2, %v12774_v24 }
 0x379   : > { %v4932_v10 = vmul.f32 0.2, %v12776_v47  ;;  %v4949_v44 = vsel %vm4885_vm13, %v12746_v22, %v4917_v6  ;;  %v4933_v26 = vmul.f32 0.2, %v12778_v3  ;;  %v4934_v29 = vmul.f32 0.2, %v12780_v31 }
 0x37a   : > { %v4935_v32 = vmul.f32 0.2, %v12782_v2  ;;  %v4950_v54 = vsel %vm4886_vm14, %v12748_v14, %v4918_v34  ;;  %v4936_v7 = vmul.f32 0.2, %v12784_v28  ;;  %v4937_v59 = vmul.f32 0.2, %v12786_v21 }
 0x37b   : > { %v4938_v19 = vmul.f32 0.2, %v12788_v18  ;;  %v4951_v22 = vsel %vm4887_vm15, %v12750_v55, %v4919_v49  ;;  %v4939_v56 = vmul.f32 0.2, %v12792_v27  ;;  %v4940_v61 = vmul.f32 0.2, %v12794_v51 }
 0x37c   : > { %v4943_v1 = vmul.f32 0.2, %v12796_v40  ;;  %v4952_v14 = vsel %vm4888_vm7, %v12752_v41, %v4920_v0  ;;  %v4944_v25 = vmul.f32 0.2, %v12798_v33  ;;  %vm14178_vm10 = vcmp.ge.f32.partialorder %v12754_v11, 0.0 }
 0x37d   : > { %v4953_v23 = vsel %vm14178_vm10, %v12754_v11, %v4921_v60  ;;  %vm14179_vm11 = vcmp.ge.f32.partialorder %v12756_v42, 0.0  ;;  %vm14180_vm12 = vcmp.ge.f32.partialorder %v12758_v62, 0.0  ;;  %v4956_v4 = vsel %vm4892_vm0, %v12760_v5, %v4924_v39 }
 0x37e   : > { %v4954_v55 = vsel %vm14179_vm11, %v12756_v42, %v4922_v17  ;;  %v4955_v8 = vsel %vm14180_vm12, %v12758_v62, %v4923_v9  ;;  %vm14181_vm13 = vcmp.ge.f32.partialorder %v12762_v50, 0.0  ;;  %vm14182_vm14 = vcmp.ge.f32.partialorder %v12764_v63, 0.0 }
 0x37f   : > { %v4957_v41 = vsel %vm14181_vm13, %v12762_v50, %v4925_v38  ;;  %v4958_v11 = vsel %vm14182_vm14, %v12764_v63, %v4926_v15  ;;  %vm14183_vm15 = vcmp.ge.f32.partialorder %v12766_v16, 0.0  ;;  %vm14184_vm7 = vcmp.ge.f32.partialorder %v12768_v20, 0.0 }
 0x380   : > { %v4959_v42 = vsel %vm14183_vm15, %v12766_v16, %v4927_v48  ;;  %v4960_v62 = vsel %vm14184_vm7, %v12768_v20, %v4928_v53  ;;  %v4961_v5 = vsel %vm4897_vm8, %v12770_v37, %v4929_v45  ;;  %v4962_v50 = vsel %vm4898_vm6, %v12772_v52, %v4930_v35 }
 0x381   : > { %vm14185_vm0 = vcmp.ge.f32.partialorder %v12774_v24, 0.0  ;;  %vm14186_vm10 = vcmp.ge.f32.partialorder %v12776_v47, 0.0  ;;  %vm14187_vm11 = vcmp.ge.f32.partialorder %v12778_v3, 0.0  ;;  %vm14188_vm12 = vcmp.ge.f32.partialorder %v12780_v31, 0.0 }
 0x382   : > { %v4963_v63 = vsel %vm14185_vm0, %v12774_v24, %v4931_v13  ;;  %v4964_v16 = vsel %vm14186_vm10, %v12776_v47, %v4932_v10  ;;  %v4965_v20 = vsel %vm14187_vm11, %v12778_v3, %v4933_v26  ;;  %v4966_v37 = vsel %vm14188_vm12, %v12780_v31, %v4934_v29 }
 0x383   : > { %v4967_v52 = vsel %vm4903_vm2, %v12782_v2, %v4935_v32  ;;  %vm14189_vm6 = vcmp.ge.f32.partialorder %v12784_v28, 0.0  ;;  %vm14190_vm8 = vcmp.ge.f32.partialorder %v12786_v21, 0.0  ;;  %v4970_v3 = vsel %vm4906_vm3, %v12788_v18, %v4938_v19 }
 0x384   : > { %v4968_v24 = vsel %vm14189_vm6, %v12784_v28, %v4936_v7  ;;  %v4969_v47 = vsel %vm14190_vm8, %v12786_v21, %v4937_v59  ;;  %v4971_v31 = vsel %vm4907_vm4, %v12792_v27, %v4939_v56  ;;  %v4972_v2 = vsel %vm4908_vm9, %v12794_v51, %v4940_v61 }
 0x385   : > { %v4975_v28 = vsel %vm4911_vm5, %v12796_v40, %v4943_v1  ;;  %v4976_v21 = vsel %vm4912_vm1, %v12798_v33, %v4944_v25  ;;  %v4977_v43 = vpack.c.bf16 %v12846_v57, %v12834_v12  ;;  %v4978_v18 = vpack.c.bf16 %v4948_v36, %v4947_v30  ;;  %v13004_v25 = vld [vmem:[%s14168_s2 + $0x4] sm:$0x3] }
 0x386   : > { %v4979_v46 = vpack.c.bf16 %v4950_v54, %v4949_v44  ;;  %v4980_v6 = vpack.c.bf16 %v4952_v14, %v4951_v22  ;;  %v4981_v34 = vpack.c.bf16 %v4954_v55, %v4953_v23  ;;  %v4982_v27 = vpack.c.bf16 %v4956_v4, %v4955_v8 }
 0x387   : > { %v4983_v49 = vpack.c.bf16 %v4958_v11, %v4957_v41  ;;  %v4984_v0 = vpack.c.bf16 %v4960_v62, %v4959_v42  ;;  %v4985_v60 = vpack.c.bf16 %v4962_v50, %v4961_v5  ;;  %v4986_v51 = vpack.c.bf16 %v4964_v16, %v4963_v63 }
 0x388   : > { %v4987_v17 = vpack.c.bf16 %v4966_v37, %v4965_v20  ;;  %v4988_v9 = vpack.c.bf16 %v4968_v24, %v4967_v52  ;;  %v4989_v39 = vpack.c.bf16 %v4970_v3, %v4969_v47  ;;  %v4990_v40 = vpack.c.bf16 %v4972_v2, %v4971_v31 }
 0x389   : > { %v4992_v38 = vpack.c.bf16 %v4976_v21, %v4975_v28  ;;  %v5009_v15 = vrot.slane %v4977_v43, 4  ;;  %v5010_v48 = vrot.slane %v4978_v18, 4  ;;  %v5011_v33 = vrot.slane %v4979_v46, 4 }
 0x38a   : > { %v5012_v53 = vrot.slane %v4980_v6, 4  ;;  %v5013_v45 = vrot.slane %v4981_v34, 4  ;;  %v5014_v12 = vrot.slane %v4982_v27, 4  ;;  %v5015_v57 = vrot.slane %v4983_v49, 4 }
 0x38b   : > { %v5016_v30 = vrot.slane %v4984_v0, 4  ;;  %v5017_v36 = vrot.slane %v4985_v60, 4  ;;  %v5018_v35 = vrot.slane %v4986_v51, 4  ;;  %vm14191_vm1 = vcmask 31748  }
 0x38c   : > { %5041 = vst.msk [vmem:[#allocation2 + $0x10] sm:$0xf0] %vm14191_vm1, %v5009_v15  ;;  %vm14192_vm2 = vcmask 27648   ;;  %vm14193_vm3 = vmmov %vm14191_vm1  ;;  %v5019_v13 = vrot.slane %v4987_v17, 4  ;;  %v5020_v10 = vrot.slane %v4988_v9, 4  ;;  %v5021_v44 = vrot.slane %v4989_v39, 4 }
 0x38d   : > { %5042 = vst.msk [vmem:[#allocation2 + $0x18] sm:$0xf] %vm14192_vm2, %v5009_v15  ;;  %vm14194_vm4 = vmmov %vm14192_vm2  ;;  %v5022_v26 = vrot.slane %v4990_v40, 4  ;;  %v5024_v29 = vrot.slane %v4992_v38, 4 }
 0x38e   : > { %5043 = vst.msk [vmem:[#allocation2 + $0x20] sm:$0xf0] %vm14193_vm3, %v5010_v48  ;;  %vm14195_vm5 = vmmov %vm14191_vm1 }
 0x38f   : > { %5044 = vst.msk [vmem:[#allocation2 + $0x28] sm:$0xf] %vm14194_vm4, %v5010_v48  ;;  %vm14196_vm9 = vmmov %vm14192_vm2 }
 0x390   : > { %5045 = vst.msk [vmem:[#allocation2 + $0x30] sm:$0xf0] %vm14195_vm5, %v5011_v33  ;;  %vm14197_vm13 = vmmov %vm14191_vm1 }
 0x391   : > { %5046 = vst.msk [vmem:[#allocation2 + $0x38] sm:$0xf] %vm14196_vm9, %v5011_v33  ;;  %vm14198_vm14 = vmmov %vm14192_vm2 }
 0x392   : > { %5047 = vst.msk [vmem:[#allocation2 + $0x40] sm:$0xf0] %vm14197_vm13, %v5012_v53  ;;  %vm14199_vm15 = vmmov %vm14191_vm1 }
 0x393   : > { %5048 = vst.msk [vmem:[#allocation2 + $0x48] sm:$0xf] %vm14198_vm14, %v5012_v53  ;;  %vm14200_vm7 = vmmov %vm14192_vm2  ;;  %v12988_v54 = vld [vmem:[#allocation2 + $0x10] sm:$0xf0] }
 0x394   : > { %5049 = vst.msk [vmem:[#allocation2 + $0x50] sm:$0xf0] %vm14199_vm15, %v5013_v45  ;;  %vm14201_vm0 = vmmov %vm14191_vm1  ;;  %v12986_v32 = vld [vmem:[#allocation2 + $0x18] sm:$0xf]  ;;  %v5430_v59 = vrot.slane %v12988_v54, 4 }
 0x395   : > { %5050 = vst.msk [vmem:[#allocation2 + $0x58] sm:$0xf] %vm14200_vm7, %v5013_v45  ;;  %vm14202_vm10 = vmmov %vm14192_vm2  ;;  %v5431_v19 = vrot.slane %v12986_v32, 4  ;;  %v12994_v22 = vld [vmem:[#allocation2 + $0x20] sm:$0xf0] }
 0x396   : > { %5051 = vst.msk [vmem:[#allocation2 + $0x60] sm:$0xf0] %vm14201_vm0, %v5014_v12  ;;  %vm14203_vm11 = vmmov %vm14201_vm0  ;;  %v12990_v7 = vld [vmem:[#allocation2 + $0x28] sm:$0xf]  ;;  %v5433_v61 = vrot.slane %v12994_v22, 4 }
 0x397   : > { %5052 = vst.msk [vmem:[#allocation2 + $0x68] sm:$0xf] %vm14202_vm10, %v5014_v12  ;;  %vm14204_vm12 = vmmov %vm14192_vm2  ;;  %v5434_v1 = vrot.slane %v12990_v7, 4  ;;  %v13010_v8 = vld [vmem:[#allocation2 + $0x30] sm:$0xf0] }
 0x398   : > { %5053 = vst.msk [vmem:[#allocation2 + $0x70] sm:$0xf0] %vm14203_vm11, %v5015_v57  ;;  %vm14205_vm6 = vmmov %vm14201_vm0  ;;  %v13008_v55 = vld [vmem:[#allocation2 + $0x38] sm:$0xf]  ;;  %v5436_v41 = vrot.slane %v13010_v8, 4 }
 0x399   : > { %5054 = vst.msk [vmem:[#allocation2 + $0x78] sm:$0xf] %vm14204_vm12, %v5015_v57  ;;  %vm14206_vm8 = vmmov %vm14192_vm2  ;;  %v13015_v4 = vld [vmem:[#allocation2 + $0x40] sm:$0xf0]  ;;  %v5437_v11 = vrot.slane %v13008_v55, 4 }
 0x39a   : > { %5055 = vst.msk [vmem:[#allocation2 + $0x80] sm:$0xf0] %vm14205_vm6, %v5016_v30  ;;  %vm14207_vm1 = vmmov %vm14201_vm0  ;;  %vm14219_vm6 = vcmask 1041408   ;;  %v5439_v42 = vrot.slane %v13015_v4, 4 }
 0x39b   : > { %5056 = vst.msk [vmem:[#allocation2 + $0x88] sm:$0xf] %vm14206_vm8, %v5016_v30  ;;  %vm14208_vm3 = vmmov %vm14201_vm0  ;;  %v5740_v56 = vsel %vm14219_vm6, %v12555_v58, 0  ;;  %vm14220_vm8 = vcmask 1043456   ;;  %v13013_v58 = vld [vmem:[#allocation2 + $0x48] sm:$0xf] }
 0x39c   : > { %5057 = vst.msk [vmem:[#allocation2 + $0x90] sm:$0xf0] %vm14207_vm1, %v5017_v36  ;;  %vm14209_vm4 = vmmov %vm14192_vm2  ;;  %v5432_v14 = vsel %vm14220_vm8, %v5430_v59, %v5431_v19  ;;  %vm14221_vm1 = vcmask 31744   ;;  %v5440_v62 = vrot.slane %v13013_v58, 4  ;;  %v13026_v63 = vld [vmem:[#allocation2 + $0x58] sm:$0xf] }
 0x39d   : > { %5058 = vst.msk [vmem:[#allocation2 + $0x98] sm:$0xf] %vm14192_vm2, %v5017_v36  ;;  %vm14210_vm5 = vmmov %vm14201_vm0  ;;  %10680 = vmatmul.mubr.msk.bf16.vlgmr.msra.gmra.mrb[0].mxu1 %vm14221_vm1, %v5432_v14  ;;  %v13028_v16 = vld [vmem:[#allocation2 + $0x50] sm:$0xf0]  ;;  %v13033_v37 = vld [vmem:[#allocation2 + $0x60] sm:$0xf0] }
 0x39e   : > { %5059 = vst.msk [vmem:[#allocation2 + $0xa0] sm:$0xf0] %vm14208_vm3, %v5018_v35  ;;  %vm14211_vm9 = vmmov %vm14192_vm2  ;;  %10712 = vmatpush3.bf16.msra.mxu1 %v5740_v56  ;;  %v13031_v20 = vld [vmem:[#allocation2 + $0x68] sm:$0xf]  ;;  %v5442_v52 = vrot.slane %v13028_v16, 4  ;;  %v5443_v24 = vrot.slane %v13026_v63, 4 }
 0x39f   : > { %5060 = vst.msk [vmem:[#allocation2 + $0xa8] sm:$0xf] %vm14209_vm4, %v5018_v35  ;;  %vm14212_vm13 = vmmov %vm14201_vm0  ;;  %v5445_v47 = vrot.slane %v13033_v37, 4  ;;  %v5446_v3 = vrot.slane %v13031_v20, 4  ;;  %v13044_v21 = vld [vmem:[#allocation2 + $0x70] sm:$0xf0] }
 0x3a0   : > { %5061 = vst.msk [vmem:[#allocation2 + $0xb0] sm:$0xf0] %vm14210_vm5, %v5019_v13  ;;  %vm14213_vm14 = vmmov %vm14192_vm2  ;;  %v13042_v28 = vld [vmem:[#allocation2 + $0x78] sm:$0xf]  ;;  %v5448_v46 = vrot.slane %v13044_v21, 4 }
 0x3a1   : > { %5062 = vst.msk [vmem:[#allocation2 + $0xb8] sm:$0xf] %vm14211_vm9, %v5019_v13  ;;  %vm14214_vm15 = vmmov %vm14201_vm0  ;;  %v13049_v18 = vld [vmem:[#allocation2 + $0x80] sm:$0xf0]  ;;  %v5449_v6 = vrot.slane %v13042_v28, 4 }
 0x3a2   : > { %5063 = vst.msk [vmem:[#allocation2 + $0xc0] sm:$0xf0] %vm14212_vm13, %v5020_v10  ;;  %vm14215_vm7 = vmmov %vm14192_vm2  ;;  %v13047_v43 = vld [vmem:[#allocation2 + $0x88] sm:$0xf]  ;;  %v5451_v34 = vrot.slane %v13049_v18, 4 }
 0x3a3   : > { %5064 = vst.msk [vmem:[#allocation2 + $0xc8] sm:$0xf] %vm14213_vm14, %v5020_v10  ;;  %vm14216_vm10 = vmmov %vm14192_vm2  ;;  %v5452_v27 = vrot.slane %v13047_v43, 4  ;;  %v13060_v51 = vld [vmem:[#allocation2 + $0x90] sm:$0xf0] }
 0x3a4   : > { %5065 = vst.msk [vmem:[#allocation2 + $0xd0] sm:$0xf0] %vm14214_vm15, %v5021_v44  ;;  %vm14217_vm11 = vmmov %vm14201_vm0  ;;  %v13058_v60 = vld [vmem:[#allocation2 + $0x98] sm:$0xf]  ;;  %v5454_v39 = vrot.slane %v13060_v51, 4 }
 0x3a5   : > { %5066 = vst.msk [vmem:[#allocation2 + $0xd8] sm:$0xf] %vm14215_vm7, %v5021_v44  ;;  %vm14218_vm12 = vmmov %vm14192_vm2  ;;  %v13065_v9 = vld [vmem:[#allocation2 + $0xa0] sm:$0xf0]  ;;  %v5455_v40 = vrot.slane %v13058_v60, 4 }
 0x3a6   : > { %5067 = vst.msk [vmem:[#allocation2 + $0xe0] sm:$0xf0] %vm14201_vm0, %v5022_v26  ;;  %vm14222_vm2 = vmmov %vm14220_vm8  ;;  %v13063_v17 = vld [vmem:[#allocation2 + $0xa8] sm:$0xf]  ;;  %v5457_v38 = vrot.slane %v13065_v9, 4 }
 0x3a7   : > { %5068 = vst.msk [vmem:[#allocation2 + $0xe8] sm:$0xf] %vm14216_vm10, %v5022_v26  ;;  %v5435_v23 = vsel %vm14222_vm2, %v5433_v61, %v5434_v1  ;;  %vm14223_vm3 = vmmov %vm14221_vm1  ;;  %v5458_v15 = vrot.slane %v13063_v17, 4  ;;  %v13076_v45 = vld [vmem:[#allocation2 + $0xb0] sm:$0xf0] }
 0x3a8   : > { %5071 = vst.msk [vmem:[#allocation2 + $0x100] sm:$0xf0] %vm14217_vm11, %v5024_v29  ;;  %10683 = vmatprep.mubr.msk.bf16.mxu1 %vm14223_vm3, %v5435_v23  ;;  %vm14224_vm4 = vmmov %vm14219_vm6  ;;  %v13074_v53 = vld [vmem:[#allocation2 + $0xb8] sm:$0xf]  ;;  %v5460_v30 = vrot.slane %v13076_v45, 4 }
 0x3a9   : > { %5072 = vst.msk [vmem:[#allocation2 + $0x108] sm:$0xf] %vm14218_vm12, %v5024_v29  ;;  %11506 = vmatprep.subr.msk.bf16.mxu1 %vm14224_vm4, %v13004_v25  ;;  %vm14225_vm5 = vmmov %vm14222_vm2  ;;  %v13081_v57 = vld [vmem:[#allocation2 + $0xc0] sm:$0xf0]  ;;  %v5461_v36 = vrot.slane %v13074_v53, 4 }
 0x3aa   : > { %v5438_v5 = vsel %vm14225_vm5, %v5436_v41, %v5437_v11  ;;  %vm14226_vm9 = vmmov %vm14221_vm1  ;;  %v13079_v12 = vld [vmem:[#allocation2 + $0xc8] sm:$0xf]  ;;  %v5463_v35 = vrot.slane %v13081_v57, 4  ;;  %v5075_v10 = vld [vmem:[#allocation2] sm:$0xf8] }
 0x3ab   : > { %10684 = vmatmul.mubr.msk.bf16.gmra.mrb[4].mxu1 %vm14226_vm9, %v5438_v5  ;;  %vm14227_vm13 = vmmov %vm14222_vm2  ;;  %v5464_v13 = vrot.slane %v13079_v12, 4  ;;  %v11532_v26 = vld [vmem:[#allocation2 + $0x8] sm:$0xf]  ;;  %v13092_v61 = vld [vmem:[#allocation2 + $0xd0] sm:$0xf0]  ;;  %v5108_v23 = vshrl.u32 %v5075_v10, 16 }
 0x3ac   : > { %v5441_v50 = vsel %vm14227_vm13, %v5439_v42, %v5440_v62  ;;  %vm14228_vm14 = vmmov %vm14221_vm1  ;;  %v5116_v29 = vshrl.u32 %v11532_v26, 16  ;;  %v5119_v59 = vshll.u32 %v11532_v26, 16  ;;  %v13090_v56 = vld [vmem:[#allocation2 + $0xd8] sm:$0xf]  ;;  %v5111_v41 = vshll.u32 %v5075_v10, 16 }
 0x3ad   : > { %10687 = vmatprep.mubr.msk.bf16.mxu1 %vm14228_vm14, %v5441_v50  ;;  %vm14229_vm15 = vmmov %vm14222_vm2  ;;  %v13097_v14 = vld [vmem:[#allocation2 + $0xe0] sm:$0xf0]  ;;  %v5466_v11 = vrot.slane %v13092_v61, 4  ;;  %v5467_v42 = vrot.slane %v13090_v56, 4  ;;  %v5110_v50 = vrot.slane %v5108_v23, 3 }
 0x3ae   : > { %v5444_v31 = vsel %vm14229_vm15, %v5442_v52, %v5443_v24  ;;  %vm14230_vm7 = vmmov %vm14221_vm1  ;;  %v13095_v1 = vld [vmem:[#allocation2 + $0xe8] sm:$0xf]  ;;  %v5469_v62 = vrot.slane %v13097_v14, 4  ;;  %v5113_v52 = vrot.slane %v5111_v41, 4  ;;  %v5118_v24 = vrot.slane %v5116_v29, 3 }
 0x3af   : > { %vm14231_vm0 = vmmov %vm14222_vm2  ;;  %v5470_v5 = vrot.slane %v13095_v1, 4 }
 0x3b0   : > { %v5447_v2 = vsel %vm14231_vm0, %v5445_v47, %v5446_v3  ;;  %vm14232_vm10 = vmmov %vm14221_vm1  ;;  %v5121_v47 = vrot.slane %v5119_v59, 4  ;;  %v5081_v59 = vld [vmem:[#allocation2 + $0x30] sm:$0xf8] }
 0x3b1   : > { %vm14233_vm11 = vmmov %vm14231_vm0 }
 0x3b2   : > { %v5450_v49 = vsel %vm14233_vm11, %v5448_v46, %v5449_v6  ;;  %vm14234_vm12 = vmmov %vm14221_vm1  ;;  %v13106_v46 = vld [vmem:[#allocation2 + $0xf8] sm:$0xf]  ;;  %v13108_v6 = vld [vmem:[#allocation2 + $0xf0] sm:$0xf0]  ;;  %vm14248_vm11 = vsmask.f32 4352 }
 0x3b3   : > { %10688 = vmatmul.mubr.msk.bf16.gmra.mrb[8].mxu1 %vm14230_vm7, %v5444_v31  ;;  %vm14235_vm6 = vmmov %vm14231_vm0  ;;  %v5077_v31 = vld [vmem:[#allocation2 + $0x10] sm:$0xf8] }
 0x3b4   : > { %10691 = vmatprep.mubr.msk.bf16.mxu1 %vm14232_vm10, %v5447_v2  ;;  %v5453_v0 = vsel %vm14235_vm6, %v5451_v34, %v5452_v27  ;;  %vm14236_vm8 = vmmov %vm14221_vm1  ;;  %v5471_v2 = vsel %vm14231_vm0, %v5469_v62, %v5470_v5  ;;  %v5114_v34 = vor.u32 %v5113_v52, %v5110_v50  ;;  %v5122_v27 = vor.u32 %v5121_v47, %v5118_v24 }
 0x3b5   : > { %vm14237_vm1 = vmmov %vm14231_vm0  ;;  %v5159_v5 = vshrl.u32 %v5081_v59, 16  ;;  %v5162_v50 = vshll.u32 %v5081_v59, 16  ;;  %v5167_v52 = vshrl.u32 %v13008_v55, 16  ;;  %v5170_v24 = vshll.u32 %v13008_v55, 16 }
 0x3b6   : > { %v5456_v48 = vsel %vm14237_vm1, %v5454_v39, %v5455_v40  ;;  %vm14238_vm2 = vmmov %vm14223_vm3  ;;  %v5136_v39 = vshll.u32 %v12986_v32, 16  ;;  %v5125_v40 = vshrl.u32 %v5077_v31, 16 }
 0x3b7   : > { %vm14239_vm3 = vmmov %vm14231_vm0 }
 0x3b8   : > { %v5459_v33 = vsel %vm14239_vm3, %v5457_v38, %v5458_v15  ;;  %vm14240_vm4 = vmmov %vm14238_vm2  ;;  %v5128_v38 = vshll.u32 %v5077_v31, 16  ;;  %v5472_v15 = vrot.slane %v13108_v6, 4  ;;  %v5127_v26 = vrot.slane %v5125_v40, 3 }
 0x3b9   : > { %vm14241_vm5 = vmmov %vm14231_vm0  ;;  %v5164_v40 = vrot.slane %v5162_v50, 4 }
 0x3ba   : > { %v5462_v44 = vsel %vm14241_vm5, %v5460_v30, %v5461_v36  ;;  %vm14242_vm9 = vmmov %vm14238_vm2  ;;  %v5150_v36 = vshrl.u32 %v12990_v7, 16  ;;  %v5130_v29 = vrot.slane %v5128_v38, 4  ;;  %v5085_v38 = vld [vmem:[#allocation2 + $0x50] sm:$0xf8] }
 0x3bb   : > { %10692 = vmatmul.mubr.msk.bf16.gmra.mrb[12].mxu1 %vm14234_vm12, %v5450_v49  ;;  %vm14243_vm13 = vmmov %vm14231_vm0  ;;  %v5079_v49 = vld [vmem:[#allocation2 + $0x20] sm:$0xf8] }
 0x3bc   : > { %10695 = vmatprep.mubr.msk.bf16.mxu1 %vm14236_vm8, %v5453_v0  ;;  %v5465_v19 = vsel %vm14243_vm13, %v5463_v35, %v5464_v13  ;;  %vm14244_vm14 = vmmov %vm14238_vm2  ;;  %v5133_v0 = vshrl.u32 %v12986_v32, 16  ;;  %v5145_v30 = vshll.u32 %v5079_v49, 16  ;;  %v5153_v35 = vshll.u32 %v12990_v7, 16 }
 0x3bd   : > { %vm14245_vm15 = vmmov %vm14231_vm0  ;;  %v5123_v13 = vsel %vm14248_vm11, %v5114_v34, %v5122_v27  ;;  %v5152_v41 = vrot.slane %v5150_v36, 3  ;;  %v5131_v62 = vor.u32 %v5130_v29, %v5127_v26  ;;  %v5184_v34 = vshrl.u32 %v13013_v58, 16 }
 0x3be   : > { %v5468_v3 = vsel %vm14245_vm15, %v5466_v11, %v5467_v42  ;;  %vm14246_vm7 = vmmov %vm14238_vm2  ;;  %v5135_v10 = vrot.slane %v5133_v0, 3  ;;  %v5147_v23 = vrot.slane %v5145_v30, 4  ;;  %v5155_v11 = vrot.slane %v5153_v35, 4  ;;  %v5083_v42 = vld [vmem:[#allocation2 + $0x40] sm:$0xf8] }
 0x3bf   : > { %vm14247_vm10 = vmmov %vm14238_vm2  ;;  %v5176_v47 = vshrl.u32 %v5083_v42, 16  ;;  %v5187_v27 = vshll.u32 %v13013_v58, 16  ;;  %v13131_v30 = vld [vmem:[%s14168_s2 + $0x8] sm:$0xf]  ;;  %v5186_v36 = vrot.slane %v5184_v34, 3  ;;  %v5204_v26 = vshll.u32 %v13026_v63, 16 }
 0x3c0   : > { %vm14249_vm12 = vmmov %vm14231_vm0  ;;  %v5091_v34 = vld [vmem:[#allocation2 + $0x80] sm:$0xf8] }
 0x3c1   : > { %vm14250_vm6 = vmmov %vm14238_vm2  ;;  %v5189_v35 = vrot.slane %v5187_v27, 4  ;;  %v5206_v50 = vrot.slane %v5204_v26, 4 }
 0x3c2   : > { %vm14251_vm8 = vmmov %vm14238_vm2 }
 0x3c3   : > { %10696 = vmatmul.mubr.msk.bf16.gmra.mrb[16].mxu1 %vm14238_vm2, %v5456_v48  ;;  %v5473_v48 = vrot.slane %v13106_v46, 4  ;;  %vm14252_vm1 = vmmov %vm14248_vm11  ;;  %vm14253_vm2 = vcmask 1041408  }
 0x3c4   : > { %10699 = vmatprep.mubr.msk.bf16.mxu1 %vm14240_vm4, %v5459_v33  ;;  %v5142_v33 = vshrl.u32 %v5079_v49, 16  ;;  %v6240_v0 = vsel %vm14253_vm2, %v13004_v25, 0  ;;  %vm14254_vm3 = vmmov %vm14240_vm4  ;;  %v5193_v25 = vshrl.u32 %v5085_v38, 16 }
 0x3c5   : > { %v5474_v32 = vsel %vm14249_vm12, %v5472_v15, %v5473_v48  ;;  %v5169_v15 = vrot.slane %v5167_v52, 3  ;;  %v5172_v48 = vrot.slane %v5170_v24, 4  ;;  %vm14255_vm4 = vmmov %vm14252_vm1  ;;  %v5089_v52 = vld [vmem:[#allocation2 + $0x70] sm:$0xf8] }
 0x3c6   : > { %vm14256_vm5 = vmmov %vm14254_vm3 }
 0x3c7   : > { %vm14258_vm13 = vmmov %vm14252_vm1 }
 0x3c8   : > { %vm14260_vm15 = vmmov %vm14252_vm1 }
 0x3c9   : > { %vm14262_vm0 = vmmov %vm14252_vm1 }
 0x3ca   : > { %vm14264_vm11 = vmmov %vm14262_vm0 }
 0x3cb   : > { %10700 = vmatmul.mubr.msk.bf16.gmra.mrb[20].mxu1 %vm14242_vm9, %v5462_v44  ;;  %v5138_v44 = vrot.slane %v5136_v39, 4  ;;  %v5161_v39 = vrot.slane %v5159_v5, 3  ;;  %vm14257_vm9 = vmmov %vm14253_vm2 }
 0x3cc   : > { %10703 = vmatprep.mubr.msk.bf16.mxu1 %vm14244_vm14, %v5465_v19  ;;  %v5144_v19 = vrot.slane %v5142_v33, 3  ;;  %v5178_v33 = vrot.slane %v5176_v47, 3  ;;  %vm14259_vm14 = vmmov %vm14254_vm3 }
 0x3cd   : > { %v5139_v7 = vor.u32 %v5138_v44, %v5135_v10  ;;  %v5196_v10 = vshll.u32 %v5085_v38, 16  ;;  %v5201_v44 = vshrl.u32 %v13026_v63, 16  ;;  %v5165_v29 = vor.u32 %v5164_v40, %v5161_v39  ;;  %vm14265_vm12 = vmmov %vm14254_vm3 }
 0x3ce   : > { %v5148_v31 = vor.u32 %v5147_v23, %v5144_v19  ;;  %v5190_v23 = vor.u32 %v5189_v35, %v5186_v36  ;;  %v5235_v39 = vshrl.u32 %v13042_v28, 16  ;;  %v5238_v40 = vshll.u32 %v13042_v28, 16 }
 0x3cf   : > { %v5140_v49 = vsel %vm14252_vm1, %v5131_v62, %v5139_v7  ;;  %v5195_v62 = vrot.slane %v5193_v25, 3  ;;  %v5198_v7 = vrot.slane %v5196_v10, 4  ;;  %v5203_v5 = vrot.slane %v5201_v44, 3  ;;  %v5093_v44 = vld [vmem:[#allocation2 + $0x90] sm:$0xf8]  ;;  %vm14268_vm1 = vmmov %vm14254_vm3 }
 0x3d0   : > { %v5244_v38 = vshrl.u32 %v5091_v34, 16  ;;  %v5237_v25 = vrot.slane %v5235_v39, 3  ;;  %v5240_v10 = vrot.slane %v5238_v40, 4  ;;  %v5099_v40 = vld [vmem:[#allocation2 + $0xc0] sm:$0xf8]  ;;  %vm14269_vm2 = vmmov %vm14268_vm1 }
 0x3d1   : > { %v5199_v27 = vor.u32 %v5198_v7, %v5195_v62 }
 0x3d2   : > { %v5246_v26 = vrot.slane %v5244_v38, 3  ;;  %v5241_v62 = vor.u32 %v5240_v10, %v5237_v25 }
 0x3d3   : > { %10704 = vmatmul.mubr.msk.bf16.gmra.mrb[24].mxu1 %vm14246_vm7, %v5468_v3  ;;  %v5179_v3 = vshll.u32 %v5083_v42, 16  ;;  %v5221_v42 = vshll.u32 %v13031_v20, 16  ;;  %vm14261_vm7 = vmmov %vm14254_vm3 }
 0x3d4   : > { %10707 = vmatprep.mubr.msk.bf16.mxu1 %vm14247_vm10, %v5471_v2  ;;  %v5156_v2 = vor.u32 %v5155_v11, %v5152_v41  ;;  %v5218_v11 = vshrl.u32 %v13031_v20, 16  ;;  %v5227_v20 = vshrl.u32 %v5089_v52, 16  ;;  %vm14263_vm10 = vmmov %vm14254_vm3 }
 0x3d5   : > { %v5181_v55 = vrot.slane %v5179_v3, 4 }
 0x3d6   : > { %v5157_v58 = vsel %vm14255_vm4, %v5148_v31, %v5156_v2  ;;  %v5220_v31 = vrot.slane %v5218_v11, 3  ;;  %v5223_v2 = vrot.slane %v5221_v42, 4  ;;  %v5229_v36 = vrot.slane %v5227_v20, 3  ;;  %v5095_v11 = vld [vmem:[#allocation2 + $0xa0] sm:$0xf8]  ;;  %vm14271_vm4 = vmmov %vm14268_vm1 }
 0x3d7   : > { %v5182_v59 = vor.u32 %v5181_v55, %v5178_v33  ;;  %v5255_v33 = vshll.u32 %v13047_v43, 16 }
 0x3d9   : > { %v5191_v47 = vsel %vm14260_vm15, %v5182_v59, %v5190_v23  ;;  %v5257_v59 = vrot.slane %v5255_v33, 4  ;;  %v5269_v23 = vshrl.u32 %v13058_v60, 16  ;;  %v5303_v33 = vshrl.u32 %v13074_v53, 16  ;;  %vm14276_vm15 = vmmov %vm14268_vm1 }
 0x3db   : > { %10708 = vmatmul.mubr.msk.bf16.gmra.mrb[28].mxu1 %vm14250_vm6, %v5474_v32  ;;  %v5173_v32 = vor.u32 %v5172_v48, %v5169_v15  ;;  %v5247_v15 = vshll.u32 %v5091_v34, 16  ;;  %v5252_v48 = vshrl.u32 %v13047_v43, 16  ;;  %v5261_v43 = vshrl.u32 %v5093_v44, 16  ;;  %vm14266_vm6 = vmmov %vm14262_vm0 }
 0x3dc   : > { %10713 = vmatprep.mubr.msk.bf16.mxu1 %vm14251_vm8, %v5123_v13  ;;  %v5087_v13 = vld [vmem:[#allocation2 + $0x60] sm:$0xf8]  ;;  %vm14267_vm8 = vmmov %vm14262_vm0 }
 0x3dd   : > { %v5210_v19 = vshrl.u32 %v5087_v13, 16  ;;  %v5213_v41 = vshll.u32 %v5087_v13, 16  ;;  %v5174_v63 = vsel %vm14258_vm13, %v5165_v29, %v5173_v32  ;;  %v5249_v29 = vrot.slane %v5247_v15, 4  ;;  %vm14274_vm13 = vmmov %vm14262_vm0 }
 0x3de   : > { %v5254_v32 = vrot.slane %v5252_v48, 3 }
 0x3df   : > { %v5212_v24 = vrot.slane %v5210_v19, 3  ;;  %v5215_v3 = vrot.slane %v5213_v41, 4  ;;  %v5264_v19 = vshll.u32 %v5093_v44, 16  ;;  %v5272_v41 = vshll.u32 %v13058_v60, 16  ;;  %v5097_v60 = vld [vmem:[#allocation2 + $0xb0] sm:$0xf8] }
 0x3e0   : > { %v5250_v7 = vor.u32 %v5249_v29, %v5246_v26  ;;  %v5295_v15 = vshrl.u32 %v5097_v60, 16  ;;  %v5298_v48 = vshll.u32 %v5097_v60, 16 }
 0x3e1   : > { %v5216_v55 = vor.u32 %v5215_v3, %v5212_v24  ;;  %v5289_v24 = vshll.u32 %v13063_v17, 16  ;;  %v5266_v3 = vrot.slane %v5264_v19, 4 }
 0x3e2   : > { %v5297_v26 = vrot.slane %v5295_v15, 3  ;;  %v5300_v29 = vrot.slane %v5298_v48, 4  ;;  %v11533_v15 = vld [vmem:[#allocation2] sm:$0xf0] }
 0x3e3   : > { %10714 = vmatmul.mubr.msk.bf16.vlgmr.msra.gmra.mrb[0].mxu1 %vm14254_vm3, %v5140_v49  ;;  %v5207_v49 = vor.u32 %v5206_v50, %v5203_v5  ;;  %v5258_v5 = vor.u32 %v5257_v59, %v5254_v32  ;;  %v5278_v50 = vshrl.u32 %v5095_v11, 16  ;;  %v5291_v39 = vrot.slane %v5289_v24, 4  ;;  %vm14270_vm3 = vmmov %vm14262_vm0 }
 0x3e4   : > { %10746 = vmatpush3.bf16.msra.mxu1 %v6240_v0  ;;  %10717 = vmatprep.mubr.msk.bf16.mxu1 %vm14256_vm5, %v5157_v58  ;;  %v5230_v0 = vshll.u32 %v5089_v52, 16  ;;  %v5224_v58 = vor.u32 %v5223_v2, %v5220_v31  ;;  %v5281_v52 = vshll.u32 %v5095_v11, 16  ;;  %v5271_v31 = vrot.slane %v5269_v23, 3  ;;  %vm14272_vm5 = vmmov %vm14262_vm0 }
 0x3e5   : > { %11507 = vmatprep.subr.msk.bf16.mxu1 %vm14257_vm9, %v13131_v30  ;;  %v5208_v35 = vsel %vm14262_vm0, %v5199_v27, %v5207_v49  ;;  %v5274_v2 = vrot.slane %v5272_v41, 4  ;;  %v5259_v27 = vsel %vm14267_vm8, %v5250_v7, %v5258_v5  ;;  %v5280_v20 = vrot.slane %v5278_v50, 3  ;;  %v5101_v41 = vld [vmem:[#allocation2 + $0xd0] sm:$0xf8]  ;;  %vm14273_vm9 = vmmov %vm14268_vm1 }
 0x3e6   : > { %v5232_v13 = vrot.slane %v5230_v0, 4  ;;  %v5225_v28 = vsel %vm14264_vm11, %v5216_v55, %v5224_v58  ;;  %v5283_v49 = vrot.slane %v5281_v52, 4  ;;  %v5306_v55 = vshll.u32 %v13074_v53, 16  ;;  %vm14279_vm11 = vmmov %vm14262_vm0 }
 0x3e7   : > { %v5312_v58 = vshrl.u32 %v5099_v40, 16  ;;  %v5305_v32 = vrot.slane %v5303_v33, 3  ;;  %v5301_v11 = vor.u32 %v5300_v29, %v5297_v26  ;;  %v5332_v7 = vshll.u32 %v5101_v41, 16  ;;  %vm14282_vm8 = vmmov %vm14262_vm0 }
 0x3e8   : > { %v5233_v42 = vor.u32 %v5232_v13, %v5229_v36  ;;  %v5315_v36 = vshll.u32 %v5099_v40, 16  ;;  %v5323_v13 = vshll.u32 %v13079_v12, 16  ;;  %v5284_v25 = vor.u32 %v5283_v49, %v5280_v20 }
 0x3e9   : > { %v5308_v59 = vrot.slane %v5306_v55, 4  ;;  %v5337_v52 = vshrl.u32 %v13090_v56, 16  ;;  %v5334_v20 = vrot.slane %v5332_v7, 4  ;;  %v5920_v48 = vshrl.u32 %v11533_v15, 16 }
 0x3ea   : > { %v5242_v34 = vsel %vm14266_vm6, %v5233_v42, %v5241_v62  ;;  %v5325_v23 = vrot.slane %v5323_v13, 4  ;;  %v5329_v62 = vshrl.u32 %v5101_v41, 16  ;;  %v5923_v33 = vshll.u32 %v11533_v15, 16 }
 0x3eb   : > { %10718 = vmatmul.mubr.msk.bf16.gmra.mrb[4].mxu1 %vm14259_vm14, %v5174_v63  ;;  %v5286_v63 = vshrl.u32 %v13063_v17, 16  ;;  %v5275_v17 = vor.u32 %v5274_v2, %v5271_v31  ;;  %v5309_v42 = vor.u32 %v5308_v59, %v5305_v32  ;;  %v5357_v31 = vshll.u32 %v13095_v1, 16  ;;  %vm14275_vm14 = vmmov %vm14262_vm0 }
 0x3ec   : > { %10721 = vmatprep.mubr.msk.bf16.mxu1 %vm14261_vm7, %v5191_v47  ;;  %v5263_v47 = vrot.slane %v5261_v43, 3  ;;  %v5317_v43 = vrot.slane %v5315_v36, 4  ;;  %v5339_v49 = vrot.slane %v5337_v52, 3  ;;  %vm14277_vm7 = vmmov %vm14268_vm1  ;;  %v5922_v29 = vrot.slane %v5920_v48, 4 }
 0x3ed   : > { %v5288_v0 = vrot.slane %v5286_v63, 3  ;;  %v5340_v63 = vshll.u32 %v13090_v56, 16  ;;  %v5310_v2 = vsel %vm14274_vm13, %v5301_v11, %v5309_v42  ;;  %v5925_v32 = vrot.slane %v5923_v33, 5  ;;  %vm14288_vm13 = vmmov %vm14268_vm1 }
 0x3ee   : > { %v5267_v38 = vor.u32 %v5266_v3, %v5263_v47  ;;  %v5354_v3 = vshrl.u32 %v13095_v1, 16  ;;  %v5937_v42 = vshrl.u32 %v12988_v54, 16  ;;  %v5940_v7 = vshll.u32 %v12988_v54, 16 }
 0x3ef   : > { %v5292_v10 = vor.u32 %v5291_v39, %v5288_v0  ;;  %v5342_v0 = vrot.slane %v5340_v63, 4  ;;  %v5903_v39 = vld [vmem:[#allocation2 + $0x8] sm:$0x1f]  ;;  %vm14281_vm6 = vsmask.f32 3328  ;;  %v5971_v33 = vshrl.u32 %v13010_v8, 16 }
 0x3f0   : > { %v5276_v44 = vsel %vm14270_vm3, %v5267_v38, %v5275_v17  ;;  %v5356_v38 = vrot.slane %v5354_v3, 3  ;;  %v5359_v17 = vrot.slane %v5357_v31, 4  ;;  %v5931_v36 = vshll.u32 %v5903_v39, 16  ;;  %vm14284_vm3 = vmmov %vm14281_vm6 }
 0x3f1   : > { %v5293_v53 = vsel %vm14272_vm5, %v5284_v25, %v5292_v10  ;;  %v5343_v13 = vor.u32 %v5342_v0, %v5339_v49  ;;  %v5371_v25 = vshrl.u32 %v13106_v46, 16  ;;  %v5374_v10 = vshll.u32 %v13106_v46, 16  ;;  %vm14286_vm5 = vmmov %vm14268_vm1 }
 0x3f2   : > { %v5360_v26 = vor.u32 %v5359_v17, %v5356_v38  ;;  %v5926_v46 = vor.u32 %v5925_v32, %v5922_v29  ;;  %v5957_v3 = vshll.u32 %v12994_v22, 16  ;;  %v5906_v38 = vld [vmem:[#allocation2 + $0x38] sm:$0x1f]  ;;  %v5907_v17 = vld [vmem:[#allocation2 + $0x48] sm:$0x1f] }
 0x3f3   : > { %10722 = vmatmul.mubr.msk.bf16.gmra.mrb[8].mxu1 %vm14263_vm10, %v5208_v35  ;;  %v5320_v35 = vshrl.u32 %v13079_v12, 16  ;;  %v5103_v12 = vld [vmem:[#allocation2 + $0xe0] sm:$0xf8]  ;;  %v5373_v41 = vrot.slane %v5371_v25, 3  ;;  %vm14278_vm10 = vmmov %vm14268_vm1 }
 0x3f4   : > { %10725 = vmatprep.mubr.msk.bf16.mxu1 %vm14265_vm12, %v5225_v28  ;;  %v5314_v28 = vrot.slane %v5312_v58, 3  ;;  %v5346_v24 = vshrl.u32 %v5103_v12, 16  ;;  %v5349_v47 = vshll.u32 %v5103_v12, 16  ;;  %v5928_v58 = vshrl.u32 %v5903_v39, 16  ;;  %v5904_v12 = vld [vmem:[#allocation2 + $0x18] sm:$0x1f]  ;;  %vm14280_vm12 = vmmov %vm14268_vm1 }
 0x3f5   : > { %v5322_v19 = vrot.slane %v5320_v35, 3  ;;  %v5948_v52 = vshll.u32 %v5904_v12, 16  ;;  %v5959_v39 = vrot.slane %v5957_v3, 5 }
 0x3f6   : > { %v5318_v5 = vor.u32 %v5317_v43, %v5314_v28  ;;  %v5348_v40 = vrot.slane %v5346_v24, 3  ;;  %v5351_v56 = vrot.slane %v5349_v47, 4  ;;  %v5930_v28 = vrot.slane %v5928_v58, 4 }
 0x3f7   : > { %v5326_v50 = vor.u32 %v5325_v23, %v5322_v19  ;;  %v5933_v43 = vrot.slane %v5931_v36, 5  ;;  %v5954_v47 = vshrl.u32 %v12994_v22, 16  ;;  %v5950_v49 = vrot.slane %v5948_v52, 5 }
 0x3f8   : > { %v9977_v22 = vcombine.low %v13131_v30, %v13131_v30  ;;  %v5982_v58 = vshll.u32 %v5906_v38, 16  ;;  %v5988_v36 = vshrl.u32 %v13015_v4, 16  ;;  %v6022_v52 = vshrl.u32 %v13033_v37, 16 }
 0x3f9   : > { %v5327_v60 = vsel %vm14275_vm14, %v5318_v5, %v5326_v50  ;;  %v5934_v5 = vor.u32 %v5933_v43, %v5930_v28  ;;  %v5945_v50 = vshrl.u32 %v5904_v12, 16  ;;  %v5956_v54 = vrot.slane %v5954_v47, 4 }
 0x3fa   : > { %v5984_v43 = vrot.slane %v5982_v58, 5 }
 0x3fb   : > { %10726 = vmatmul.mubr.msk.bf16.gmra.mrb[12].mxu1 %vm14268_vm1, %v5242_v34  ;;  %v5331_v34 = vrot.slane %v5329_v62, 3  ;;  %v5905_v62 = vld [vmem:[#allocation2 + $0x28] sm:$0x1f] }
 0x3fc   : > { %10729 = vmatprep.mubr.msk.bf16.mxu1 %vm14269_vm2, %v5259_v27  ;;  %v5105_v27 = vld [vmem:[#allocation2 + $0xf0] sm:$0xf8]  ;;  %v5962_v31 = vshrl.u32 %v5905_v62, 16  ;;  %vm14283_vm2 = vmmov %vm14268_vm1 }
 0x3fd   : > { %v5363_v1 = vshrl.u32 %v5105_v27, 16  ;;  %v5366_v55 = vshll.u32 %v5105_v27, 16  ;;  %v5335_v35 = vor.u32 %v5334_v20, %v5331_v34  ;;  %v5939_v34 = vrot.slane %v5937_v42, 4 }
 0x3fe   : > { %v5942_v27 = vrot.slane %v5940_v7, 5  ;;  %v5947_v20 = vrot.slane %v5945_v50, 4  ;;  %v6005_v42 = vshrl.u32 %v13028_v16, 16 }
 0x3ff   : > { %v5365_v59 = vrot.slane %v5363_v1, 3  ;;  %v5344_v19 = vsel %vm14262_vm0, %v5335_v35, %v5343_v13  ;;  %v5368_v23 = vrot.slane %v5366_v55, 4  ;;  %v5974_v1 = vshll.u32 %v13010_v8, 16  ;;  %vm14292_vm0 = vmmov %vm14284_vm3 }
 0x400   : > { %v5943_v15 = vor.u32 %v5942_v27, %v5939_v34  ;;  %v5951_v48 = vor.u32 %v5950_v49, %v5947_v20  ;;  %v5979_v55 = vshrl.u32 %v5906_v38, 16  ;;  %v5991_v35 = vshll.u32 %v13015_v4, 16 }
 0x401   : > { %v5369_v63 = vor.u32 %v5368_v23, %v5365_v59  ;;  %v5960_v13 = vor.u32 %v5959_v39, %v5956_v54  ;;  %v5973_v59 = vrot.slane %v5971_v33, 4  ;;  %v5976_v28 = vrot.slane %v5974_v1, 5  ;;  %v5910_v39 = vld [vmem:[#allocation2 + $0x78] sm:$0x1f] }
 0x402   : > { %v5952_v29 = vsel %vm14284_vm3, %v5943_v15, %v5951_v48  ;;  %v5981_v8 = vrot.slane %v5979_v55, 4  ;;  %v5993_v23 = vrot.slane %v5991_v35, 5  ;;  %v6039_v38 = vshrl.u32 %v13044_v21, 16 }
 0x403   : > { %10730 = vmatmul.mubr.msk.bf16.gmra.mrb[16].mxu1 %vm14271_vm4, %v5276_v44  ;;  %v5352_v44 = vor.u32 %v5351_v56, %v5348_v40  ;;  %v5964_v40 = vrot.slane %v5962_v31, 4  ;;  %vm14285_vm4 = vcmask 1041408   ;;  %v5977_v7 = vor.u32 %v5976_v28, %v5973_v59  ;;  %v5912_v59 = vld [vmem:[#allocation2 + $0x98] sm:$0x1f] }
 0x404   : > { %10733 = vmatprep.mubr.msk.bf16.mxu1 %vm14273_vm9, %v5293_v53  ;;  %v5376_v53 = vrot.slane %v5374_v10, 4  ;;  %v5996_v10 = vshrl.u32 %v5907_v17, 16  ;;  %v6791_v32 = vsel %vm14285_vm4, %v13131_v30, 0  ;;  %vm14287_vm9 = vmmov %vm14284_vm3  ;;  %v6008_v30 = vshll.u32 %v13028_v16, 16 }
 0x405   : > { %v5361_v11 = vsel %vm14279_vm11, %v5352_v44, %v5360_v26  ;;  %v5999_v44 = vshll.u32 %v5907_v17, 16  ;;  %v13198_v26 = vrot.slane %v9977_v22, 2  ;;  %vm14289_vm14 = vmmov %vm14285_vm4  ;;  %v6007_v31 = vrot.slane %v6005_v42, 4 }
 0x406   : > { %v5377_v24 = vor.u32 %v5376_v53, %v5373_v41  ;;  %v5908_v41 = vld [vmem:[#allocation2 + $0x58] sm:$0x1f]  ;;  %v5998_v53 = vrot.slane %v5996_v10, 4  ;;  %v6042_v22 = vshll.u32 %v13044_v21, 16  ;;  %v6047_v17 = vshrl.u32 %v5910_v39, 16  ;;  %vm14294_vm11 = vmmov %vm14292_vm0 }
 0x407   : > { %v6001_v12 = vrot.slane %v5999_v44, 5  ;;  %v6050_v15 = vshll.u32 %v5910_v39, 16  ;;  %v6056_v48 = vshrl.u32 %v13049_v18, 16  ;;  %v6059_v33 = vshll.u32 %v13049_v18, 16  ;;  %v5913_v18 = vld [vmem:[#allocation2 + $0xa8] sm:$0x1f]  ;;  %vm14300_vm4 = vmmov %vm14283_vm2 }
 0x408   : > { %v5378_v0 = vsel %vm14282_vm8, %v5369_v63, %v5377_v24  ;;  %v6025_v24 = vshll.u32 %v13033_v37, 16  ;;  %v5911_v37 = vld [vmem:[#allocation2 + $0x88] sm:$0x1f]  ;;  %v6049_v10 = vrot.slane %v6047_v17, 4  ;;  %vm14297_vm8 = vmmov %vm14268_vm1 }
 0x409   : > { %v6002_v63 = vor.u32 %v6001_v12, %v5998_v53  ;;  %v6064_v58 = vshrl.u32 %v5911_v37, 16  ;;  %v6052_v44 = vrot.slane %v6050_v15, 5 }
 0x40a   : > { %v6027_v49 = vrot.slane %v6025_v24, 5 }
 0x40b   : > { %10734 = vmatmul.mubr.msk.bf16.gmra.mrb[20].mxu1 %vm14276_vm15, %v5310_v2  ;;  %v5965_v2 = vshll.u32 %v5905_v62, 16  ;;  %v6016_v62 = vshll.u32 %v5908_v41, 16  ;;  %vm14290_vm15 = vmmov %vm14284_vm3  ;;  %v6066_v28 = vrot.slane %v6064_v58, 4  ;;  %v6053_v53 = vor.u32 %v6052_v44, %v6049_v10 }
 0x40c   : > { %10737 = vmatprep.mubr.msk.bf16.mxu1 %vm14277_vm7, %v5327_v60  ;;  %v5935_v60 = vsel %vm14281_vm6, %v5926_v46, %v5934_v5  ;;  %v6013_v46 = vshrl.u32 %v5908_v41, 16  ;;  %v5985_v5 = vor.u32 %v5984_v43, %v5981_v8  ;;  %vm14291_vm7 = vmmov %vm14268_vm1  ;;  %v6073_v43 = vshrl.u32 %v13060_v51, 16 }
 0x40d   : > { %v5967_v56 = vrot.slane %v5965_v2, 5  ;;  %v6010_v2 = vrot.slane %v6008_v30, 5  ;;  %v6018_v27 = vrot.slane %v6016_v62, 5  ;;  %vm14296_vm6 = vmmov %vm14292_vm0  ;;  %v6084_v41 = vshll.u32 %v5912_v59, 16 }
 0x40e   : > { %v6015_v34 = vrot.slane %v6013_v46, 4  ;;  %v5986_v16 = vsel %vm14290_vm15, %v5977_v7, %v5985_v5  ;;  %v6093_v30 = vshll.u32 %v13065_v9, 16  ;;  %v6098_v46 = vshrl.u32 %v5913_v18, 16  ;;  %vm14299_vm3 = vmmov %vm14292_vm0 }
 0x40f   : > { %v5968_v25 = vor.u32 %v5967_v56, %v5964_v40  ;;  %v6011_v40 = vor.u32 %v6010_v2, %v6007_v31  ;;  %v6101_v62 = vshll.u32 %v5913_v18, 16  ;;  %v6075_v7 = vrot.slane %v6073_v43, 4  ;;  %v5914_v2 = vld [vmem:[#allocation2 + $0xb8] sm:$0x1f]  ;;  %vm14305_vm15 = vmmov %vm14292_vm0 }
 0x410   : > { %v6019_v56 = vor.u32 %v6018_v27, %v6015_v34 }
 0x411   : > { %v5969_v4 = vsel %vm14287_vm9, %v5960_v13, %v5968_v25  ;;  %v6041_v13 = vrot.slane %v6039_v38, 4  ;;  %v6044_v25 = vrot.slane %v6042_v22, 5  ;;  %v6103_v31 = vrot.slane %v6101_v62, 5  ;;  %vm14302_vm9 = vmmov %vm14283_vm2  ;;  %v13247_v62 = vld [vmem:[#allocation2 + $0x18] sm:$0xf] }
 0x412   : > { %v6020_v35 = vsel %vm14294_vm11, %v6011_v40, %v6019_v56  ;;  %vm14308_vm11 = vmmov %vm14292_vm0 }
 0x413   : > { %10738 = vmatmul.mubr.msk.bf16.gmra.mrb[24].mxu1 %vm14278_vm10, %v5344_v19  ;;  %v5990_v19 = vrot.slane %v5988_v36, 4  ;;  %vm14293_vm10 = vmmov %vm14268_vm1  ;;  %v6067_v36 = vshll.u32 %v5911_v37, 16 }
 0x414   : > { %10741 = vmatprep.mubr.msk.bf16.mxu1 %vm14280_vm12, %v5361_v11  ;;  %v5909_v11 = vld [vmem:[#allocation2 + $0x68] sm:$0x1f]  ;;  %vm14295_vm12 = vmmov %vm14268_vm1 }
 0x415   : > { %v5994_v50 = vor.u32 %v5993_v23, %v5990_v19  ;;  %v6030_v47 = vshrl.u32 %v5909_v11, 16  ;;  %v6033_v3 = vshll.u32 %v5909_v11, 16  ;;  %v6069_v8 = vrot.slane %v6067_v36, 5 }
 0x416   : > { %v6076_v19 = vshll.u32 %v13060_v51, 16  ;;  %v6081_v23 = vshrl.u32 %v5912_v59, 16  ;;  %v6090_v11 = vshrl.u32 %v13065_v9, 16  ;;  %v5915_v9 = vld [vmem:[#allocation2 + $0xc8] sm:$0x1f]  ;;  %v6158_v59 = vshrl.u32 %v13097_v14, 16 }
 0x417   : > { %v6003_v20 = vsel %vm14292_vm0, %v5994_v50, %v6002_v63  ;;  %v6035_v54 = vrot.slane %v6033_v3, 5  ;;  %v6070_v42 = vor.u32 %v6069_v8, %v6066_v28  ;;  %v6100_v3 = vrot.slane %v6098_v46, 4 }
 0x418   : > { %v6078_v5 = vrot.slane %v6076_v19, 5  ;;  %v6083_v50 = vrot.slane %v6081_v23, 4  ;;  %v6092_v24 = vrot.slane %v6090_v11, 4  ;;  %v6132_v40 = vshrl.u32 %v5915_v9, 16 }
 0x419   : > { %v6104_v37 = vor.u32 %v6103_v31, %v6100_v3  ;;  %v6135_v56 = vshll.u32 %v5915_v9, 16  ;;  %v6161_v28 = vshll.u32 %v13097_v14, 16  ;;  %v6482_v3 = vshll.u32 %v13247_v62, 16 }
 0x41a   : > { %v6079_v34 = vor.u32 %v6078_v5, %v6075_v7  ;;  %v6134_v58 = vrot.slane %v6132_v40, 4  ;;  %v6175_v7 = vshrl.u32 %v13108_v6, 16  ;;  %v6442_v40 = vld [vmem:[#allocation2 + $0x30] sm:$0xf8] }
 0x41b   : > { %10742 = vmatmul.mubr.msk.bf16.gmra.mrb[28].mxu1 %vm14268_vm1, %v5378_v0  ;;  %v6032_v0 = vrot.slane %v6030_v47, 4  ;;  %vm14298_vm1 = vmmov %vm14292_vm0  ;;  %v6095_v47 = vrot.slane %v6093_v30, 5  ;;  %v6137_v36 = vrot.slane %v6135_v56, 5  ;;  %v13260_v56 = vld [vmem:[#allocation2 + $0x38] sm:$0xf] }
 0x41c   : > { %10747 = vmatprep.mubr.msk.bf16.mxu1 %vm14283_vm2, %v5935_v60  ;;  %v6024_v60 = vrot.slane %v6022_v52, 4  ;;  %v6086_v52 = vrot.slane %v6084_v41, 5  ;;  %v6177_v9 = vrot.slane %v6175_v7, 4 }
 0x41d   : > { %v6036_v55 = vor.u32 %v6035_v54, %v6032_v0  ;;  %v6124_v0 = vshrl.u32 %v13081_v57, 16  ;;  %v6127_v54 = vshll.u32 %v13081_v57, 16  ;;  %v6096_v39 = vor.u32 %v6095_v47, %v6092_v24 }
 0x41e   : > { %v6028_v1 = vor.u32 %v6027_v49, %v6024_v60  ;;  %v6087_v27 = vor.u32 %v6086_v52, %v6083_v50  ;;  %v6110_v60 = vshll.u32 %v13076_v45, 16  ;;  %v6118_v49 = vshll.u32 %v5914_v2, 16 }
 0x41f   : > { %v6141_v57 = vshrl.u32 %v13092_v61, 16  ;;  %v6178_v50 = vshll.u32 %v13108_v6, 16  ;;  %v6479_v47 = vshrl.u32 %v13247_v62, 16 }
 0x420   : > { %v6037_v21 = vsel %vm14296_vm6, %v6028_v1, %v6036_v55  ;;  %v6112_v17 = vrot.slane %v6110_v60, 5  ;;  %v6129_v1 = vrot.slane %v6127_v54, 5  ;;  %v5916_v55 = vld [vmem:[#allocation2 + $0xd8] sm:$0x1f]  ;;  %v6484_v54 = vrot.slane %v6482_v3, 4  ;;  %vm14310_vm6 = vmmov %vm14292_vm0 }
 0x421   : > { %v6152_v10 = vshll.u32 %v5916_v55, 16  ;;  %v6143_v43 = vrot.slane %v6141_v57, 4  ;;  %v6481_v6 = vrot.slane %v6479_v47, 3  ;;  %v6516_v57 = vshll.u32 %v13260_v56, 16 }
 0x423   : > { %10748 = vmatmul.mubr.msk.bf16.vlgmr.msra.gmra.mrb[0].mxu1 %vm14286_vm5, %v5952_v29  ;;  %v6058_v29 = vrot.slane %v6056_v48, 4  ;;  %vm14301_vm5 = vmmov %vm14292_vm0  ;;  %v6120_v48 = vrot.slane %v6118_v49, 5  ;;  %v6154_v41 = vrot.slane %v6152_v10, 5 }
 0x424   : > { %10780 = vmatpush3.bf16.msra.mxu1 %v6791_v32  ;;  %10751 = vmatprep.mubr.msk.bf16.mxu1 %vm14288_vm13, %v5969_v4  ;;  %v6061_v32 = vrot.slane %v6059_v33, 5  ;;  %v6045_v4 = vor.u32 %v6044_v25, %v6041_v13  ;;  %v6088_v38 = vsel %vm14301_vm5, %v6079_v34, %v6087_v27  ;;  %v6126_v33 = vrot.slane %v6124_v0, 4  ;;  %vm14303_vm13 = vmmov %vm14292_vm0  ;;  %v5917_v13 = vld [vmem:[#allocation2 + $0xe8] sm:$0x1f] }
 0x425   : > { %11508 = vmatprep.subr.msk.bf16.mxu1 %vm14289_vm14, %v13198_v26  ;;  %vm14304_vm14 = vmmov %vm14283_vm2  ;;  %v6149_v25 = vshrl.u32 %v5916_v55, 16  ;;  %v6166_v8 = vshrl.u32 %v5917_v13, 16  ;;  %v6169_v18 = vshll.u32 %v5917_v13, 16  ;;  %v6180_v27 = vrot.slane %v6178_v50, 5 }
 0x426   : > { %v6062_v12 = vor.u32 %v6061_v32, %v6058_v29  ;;  %v6054_v63 = vsel %vm14298_vm1, %v6045_v4, %v6053_v53  ;;  %v6130_v32 = vor.u32 %v6129_v1, %v6126_v33  ;;  %v5918_v53 = vld [vmem:[#allocation2 + $0xf8] sm:$0x1f]  ;;  %v6485_v55 = vor.u32 %v6484_v54, %v6481_v6  ;;  %vm14312_vm1 = vmmov %vm14292_vm0 }
 0x427   : > { %v6151_v23 = vrot.slane %v6149_v25, 4  ;;  %v6168_v30 = vrot.slane %v6166_v8, 4  ;;  %v6171_v46 = vrot.slane %v6169_v18, 5  ;;  %v6183_v52 = vshrl.u32 %v5918_v53, 16 }
 0x428   : > { %v6071_v51 = vsel %vm14299_vm3, %v6062_v12, %v6070_v42  ;;  %v6438_v12 = vld [vmem:[#allocation2 + $0x10] sm:$0xf8]  ;;  %v6163_v42 = vrot.slane %v6161_v28, 5  ;;  %vm14314_vm3 = vmmov %vm14300_vm4  ;;  %v6518_v18 = vrot.slane %v6516_v57, 4  ;;  %v6452_v57 = vld [vmem:[#allocation2 + $0x80] sm:$0xf8] }
 0x429   : > { %v6155_v5 = vor.u32 %v6154_v41, %v6151_v23  ;;  %v6471_v24 = vshrl.u32 %v6438_v12, 16 }
 0x42b   : > { %10752 = vmatmul.mubr.msk.bf16.gmra.mrb[4].mxu1 %vm14291_vm7, %v5986_v16  ;;  %v6107_v16 = vshrl.u32 %v13076_v45, 16  ;;  %v6105_v45 = vsel %vm14303_vm13, %v6096_v39, %v6104_v37  ;;  %vm14306_vm7 = vmmov %vm14283_vm2  ;;  %v6473_v49 = vrot.slane %v6471_v24, 3  ;;  %v13255_v39 = vld [vmem:[#allocation2 + $0x28] sm:$0xf] }
 0x42c   : > { %10755 = vmatprep.mubr.msk.bf16.mxu1 %vm14293_vm10, %v6003_v20  ;;  %v6115_v20 = vshrl.u32 %v5914_v2, 16  ;;  %vm14307_vm10 = vmmov %vm14283_vm2  ;;  %v6172_v2 = vor.u32 %v6171_v46, %v6168_v30 }
 0x42d   : > { %v6109_v22 = vrot.slane %v6107_v16, 4  ;;  %v6185_v16 = vrot.slane %v6183_v52, 4  ;;  %vm14318_vm13 = vmmov %vm14314_vm3 }
 0x42e   : > { %v6117_v15 = vrot.slane %v6115_v20, 4  ;;  %v6440_v20 = vld [vmem:[#allocation2 + $0x20] sm:$0xf8] }
 0x42f   : > { %v6113_v44 = vor.u32 %v6112_v17, %v6109_v22  ;;  %v6491_v22 = vshll.u32 %v6440_v20, 16  ;;  %v6496_v17 = vshrl.u32 %v13255_v39, 16 }
 0x430   : > { %v6121_v29 = vor.u32 %v6120_v48, %v6117_v15  ;;  %v6499_v15 = vshll.u32 %v13255_v39, 16  ;;  %v6181_v48 = vor.u32 %v6180_v27, %v6177_v9  ;;  %v13286_v9 = vld [vmem:[%s14168_s2 + $0xc] sm:$0x3] }
 0x431   : > { %v6493_v13 = vrot.slane %v6491_v22, 4  ;;  %v6498_v25 = vrot.slane %v6496_v17, 3 }
 0x432   : > { %v6122_v4 = vsel %vm14305_vm15, %v6113_v44, %v6121_v29  ;;  %v6501_v10 = vrot.slane %v6499_v15, 4  ;;  %vm14320_vm15 = vmmov %vm14314_vm3 }
 0x433   : > { %10756 = vmatmul.mubr.msk.bf16.gmra.mrb[8].mxu1 %vm14295_vm12, %v6020_v35  ;;  %v6144_v35 = vshll.u32 %v13092_v61, 16  ;;  %v6160_v61 = vrot.slane %v6158_v59, 4  ;;  %vm14309_vm12 = vmmov %vm14283_vm2  ;;  %v13268_v59 = vld [vmem:[#allocation2 + $0x48] sm:$0xf] }
 0x434   : > { %10759 = vmatprep.mubr.msk.bf16.mxu1 %vm14297_vm8, %v6037_v21  ;;  %v6138_v21 = vor.u32 %v6137_v36, %v6134_v58  ;;  %vm14311_vm8 = vmmov %vm14283_vm2  ;;  %v6508_v58 = vshll.u32 %v6442_v40, 16  ;;  %v6513_v36 = vshrl.u32 %v13260_v56, 16  ;;  %v6502_v41 = vor.u32 %v6501_v10, %v6498_v25 }
 0x435   : > { %v6146_v19 = vrot.slane %v6144_v35, 5  ;;  %v6164_v31 = vor.u32 %v6163_v42, %v6160_v61 }
 0x436   : > { %v6139_v11 = vsel %vm14292_vm0, %v6130_v32, %v6138_v21  ;;  %v6444_v32 = vld [vmem:[#allocation2 + $0x40] sm:$0xf8]  ;;  %v6510_v28 = vrot.slane %v6508_v58, 4  ;;  %v6515_v8 = vrot.slane %v6513_v36, 3 }
 0x437   : > { %v6147_v14 = vor.u32 %v6146_v19, %v6143_v43  ;;  %v6173_v37 = vsel %vm14310_vm6, %v6164_v31, %v6172_v2  ;;  %v6446_v43 = vld [vmem:[#allocation2 + $0x50] sm:$0xf8]  ;;  %v13272_v19 = vld [vmem:[#allocation2 + $0x58] sm:$0xf]  ;;  %v6525_v61 = vshll.u32 %v6444_v32, 16 }
 0x438   : > { %v6542_v42 = vshll.u32 %v6446_v43, 16  ;;  %v6519_v46 = vor.u32 %v6518_v18, %v6515_v8  ;;  %v6550_v7 = vshll.u32 %v13272_v19, 16  ;;  %v6590_v8 = vshrl.u32 %v6452_v57, 16 }
 0x439   : > { %v6156_v34 = vsel %vm14308_vm11, %v6147_v14, %v6155_v5  ;;  %v6547_v14 = vshrl.u32 %v13272_v19, 16  ;;  %v6448_v5 = vld [vmem:[#allocation2 + $0x60] sm:$0xf8]  ;;  %v6527_v24 = vrot.slane %v6525_v61, 4  ;;  %v6593_v18 = vshll.u32 %v6452_v57, 16 }
 0x43a   : > { %v6544_v2 = vrot.slane %v6542_v42, 4 }
 0x43b   : > { %10760 = vmatmul.mubr.msk.bf16.gmra.mrb[12].mxu1 %vm14283_vm2, %v6054_v63  ;;  %v6186_v63 = vshll.u32 %v5918_v53, 16  ;;  %vm14313_vm2 = vsmask.f32 4352  ;;  %v6530_v53 = vshrl.u32 %v13268_v59, 16  ;;  %v6549_v27 = vrot.slane %v6547_v14, 3 }
 0x43c   : > { %10763 = vmatprep.mubr.msk.bf16.mxu1 %vm14300_vm4, %v6071_v51  ;;  %v6474_v51 = vshll.u32 %v6438_v12, 16  ;;  %vm14315_vm4 = vmmov %vm14314_vm3  ;;  %v6533_v12 = vshll.u32 %v13268_v59, 16  ;;  %v6456_v14 = vld [vmem:[#allocation2 + $0xa0] sm:$0xf8] }
 0x43d   : > { %v6188_v60 = vrot.slane %v6186_v63, 5  ;;  %vm14316_vm5 = vmmov %vm14313_vm2  ;;  %v6532_v47 = vrot.slane %v6530_v53, 3 }
 0x43e   : > { %v6476_v0 = vrot.slane %v6474_v51, 4  ;;  %v13281_v51 = vld [vmem:[#allocation2 + $0x68] sm:$0xf]  ;;  %v6535_v3 = vrot.slane %v6533_v12, 4  ;;  %vm14322_vm0 = vmmov %vm14313_vm2 }
 0x43f   : > { %v6189_v33 = vor.u32 %v6188_v60, %v6185_v16  ;;  %v6552_v16 = vrot.slane %v6550_v7, 4  ;;  %v13291_v60 = vld [vmem:[#allocation2 + $0x78] sm:$0xf]  ;;  %v6567_v6 = vshll.u32 %v13281_v51, 16  ;;  %vm14324_vm11 = vmmov %vm14322_vm0 }
 0x440   : > { %v6477_v1 = vor.u32 %v6476_v0, %v6473_v49  ;;  %v6559_v49 = vshll.u32 %v6448_v5, 16  ;;  %v6564_v0 = vshrl.u32 %v13281_v51, 16  ;;  %v6581_v15 = vshrl.u32 %v13291_v60, 16  ;;  %vm14326_vm6 = vmmov %vm14322_vm0 }
 0x441   : > { %v6190_v44 = vsel %vm14312_vm1, %v6181_v48, %v6189_v33  ;;  %v6553_v22 = vor.u32 %v6552_v16, %v6549_v27  ;;  %v6584_v48 = vshll.u32 %v13291_v60, 16  ;;  %vm14328_vm1 = vmmov %vm14322_vm0  ;;  %v6627_v27 = vshll.u32 %v6456_v14, 16 }
 0x442   : > { %v6486_v29 = vsel %vm14313_vm2, %v6477_v1, %v6485_v55  ;;  %v6561_v1 = vrot.slane %v6559_v49, 4  ;;  %v6566_v55 = vrot.slane %v6564_v0, 3  ;;  %v6583_v10 = vrot.slane %v6581_v15, 3 }
 0x443   : > { %10764 = vmatmul.mubr.msk.bf16.gmra.mrb[16].mxu1 %vm14302_vm9, %v6088_v38  ;;  %v6488_v38 = vshrl.u32 %v6440_v20, 16  ;;  %vm14317_vm9 = vcmask 1041408   ;;  %v6556_v20 = vshrl.u32 %v6448_v5, 16 }
 0x444   : > { %10767 = vmatprep.mubr.msk.bf16.mxu1 %vm14304_vm14, %v6105_v45  ;;  %v6505_v45 = vshrl.u32 %v6442_v40, 16  ;;  %v7135_v52 = vsel %vm14317_vm9, %v13198_v26, 0  ;;  %vm14319_vm14 = vmmov %vm14313_vm2  ;;  %v6450_v26 = vld [vmem:[#allocation2 + $0x70] sm:$0xf8] }
 0x445   : > { %v6490_v35 = vrot.slane %v6488_v38, 3  ;;  %v6573_v38 = vshrl.u32 %v6450_v26, 16  ;;  %v6576_v17 = vshll.u32 %v6450_v26, 16  ;;  %v6558_v33 = vrot.slane %v6556_v20, 3  ;;  %vm14329_vm2 = vmmov %vm14314_vm3 }
 0x446   : > { %v6507_v21 = vrot.slane %v6505_v45, 3  ;;  %v6569_v45 = vrot.slane %v6567_v6, 4 }
 0x447   : > { %v6494_v23 = vor.u32 %v6493_v13, %v6490_v35  ;;  %v6575_v36 = vrot.slane %v6573_v38, 3  ;;  %v13300_v35 = vld [vmem:[#allocation2 + $0x88] sm:$0xf]  ;;  %v6578_v25 = vrot.slane %v6576_v17, 4  ;;  %v6629_v17 = vrot.slane %v6627_v27, 4 }
 0x448   : > { %v6511_v30 = vor.u32 %v6510_v28, %v6507_v21  ;;  %v6562_v21 = vor.u32 %v6561_v1, %v6558_v33  ;;  %v6570_v28 = vor.u32 %v6569_v45, %v6566_v55  ;;  %v6460_v55 = vld [vmem:[#allocation2 + $0xc0] sm:$0xf8]  ;;  %v13324_v45 = vld [vmem:[#allocation2 + $0xc8] sm:$0xf] }
 0x449   : > { %v6503_v50 = vsel %vm14316_vm5, %v6494_v23, %v6502_v41  ;;  %v6601_v23 = vshll.u32 %v13300_v35, 16  ;;  %v6579_v61 = vor.u32 %v6578_v25, %v6575_v36  ;;  %vm14332_vm5 = vmmov %vm14322_vm0  ;;  %v6462_v25 = vld [vmem:[#allocation2 + $0xd0] sm:$0xf8] }
 0x44a   : > { %v6571_v42 = vsel %vm14326_vm6, %v6562_v21, %v6570_v28  ;;  %v6658_v21 = vshrl.u32 %v6460_v55, 16  ;;  %v6661_v28 = vshll.u32 %v6460_v55, 16  ;;  %v6468_v55 = vld [vmem:[#allocation2 + $0x100] sm:$0xf8]  ;;  %vm14341_vm6 = vmmov %vm14322_vm0 }
 0x44b   : > { %10768 = vmatmul.mubr.msk.bf16.gmra.mrb[20].mxu1 %vm14306_vm7, %v6122_v4  ;;  %v6522_v4 = vshrl.u32 %v6444_v32, 16  ;;  %vm14321_vm7 = vmmov %vm14317_vm9  ;;  %v13305_v32 = vld [vmem:[#allocation2 + $0x98] sm:$0xf]  ;;  %v6603_v5 = vrot.slane %v6601_v23, 4  ;;  %v6678_v23 = vshll.u32 %v6462_v25, 16 }
 0x44c   : > { %10771 = vmatprep.mubr.msk.bf16.mxu1 %vm14307_vm10, %v6139_v11  ;;  %v6539_v11 = vshrl.u32 %v6446_v43, 16  ;;  %vm14323_vm10 = vmmov %vm14314_vm3  ;;  %v6598_v43 = vshrl.u32 %v13300_v35, 16  ;;  %v6615_v12 = vshrl.u32 %v13305_v32, 16 }
 0x44d   : > { %v6524_v63 = vrot.slane %v6522_v4, 3  ;;  %vm14333_vm9 = vmmov %vm14329_vm2 }
 0x44e   : > { %v6541_v31 = vrot.slane %v6539_v11, 3  ;;  %v6618_v11 = vshll.u32 %v13305_v32, 16  ;;  %v6600_v7 = vrot.slane %v6598_v43, 3  ;;  %v6675_v43 = vshrl.u32 %v6462_v25, 16  ;;  %v13350_v25 = vld [vmem:[#allocation2 + $0x108] sm:$0xf] }
 0x44f   : > { %v6528_v54 = vor.u32 %v6527_v24, %v6524_v63  ;;  %v13312_v63 = vld [vmem:[#allocation2 + $0xa8] sm:$0xf] }
 0x450   : > { %v6545_v40 = vor.u32 %v6544_v2, %v6541_v31  ;;  %v6458_v31 = vld [vmem:[#allocation2 + $0xb0] sm:$0xf8]  ;;  %v13317_v2 = vld [vmem:[#allocation2 + $0xb8] sm:$0xf]  ;;  %v6632_v16 = vshrl.u32 %v13312_v63, 16  ;;  %v6635_v26 = vshll.u32 %v13312_v63, 16  ;;  %v6604_v49 = vor.u32 %v6603_v5, %v6600_v7 }
 0x451   : > { %v6641_v6 = vshrl.u32 %v6458_v31, 16  ;;  %v6652_v38 = vshll.u32 %v13317_v2, 16  ;;  %v6677_v7 = vrot.slane %v6675_v43, 3  ;;  %v6680_v5 = vrot.slane %v6678_v23, 4 }
 0x452   : > { %v6554_v13 = vsel %vm14324_vm11, %v6545_v40, %v6553_v22  ;;  %v6649_v40 = vshrl.u32 %v13317_v2, 16  ;;  %v6634_v15 = vrot.slane %v6632_v16, 3  ;;  %vm14339_vm11 = vmmov %vm14322_vm0 }
 0x453   : > { %10772 = vmatmul.mubr.msk.bf16.gmra.mrb[24].mxu1 %vm14309_vm12, %v6156_v34  ;;  %v6520_v34 = vsel %vm14319_vm14, %v6511_v30, %v6519_v46  ;;  %vm14325_vm12 = vmmov %vm14314_vm3  ;;  %v6592_v30 = vrot.slane %v6590_v8, 3  ;;  %v6595_v46 = vrot.slane %v6593_v18, 4  ;;  %v6643_v1 = vrot.slane %v6641_v6, 3 }
 0x454   : > { %10775 = vmatprep.mubr.msk.bf16.mxu1 %vm14311_vm8, %v6173_v37  ;;  %v6536_v37 = vor.u32 %v6535_v3, %v6532_v47  ;;  %vm14327_vm8 = vmmov %vm14314_vm3  ;;  %v6617_v47 = vrot.slane %v6615_v12, 3  ;;  %v6620_v3 = vrot.slane %v6618_v11, 4  ;;  %v6651_v57 = vrot.slane %v6649_v40, 3 }
 0x455   : > { %v6596_v20 = vor.u32 %v6595_v46, %v6592_v30  ;;  %v6666_v8 = vshrl.u32 %v13324_v45, 16  ;;  %v6669_v18 = vshll.u32 %v13324_v45, 16  ;;  %v6660_v11 = vrot.slane %v6658_v21, 3  ;;  %v6464_v30 = vld [vmem:[#allocation2 + $0xe0] sm:$0xf8]  ;;  %vm14335_vm14 = vmmov %vm14329_vm2 }
 0x456   : > { %v6537_v58 = vsel %vm14322_vm0, %v6528_v54, %v6536_v37  ;;  %v6621_v54 = vor.u32 %v6620_v3, %v6617_v47  ;;  %v6644_v37 = vshll.u32 %v6458_v31, 16  ;;  %v6466_v3 = vld [vmem:[#allocation2 + $0xf0] sm:$0xf8]  ;;  %v13341_v31 = vld [vmem:[#allocation2 + $0xf8] sm:$0xf]  ;;  %v6695_v27 = vshll.u32 %v6464_v30, 16 }
 0x457   : > { %v6668_v46 = vrot.slane %v6666_v8, 3  ;;  %v6709_v6 = vshrl.u32 %v6466_v3, 16  ;;  %v6717_v40 = vshrl.u32 %v13341_v31, 16  ;;  %v6726_v21 = vshrl.u32 %v6468_v55, 16 }
 0x458   : > { %v6646_v36 = vrot.slane %v6644_v37, 4  ;;  %v6712_v37 = vshll.u32 %v6466_v3, 16  ;;  %v6734_v8 = vshrl.u32 %v13350_v25, 16 }
 0x45b   : > { %10776 = vmatmul.mubr.msk.bf16.gmra.mrb[28].mxu1 %vm14314_vm3, %v6190_v44  ;;  %v6586_v44 = vrot.slane %v6584_v48, 4  ;;  %v6637_v48 = vrot.slane %v6635_v26, 4  ;;  %vm14330_vm3 = vmmov %vm14322_vm0 }
 0x45c   : > { %10781 = vmatprep.mubr.msk.bf16.mxu1 %vm14315_vm4, %v6486_v29  ;;  %v6454_v29 = vld [vmem:[#allocation2 + $0x90] sm:$0xf8]  ;;  %v6605_v33 = vsel %vm14330_vm3, %v6596_v20, %v6604_v49  ;;  %vm14331_vm4 = vmmov %vm14329_vm2 }
 0x45d   : > { %v6607_v41 = vshrl.u32 %v6454_v29, 16  ;;  %v6610_v4 = vshll.u32 %v6454_v29, 16  ;;  %v6587_v53 = vor.u32 %v6586_v44, %v6583_v10  ;;  %v13329_v10 = vld [vmem:[#allocation2 + $0xd8] sm:$0xf]  ;;  %v6638_v29 = vor.u32 %v6637_v48, %v6634_v15  ;;  %vm14344_vm3 = vmmov %vm14322_vm0 }
 0x45f   : > { %v6588_v24 = vsel %vm14328_vm1, %v6579_v61, %v6587_v53  ;;  %v6683_v61 = vshrl.u32 %v13329_v10, 16  ;;  %v6686_v53 = vshll.u32 %v13329_v10, 16  ;;  %vm14343_vm1 = vmmov %vm14322_vm0 }
 0x461   : > { %v6688_v47 = vrot.slane %v6686_v53, 4  ;;  %v6736_v53 = vrot.slane %v6734_v8, 3 }
 0x463   : > { %10782 = vmatmul.mubr.msk.bf16.vlgmr.msra.gmra.mrb[0].mxu1 %vm14318_vm13, %v6503_v50  ;;  %v6609_v50 = vrot.slane %v6607_v41, 3  ;;  %v6647_v41 = vor.u32 %v6646_v36, %v6643_v1  ;;  %vm14334_vm13 = vmmov %vm14322_vm0  ;;  %v6711_v1 = vrot.slane %v6709_v6, 3  ;;  %v6714_v36 = vrot.slane %v6712_v37, 4 }
 0x464   : > { %10814 = vmatpush3.bf16.msra.mxu1 %v7135_v52  ;;  %10785 = vmatprep.mubr.msk.bf16.mxu1 %vm14320_vm15, %v6520_v34  ;;  %v6612_v52 = vrot.slane %v6610_v4, 4  ;;  %v6624_v34 = vshrl.u32 %v6456_v14, 16  ;;  %v6671_v14 = vrot.slane %v6669_v18, 4  ;;  %vm14336_vm15 = vmmov %vm14322_vm0  ;;  %v6737_v18 = vshll.u32 %v13350_v25, 16 }
 0x465   : > { %11509 = vmatprep.subr.msk.bf16.mxu1 %vm14321_vm7, %v13286_v9  ;;  %vm14337_vm7 = vmmov %vm14329_vm2  ;;  %v6715_v43 = vor.u32 %v6714_v36, %v6711_v1  ;;  %v13411_v1 = vld [vmem:[#allocation2 + $0x80] sm:$0xf0] }
 0x466   : > { %v6613_v0 = vor.u32 %v6612_v52, %v6609_v50  ;;  %v6626_v22 = vrot.slane %v6624_v34, 3  ;;  %v13336_v50 = vld [vmem:[#allocation2 + $0xe8] sm:$0xf]  ;;  %v6692_v34 = vshrl.u32 %v6464_v30, 16  ;;  %v6672_v49 = vor.u32 %v6671_v14, %v6668_v46 }
 0x467   : > { %v6700_v16 = vshrl.u32 %v13336_v50, 16  ;;  %v6703_v26 = vshll.u32 %v13336_v50, 16 }
 0x468   : > { %v6630_v44 = vor.u32 %v6629_v17, %v6626_v22  ;;  %v6694_v22 = vrot.slane %v6692_v34, 3  ;;  %v6697_v17 = vrot.slane %v6695_v27, 4  ;;  %v7038_v34 = vrot.slane %v13255_v39, 4  ;;  %v13388_v39 = vld [vmem:[#allocation2 + $0x50] sm:$0xf0] }
 0x469   : > { %v6702_v15 = vrot.slane %v6700_v16, 3  ;;  %v6705_v48 = vrot.slane %v6703_v26, 4  ;;  %v7046_v6 = vrot.slane %v13388_v39, 4 }
 0x46a   : > { %v6639_v12 = vsel %vm14334_vm13, %v6630_v44, %v6638_v29  ;;  %v6698_v44 = vor.u32 %v6697_v17, %v6694_v22  ;;  %vm14348_vm13 = vcmask 1041408   ;;  %v13402_v22 = vld [vmem:[#allocation2 + $0x70] sm:$0xf0] }
 0x46b   : > { %10786 = vmatmul.mubr.msk.bf16.gmra.mrb[4].mxu1 %vm14323_vm10, %v6537_v58  ;;  %v6622_v58 = vsel %vm14332_vm5, %v6613_v0, %v6621_v54  ;;  %v6681_v0 = vor.u32 %v6680_v5, %v6677_v7  ;;  %vm14338_vm10 = vmmov %vm14329_vm2  ;;  %v6706_v29 = vor.u32 %v6705_v48, %v6702_v15  ;;  %v7035_v7 = vrot.slane %v13247_v62, 4 }
 0x46c   : > { %10789 = vmatprep.mubr.msk.bf16.mxu1 %vm14325_vm12, %v6554_v13  ;;  %v6654_v13 = vrot.slane %v6652_v38, 4  ;;  %v6720_v38 = vshll.u32 %v13341_v31, 16  ;;  %vm14340_vm12 = vmmov %vm14329_vm2  ;;  %vm14346_vm5 = vcmask 1043456   ;;  %v7041_v62 = vrot.slane %v13260_v56, 4 }
 0x46d   : > { %v7667_v16 = vsel %vm14348_vm13, %v13286_v9, 0  ;;  %v7044_v9 = vrot.slane %v13268_v59, 4  ;;  %v7050_v59 = vrot.slane %v13281_v51, 4  ;;  %v7052_v15 = vrot.slane %v13402_v22, 4 }
 0x46e   : > { %v6655_v4 = vor.u32 %v6654_v13, %v6651_v57  ;;  %v6719_v57 = vrot.slane %v6717_v40, 3  ;;  %v6722_v13 = vrot.slane %v6720_v38, 4  ;;  %v13399_v38 = vld [vmem:[#allocation2 + $0x60] sm:$0xf0]  ;;  %v7056_v51 = vrot.slane %v13300_v35, 4 }
 0x46f   : > { %v7049_v17 = vrot.slane %v13399_v38, 4  ;;  %v7062_v35 = vrot.slane %v13312_v63, 4  ;;  %v7068_v63 = vrot.slane %v13324_v45, 4  ;;  %v7074_v45 = vrot.slane %v13336_v50, 4  ;;  %v13461_v50 = vld [vmem:[#allocation2 + $0x100] sm:$0xf0] }
 0x470   : > { %v6656_v52 = vsel %vm14336_vm15, %v6647_v41, %v6655_v4  ;;  %v6723_v23 = vor.u32 %v6722_v13, %v6719_v57  ;;  %v6707_v41 = vsel %vm14341_vm6, %v6698_v44, %v6706_v29  ;;  %v6728_v4 = vrot.slane %v6726_v21, 3  ;;  %vm14350_vm15 = vmmov %vm14329_vm2  ;;  %v13423_v44 = vld [vmem:[#allocation2 + $0xa0] sm:$0xf0]  ;;  %v13426_v29 = vld [vmem:[#allocation2 + $0xb0] sm:$0xf0] }
 0x471   : > { %vm14356_vm6 = vmmov %vm14346_vm5  ;;  %v7061_v21 = vrot.slane %v13423_v44, 4 }
 0x473   : > { %10790 = vmatmul.mubr.msk.bf16.gmra.mrb[8].mxu1 %vm14327_vm8, %v6571_v42  ;;  %v6663_v42 = vrot.slane %v6661_v28, 4  ;;  %v6729_v28 = vshll.u32 %v6468_v55, 16  ;;  %vm14342_vm8 = vmmov %vm14329_vm2  ;;  %v13414_v55 = vld [vmem:[#allocation2 + $0x90] sm:$0xf0] }
 0x474   : > { %10793 = vmatprep.mubr.msk.bf16.mxu1 %vm14329_vm2, %v6588_v24  ;;  %v6685_v24 = vrot.slane %v6683_v61, 3  ;;  %v7058_v36 = vrot.slane %v13414_v55, 4 }
 0x475   : > { %v6664_v20 = vor.u32 %v6663_v42, %v6660_v11  ;;  %v6731_v61 = vrot.slane %v6729_v28, 4  ;;  %v6724_v11 = vsel %vm14343_vm1, %v6715_v43, %v6723_v23  ;;  %v13359_v42 = vld [vmem:[#allocation2 + $0x10] sm:$0xf0]  ;;  %vm14358_vm1 = vmmov %vm14346_vm5  ;;  %v7064_v28 = vrot.slane %v13426_v29, 4  ;;  %v13435_v43 = vld [vmem:[#allocation2 + $0xc0] sm:$0xf0] }
 0x476   : > { %v6689_v54 = vor.u32 %v6688_v47, %v6685_v24  ;;  %v7034_v14 = vrot.slane %v13359_v42, 4  ;;  %v13366_v24 = vld [vmem:[#allocation2 + $0x20] sm:$0xf0]  ;;  %v13369_v47 = vld [vmem:[#allocation2 + $0x30] sm:$0xf0]  ;;  %v7051_v48 = vsel %vm14358_vm1, %v7049_v17, %v7050_v59 }
 0x477   : > { %v6732_v30 = vor.u32 %v6731_v61, %v6728_v4  ;;  %v7037_v3 = vrot.slane %v13366_v24, 4  ;;  %v7040_v27 = vrot.slane %v13369_v47, 4  ;;  %v13438_v23 = vld [vmem:[#allocation2 + $0xd0] sm:$0xf0]  ;;  %v7381_v59 = vshrl.u32 %v13369_v47, 16 }
 0x478   : > { %v7070_v4 = vrot.slane %v13438_v23, 4 }
 0x47b   : > { %10794 = vmatmul.mubr.msk.bf16.gmra.mrb[12].mxu1 %vm14331_vm4, %v6605_v33  ;;  %v6673_v33 = vsel %vm14322_vm0, %v6664_v20, %v6672_v49  ;;  %vm14345_vm4 = vmmov %vm14329_vm2  ;;  %v13381_v20 = vld [vmem:[%s14168_s2 + $0x10] sm:$0xf] }
 0x47c   : > { %10797 = vmatprep.mubr.msk.bf16.mxu1 %vm14333_vm9, %v6622_v58  ;;  %v6690_v58 = vsel %vm14339_vm11, %v6681_v0, %v6689_v54  ;;  %vm14347_vm9 = vmmov %vm14329_vm2  ;;  %v13385_v0 = vld [vmem:[#allocation2 + $0x40] sm:$0xf0]  ;;  %v7047_v54 = vrot.slane %v13272_v19, 4  ;;  %v7053_v19 = vrot.slane %v13291_v60, 4  ;;  %v7059_v60 = vrot.slane %v13305_v32, 4 }
 0x47d   : > { %vm14352_vm0 = vmmov %vm14329_vm2  ;;  %v7043_v56 = vrot.slane %v13385_v0, 4  ;;  %v7065_v32 = vrot.slane %v13317_v2, 4  ;;  %v7071_v2 = vrot.slane %v13329_v10, 4  ;;  %v7350_v10 = vshll.u32 %v13359_v42, 16 }
 0x47e   : > { %vm14354_vm11 = vmmov %vm14346_vm5  ;;  %v7048_v40 = vsel %vm14356_vm6, %v7046_v6, %v7047_v54 }
 0x47f   : > { %v7045_v37 = vsel %vm14354_vm11, %v7043_v56, %v7044_v9  ;;  %v7367_v9 = vshll.u32 %v13366_v24, 16 }
 0x483   : > { %10798 = vmatmul.mubr.msk.bf16.gmra.mrb[16].mxu1 %vm14335_vm14, %v6639_v12  ;;  %v6739_v12 = vrot.slane %v6737_v18, 4  ;;  %vm14349_vm14 = vmmov %vm14346_vm5 }
 0x484   : > { %10801 = vmatprep.mubr.msk.bf16.mxu1 %vm14337_vm7, %v6656_v52  ;;  %v7036_v52 = vsel %vm14346_vm5, %v7034_v14, %v7035_v7  ;;  %v7039_v26 = vsel %vm14349_vm14, %v7037_v3, %v7038_v34  ;;  %vm14351_vm7 = vmmov %vm14346_vm5  ;;  %v7347_v14 = vshrl.u32 %v13359_v42, 16  ;;  %v7332_v42 = vld [vmem:[#allocation2 + $0x38] sm:$0x1f] }
 0x485   : > { %v6740_v46 = vor.u32 %v6739_v12, %v6736_v53  ;;  %v7042_v49 = vsel %vm14351_vm7, %v7040_v27, %v7041_v62  ;;  %vm14362_vm5 = vmmov %vm14358_vm1  ;;  %v13447_v12 = vld [vmem:[#allocation2 + $0xe0] sm:$0xf0]  ;;  %v7352_v62 = vrot.slane %v7350_v10, 5 }
 0x486   : > { %vm14365_vm14 = vmmov %vm14352_vm0  ;;  %v7349_v27 = vrot.slane %v7347_v14, 4 }
 0x487   : > { %v6741_v5 = vsel %vm14344_vm3, %v6732_v30, %v6740_v46  ;;  %vm14360_vm3 = vmmov %vm14358_vm1  ;;  %v7330_v30 = vld [vmem:[#allocation2 + $0x18] sm:$0x1f]  ;;  %v7073_v46 = vrot.slane %v13447_v12, 4 }
 0x488   : > { %vm14367_vm7 = vmmov %vm14352_vm0  ;;  %v7358_v3 = vshll.u32 %v7330_v30, 16  ;;  %v7353_v17 = vor.u32 %v7352_v62, %v7349_v27 }
 0x48a   : > { %v7360_v56 = vrot.slane %v7358_v3, 5 }
 0x48b   : > { %10802 = vmatmul.mubr.msk.bf16.gmra.mrb[20].mxu1 %vm14338_vm10, %v6673_v33  ;;  %vm14353_vm10 = vmmov %vm14348_vm13  ;;  %v7054_v33 = vsel %vm14360_vm3, %v7052_v15, %v7053_v19  ;;  %v7384_v19 = vshll.u32 %v13369_v47, 16  ;;  %v7398_v47 = vshrl.u32 %v13385_v0, 16 }
 0x48c   : > { %10805 = vmatprep.mubr.msk.bf16.mxu1 %vm14340_vm12, %v6690_v58  ;;  %vm14355_vm12 = vmmov %vm14352_vm0  ;;  %v7055_v58 = vrot.slane %v13411_v1, 4 }
 0x48d   : > { %vm14364_vm13 = vmmov %vm14358_vm1  ;;  %v7400_v10 = vrot.slane %v7398_v47, 4  ;;  %v7469_v47 = vshll.u32 %v13411_v1, 16 }
 0x48e   : > { %v7057_v57 = vsel %vm14362_vm5, %v7055_v58, %v7056_v51  ;;  %v7060_v13 = vsel %vm14364_vm13, %v7058_v36, %v7059_v60  ;;  %v7369_v51 = vrot.slane %v7367_v9, 5  ;;  %vm14379_vm13 = vsmask.f32 3328 }
 0x493   : > { %10806 = vmatmul.mubr.msk.bf16.gmra.mrb[24].mxu1 %vm14342_vm8, %v6707_v41  ;;  %vm14357_vm8 = vmmov %vm14352_vm0  ;;  %v7067_v41 = vrot.slane %v13435_v43, 4 }
 0x494   : > { %10809 = vmatprep.mubr.msk.bf16.mxu1 %vm14329_vm2, %v6724_v11  ;;  %vm14359_vm2 = vmmov %vm14352_vm0  ;;  %v13450_v11 = vld [vmem:[#allocation2 + $0xf0] sm:$0xf0] }
 0x495   : > { %v7076_v7 = vrot.slane %v13450_v11, 4 }
 0x49b   : > { %10810 = vmatmul.mubr.msk.bf16.gmra.mrb[28].mxu1 %vm14345_vm4, %v6741_v5  ;;  %vm14361_vm4 = vmmov %vm14352_vm0  ;;  %v7077_v5 = vrot.slane %v13341_v31, 4  ;;  %v7364_v31 = vshrl.u32 %v13366_v24, 16 }
 0x49c   : > { %10815 = vmatprep.mubr.msk.bf16.mxu1 %vm14347_vm9, %v7036_v52  ;;  %vm14363_vm9 = vmmov %vm14352_vm0  ;;  %v7355_v52 = vshrl.u32 %v7330_v30, 16 }
 0x49d   : > { %v7366_v58 = vrot.slane %v7364_v31, 4 }
 0x4a3   : > { %10816 = vmatmul.mubr.msk.bf16.vlgmr.msra.gmra.mrb[0].mxu1 %vm14350_vm15, %v7039_v26  ;;  %vm14366_vm15 = vmmov %vm14358_vm1 }
 0x4a4   : > { %10848 = vmatpush3.bf16.msra.mxu1 %v7667_v16  ;;  %10819 = vmatprep.mubr.msk.bf16.mxu1 %vm14352_vm0, %v7042_v49  ;;  %v7063_v8 = vsel %vm14366_vm15, %v7061_v21, %v7062_v35  ;;  %vm14368_vm0 = vmmov %vm14358_vm1  ;;  %v7331_v16 = vld [vmem:[#allocation2 + $0x28] sm:$0x1f]  ;;  %v7357_v49 = vrot.slane %v7355_v52, 4 }
 0x4a5   : > { %11510 = vmatprep.subr.msk.bf16.mxu1 %vm14353_vm10, %v13381_v20  ;;  %v7066_v18 = vsel %vm14368_vm0, %v7064_v28, %v7065_v32  ;;  %vm14369_vm10 = vmmov %vm14359_vm2  ;;  %v7372_v6 = vshrl.u32 %v7331_v16, 16  ;;  %v7375_v54 = vshll.u32 %v7331_v16, 16  ;;  %v7333_v28 = vld [vmem:[#allocation2 + $0x48] sm:$0x1f]  ;;  %v7334_v32 = vld [vmem:[#allocation2 + $0x58] sm:$0x1f] }
 0x4a6   : > { %vm14370_vm11 = vmmov %vm14368_vm0  ;;  %v7361_v15 = vor.u32 %v7360_v56, %v7357_v49  ;;  %v7426_v14 = vshll.u32 %v7334_v32, 16  ;;  %v7335_v16 = vld [vmem:[#allocation2 + $0x68] sm:$0x1f]  ;;  %v7432_v56 = vshrl.u32 %v13399_v38, 16 }
 0x4a7   : > { %v7069_v61 = vsel %vm14370_vm11, %v7067_v41, %v7068_v63  ;;  %vm14372_vm6 = vmmov %vm14368_vm0  ;;  %v7374_v36 = vrot.slane %v7372_v6, 4  ;;  %v7377_v60 = vrot.slane %v7375_v54, 5  ;;  %v7401_v63 = vshll.u32 %v13385_v0, 16 }
 0x4a8   : > { %v7072_v53 = vsel %vm14372_vm6, %v7070_v4, %v7071_v2  ;;  %vm14374_vm1 = vmmov %vm14368_vm0  ;;  %v7406_v4 = vshrl.u32 %v7333_v28, 16  ;;  %v7409_v2 = vshll.u32 %v7333_v28, 16  ;;  %v7428_v49 = vrot.slane %v7426_v14, 5 }
 0x4a9   : > { %v7075_v34 = vsel %vm14374_vm1, %v7073_v46, %v7074_v45  ;;  %vm14375_vm3 = vmmov %vm14368_vm0  ;;  %v7378_v41 = vor.u32 %v7377_v60, %v7374_v36  ;;  %v7423_v45 = vshrl.u32 %v7334_v32, 16  ;;  %v7403_v3 = vrot.slane %v7401_v63, 5  ;;  %v7337_v60 = vld [vmem:[#allocation2 + $0x88] sm:$0x1f] }
 0x4aa   : > { %v7078_v26 = vsel %vm14375_vm3, %v7076_v7, %v7077_v5  ;;  %vm14377_vm5 = vmmov %vm14368_vm0  ;;  %v7408_v0 = vrot.slane %v7406_v4, 4  ;;  %v7440_v31 = vshrl.u32 %v7335_v16, 16  ;;  %v7443_v9 = vshll.u32 %v7335_v16, 16 }
 0x4ab   : > { %10820 = vmatmul.mubr.msk.bf16.gmra.mrb[4].mxu1 %vm14355_vm12, %v7045_v37  ;;  %vm14371_vm12 = vmmov %vm14359_vm2  ;;  %v7079_v37 = vrot.slane %v13461_v50, 4  ;;  %v7404_v6 = vor.u32 %v7403_v3, %v7400_v10  ;;  %v7474_v32 = vshrl.u32 %v7337_v60, 16  ;;  %v7339_v3 = vld [vmem:[#allocation2 + $0xa8] sm:$0x1f] }
 0x4ac   : > { %10823 = vmatprep.mubr.msk.bf16.mxu1 %vm14357_vm8, %v7048_v40  ;;  %vm14373_vm8 = vmmov %vm14359_vm2  ;;  %v7080_v40 = vrot.slane %v13350_v25, 4  ;;  %v7386_v25 = vrot.slane %v7384_v19, 5  ;;  %v7511_v16 = vshll.u32 %v7339_v3, 16 }
 0x4ad   : > { %vm14381_vm15 = vmmov %vm14379_vm13 }
 0x4ae   : > { %v7081_v24 = vsel %vm14377_vm5, %v7079_v37, %v7080_v40  ;;  %vm14383_vm0 = vmmov %vm14359_vm2  ;;  %v7449_v40 = vshrl.u32 %v13402_v22, 16 }
 0x4af   : > { %vm14385_vm11 = vmmov %vm14383_vm0 }
 0x4b0   : > { %v7451_v36 = vrot.slane %v7449_v40, 4  ;;  %v7513_v40 = vrot.slane %v7511_v16, 5 }
 0x4b3   : > { %10824 = vmatmul.mubr.msk.bf16.gmra.mrb[8].mxu1 %vm14359_vm2, %v7051_v48  ;;  %v7389_v48 = vshrl.u32 %v7332_v42, 16 }
 0x4b4   : > { %10827 = vmatprep.mubr.msk.bf16.mxu1 %vm14361_vm4, %v7054_v33  ;;  %vm14376_vm4 = vmmov %vm14359_vm2  ;;  %v7392_v33 = vshll.u32 %v7332_v42, 16  ;;  %v7435_v42 = vshll.u32 %v13399_v38, 16  ;;  %v7445_v38 = vrot.slane %v7443_v9, 5 }
 0x4b5   : > { %v7391_v21 = vrot.slane %v7389_v48, 4  ;;  %v7434_v48 = vrot.slane %v7432_v56, 4 }
 0x4b6   : > { %v7394_v35 = vrot.slane %v7392_v33, 5  ;;  %v7437_v33 = vrot.slane %v7435_v42, 5  ;;  %v7517_v42 = vshrl.u32 %v13426_v29, 16 }
 0x4b8   : > { %v7395_v46 = vor.u32 %v7394_v35, %v7391_v21  ;;  %v7338_v21 = vld [vmem:[#allocation2 + $0x98] sm:$0x1f]  ;;  %v7466_v35 = vshrl.u32 %v13411_v1, 16 }
 0x4b9   : > { %v7491_v63 = vshrl.u32 %v7338_v21, 16  ;;  %v7494_v4 = vshll.u32 %v7338_v21, 16 }
 0x4bb   : > { %10828 = vmatmul.mubr.msk.bf16.gmra.mrb[12].mxu1 %vm14363_vm9, %v7057_v57  ;;  %v7383_v57 = vrot.slane %v7381_v59, 4  ;;  %vm14378_vm9 = vmmov %vm14359_vm2  ;;  %v7452_v59 = vshll.u32 %v13402_v22, 16  ;;  %v7438_v22 = vor.u32 %v7437_v33, %v7434_v48  ;;  %v7496_v1 = vrot.slane %v7494_v4, 5 }
 0x4bc   : > { %10831 = vmatprep.mubr.msk.bf16.mxu1 %vm14365_vm14, %v7060_v13  ;;  %v7362_v13 = vsel %vm14379_vm13, %v7353_v17, %v7361_v15  ;;  %vm14380_vm14 = vmmov %vm14359_vm2 }
 0x4bd   : > { %v7387_v30 = vor.u32 %v7386_v25, %v7383_v57  ;;  %v7454_v57 = vrot.slane %v7452_v59, 5  ;;  %v7341_v59 = vld [vmem:[#allocation2 + $0xc8] sm:$0x1f] }
 0x4c3   : > { %10832 = vmatmul.mubr.msk.bf16.gmra.mrb[16].mxu1 %vm14367_vm7, %v7063_v8  ;;  %v10028_v8 = vcombine.low %v13381_v20, %v13381_v20  ;;  %vm14382_vm7 = vcmask 1041408  }
 0x4c4   : > { %10835 = vmatprep.mubr.msk.bf16.mxu1 %vm14369_vm10, %v7066_v18  ;;  %v7370_v18 = vor.u32 %v7369_v51, %v7366_v58  ;;  %v8218_v52 = vsel %vm14382_vm7, %v13381_v20, 0  ;;  %vm14384_vm10 = vmmov %vm14379_vm13  ;;  %v7336_v20 = vld [vmem:[#allocation2 + $0x78] sm:$0x1f]  ;;  %v7442_v58 = vrot.slane %v7440_v31, 4 }
 0x4c5   : > { %v13480_v7 = vrot.slane %v10028_v8, 2  ;;  %v7457_v15 = vshrl.u32 %v7336_v20, 16  ;;  %v7460_v19 = vshll.u32 %v7336_v20, 16  ;;  %vm14387_vm6 = vmmov %vm14384_vm10  ;;  %v7477_v8 = vshll.u32 %v7337_v60, 16 }
 0x4c6   : > { %v7379_v5 = vsel %vm14381_vm15, %v7370_v18, %v7378_v41  ;;  %vm14389_vm1 = vmmov %vm14387_vm6  ;;  %v7446_v28 = vor.u32 %v7445_v38, %v7442_v58  ;;  %v7483_v18 = vshrl.u32 %v13414_v55, 16  ;;  %v7486_v41 = vshll.u32 %v13414_v55, 16  ;;  %v7342_v58 = vld [vmem:[#allocation2 + $0xd8] sm:$0x1f] }
 0x4c7   : > { %v7462_v25 = vrot.slane %v7460_v19, 5  ;;  %vm14391_vm3 = vmmov %vm14389_vm1  ;;  %v7479_v14 = vrot.slane %v7477_v8, 5  ;;  %v7500_v55 = vshrl.u32 %v13423_v44, 16  ;;  %v7520_v20 = vshll.u32 %v13426_v29, 16 }
 0x4c8   : > { %v7485_v10 = vrot.slane %v7483_v18, 4  ;;  %vm14393_vm5 = vmmov %vm14389_vm1  ;;  %v7534_v38 = vshrl.u32 %v13435_v43, 16  ;;  %v7542_v60 = vshrl.u32 %v7341_v59, 16  ;;  %v7562_v21 = vshll.u32 %v7342_v58, 16 }
 0x4c9   : > { %vm14395_vm13 = vmmov %vm14389_vm1  ;;  %v7522_v19 = vrot.slane %v7520_v20, 5 }
 0x4ca   : > { %vm14397_vm15 = vmmov %vm14383_vm0  ;;  %v7544_v8 = vrot.slane %v7542_v60, 4 }
 0x4cb   : > { %10836 = vmatmul.mubr.msk.bf16.gmra.mrb[20].mxu1 %vm14371_vm12, %v7069_v61  ;;  %v7415_v61 = vshrl.u32 %v13388_v39, 16  ;;  %vm14386_vm12 = vmmov %vm14382_vm7 }
 0x4cc   : > { %10839 = vmatprep.mubr.msk.bf16.mxu1 %vm14373_vm8, %v7072_v53  ;;  %v7418_v53 = vshll.u32 %v13388_v39, 16  ;;  %v7396_v39 = vsel %vm14384_vm10, %v7387_v30, %v7395_v46  ;;  %vm14388_vm8 = vmmov %vm14383_vm0  ;;  %v7447_v30 = vsel %vm14391_vm3, %v7438_v22, %v7446_v28  ;;  %v7471_v46 = vrot.slane %v7469_v47, 5 }
 0x4cd   : > { %v7417_v27 = vrot.slane %v7415_v61, 4  ;;  %vm14398_vm7 = vmmov %vm14383_vm0  ;;  %v7536_v28 = vrot.slane %v7534_v38, 4 }
 0x4ce   : > { %v7420_v62 = vrot.slane %v7418_v53, 5  ;;  %v7468_v53 = vrot.slane %v7466_v35, 4 }
 0x4d0   : > { %v7421_v37 = vor.u32 %v7420_v62, %v7417_v27  ;;  %v7340_v27 = vld [vmem:[#allocation2 + $0xb8] sm:$0x1f]  ;;  %v7508_v62 = vshrl.u32 %v7339_v3, 16  ;;  %v7588_v3 = vshll.u32 %v13450_v11, 16 }
 0x4d1   : > { %v7525_v31 = vshrl.u32 %v7340_v27, 16  ;;  %v7528_v9 = vshll.u32 %v7340_v27, 16 }
 0x4d3   : > { %10840 = vmatmul.mubr.msk.bf16.gmra.mrb[24].mxu1 %vm14359_vm2, %v7075_v34  ;;  %v7411_v34 = vrot.slane %v7409_v2, 5  ;;  %vm14390_vm2 = vmmov %vm14383_vm0  ;;  %v7455_v2 = vor.u32 %v7454_v57, %v7451_v36  ;;  %v7527_v48 = vrot.slane %v7525_v31, 4  ;;  %v7530_v33 = vrot.slane %v7528_v9, 5  ;;  %v7865_v31 = vld [vmem:[#allocation2 + $0x20] sm:$0xf8] }
 0x4d4   : > { %10843 = vmatprep.mubr.msk.bf16.mxu1 %vm14376_vm4, %v7078_v26  ;;  %v7425_v26 = vrot.slane %v7423_v45, 4  ;;  %v7476_v45 = vrot.slane %v7474_v32, 4  ;;  %vm14392_vm4 = vmmov %vm14383_vm0  ;;  %v7537_v36 = vshll.u32 %v13435_v43, 16  ;;  %v7551_v57 = vshrl.u32 %v13438_v23, 16 }
 0x4d5   : > { %v7412_v54 = vor.u32 %v7411_v34, %v7408_v0  ;;  %v7503_v34 = vshll.u32 %v13423_v44, 16  ;;  %v7531_v35 = vor.u32 %v7530_v33, %v7527_v48  ;;  %v7564_v43 = vrot.slane %v7562_v21, 5  ;;  %vm14400_vm10 = vmmov %vm14390_vm2  ;;  %v13539_v21 = vld [vmem:[#allocation2 + $0x38] sm:$0xf] }
 0x4d6   : > { %v7429_v17 = vor.u32 %v7428_v49, %v7425_v26  ;;  %v7480_v26 = vor.u32 %v7479_v14, %v7476_v45  ;;  %v7539_v32 = vrot.slane %v7537_v36, 5  ;;  %v7571_v45 = vshll.u32 %v13447_v12, 16 }
 0x4d7   : > { %v7413_v51 = vsel %vm14387_vm6, %v7404_v6, %v7412_v54  ;;  %v7502_v6 = vrot.slane %v7500_v55, 4  ;;  %v7505_v54 = vrot.slane %v7503_v34, 5  ;;  %v7602_v9 = vshrl.u32 %v13461_v50, 16 }
 0x4d8   : > { %v7573_v16 = vrot.slane %v7571_v45, 5 }
 0x4d9   : > { %v7506_v29 = vor.u32 %v7505_v54, %v7502_v6  ;;  %v7605_v6 = vshll.u32 %v13461_v50, 16 }
 0x4db   : > { %10844 = vmatmul.mubr.msk.bf16.gmra.mrb[28].mxu1 %vm14378_vm9, %v7081_v24  ;;  %v7430_v24 = vsel %vm14389_vm1, %v7421_v37, %v7429_v17  ;;  %vm14394_vm9 = vmmov %vm14383_vm0  ;;  %v7510_v37 = vrot.slane %v7508_v62, 4 }
 0x4dc   : > { %10849 = vmatprep.mubr.msk.bf16.mxu1 %vm14380_vm14, %v7362_v13  ;;  %v7459_v13 = vrot.slane %v7457_v15, 4  ;;  %vm14396_vm14 = vmmov %vm14389_vm1  ;;  %v7519_v15 = vrot.slane %v7517_v42, 4 }
 0x4de   : > { %v7463_v61 = vor.u32 %v7462_v25, %v7459_v13  ;;  %v7554_v13 = vshll.u32 %v13438_v23, 16  ;;  %v7559_v25 = vshrl.u32 %v7342_v58, 16  ;;  %v7523_v22 = vor.u32 %v7522_v19, %v7519_v15  ;;  %v7344_v23 = vld [vmem:[#allocation2 + $0xf8] sm:$0x1f] }
 0x4df   : > { %v7596_v55 = vshll.u32 %v7344_v23, 16  ;;  %v7604_v58 = vrot.slane %v7602_v9, 4 }
 0x4e0   : > { %v7464_v0 = vsel %vm14393_vm5, %v7455_v2, %v7463_v61  ;;  %v7561_v4 = vrot.slane %v7559_v25, 4  ;;  %v7343_v61 = vld [vmem:[#allocation2 + $0xe8] sm:$0x1f] }
 0x4e1   : > { %v7598_v20 = vrot.slane %v7596_v55, 5 }
 0x4e3   : > { %10850 = vmatmul.mubr.msk.bf16.vlgmr.msra.gmra.mrb[0].mxu1 %vm14383_vm0, %v7379_v5  ;;  %v7488_v5 = vrot.slane %v7486_v41, 5  ;;  %vm14399_vm0 = vmmov %vm14389_vm1  ;;  %v7553_v41 = vrot.slane %v7551_v57, 4 }
 0x4e4   : > { %10882 = vmatpush3.bf16.msra.mxu1 %v8218_v52  ;;  %10853 = vmatprep.mubr.msk.bf16.mxu1 %vm14385_vm11, %v7396_v39  ;;  %v7493_v52 = vrot.slane %v7491_v63, 4  ;;  %v7472_v39 = vor.u32 %v7471_v46, %v7468_v53  ;;  %v7556_v63 = vrot.slane %v7554_v13, 5  ;;  %vm14401_vm11 = vmmov %vm14399_vm0  ;;  %v7540_v53 = vor.u32 %v7539_v32, %v7536_v28 }
 0x4e5   : > { %11511 = vmatprep.subr.msk.bf16.mxu1 %vm14386_vm12, %v13480_v7  ;;  %v7489_v49 = vor.u32 %v7488_v5, %v7485_v10  ;;  %v7532_v2 = vsel %vm14401_vm11, %v7523_v22, %v7531_v35  ;;  %vm14402_vm12 = vmmov %vm14390_vm2  ;;  %v7568_v46 = vshrl.u32 %v13447_v12, 16  ;;  %v7565_v10 = vor.u32 %v7564_v43, %v7561_v4  ;;  %v7869_v22 = vld [vmem:[#allocation2 + $0x40] sm:$0xf8]  ;;  %v13542_v35 = vld [vmem:[#allocation2 + $0x48] sm:$0xf] }
 0x4e6   : > { %v7497_v56 = vor.u32 %v7496_v1, %v7493_v52  ;;  %v7481_v17 = vsel %vm14395_vm13, %v7472_v39, %v7480_v26  ;;  %v7557_v14 = vor.u32 %v7556_v63, %v7553_v41  ;;  %v7576_v5 = vshrl.u32 %v7343_v61, 16  ;;  %vm14403_vm6 = vmmov %vm14399_vm0 }
 0x4e7   : > { %v7579_v52 = vshll.u32 %v7343_v61, 16  ;;  %v7585_v1 = vshrl.u32 %v13450_v11, 16  ;;  %v7570_v27 = vrot.slane %v7568_v46, 4  ;;  %vm14405_vm1 = vmmov %vm14390_vm2  ;;  %v13530_v11 = vld [vmem:[#allocation2 + $0x28] sm:$0xf]  ;;  %v7923_v41 = vshrl.u32 %v13539_v21, 16 }
 0x4e8   : > { %v7498_v44 = vsel %vm14396_vm14, %v7489_v49, %v7497_v56  ;;  %v7578_v39 = vrot.slane %v7576_v5, 4  ;;  %v7345_v49 = vld [vmem:[#allocation2 + $0x108] sm:$0x1f]  ;;  %v7590_v56 = vrot.slane %v7588_v3, 5  ;;  %v7906_v48 = vshrl.u32 %v13530_v11, 16  ;;  %vm14407_vm3 = vmmov %vm14399_vm0 }
 0x4e9   : > { %v7581_v26 = vrot.slane %v7579_v52, 5  ;;  %v7587_v12 = vrot.slane %v7585_v1, 4  ;;  %v7610_v54 = vshrl.u32 %v7345_v49, 16  ;;  %v7909_v33 = vshll.u32 %v13530_v11, 16  ;;  %vm14409_vm5 = vmmov %vm14399_vm0  ;;  %v7871_v46 = vld [vmem:[#allocation2 + $0x50] sm:$0xf8] }
 0x4ea   : > { %v7908_v13 = vrot.slane %v7906_v48, 3  ;;  %v7926_v63 = vshll.u32 %v13539_v21, 16  ;;  %v7932_v4 = vshrl.u32 %v7869_v22, 16  ;;  %v7940_v61 = vshrl.u32 %v13542_v35, 16  ;;  %vm14411_vm13 = vmmov %vm14399_vm0  ;;  %v13549_v52 = vld [vmem:[#allocation2 + $0x58] sm:$0xf] }
 0x4eb   : > { %10854 = vmatmul.mubr.msk.bf16.gmra.mrb[4].mxu1 %vm14388_vm8, %v7413_v51  ;;  %v7514_v51 = vor.u32 %v7513_v40, %v7510_v37  ;;  %vm14404_vm8 = vmmov %vm14399_vm0  ;;  %v7613_v37 = vshll.u32 %v7345_v49, 16  ;;  %v7574_v40 = vor.u32 %v7573_v16, %v7570_v27  ;;  %v7591_v15 = vor.u32 %v7590_v56, %v7587_v12  ;;  %v7875_v48 = vld [vmem:[#allocation2 + $0x70] sm:$0xf8] }
 0x4ec   : > { %10857 = vmatprep.mubr.msk.bf16.mxu1 %vm14390_vm2, %v7430_v24  ;;  %v7545_v24 = vshll.u32 %v7341_v59, 16  ;;  %v7566_v62 = vsel %vm14404_vm8, %v7557_v14, %v7565_v10  ;;  %vm14406_vm2 = vmmov %vm14405_vm1  ;;  %v7901_v59 = vshll.u32 %v7865_v31, 16  ;;  %v7612_v38 = vrot.slane %v7610_v54, 4 }
 0x4ed   : > { %v7515_v47 = vsel %vm14399_vm0, %v7506_v29, %v7514_v51  ;;  %v7607_v29 = vrot.slane %v7605_v6, 5  ;;  %v7615_v51 = vrot.slane %v7613_v37, 5  ;;  %v7911_v25 = vrot.slane %v7909_v33, 4  ;;  %vm14412_vm14 = vmmov %vm14405_vm1  ;;  %v13566_v33 = vld [vmem:[%s14168_s2 + $0x14] sm:$0x3] }
 0x4ee   : > { %v7547_v18 = vrot.slane %v7545_v24, 5  ;;  %v7903_v50 = vrot.slane %v7901_v59, 4  ;;  %v7867_v24 = vld [vmem:[#allocation2 + $0x30] sm:$0xf8]  ;;  %v7925_v14 = vrot.slane %v7923_v41, 3  ;;  %v7928_v10 = vrot.slane %v7926_v63, 4  ;;  %vm14417_vm11 = vmmov %vm14405_vm1 }
 0x4ef   : > { %v7608_v28 = vor.u32 %v7607_v29, %v7604_v58  ;;  %v7915_v32 = vshrl.u32 %v7867_v24, 16  ;;  %v7912_v43 = vor.u32 %v7911_v25, %v7908_v13  ;;  %v7934_v5 = vrot.slane %v7932_v4, 3  ;;  %v7879_v4 = vld [vmem:[#allocation2 + $0x90] sm:$0xf8] }
 0x4f0   : > { %v7949_v27 = vshrl.u32 %v7871_v46, 16  ;;  %v7952_v16 = vshll.u32 %v7871_v46, 16  ;;  %v7929_v12 = vor.u32 %v7928_v10, %v7925_v14  ;;  %vm14415_vm0 = vcmask 1041408   ;;  %v7881_v10 = vld [vmem:[#allocation2 + $0xa0] sm:$0xf8] }
 0x4f1   : > { %v8562_v37 = vsel %vm14415_vm0, %v13480_v7, 0  ;;  %v13570_v7 = vld [vmem:[#allocation2 + $0x78] sm:$0xf]  ;;  %vm14420_vm8 = vmmov %vm14415_vm0 }
 0x4f2   : > { %v7951_v54 = vrot.slane %v7949_v27, 3  ;;  %v7991_v25 = vshrl.u32 %v13570_v7, 16 }
 0x4f3   : > { %10858 = vmatmul.mubr.msk.bf16.gmra.mrb[8].mxu1 %vm14392_vm4, %v7447_v30  ;;  %v7548_v30 = vor.u32 %v7547_v18, %v7544_v8  ;;  %vm14408_vm4 = vmmov %vm14405_vm1  ;;  %v7918_v8 = vshll.u32 %v7867_v24, 16  ;;  %v7983_v24 = vshrl.u32 %v7875_v48, 16 }
 0x4f4   : > { %10861 = vmatprep.mubr.msk.bf16.mxu1 %vm14394_vm9, %v7464_v0  ;;  %v7593_v0 = vshrl.u32 %v7344_v23, 16  ;;  %vm14410_vm9 = vmmov %vm14405_vm1  ;;  %v7943_v23 = vshll.u32 %v13542_v35, 16 }
 0x4f5   : > { %v7549_v34 = vsel %vm14403_vm6, %v7540_v53, %v7548_v30  ;;  %v7917_v30 = vrot.slane %v7915_v32, 3  ;;  %v7920_v45 = vrot.slane %v7918_v8, 4  ;;  %vm14419_vm6 = vmmov %vm14405_vm1  ;;  %v7985_v63 = vrot.slane %v7983_v24, 3 }
 0x4f6   : > { %v7595_v42 = vrot.slane %v7593_v0, 4  ;;  %v7942_v0 = vrot.slane %v7940_v61, 3  ;;  %v7945_v55 = vrot.slane %v7943_v23, 4 }
 0x4f7   : > { %v7921_v49 = vor.u32 %v7920_v45, %v7917_v30 }
 0x4f8   : > { %v7599_v19 = vor.u32 %v7598_v20, %v7595_v42 }
 0x4fa   : > { %v7600_v57 = vsel %vm14409_vm5, %v7591_v15, %v7599_v19 }
 0x4fb   : > { %10862 = vmatmul.mubr.msk.bf16.gmra.mrb[12].mxu1 %vm14397_vm15, %v7481_v17  ;;  %v7582_v17 = vor.u32 %v7581_v26, %v7578_v39  ;;  %vm14413_vm15 = vsmask.f32 4352  ;;  %v7957_v39 = vshrl.u32 %v13549_v52, 16  ;;  %v7960_v26 = vshll.u32 %v13549_v52, 16 }
 0x4fc   : > { %10865 = vmatprep.mubr.msk.bf16.mxu1 %vm14398_vm7, %v7498_v44  ;;  %v7898_v44 = vshrl.u32 %v7865_v31, 16  ;;  %vm14414_vm7 = vmmov %vm14405_vm1  ;;  %v7946_v31 = vor.u32 %v7945_v55, %v7942_v0 }
 0x4fd   : > { %v7583_v36 = vsel %vm14407_vm3, %v7574_v40, %v7582_v17  ;;  %v7954_v40 = vrot.slane %v7952_v16, 4  ;;  %v7959_v17 = vrot.slane %v7957_v39, 3  ;;  %v8034_v16 = vshrl.u32 %v7881_v10, 16 }
 0x4fe   : > { %v7900_v60 = vrot.slane %v7898_v44, 3  ;;  %v7962_v44 = vrot.slane %v7960_v26, 4  ;;  %v8037_v39 = vshll.u32 %v7881_v10, 16 }
 0x500   : > { %v7904_v18 = vor.u32 %v7903_v50, %v7900_v60  ;;  %v7955_v60 = vor.u32 %v7954_v40, %v7951_v54  ;;  %v7963_v50 = vor.u32 %v7962_v44, %v7959_v17  ;;  %v8036_v54 = vrot.slane %v8034_v16, 3  ;;  %v7883_v40 = vld [vmem:[#allocation2 + $0xb0] sm:$0xf8] }
 0x502   : > { %v7913_v1 = vsel %vm14413_vm15, %v7904_v18, %v7912_v43 }
 0x503   : > { %10866 = vmatmul.mubr.msk.bf16.gmra.mrb[16].mxu1 %vm14400_vm10, %v7515_v47  ;;  %v7616_v47 = vor.u32 %v7615_v51, %v7612_v38  ;;  %vm14416_vm10 = vmmov %vm14413_vm15  ;;  %v7877_v51 = vld [vmem:[#allocation2 + $0x80] sm:$0xf8] }
 0x504   : > { %10869 = vmatprep.mubr.msk.bf16.mxu1 %vm14402_vm12, %v7532_v2  ;;  %v7935_v2 = vshll.u32 %v7869_v22, 16  ;;  %v7930_v59 = vsel %vm14416_vm10, %v7921_v49, %v7929_v12  ;;  %vm14418_vm12 = vmmov %vm14416_vm10  ;;  %v7994_v22 = vshll.u32 %v13570_v7, 16  ;;  %v8003_v32 = vshll.u32 %v7877_v51, 16 }
 0x505   : > { %v7617_v53 = vsel %vm14411_vm13, %v7608_v28, %v7616_v47  ;;  %v8000_v28 = vshrl.u32 %v7877_v51, 16  ;;  %v8054_v51 = vshll.u32 %v7883_v40, 16 }
 0x506   : > { %v7937_v3 = vrot.slane %v7935_v2, 4  ;;  %v7993_v2 = vrot.slane %v7991_v25, 3  ;;  %v7996_v61 = vrot.slane %v7994_v22, 4  ;;  %v8005_v46 = vrot.slane %v8003_v32, 4 }
 0x507   : > { %v8002_v23 = vrot.slane %v8000_v28, 3 }
 0x508   : > { %v7938_v20 = vor.u32 %v7937_v3, %v7934_v5  ;;  %v13587_v5 = vld [vmem:[#allocation2 + $0xa8] sm:$0xf]  ;;  %v8020_v3 = vshll.u32 %v7879_v4, 16  ;;  %v7997_v27 = vor.u32 %v7996_v61, %v7993_v2 }
 0x509   : > { %v8006_v26 = vor.u32 %v8005_v46, %v8002_v23  ;;  %v8042_v12 = vshrl.u32 %v13587_v5, 16  ;;  %v7889_v46 = vld [vmem:[#allocation2 + $0xe0] sm:$0xf8] }
 0x50a   : > { %v7947_v58 = vsel %vm14418_vm12, %v7938_v20, %v7946_v31  ;;  %v8022_v20 = vrot.slane %v8020_v3, 4  ;;  %vm14433_vm12 = vmmov %vm14406_vm2 }
 0x50b   : > { %10870 = vmatmul.mubr.msk.bf16.gmra.mrb[20].mxu1 %vm14405_vm1, %v7549_v34  ;;  %v7873_v34 = vld [vmem:[#allocation2 + $0x60] sm:$0xf8]  ;;  %vm14421_vm1 = vmmov %vm14416_vm10  ;;  %v8044_v44 = vrot.slane %v8042_v12, 3 }
 0x50c   : > { %10873 = vmatprep.mubr.msk.bf16.mxu1 %vm14406_vm2, %v7566_v62  ;;  %v13554_v62 = vld [vmem:[#allocation2 + $0x68] sm:$0xf]  ;;  %v7966_v56 = vshrl.u32 %v7873_v34, 16  ;;  %v7969_v42 = vshll.u32 %v7873_v34, 16  ;;  %v7964_v41 = vsel %vm14421_vm1, %v7955_v60, %v7963_v50  ;;  %vm14422_vm3 = vmmov %vm14421_vm1 }
 0x50d   : > { %v7974_v9 = vshrl.u32 %v13554_v62, 16  ;;  %v7977_v6 = vshll.u32 %v13554_v62, 16  ;;  %vm14424_vm5 = vmmov %vm14421_vm1 }
 0x50e   : > { %v7968_v15 = vrot.slane %v7966_v56, 3  ;;  %v7971_v19 = vrot.slane %v7969_v42, 4  ;;  %v8045_v56 = vshll.u32 %v13587_v5, 16  ;;  %vm14426_vm13 = vmmov %vm14421_vm1 }
 0x50f   : > { %v7976_v29 = vrot.slane %v7974_v9, 3  ;;  %v7979_v38 = vrot.slane %v7977_v6, 4  ;;  %vm14428_vm15 = vmmov %vm14421_vm1 }
 0x510   : > { %v7972_v13 = vor.u32 %v7971_v19, %v7968_v15  ;;  %v13596_v15 = vld [vmem:[#allocation2 + $0xb8] sm:$0xf]  ;;  %v7885_v19 = vld [vmem:[#allocation2 + $0xc0] sm:$0xf8]  ;;  %vm14430_vm0 = vmmov %vm14421_vm1 }
 0x511   : > { %v7980_v47 = vor.u32 %v7979_v38, %v7976_v29  ;;  %v8051_v38 = vshrl.u32 %v7883_v40, 16  ;;  %v8059_v50 = vshrl.u32 %v13596_v15, 16  ;;  %v8062_v24 = vshll.u32 %v13596_v15, 16  ;;  %vm14431_vm10 = vmmov %vm14406_vm2 }
 0x512   : > { %v8071_v25 = vshll.u32 %v7885_v19, 16  ;;  %vm14436_vm1 = vmmov %vm14430_vm0 }
 0x513   : > { %10874 = vmatmul.mubr.msk.bf16.gmra.mrb[24].mxu1 %vm14408_vm4, %v7583_v36  ;;  %v13573_v36 = vld [vmem:[#allocation2 + $0x88] sm:$0xf]  ;;  %v7981_v30 = vsel %vm14422_vm3, %v7972_v13, %v7980_v47  ;;  %vm14423_vm4 = vmmov %vm14406_vm2  ;;  %v8053_v32 = vrot.slane %v8051_v38, 3 }
 0x514   : > { %10877 = vmatprep.mubr.msk.bf16.mxu1 %vm14410_vm9, %v7600_v57  ;;  %v7986_v57 = vshll.u32 %v7875_v48, 16  ;;  %v8008_v8 = vshrl.u32 %v13573_v36, 16  ;;  %v8011_v18 = vshll.u32 %v13573_v36, 16  ;;  %vm14425_vm9 = vmmov %vm14406_vm2  ;;  %v13599_v48 = vld [vmem:[#allocation2 + $0xc8] sm:$0xf]  ;;  %v8073_v61 = vrot.slane %v8071_v25, 4 }
 0x515   : > { %v8076_v22 = vshrl.u32 %v13599_v48, 16  ;;  %v8079_v28 = vshll.u32 %v13599_v48, 16  ;;  %vm14437_vm3 = vmmov %vm14430_vm0 }
 0x516   : > { %v7988_v43 = vrot.slane %v7986_v57, 4  ;;  %v8010_v45 = vrot.slane %v8008_v8, 3  ;;  %v8013_v14 = vrot.slane %v8011_v18, 4  ;;  %v8068_v57 = vshrl.u32 %v7885_v19, 16  ;;  %v7887_v8 = vld [vmem:[#allocation2 + $0xd0] sm:$0xf8] }
 0x517   : > { %v8056_v18 = vrot.slane %v8054_v51, 4  ;;  %v8078_v23 = vrot.slane %v8076_v22, 3  ;;  %v8088_v10 = vshll.u32 %v7887_v8, 16  ;;  %v13623_v19 = vld [vmem:[#allocation2 + $0x108] sm:$0xf] }
 0x518   : > { %v7989_v34 = vor.u32 %v7988_v43, %v7985_v63  ;;  %v8014_v49 = vor.u32 %v8013_v14, %v8010_v45  ;;  %v8064_v63 = vrot.slane %v8062_v24, 4  ;;  %v13606_v43 = vld [vmem:[#allocation2 + $0xd8] sm:$0xf]  ;;  %v13611_v45 = vld [vmem:[#allocation2 + $0xe8] sm:$0xf]  ;;  %v8085_v14 = vshrl.u32 %v7887_v8, 16 }
 0x519   : > { %v8096_v3 = vshll.u32 %v13606_v43, 16  ;;  %v8144_v22 = vshrl.u32 %v13623_v19, 16  ;;  %v7895_v8 = vld [vmem:[#allocation2 + $0x110] sm:$0xf8] }
 0x51a   : > { %v7998_v6 = vsel %vm14424_vm5, %v7989_v34, %v7997_v27  ;;  %v8015_v17 = vsel %vm14426_vm13, %v8006_v26, %v8014_v49  ;;  %v8102_v34 = vshrl.u32 %v7889_v46, 16  ;;  %v8105_v27 = vshll.u32 %v7889_v46, 16  ;;  %vm14439_vm5 = vmmov %vm14430_vm0 }
 0x51b   : > { %10878 = vmatmul.mubr.msk.bf16.gmra.mrb[28].mxu1 %vm14412_vm14, %v7617_v53  ;;  %v13582_v53 = vld [vmem:[#allocation2 + $0x98] sm:$0xf]  ;;  %vm14427_vm14 = vmmov %vm14406_vm2  ;;  %v8110_v26 = vshrl.u32 %v13611_v45, 16  ;;  %v8113_v49 = vshll.u32 %v13611_v45, 16  ;;  %v8087_v12 = vrot.slane %v8085_v14, 3  ;;  %v8153_v14 = vshrl.u32 %v7895_v8, 16 }
 0x51c   : > { %10883 = vmatprep.mubr.msk.bf16.mxu1 %vm14414_vm7, %v7913_v1  ;;  %v8017_v1 = vshrl.u32 %v7879_v4, 16  ;;  %v8025_v0 = vshrl.u32 %v13582_v53, 16  ;;  %v8028_v55 = vshll.u32 %v13582_v53, 16  ;;  %v8070_v4 = vrot.slane %v8068_v57, 3  ;;  %vm14429_vm7 = vmmov %vm14406_vm2 }
 0x51d   : > { %v8112_v40 = vrot.slane %v8110_v26, 3  ;;  %vm14441_vm13 = vmmov %vm14430_vm0 }
 0x51e   : > { %v8019_v42 = vrot.slane %v8017_v1, 3  ;;  %v8027_v31 = vrot.slane %v8025_v0, 3  ;;  %v8030_v9 = vrot.slane %v8028_v55, 4  ;;  %v8093_v1 = vshrl.u32 %v13606_v43, 16 }
 0x51f   : > { %v8057_v0 = vor.u32 %v8056_v18, %v8053_v32  ;;  %v8074_v16 = vor.u32 %v8073_v61, %v8070_v4  ;;  %v13630_v18 = vld [vmem:[#allocation2 + $0x118] sm:$0xf] }
 0x520   : > { %v8031_v29 = vor.u32 %v8030_v9, %v8027_v31  ;;  %v8104_v9 = vrot.slane %v8102_v34, 3 }
 0x523   : > { %10884 = vmatmul.mubr.msk.bf16.vlgmr.msra.gmra.mrb[0].mxu1 %vm14417_vm11, %v7930_v59  ;;  %v8047_v59 = vrot.slane %v8045_v56, 4  ;;  %v8090_v56 = vrot.slane %v8088_v10, 4  ;;  %vm14432_vm11 = vmmov %vm14430_vm0  ;;  %v8156_v10 = vshll.u32 %v7895_v8, 16 }
 0x524   : > { %10916 = vmatpush3.bf16.msra.mxu1 %v8562_v37  ;;  %10887 = vmatprep.mubr.msk.bf16.mxu1 %vm14419_vm6, %v7947_v58  ;;  %v8039_v37 = vrot.slane %v8037_v39, 4  ;;  %v8023_v58 = vor.u32 %v8022_v20, %v8019_v42  ;;  %v8095_v42 = vrot.slane %v8093_v1, 3  ;;  %v8098_v20 = vrot.slane %v8096_v3, 4  ;;  %vm14434_vm6 = vmmov %vm14430_vm0 }
 0x525   : > { %11512 = vmatprep.subr.msk.bf16.mxu1 %vm14420_vm8, %v13566_v33  ;;  %v8048_v13 = vor.u32 %v8047_v59, %v8044_v44  ;;  %v13620_v44 = vld [vmem:[#allocation2 + $0xf8] sm:$0xf]  ;;  %v7893_v59 = vld [vmem:[#allocation2 + $0x100] sm:$0xf8]  ;;  %vm14435_vm8 = vmmov %vm14406_vm2  ;;  %v8161_v1 = vshrl.u32 %v13630_v18, 16  ;;  %v8164_v3 = vshll.u32 %v13630_v18, 16 }
 0x526   : > { %v8040_v60 = vor.u32 %v8039_v37, %v8036_v54  ;;  %v8032_v47 = vsel %vm14428_vm15, %v8023_v58, %v8031_v29  ;;  %v7891_v54 = vld [vmem:[#allocation2 + $0xf0] sm:$0xf8]  ;;  %v8091_v58 = vor.u32 %v8090_v56, %v8087_v12  ;;  %v8099_v29 = vor.u32 %v8098_v20, %v8095_v42  ;;  %vm14443_vm15 = vmmov %vm14430_vm0 }
 0x527   : > { %v8119_v38 = vshrl.u32 %v7891_v54, 16  ;;  %v8122_v51 = vshll.u32 %v7891_v54, 16  ;;  %v8130_v24 = vshll.u32 %v13620_v44, 16  ;;  %v8136_v57 = vshrl.u32 %v7893_v59, 16 }
 0x528   : > { %v8049_v2 = vsel %vm14430_vm0, %v8040_v60, %v8048_v13  ;;  %v8139_v25 = vshll.u32 %v7893_v59, 16  ;;  %v8163_v26 = vrot.slane %v8161_v1, 3  ;;  %vm14445_vm0 = vcmask 1043456  }
 0x529   : > { %v8121_v32 = vrot.slane %v8119_v38, 3  ;;  %v8132_v4 = vrot.slane %v8130_v24, 4  ;;  %v13665_v24 = vld [vmem:[#allocation2 + $0x60] sm:$0xf0] }
 0x52b   : > { %10888 = vmatmul.mubr.msk.bf16.gmra.mrb[4].mxu1 %vm14406_vm2, %v7964_v41  ;;  %v8061_v41 = vrot.slane %v8059_v50, 3  ;;  %v8127_v50 = vshrl.u32 %v13620_v44, 16 }
 0x52c   : > { %10891 = vmatprep.mubr.msk.bf16.mxu1 %vm14423_vm4, %v7981_v30  ;;  %v8081_v30 = vrot.slane %v8079_v28, 4  ;;  %v8147_v28 = vshll.u32 %v13623_v19, 16  ;;  %vm14438_vm4 = vmmov %vm14406_vm2 }
 0x52d   : > { %v8065_v55 = vor.u32 %v8064_v63, %v8061_v41  ;;  %v8124_v41 = vrot.slane %v8122_v51, 4  ;;  %v8129_v63 = vrot.slane %v8127_v50, 3  ;;  %v13662_v50 = vld [vmem:[#allocation2 + $0x50] sm:$0xf0] }
 0x52e   : > { %v8082_v39 = vor.u32 %v8081_v30, %v8078_v23  ;;  %v8141_v23 = vrot.slane %v8139_v25, 4  ;;  %v8146_v30 = vrot.slane %v8144_v22, 3  ;;  %v8149_v46 = vrot.slane %v8147_v28, 4  ;;  %v13674_v22 = vld [vmem:[#allocation2 + $0x70] sm:$0xf0] }
 0x52f   : > { %v8066_v31 = vsel %vm14432_vm11, %v8057_v0, %v8065_v55  ;;  %v8125_v0 = vor.u32 %v8124_v41, %v8121_v32  ;;  %v8133_v55 = vor.u32 %v8132_v4, %v8129_v63  ;;  %vm14447_vm11 = vcmask 1041408   ;;  %v13677_v28 = vld [vmem:[#allocation2 + $0x80] sm:$0xf0]  ;;  %v13686_v63 = vld [vmem:[#allocation2 + $0x90] sm:$0xf0] }
 0x530   : > { %v8083_v37 = vsel %vm14434_vm6, %v8074_v16, %v8082_v39  ;;  %v8155_v16 = vrot.slane %v8153_v14, 3  ;;  %v8158_v39 = vrot.slane %v8156_v10, 4  ;;  %v9094_v38 = vsel %vm14447_vm11, %v13566_v33, 0  ;;  %vm14449_vm6 = vmmov %vm14406_vm2  ;;  %v13689_v4 = vld [vmem:[#allocation2 + $0xa0] sm:$0xf0] }
 0x531   : > { %v8134_v12 = vsel %vm14439_vm5, %v8125_v0, %v8133_v55  ;;  %v8474_v33 = vrot.slane %v13554_v62, 4  ;;  %v8479_v32 = vrot.slane %v13677_v28, 4  ;;  %v8480_v62 = vrot.slane %v13573_v36, 4  ;;  %v13701_v14 = vld [vmem:[#allocation2 + $0xc0] sm:$0xf0] }
 0x532   : > { %v8159_v42 = vor.u32 %v8158_v39, %v8155_v16  ;;  %v8486_v36 = vrot.slane %v13587_v5, 4  ;;  %v8491_v1 = vrot.slane %v13701_v14, 4  ;;  %v8492_v5 = vrot.slane %v13599_v48, 4  ;;  %v13710_v55 = vld [vmem:[#allocation2 + $0xd0] sm:$0xf0] }
 0x533   : > { %10892 = vmatmul.mubr.msk.bf16.gmra.mrb[8].mxu1 %vm14425_vm9, %v7998_v6  ;;  %v8107_v6 = vrot.slane %v8105_v27, 4  ;;  %v8150_v27 = vor.u32 %v8149_v46, %v8146_v30  ;;  %vm14440_vm9 = vmmov %vm14406_vm2  ;;  %v13698_v46 = vld [vmem:[#allocation2 + $0xb0] sm:$0xf0]  ;;  %v8498_v48 = vrot.slane %v13611_v45, 4 }
 0x534   : > { %10895 = vmatprep.mubr.msk.bf16.mxu1 %vm14427_vm14, %v8015_v17  ;;  %v8115_v17 = vrot.slane %v8113_v49, 4  ;;  %v8166_v49 = vrot.slane %v8164_v3, 4  ;;  %vm14442_vm14 = vmmov %vm14406_vm2  ;;  %v8488_v10 = vrot.slane %v13698_v46, 4 }
 0x535   : > { %v8108_v60 = vor.u32 %v8107_v6, %v8104_v9  ;;  %v8462_v6 = vrot.slane %v13530_v11, 4  ;;  %v8468_v11 = vrot.slane %v13542_v35, 4  ;;  %v8471_v35 = vrot.slane %v13549_v52, 4 }
 0x536   : > { %v8116_v13 = vor.u32 %v8115_v17, %v8112_v40  ;;  %v8167_v20 = vor.u32 %v8166_v49, %v8163_v26  ;;  %v13648_v40 = vld [vmem:[#allocation2 + $0x30] sm:$0xf0]  ;;  %v13651_v17 = vld [vmem:[#allocation2 + $0x40] sm:$0xf0]  ;;  %v8477_v52 = vrot.slane %v13570_v7, 4  ;;  %v8483_v7 = vrot.slane %v13582_v53, 4 }
 0x537   : > { %v8464_v59 = vrot.slane %v13648_v40, 4  ;;  %v8489_v53 = vrot.slane %v13596_v15, 4  ;;  %v8495_v15 = vrot.slane %v13606_v43, 4  ;;  %v13722_v49 = vld [vmem:[#allocation2 + $0xf0] sm:$0xf0]  ;;  %v8501_v43 = vrot.slane %v13620_v44, 4 }
 0x538   : > { %v8117_v61 = vsel %vm14437_vm3, %v8108_v60, %v8116_v13  ;;  %v8168_v54 = vsel %vm14443_vm15, %v8159_v42, %v8167_v20  ;;  %v8500_v42 = vrot.slane %v13722_v49, 4 }
 0x53b   : > { %10896 = vmatmul.mubr.msk.bf16.gmra.mrb[12].mxu1 %vm14429_vm7, %v8032_v47  ;;  %v8100_v47 = vsel %vm14436_vm1, %v8091_v58, %v8099_v29  ;;  %vm14444_vm7 = vmmov %vm14406_vm2  ;;  %v8465_v58 = vrot.slane %v13539_v21, 4  ;;  %v8467_v29 = vrot.slane %v13651_v17, 4  ;;  %v8470_v21 = vrot.slane %v13662_v50, 4 }
 0x53c   : > { %10899 = vmatprep.mubr.msk.bf16.mxu1 %vm14431_vm10, %v8049_v2  ;;  %v8138_v2 = vrot.slane %v8136_v57, 3  ;;  %vm14446_vm10 = vmmov %vm14406_vm2  ;;  %v8473_v57 = vrot.slane %v13665_v24, 4 }
 0x53d   : > { %vm14451_vm1 = vmmov %vm14406_vm2 }
 0x53e   : > { %v8142_v34 = vor.u32 %v8141_v23, %v8138_v2  ;;  %vm14453_vm3 = vmmov %vm14451_vm1  ;;  %v8482_v2 = vrot.slane %v13686_v63, 4 }
 0x53f   : > { %vm14455_vm5 = vmmov %vm14451_vm1 }
 0x540   : > { %v8151_v56 = vsel %vm14441_vm13, %v8142_v34, %v8150_v27  ;;  %vm14457_vm13 = vmmov %vm14451_vm1  ;;  %v13713_v34 = vld [vmem:[#allocation2 + $0xe0] sm:$0xf0]  ;;  %v8494_v27 = vrot.slane %v13710_v55, 4 }
 0x541   : > { %vm14459_vm15 = vmmov %vm14451_vm1  ;;  %v8497_v16 = vrot.slane %v13713_v34, 4 }
 0x543   : > { %10900 = vmatmul.mubr.msk.bf16.gmra.mrb[16].mxu1 %vm14433_vm12, %v8066_v31  ;;  %v13641_v31 = vld [vmem:[#allocation2 + $0x20] sm:$0xf0]  ;;  %vm14448_vm12 = vmmov %vm14445_vm0 }
 0x544   : > { %10903 = vmatprep.mubr.msk.bf16.mxu1 %vm14435_vm8, %v8083_v37  ;;  %v8461_v9 = vrot.slane %v13641_v31, 4  ;;  %v8466_v51 = vsel %vm14448_vm12, %v8464_v59, %v8465_v58  ;;  %vm14450_vm8 = vmmov %vm14445_vm0  ;;  %v8774_v20 = vshrl.u32 %v13641_v31, 16  ;;  %v8777_v45 = vshll.u32 %v13641_v31, 16  ;;  %v13733_v59 = vld [vmem:[#allocation2 + $0x110] sm:$0xf0] }
 0x545   : > { %v8469_v60 = vsel %vm14450_vm8, %v8467_v29, %v8468_v11  ;;  %v8758_v58 = vld [vmem:[#allocation2 + $0x38] sm:$0x1f] }
 0x546   : > { %v8463_v37 = vsel %vm14445_vm0, %v8461_v9, %v8462_v6  ;;  %v8504_v6 = vrot.slane %v13623_v19, 4  ;;  %v8776_v11 = vrot.slane %v8774_v20, 4  ;;  %v8506_v19 = vrot.slane %v13733_v59, 4 }
 0x54b   : > { %10904 = vmatmul.mubr.msk.bf16.gmra.mrb[20].mxu1 %vm14406_vm2, %v8100_v47  ;;  %vm14452_vm2 = vmmov %vm14445_vm0  ;;  %v8476_v47 = vrot.slane %v13674_v22, 4 }
 0x54c   : > { %10907 = vmatprep.mubr.msk.bf16.mxu1 %vm14438_vm4, %v8117_v61  ;;  %v8472_v13 = vsel %vm14452_vm2, %v8470_v21, %v8471_v35  ;;  %vm14454_vm4 = vmmov %vm14445_vm0  ;;  %v8485_v61 = vrot.slane %v13689_v4, 4  ;;  %v8496_v39 = vsel %vm14452_vm2, %v8494_v27, %v8495_v15  ;;  %v8794_v21 = vshll.u32 %v13648_v40, 16 }
 0x54d   : > { %v8475_v25 = vsel %vm14454_vm4, %v8473_v57, %v8474_v33  ;;  %vm14464_vm12 = vmmov %vm14452_vm2  ;;  %v8507_v35 = vrot.slane %v13630_v18, 4  ;;  %v8799_v57 = vshrl.u32 %v8758_v58, 16  ;;  %v8802_v33 = vshll.u32 %v8758_v58, 16 }
 0x54e   : > { %v8490_v3 = vsel %vm14464_vm12, %v8488_v10, %v8489_v53  ;;  %vm14466_vm8 = vmmov %vm14452_vm2 }
 0x54f   : > { %v8493_v0 = vsel %vm14466_vm8, %v8491_v1, %v8492_v5  ;;  %vm14469_vm4 = vmmov %vm14452_vm2  ;;  %v8761_v1 = vld [vmem:[#allocation2 + $0x68] sm:$0x1f] }
 0x550   : > { %v8499_v26 = vsel %vm14469_vm4, %v8497_v16, %v8498_v48  ;;  %v8842_v16 = vshrl.u32 %v13665_v24, 16  ;;  %v8845_v48 = vshll.u32 %v13665_v24, 16  ;;  %v8859_v24 = vshrl.u32 %v13674_v22, 16 }
 0x552   : > { %v8847_v58 = vrot.slane %v8845_v48, 5 }
 0x553   : > { %10908 = vmatmul.mubr.msk.bf16.gmra.mrb[24].mxu1 %vm14440_vm9, %v8134_v12  ;;  %vm14456_vm9 = vmmov %vm14445_vm0  ;;  %v13725_v12 = vld [vmem:[#allocation2 + $0x100] sm:$0xf0] }
 0x554   : > { %10911 = vmatprep.mubr.msk.bf16.mxu1 %vm14442_vm14, %v8151_v56  ;;  %v8478_v8 = vsel %vm14456_vm9, %v8476_v47, %v8477_v52  ;;  %vm14458_vm14 = vmmov %vm14445_vm0  ;;  %v8757_v56 = vld [vmem:[#allocation2 + $0x28] sm:$0x1f]  ;;  %v8503_v9 = vrot.slane %v13725_v12, 4  ;;  %v8808_v52 = vshrl.u32 %v13651_v17, 16 }
 0x555   : > { %v8481_v41 = vsel %vm14458_vm14, %v8479_v32, %v8480_v62  ;;  %vm14471_vm9 = vmmov %vm14452_vm2  ;;  %v8811_v62 = vshll.u32 %v13651_v17, 16 }
 0x556   : > { %v8502_v29 = vsel %vm14471_vm9, %v8500_v42, %v8501_v43  ;;  %vm14473_vm14 = vmmov %vm14452_vm2 }
 0x557   : > { %v8505_v44 = vsel %vm14473_vm14, %v8503_v9, %v8504_v6 }
 0x55b   : > { %10912 = vmatmul.mubr.msk.bf16.gmra.mrb[28].mxu1 %vm14444_vm7, %v8168_v54  ;;  %vm14460_vm7 = vmmov %vm14445_vm0  ;;  %v8782_v54 = vshrl.u32 %v8757_v56, 16 }
 0x55c   : > { %10917 = vmatprep.mubr.msk.bf16.mxu1 %vm14446_vm10, %v8463_v37  ;;  %v8484_v23 = vsel %vm14460_vm7, %v8482_v2, %v8483_v7  ;;  %vm14461_vm0 = vmmov %vm14451_vm1  ;;  %v8785_v37 = vshll.u32 %v8757_v56, 16  ;;  %v8796_v2 = vrot.slane %v8794_v21, 5  ;;  %v8801_v7 = vrot.slane %v8799_v57, 4 }
 0x55d   : > { %vm14462_vm10 = vmmov %vm14452_vm2  ;;  %v8784_v31 = vrot.slane %v8782_v54, 4  ;;  %v8762_v54 = vld [vmem:[#allocation2 + $0x78] sm:$0x1f]  ;;  %v8876_v57 = vshrl.u32 %v13677_v28, 16 }
 0x55e   : > { %v8487_v30 = vsel %vm14462_vm10, %v8485_v61, %v8486_v36  ;;  %vm14463_vm11 = vmmov %vm14461_vm0  ;;  %v8804_v61 = vrot.slane %v8802_v33, 5  ;;  %v8810_v36 = vrot.slane %v8808_v52, 4  ;;  %vm14476_vm10 = vsmask.f32 3328 }
 0x55f   : > { %vm14475_vm7 = vmmov %vm14452_vm2  ;;  %v8879_v33 = vshll.u32 %v13677_v28, 16 }
 0x560   : > { %v8805_v5 = vor.u32 %v8804_v61, %v8801_v7  ;;  %vm14478_vm12 = vmmov %vm14476_vm10 }
 0x561   : > { %vm14480_vm8 = vmmov %vm14476_vm10 }
 0x562   : > { %vm14482_vm2 = vmmov %vm14480_vm8 }
 0x563   : > { %10918 = vmatmul.mubr.msk.bf16.vlgmr.msra.gmra.mrb[0].mxu1 %vm14449_vm6, %v8466_v51  ;;  %vm14465_vm6 = vmmov %vm14461_vm0  ;;  %v8791_v51 = vshrl.u32 %v13648_v40, 16  ;;  %v8508_v40 = vsel %vm14475_vm7, %v8506_v19, %v8507_v35 }
 0x564   : > { %10950 = vmatpush3.bf16.msra.mxu1 %v9094_v38  ;;  %10921 = vmatprep.mubr.msk.bf16.mxu1 %vm14451_vm1, %v8469_v60  ;;  %vm14467_vm1 = vmmov %vm14461_vm0  ;;  %v8779_v38 = vrot.slane %v8777_v45, 5  ;;  %v8787_v60 = vrot.slane %v8785_v37, 5  ;;  %v8844_v37 = vrot.slane %v8842_v16, 4 }
 0x565   : > { %v8793_v47 = vrot.slane %v8791_v51, 4  ;;  %v8867_v51 = vshrl.u32 %v8762_v54, 16  ;;  %vm14484_vm4 = vmmov %vm14461_vm0 }
 0x566   : > { %v8788_v32 = vor.u32 %v8787_v60, %v8784_v31  ;;  %v8763_v31 = vld [vmem:[#allocation2 + $0x88] sm:$0x1f]  ;;  %v8848_v19 = vor.u32 %v8847_v58, %v8844_v37  ;;  %vm14486_vm9 = vmmov %vm14482_vm2 }
 0x567   : > { %v8797_v17 = vor.u32 %v8796_v2, %v8793_v47  ;;  %v8861_v47 = vrot.slane %v8859_v24, 4  ;;  %v8881_v2 = vrot.slane %v8879_v33, 5  ;;  %vm14488_vm14 = vmmov %vm14482_vm2  ;;  %v8767_v37 = vld [vmem:[#allocation2 + $0xc8] sm:$0x1f]  ;;  %v8944_v24 = vshrl.u32 %v13701_v14, 16 }
 0x568   : > { %vm14490_vm7 = vmmov %vm14482_vm2 }
 0x569   : > { %v8806_v43 = vsel %vm14478_vm12, %v8797_v17, %v8805_v5  ;;  %v8913_v17 = vshll.u32 %v13689_v4, 16  ;;  %v8946_v33 = vrot.slane %v8944_v24, 4 }
 0x56b   : > { %10922 = vmatmul.mubr.msk.bf16.gmra.mrb[4].mxu1 %vm14453_vm3, %v8472_v13  ;;  %vm14468_vm3 = vmmov %vm14461_vm0  ;;  %v8759_v13 = vld [vmem:[#allocation2 + $0x48] sm:$0x1f] }
 0x56c   : > { %10925 = vmatprep.mubr.msk.bf16.mxu1 %vm14455_vm5, %v8475_v25  ;;  %vm14470_vm5 = vmmov %vm14461_vm0  ;;  %v8780_v25 = vor.u32 %v8779_v38, %v8776_v11  ;;  %v8862_v38 = vshll.u32 %v13674_v22, 16 }
 0x56e   : > { %v8789_v18 = vsel %vm14476_vm10, %v8780_v25, %v8788_v32  ;;  %v8887_v25 = vshll.u32 %v8763_v31, 16  ;;  %v8864_v52 = vrot.slane %v8862_v38, 5  ;;  %v8869_v32 = vrot.slane %v8867_v51, 4 }
 0x56f   : > { %v8947_v38 = vshll.u32 %v13701_v14, 16  ;;  %v8952_v51 = vshrl.u32 %v8767_v37, 16 }
 0x570   : > { %v8889_v61 = vrot.slane %v8887_v25, 5  ;;  %v8865_v28 = vor.u32 %v8864_v52, %v8861_v47  ;;  %v8769_v52 = vld [vmem:[#allocation2 + $0xe8] sm:$0x1f] }
 0x571   : > { %v8954_v25 = vrot.slane %v8952_v51, 4 }
 0x573   : > { %10926 = vmatmul.mubr.msk.bf16.gmra.mrb[8].mxu1 %vm14457_vm13, %v8478_v8  ;;  %vm14472_vm13 = vmmov %vm14461_vm0  ;;  %v8816_v8 = vshrl.u32 %v8759_v13, 16 }
 0x574   : > { %10929 = vmatprep.mubr.msk.bf16.mxu1 %vm14459_vm15, %v8481_v41  ;;  %vm14474_vm15 = vmmov %vm14461_vm0  ;;  %v8819_v41 = vshll.u32 %v8759_v13, 16  ;;  %v8884_v13 = vshrl.u32 %v8763_v31, 16 }
 0x575   : > { %v8818_v10 = vrot.slane %v8816_v8, 4 }
 0x576   : > { %v8821_v53 = vrot.slane %v8819_v41, 5  ;;  %v8764_v41 = vld [vmem:[#allocation2 + $0x98] sm:$0x1f]  ;;  %v8886_v7 = vrot.slane %v8884_v13, 4  ;;  %v8949_v13 = vrot.slane %v8947_v38, 5  ;;  %v9032_v38 = vshll.u32 %v13733_v59, 16 }
 0x578   : > { %v8822_v42 = vor.u32 %v8821_v53, %v8818_v10  ;;  %v8901_v10 = vshrl.u32 %v8764_v41, 16  ;;  %v8904_v53 = vshll.u32 %v8764_v41, 16 }
 0x57b   : > { %10930 = vmatmul.mubr.msk.bf16.gmra.mrb[12].mxu1 %vm14461_vm0, %v8484_v23  ;;  %v8760_v23 = vld [vmem:[#allocation2 + $0x58] sm:$0x1f] }
 0x57c   : > { %10933 = vmatprep.mubr.msk.bf16.mxu1 %vm14463_vm11, %v8487_v30  ;;  %v8813_v30 = vrot.slane %v8811_v62, 5  ;;  %vm14477_vm11 = vmmov %vm14461_vm0  ;;  %v8833_v27 = vshrl.u32 %v8760_v23, 16  ;;  %v8836_v15 = vshll.u32 %v8760_v23, 16 }
 0x57e   : > { %v8814_v56 = vor.u32 %v8813_v30, %v8810_v36  ;;  %v8835_v9 = vrot.slane %v8833_v27, 4  ;;  %v8838_v6 = vrot.slane %v8836_v15, 5  ;;  %v8765_v36 = vld [vmem:[#allocation2 + $0xa8] sm:$0x1f]  ;;  %v8896_v30 = vshll.u32 %v13686_v63, 16 }
 0x57f   : > { %v8918_v5 = vshrl.u32 %v8765_v36, 16  ;;  %v8890_v27 = vor.u32 %v8889_v61, %v8886_v7  ;;  %v8986_v7 = vshrl.u32 %v8769_v52, 16  ;;  %v8989_v61 = vshll.u32 %v8769_v52, 16 }
 0x580   : > { %v8823_v11 = vsel %vm14480_vm8, %v8814_v56, %v8822_v42  ;;  %v8839_v21 = vor.u32 %v8838_v6, %v8835_v9  ;;  %v8898_v48 = vrot.slane %v8896_v30, 5  ;;  %v8766_v56 = vld [vmem:[#allocation2 + $0xb8] sm:$0x1f]  ;;  %v8930_v9 = vshll.u32 %v13698_v46, 16 }
 0x581   : > { %v8935_v6 = vshrl.u32 %v8766_v56, 16 }
 0x583   : > { %10934 = vmatmul.mubr.msk.bf16.gmra.mrb[16].mxu1 %vm14465_vm6, %v8490_v3  ;;  %v8825_v3 = vshrl.u32 %v13662_v50, 16  ;;  %vm14479_vm6 = vmmov %vm14461_vm0 }
 0x584   : > { %10937 = vmatprep.mubr.msk.bf16.mxu1 %vm14467_vm1, %v8493_v0  ;;  %v8828_v0 = vshll.u32 %v13662_v50, 16  ;;  %vm14481_vm1 = vmmov %vm14461_vm0 }
 0x585   : > { %v8827_v20 = vrot.slane %v8825_v3, 4  ;;  %v8921_v3 = vshll.u32 %v8765_v36, 16  ;;  %vm14492_vm10 = vmmov %vm14481_vm1  ;;  %v8950_v36 = vor.u32 %v8949_v13, %v8946_v33 }
 0x586   : > { %v8830_v45 = vrot.slane %v8828_v0, 5 }
 0x588   : > { %v8831_v60 = vor.u32 %v8830_v45, %v8827_v20  ;;  %v8923_v20 = vrot.slane %v8921_v3, 5 }
 0x58a   : > { %v8840_v8 = vsel %vm14482_vm2, %v8831_v60, %v8839_v21  ;;  %v8932_v60 = vrot.slane %v8930_v9, 5  ;;  %v8937_v21 = vrot.slane %v8935_v6, 4  ;;  %v8772_v6 = vld [vmem:[#allocation2 + $0x118] sm:$0x1f] }
 0x58b   : > { %10938 = vmatmul.mubr.msk.bf16.gmra.mrb[20].mxu1 %vm14468_vm3, %v8496_v39  ;;  %v8850_v39 = vshrl.u32 %v8761_v1, 16  ;;  %vm14483_vm3 = vmmov %vm14482_vm2  ;;  %v9037_v51 = vshrl.u32 %v8772_v6, 16 }
 0x58c   : > { %10941 = vmatprep.mubr.msk.bf16.mxu1 %vm14470_vm5, %v8499_v26  ;;  %v8853_v26 = vshll.u32 %v8761_v1, 16  ;;  %vm14485_vm5 = vmmov %vm14461_vm0  ;;  %v8910_v1 = vshrl.u32 %v13689_v4, 16  ;;  %v8927_v4 = vshrl.u32 %v13698_v46, 16 }
 0x58d   : > { %v8852_v50 = vrot.slane %v8850_v39, 4  ;;  %v8903_v39 = vrot.slane %v8901_v10, 4 }
 0x58e   : > { %v8912_v42 = vrot.slane %v8910_v1, 4  ;;  %v8929_v31 = vrot.slane %v8927_v4, 4 }
 0x590   : > { %v8933_v14 = vor.u32 %v8932_v60, %v8929_v31 }
 0x593   : > { %10942 = vmatmul.mubr.msk.bf16.gmra.mrb[24].mxu1 %vm14472_vm13, %v8502_v29  ;;  %v8855_v29 = vrot.slane %v8853_v26, 5  ;;  %v8906_v26 = vrot.slane %v8904_v53, 5  ;;  %vm14487_vm13 = vmmov %vm14461_vm0 }
 0x594   : > { %10945 = vmatprep.mubr.msk.bf16.mxu1 %vm14474_vm15, %v8505_v44  ;;  %v8870_v44 = vshll.u32 %v8762_v54, 16  ;;  %vm14489_vm15 = vmmov %vm14461_vm0  ;;  %v8938_v54 = vshll.u32 %v8766_v56, 16 }
 0x595   : > { %v8856_v35 = vor.u32 %v8855_v29, %v8852_v50  ;;  %v8907_v50 = vor.u32 %v8906_v26, %v8903_v39 }
 0x596   : > { %v8872_v62 = vrot.slane %v8870_v44, 5  ;;  %v8955_v44 = vshll.u32 %v8767_v37, 16 }
 0x597   : > { %v8857_v22 = vsel %vm14483_vm3, %v8848_v19, %v8856_v35  ;;  %v8940_v19 = vrot.slane %v8938_v54, 5 }
 0x598   : > { %v8873_v23 = vor.u32 %v8872_v62, %v8869_v32  ;;  %v8957_v47 = vrot.slane %v8955_v44, 5  ;;  %v8961_v62 = vshrl.u32 %v13710_v55, 16  ;;  %v9040_v44 = vshll.u32 %v8772_v6, 16 }
 0x599   : > { %v8941_v32 = vor.u32 %v8940_v19, %v8937_v21 }
 0x59a   : > { %v8874_v15 = vsel %vm14486_vm9, %v8865_v28, %v8873_v23  ;;  %v8958_v28 = vor.u32 %v8957_v47, %v8954_v25  ;;  %v9042_v33 = vrot.slane %v9040_v44, 5 }
 0x59b   : > { %10946 = vmatmul.mubr.msk.bf16.gmra.mrb[28].mxu1 %vm14461_vm0, %v8508_v40  ;;  %v8878_v40 = vrot.slane %v8876_v57, 4  ;;  %vm14491_vm0 = vmmov %vm14482_vm2  ;;  %v8768_v57 = vld [vmem:[#allocation2 + $0xd8] sm:$0x1f] }
 0x59c   : > { %10951 = vmatprep.mubr.msk.bf16.mxu1 %vm14477_vm11, %v8789_v18  ;;  %v8893_v18 = vshrl.u32 %v13686_v63, 16  ;;  %v8920_v63 = vrot.slane %v8918_v5, 4  ;;  %vm14493_vm11 = vmmov %vm14481_vm1  ;;  %v8972_v41 = vshll.u32 %v8768_v57, 16  ;;  %v8988_v5 = vrot.slane %v8986_v7, 4 }
 0x59d   : > { %v8882_v0 = vor.u32 %v8881_v2, %v8878_v40  ;;  %v8978_v40 = vshrl.u32 %v13713_v34, 16  ;;  %v8981_v2 = vshll.u32 %v13713_v34, 16  ;;  %vm14494_vm12 = vmmov %vm14491_vm0  ;;  %v8771_v34 = vld [vmem:[#allocation2 + $0x108] sm:$0x1f] }
 0x59e   : > { %v8895_v16 = vrot.slane %v8893_v18, 4  ;;  %v8942_v23 = vsel %vm14494_vm12, %v8933_v14, %v8941_v32  ;;  %v8963_v18 = vrot.slane %v8961_v62, 4  ;;  %v8974_v53 = vrot.slane %v8972_v41, 5  ;;  %vm14496_vm8 = vmmov %vm14491_vm0 }
 0x59f   : > { %v8891_v45 = vsel %vm14488_vm14, %v8882_v0, %v8890_v27  ;;  %v8980_v1 = vrot.slane %v8978_v40, 4  ;;  %v8959_v3 = vsel %vm14496_vm8, %v8950_v36, %v8958_v28  ;;  %v8770_v0 = vld [vmem:[#allocation2 + $0xf8] sm:$0x1f]  ;;  %vm14497_vm2 = vmmov %vm14491_vm0 }
 0x5a0   : > { %v8899_v58 = vor.u32 %v8898_v48, %v8895_v16  ;;  %v8995_v16 = vshrl.u32 %v13722_v49, 16  ;;  %v8998_v48 = vshll.u32 %v13722_v49, 16  ;;  %v9003_v56 = vshrl.u32 %v8770_v0, 16  ;;  %vm14498_vm3 = vmmov %vm14491_vm0 }
 0x5a1   : > { %vm14501_vm9 = vmmov %vm14491_vm0 }
 0x5a2   : > { %v8908_v35 = vsel %vm14490_vm7, %v8899_v58, %v8907_v50  ;;  %v8997_v9 = vrot.slane %v8995_v16, 4  ;;  %v9000_v37 = vrot.slane %v8998_v48, 5  ;;  %v9005_v58 = vrot.slane %v9003_v56, 4  ;;  %vm14503_vm14 = vmmov %vm14491_vm0 }
 0x5a3   : > { %10952 = vmatmul.mubr.msk.bf16.vlgmr.msra.gmra.mrb[0].mxu1 %vm14479_vm6, %v8806_v43  ;;  %v8915_v43 = vrot.slane %v8913_v17, 5  ;;  %v8983_v17 = vrot.slane %v8981_v2, 5  ;;  %vm14495_vm6 = vmmov %vm14481_vm1 }
 0x5a4   : > { %10955 = vmatprep.mubr.msk.bf16.mxu1 %vm14481_vm1, %v8823_v11  ;;  %v8924_v11 = vor.u32 %v8923_v20, %v8920_v63  ;;  %v9015_v63 = vshll.u32 %v13725_v12, 16  ;;  %v9020_v20 = vshrl.u32 %v8771_v34, 16  ;;  %v9001_v31 = vor.u32 %v9000_v37, %v8997_v9  ;;  %vm14505_vm7 = vmmov %vm14491_vm0 }
 0x5a5   : > { %v8916_v29 = vor.u32 %v8915_v43, %v8912_v42  ;;  %v8984_v39 = vor.u32 %v8983_v17, %v8980_v1  ;;  %v9006_v42 = vshll.u32 %v8770_v0, 16  ;;  %v9012_v43 = vshrl.u32 %v13725_v12, 16 }
 0x5a6   : > { %v9029_v12 = vshrl.u32 %v13733_v59, 16 }
 0x5a7   : > { %v8925_v46 = vsel %vm14491_vm0, %v8916_v29, %v8924_v11  ;;  %v9008_v50 = vrot.slane %v9006_v42, 5  ;;  %v9014_v49 = vrot.slane %v9012_v43, 4  ;;  %v9017_v29 = vrot.slane %v9015_v63, 5  ;;  %vm14506_vm0 = vmmov %vm14481_vm1 }
 0x5a8   : > { %v9022_v11 = vrot.slane %v9020_v20, 4  ;;  %vm14509_vm12 = vmmov %vm14506_vm0 }
 0x5a9   : > { %v9009_v60 = vor.u32 %v9008_v50, %v9005_v58  ;;  %v9018_v21 = vor.u32 %v9017_v29, %v9014_v49  ;;  %vm14511_vm8 = vmmov %vm14506_vm0 }
 0x5ab   : > { %10956 = vmatmul.mubr.msk.bf16.gmra.mrb[4].mxu1 %vm14484_vm4, %v8840_v8  ;;  %v8964_v8 = vshll.u32 %v13710_v55, 16  ;;  %v8991_v55 = vrot.slane %v8989_v61, 5  ;;  %vm14499_vm4 = vmmov %vm14481_vm1  ;;  %v9010_v13 = vsel %vm14501_vm9, %v9001_v31, %v9009_v60 }
 0x5ac   : > { %10959 = vmatprep.mubr.msk.bf16.mxu1 %vm14485_vm5, %v8857_v22  ;;  %v8969_v22 = vshrl.u32 %v8768_v57, 16  ;;  %vm14500_vm5 = vmmov %vm14481_vm1  ;;  %v9039_v57 = vrot.slane %v9037_v51, 4 }
 0x5ad   : > { %v8966_v30 = vrot.slane %v8964_v8, 5  ;;  %v8992_v26 = vor.u32 %v8991_v55, %v8988_v5  ;;  %vm14517_vm9 = vmmov %vm14506_vm0 }
 0x5ae   : > { %v8971_v10 = vrot.slane %v8969_v22, 4  ;;  %v9043_v59 = vor.u32 %v9042_v33, %v9039_v57 }
 0x5af   : > { %v8967_v27 = vor.u32 %v8966_v30, %v8963_v18  ;;  %v8993_v54 = vsel %vm14498_vm3, %v8984_v39, %v8992_v26  ;;  %vm14514_vm3 = vmmov %vm14506_vm0 }
 0x5b3   : > { %10960 = vmatmul.mubr.msk.bf16.gmra.mrb[8].mxu1 %vm14487_vm13, %v8874_v15  ;;  %v8975_v15 = vor.u32 %v8974_v53, %v8971_v10  ;;  %vm14502_vm13 = vmmov %vm14481_vm1 }
 0x5b4   : > { %10963 = vmatprep.mubr.msk.bf16.mxu1 %vm14489_vm15, %v8891_v45  ;;  %v9023_v45 = vshll.u32 %v8771_v34, 16  ;;  %vm14504_vm15 = vmmov %vm14481_vm1 }
 0x5b5   : > { %v8976_v4 = vsel %vm14497_vm2, %v8967_v27, %v8975_v15  ;;  %vm14513_vm2 = vmmov %vm14506_vm0 }
 0x5b6   : > { %v9025_v24 = vrot.slane %v9023_v45, 5 }
 0x5b8   : > { %v9026_v19 = vor.u32 %v9025_v24, %v9022_v11 }
 0x5ba   : > { %v9027_v25 = vsel %vm14503_vm14, %v9018_v21, %v9026_v19  ;;  %vm14519_vm14 = vmmov %vm14506_vm0 }
 0x5bb   : > { %10964 = vmatmul.mubr.msk.bf16.gmra.mrb[12].mxu1 %vm14492_vm10, %v8908_v35  ;;  %v9031_v35 = vrot.slane %v9029_v12, 4  ;;  %vm14507_vm10 = vmmov %vm14506_vm0 }
 0x5bc   : > { %10967 = vmatprep.mubr.msk.bf16.mxu1 %vm14493_vm11, %v8925_v46  ;;  %v9034_v46 = vrot.slane %v9032_v38, 5  ;;  %vm14508_vm11 = vmmov %vm14506_vm0 }
 0x5be   : > { %v9035_v47 = vor.u32 %v9034_v46, %v9031_v35 }
 0x5c0   : > { %v9044_v52 = vsel %vm14505_vm7, %v9035_v47, %v9043_v59  ;;  %vm14521_vm7 = vmmov %vm14506_vm0 }
 0x5c3   : > { %10968 = vmatmul.mubr.msk.bf16.gmra.mrb[16].mxu1 %vm14495_vm6, %v8942_v23  ;;  %vm14510_vm6 = vmmov %vm14506_vm0 }
 0x5c4   : > { %10971 = vmatprep.mubr.msk.bf16.mxu1 %vm14481_vm1, %v8959_v3  ;;  %vm14512_vm1 = vmmov %vm14506_vm0 }
 0x5cb   : > { %10972 = vmatmul.mubr.msk.bf16.gmra.mrb[20].mxu1 %vm14499_vm4, %v8976_v4  ;;  %vm14515_vm4 = vmmov %vm14506_vm0 }
 0x5cc   : > { %10975 = vmatprep.mubr.msk.bf16.mxu1 %vm14500_vm5, %v8993_v54  ;;  %vm14516_vm5 = vmmov %vm14506_vm0 }
 0x5d3   : > { %10976 = vmatmul.mubr.msk.bf16.gmra.mrb[24].mxu1 %vm14502_vm13, %v9010_v13  ;;  %vm14518_vm13 = vmmov %vm14506_vm0 }
 0x5d4   : > { %10979 = vmatprep.mubr.msk.bf16.mxu1 %vm14504_vm15, %v9027_v25  ;;  %vm14520_vm15 = vmmov %vm14506_vm0 }
 0x5db   : > { %10980 = vmatmul.mubr.msk.bf16.gmra.mrb[28].mxu1 %vm14506_vm0, %v9044_v52 }
 0x676   : > { %v10953_v14 = vpop.f32.mrb[0].mxu1 }
 0x677   : > { %9291 = vst.msk [vmem:[#allocation3 + $0x10] sm:$0xff] %vm14507_vm10, %v10953_v14  ;;  %v9130_v32 = vpop.f32.mrb[1].mxu1  ;;  %v9393_v41 = vmul.f32 %v10953_v14, %v10953_v14  ;;  %v9324_v36 = vsel %vm14513_vm2, %v10953_v14, 0.0  ;;  %vm14522_vm10 = vmmov %vm14506_vm0 }
 0x678   : > { %9289 = vst.msk [vmem:[#allocation3] sm:$0xff] %vm14508_vm11, %v9130_v32  ;;  %v9391_v62 = vmul.f32 %v9130_v32, %v9130_v32  ;;  %v10954_v8 = vpop.f32.mrb[2].mxu1  ;;  %v9321_v40 = vsel %vm14510_vm6, %v9130_v32, 0.0  ;;  %vm14523_vm11 = vmmov %vm14506_vm0 }
 0x679   : > { %9292 = vst.msk [vmem:[#allocation3 + $0x18] sm:$0xff] %vm14509_vm12, %v10954_v8  ;;  %v9133_v22 = vpop.f32.mrb[3].mxu1  ;;  %v9394_v23 = vmul.f32 %v10954_v8, %v10954_v8  ;;  %v9426_v53 = vsel %vm14516_vm5, %v9393_v41, 0.0  ;;  %v9326_v1 = vsel %vm14517_vm9, %v10954_v8, 0.0  ;;  %vm14524_vm12 = vmmov %vm14506_vm0 }
 0x67a   : > { %9290 = vst.msk [vmem:[#allocation3 + $0x8] sm:$0xff] %vm14511_vm8, %v9133_v22  ;;  %v9322_v2 = vsel %vm14512_vm1, %v9133_v22, 0.0  ;;  %v9392_v7 = vmul.f32 %v9133_v22, %v9133_v22  ;;  %v9423_v28 = vsel %vm14514_vm3, %v9391_v62, 0.0  ;;  %vm14525_vm6 = vmmov %vm14506_vm0 }
 0x67b   : > { %v9323_v61 = vadd.f32 %v9322_v2, %v9321_v40  ;;  %v9428_v0 = vsel %vm14519_vm14, %v9394_v23, 0.0  ;;  %vm14526_vm8 = vmmov %vm14506_vm0 }
 0x67c   : > { %v9424_v18 = vsel %vm14515_vm4, %v9392_v7, 0.0  ;;  %vm14527_vm1 = vmmov %vm14506_vm0 }
 0x67d   : > { %v9325_v30 = vadd.f32 %v9324_v36, %v9323_v61  ;;  %v9425_v10 = vadd.f32 %v9424_v18, %v9423_v28  ;;  %vm14528_vm2 = vmmov %vm14506_vm0 }
 0x67e   : > { %v10957_v17 = vpop.f32.mrb[4].mxu1  ;;  %vm14529_vm3 = vmmov %vm14506_vm0 }
 0x67f   : > { %v9427_v5 = vadd.f32 %v9426_v53, %v9425_v10  ;;  %9295 = vst.msk [vmem:[#allocation3 + $0x30] sm:$0xff] %vm14518_vm13, %v10957_v17  ;;  %v9146_v55 = vpop.f32.mrb[5].mxu1  ;;  %v9327_v3 = vadd.f32 %v9326_v1, %v9325_v30  ;;  %v9397_v26 = vmul.f32 %v10957_v17, %v10957_v17  ;;  %v9332_v45 = vsel %vm14525_vm6, %v10957_v17, 0.0  ;;  %vm14530_vm4 = vmmov %vm14506_vm0 }
 0x680   : > { %9293 = vst.msk [vmem:[#allocation3 + $0x20] sm:$0xff] %vm14520_vm15, %v9146_v55  ;;  %v9328_v34 = vsel %vm14521_vm7, %v9146_v55, 0.0  ;;  %v9395_v27 = vmul.f32 %v9146_v55, %v9146_v55  ;;  %v10958_v15 = vpop.f32.mrb[6].mxu1  ;;  %vm14531_vm5 = vmmov %vm14506_vm0 }
 0x681   : > { %v9329_v16 = vadd.f32 %v9328_v34, %v9327_v3  ;;  %v9429_v48 = vadd.f32 %v9428_v0, %v9427_v5  ;;  %9296 = vst.msk [vmem:[#allocation3 + $0x38] sm:$0xff] %vm14506_vm0, %v10958_v15  ;;  %v9149_v39 = vpop.f32.mrb[7].mxu1  ;;  %v9398_v4 = vmul.f32 %v10958_v15, %v10958_v15  ;;  %v9434_v37 = vsel %vm14527_vm1, %v9397_v26, 0.0  ;;  %vm14532_vm9 = vmmov %vm14506_vm0 }
 0x682   : > { %v9430_v56 = vsel %vm14522_vm10, %v9395_v27, 0.0  ;;  %9294 = vst.msk [vmem:[#allocation3 + $0x28] sm:$0xff] %vm14523_vm11, %v9149_v39  ;;  %v9330_v42 = vsel %vm14524_vm12, %v9149_v39, 0.0  ;;  %v9396_v43 = vmul.f32 %v9149_v39, %v9149_v39  ;;  %v9334_v58 = vsel %vm14528_vm2, %v10958_v15, 0.0  ;;  %vm14533_vm13 = vmmov %vm14506_vm0 }
 0x683   : > { %v9431_v63 = vadd.f32 %v9430_v56, %v9429_v48  ;;  %v9331_v20 = vadd.f32 %v9330_v42, %v9329_v16  ;;  %v9436_v24 = vsel %vm14530_vm4, %v9398_v4, 0.0  ;;  %vm14534_vm14 = vmmov %vm14506_vm0 }
 0x684   : > { %v9432_v9 = vsel %vm14526_vm8, %v9396_v43, 0.0  ;;  %vm14535_vm15 = vmmov %vm14506_vm0 }
 0x685   : > { %v9333_v6 = vadd.f32 %v9332_v45, %v9331_v20  ;;  %v9433_v54 = vadd.f32 %v9432_v9, %v9431_v63  ;;  %vm14536_vm7 = vmmov %vm14506_vm0 }
 0x686   : > { %v10961_v50 = vpop.f32.mrb[8].mxu1  ;;  %vm14537_vm10 = vmmov %vm14506_vm0 }
 0x687   : > { %v9435_v49 = vadd.f32 %v9434_v37, %v9433_v54  ;;  %9299 = vst.msk [vmem:[#allocation3 + $0x50] sm:$0xff] %vm14529_vm3, %v10961_v50  ;;  %v9162_v29 = vpop.f32.mrb[9].mxu1  ;;  %v9335_v11 = vadd.f32 %v9334_v58, %v9333_v6  ;;  %v9401_v21 = vmul.f32 %v10961_v50, %v10961_v50  ;;  %v9340_v13 = vsel %vm14506_vm0, %v10961_v50, 0.0  ;;  %vm14538_vm11 = vmmov %vm14506_vm0 }
 0x688   : > { %9297 = vst.msk [vmem:[#allocation3 + $0x40] sm:$0xff] %vm14531_vm5, %v9162_v29  ;;  %v9336_v12 = vsel %vm14532_vm9, %v9162_v29, 0.0  ;;  %v9399_v38 = vmul.f32 %v9162_v29, %v9162_v29  ;;  %v10962_v51 = vpop.f32.mrb[10].mxu1  ;;  %vm14539_vm12 = vmmov %vm14506_vm0 }
 0x689   : > { %v9337_v44 = vadd.f32 %v9336_v12, %v9335_v11  ;;  %v9437_v31 = vadd.f32 %v9436_v24, %v9435_v49  ;;  %9300 = vst.msk [vmem:[#allocation3 + $0x58] sm:$0xff] %vm14533_vm13, %v10962_v51  ;;  %v9165_v60 = vpop.f32.mrb[11].mxu1  ;;  %v9402_v25 = vmul.f32 %v10962_v51, %v10962_v51  ;;  %v9442_v14 = vsel %vm14538_vm11, %v9401_v21, 0.0  ;;  %vm14540_vm6 = vmmov %vm14506_vm0 }
 0x68a   : > { %v9438_v19 = vsel %vm14534_vm14, %v9399_v38, 0.0  ;;  %9298 = vst.msk [vmem:[#allocation3 + $0x48] sm:$0xff] %vm14535_vm15, %v9165_v60  ;;  %v9338_v35 = vsel %vm14536_vm7, %v9165_v60, 0.0  ;;  %v9400_v46 = vmul.f32 %v9165_v60, %v9165_v60  ;;  %v9342_v32 = vsel %vm14539_vm12, %v10962_v51, 0.0  ;;  %vm14541_vm8 = vmmov %vm14506_vm0 }
 0x68b   : > { %v9439_v57 = vadd.f32 %v9438_v19, %v9437_v31  ;;  %v9339_v33 = vadd.f32 %v9338_v35, %v9337_v44  ;;  %v9444_v40 = vsel %vm14541_vm8, %v9402_v25, 0.0  ;;  %vm14542_vm1 = vmmov %vm14506_vm0 }
 0x68c   : > { %v9440_v47 = vsel %vm14537_vm10, %v9400_v46, 0.0  ;;  %vm14543_vm2 = vmmov %vm14506_vm0 }
 0x68d   : > { %v9341_v59 = vadd.f32 %v9340_v13, %v9339_v33  ;;  %v9441_v52 = vadd.f32 %v9440_v47, %v9439_v57  ;;  %vm14544_vm3 = vmmov %vm14506_vm0 }
 0x68e   : > { %v10965_v62 = vpop.f32.mrb[12].mxu1  ;;  %vm14545_vm4 = vmmov %vm14506_vm0 }
 0x68f   : > { %v9443_v8 = vadd.f32 %v9442_v14, %v9441_v52  ;;  %9303 = vst.msk [vmem:[#allocation3 + $0x70] sm:$0xff] %vm14540_vm6, %v10965_v62  ;;  %v9178_v22 = vpop.f32.mrb[13].mxu1  ;;  %v9343_v41 = vadd.f32 %v9342_v32, %v9341_v59  ;;  %v9405_v18 = vmul.f32 %v10965_v62, %v10965_v62  ;;  %vm14546_vm5 = vmmov %vm14506_vm0 }
 0x690   : > { %9301 = vst.msk [vmem:[#allocation3 + $0x60] sm:$0xff] %vm14542_vm1, %v9178_v22  ;;  %v9344_v2 = vsel %vm14543_vm2, %v9178_v22, 0.0  ;;  %v9403_v7 = vmul.f32 %v9178_v22, %v9178_v22  ;;  %v10966_v61 = vpop.f32.mrb[14].mxu1  ;;  %vm14547_vm9 = vmmov %vm14506_vm0 }
 0x691   : > { %v9345_v36 = vadd.f32 %v9344_v2, %v9343_v41  ;;  %v9445_v28 = vadd.f32 %v9444_v40, %v9443_v8  ;;  %9304 = vst.msk [vmem:[#allocation3 + $0x78] sm:$0xff] %vm14544_vm3, %v10966_v61  ;;  %v9181_v23 = vpop.f32.mrb[15].mxu1  ;;  %vm14548_vm13 = vmmov %vm14506_vm0  ;;  %v9406_v55 = vmul.f32 %v10966_v61, %v10966_v61 }
 0x692   : > { %v9446_v30 = vsel %vm14545_vm4, %v9403_v7, 0.0  ;;  %9302 = vst.msk [vmem:[#allocation3 + $0x68] sm:$0xff] %vm14546_vm5, %v9181_v23  ;;  %v9346_v10 = vsel %vm14547_vm9, %v9181_v23, 0.0  ;;  %v9404_v53 = vmul.f32 %v9181_v23, %v9181_v23  ;;  %v9348_v5 = vsel %vm14548_vm13, %v10965_v62, 0.0  ;;  %vm14549_vm14 = vmmov %vm14506_vm0 }
 0x693   : > { %v9447_v1 = vadd.f32 %v9446_v30, %v9445_v28  ;;  %v9347_v17 = vadd.f32 %v9346_v10, %v9345_v36  ;;  %vm14550_vm15 = vmmov %vm14506_vm0 }
 0x694   : > { %v9448_v3 = vsel %vm14549_vm14, %v9404_v53, 0.0  ;;  %v9450_v27 = vsel %vm14550_vm15, %v9405_v18, 0.0  ;;  %vm14551_vm7 = vmmov %vm14506_vm0 }
 0x695   : > { %v9349_v0 = vadd.f32 %v9348_v5, %v9347_v17  ;;  %v9449_v34 = vadd.f32 %v9448_v3, %v9447_v1  ;;  %v9350_v15 = vsel %vm14551_vm7, %v10966_v61, 0.0  ;;  %vm14552_vm10 = vmmov %vm14506_vm0 }
 0x696   : > { %v10969_v16 = vpop.f32.mrb[16].mxu1  ;;  %v9452_v56 = vsel %vm14552_vm10, %v9406_v55, 0.0  ;;  %vm14553_vm11 = vmmov %vm14506_vm0 }
 0x697   : > { %v9451_v48 = vadd.f32 %v9450_v27, %v9449_v34  ;;  %9307 = vst.msk [vmem:[#allocation3 + $0x90] sm:$0xff] %vm14506_vm0, %v10969_v16  ;;  %v9194_v39 = vpop.f32.mrb[17].mxu1  ;;  %v9351_v26 = vadd.f32 %v9350_v15, %v9349_v0  ;;  %vm14554_vm12 = vmmov %vm14506_vm0  ;;  %v9409_v9 = vmul.f32 %v10969_v16, %v10969_v16 }
 0x698   : > { %9305 = vst.msk [vmem:[#allocation3 + $0x80] sm:$0xff] %vm14553_vm11, %v9194_v39  ;;  %v9352_v42 = vsel %vm14554_vm12, %v9194_v39, 0.0  ;;  %v9407_v43 = vmul.f32 %v9194_v39, %v9194_v39  ;;  %v10970_v63 = vpop.f32.mrb[18].mxu1  ;;  %vm14555_vm6 = vmmov %vm14506_vm0 }
 0x699   : > { %v9353_v20 = vadd.f32 %v9352_v42, %v9351_v26  ;;  %v9453_v45 = vadd.f32 %v9452_v56, %v9451_v48  ;;  %9308 = vst.msk [vmem:[#allocation3 + $0x98] sm:$0xff] %vm14555_vm6, %v10970_v63  ;;  %v9197_v4 = vpop.f32.mrb[19].mxu1  ;;  %vm14556_vm8 = vmmov %vm14506_vm0  ;;  %v9410_v29 = vmul.f32 %v10970_v63, %v10970_v63 }
 0x69a   : > { %v9454_v6 = vsel %vm14556_vm8, %v9407_v43, 0.0  ;;  %vm14557_vm1 = vmmov %vm14506_vm0  ;;  %v9408_v37 = vmul.f32 %v9197_v4, %v9197_v4 }
 0x69b   : > { %9306 = vst.msk [vmem:[#allocation3 + $0x88] sm:$0xff] %vm14557_vm1, %v9197_v4  ;;  %vm14558_vm2 = vmmov %vm14506_vm0  ;;  %v9455_v58 = vadd.f32 %v9454_v6, %v9453_v45 }
 0x69c   : > { %v9354_v54 = vsel %vm14558_vm2, %v9197_v4, 0.0  ;;  %vm14559_vm3 = vmmov %vm14506_vm0 }
 0x69d   : > { %v9355_v50 = vadd.f32 %v9354_v54, %v9353_v20  ;;  %v9356_v49 = vsel %vm14559_vm3, %v10969_v16, 0.0  ;;  %vm14560_vm4 = vmmov %vm14506_vm0 }
 0x69e   : > { %v9456_v11 = vsel %vm14560_vm4, %v9408_v37, 0.0  ;;  %vm14561_vm5 = vmmov %vm14506_vm0  ;;  %v10973_v44 = vpop.f32.mrb[20].mxu1 }
 0x69f   : > { %v9357_v24 = vadd.f32 %v9356_v49, %v9355_v50  ;;  %v9457_v12 = vadd.f32 %v9456_v11, %v9455_v58  ;;  %v9458_v38 = vsel %vm14561_vm5, %v9409_v9, 0.0  ;;  %vm14562_vm9 = vmmov %vm14506_vm0  ;;  %v9210_v60 = vpop.f32.mrb[21].mxu1  ;;  %v9413_v47 = vmul.f32 %v10973_v44, %v10973_v44 }
 0x6a0   : > { %v9358_v51 = vsel %vm14562_vm9, %v10970_v63, 0.0  ;;  %vm14563_vm13 = vmmov %vm14506_vm0  ;;  %v9411_v46 = vmul.f32 %v9210_v60, %v9210_v60  ;;  %v10974_v57 = vpop.f32.mrb[22].mxu1 }
 0x6a1   : > { %v9459_v31 = vadd.f32 %v9458_v38, %v9457_v12  ;;  %9311 = vst.msk [vmem:[#allocation3 + $0xb0] sm:$0xff] %vm14563_vm13, %v10973_v44  ;;  %v9359_v21 = vadd.f32 %v9358_v51, %v9357_v24  ;;  %vm14564_vm14 = vmmov %vm14506_vm0  ;;  %v9213_v25 = vpop.f32.mrb[23].mxu1  ;;  %v9414_v22 = vmul.f32 %v10974_v57, %v10974_v57 }
 0x6a2   : > { %v9460_v19 = vsel %vm14564_vm14, %v9410_v29, 0.0  ;;  %vm14565_vm15 = vmmov %vm14506_vm0  ;;  %9312 = vst.msk [vmem:[#allocation3 + $0xb8] sm:$0xff] %vm14506_vm0, %v10974_v57  ;;  %v9412_v14 = vmul.f32 %v9213_v25, %v9213_v25 }
 0x6a3   : > { %9309 = vst.msk [vmem:[#allocation3 + $0xa0] sm:$0xff] %vm14565_vm15, %v9210_v60  ;;  %vm14566_vm7 = vmmov %vm14506_vm0  ;;  %v9461_v13 = vadd.f32 %v9460_v19, %v9459_v31 }
 0x6a4   : > { %v9360_v35 = vsel %vm14566_vm7, %v9210_v60, 0.0  ;;  %vm14567_vm10 = vmmov %vm14506_vm0 }
 0x6a5   : > { %v9361_v33 = vadd.f32 %v9360_v35, %v9359_v21  ;;  %v9462_v59 = vsel %vm14567_vm10, %v9411_v46, 0.0  ;;  %vm14568_vm11 = vmmov %vm14506_vm0 }
 0x6a6   : > { %9310 = vst.msk [vmem:[#allocation3 + $0xa8] sm:$0xff] %vm14568_vm11, %v9213_v25  ;;  %vm14569_vm12 = vmmov %vm14506_vm0  ;;  %v9463_v32 = vadd.f32 %v9462_v59, %v9461_v13  ;;  %v10977_v36 = vpop.f32.mrb[24].mxu1 }
 0x6a7   : > { %v9362_v52 = vsel %vm14569_vm12, %v9213_v25, 0.0  ;;  %vm14570_vm6 = vmmov %vm14506_vm0  ;;  %v9226_v23 = vpop.f32.mrb[25].mxu1  ;;  %v9417_v3 = vmul.f32 %v10977_v36, %v10977_v36  ;;  %v9372_v48 = vsel %vm14506_vm0, %v10977_v36, 0.0 }
 0x6a8   : > { %v9363_v62 = vadd.f32 %v9362_v52, %v9361_v33  ;;  %v9364_v8 = vsel %vm14570_vm6, %v10973_v44, 0.0  ;;  %vm14571_vm8 = vmmov %vm14506_vm0  ;;  %v9415_v53 = vmul.f32 %v9226_v23, %v9226_v23  ;;  %v10978_v1 = vpop.f32.mrb[26].mxu1 }
 0x6a9   : > { %v9464_v41 = vsel %vm14571_vm8, %v9412_v14, 0.0  ;;  %vm14572_vm1 = vmmov %vm14506_vm0  ;;  %v9229_v55 = vpop.f32.mrb[27].mxu1  ;;  %v9418_v39 = vmul.f32 %v10978_v1, %v10978_v1 }
 0x6aa   : > { %v9365_v40 = vadd.f32 %v9364_v8, %v9363_v62  ;;  %v9465_v2 = vadd.f32 %v9464_v41, %v9463_v32  ;;  %v9466_v7 = vsel %vm14572_vm1, %v9413_v47, 0.0  ;;  %vm14573_vm2 = vmmov %vm14506_vm0  ;;  %v9416_v27 = vmul.f32 %v9229_v55, %v9229_v55 }
 0x6ab   : > { %v9366_v61 = vsel %vm14573_vm2, %v10974_v57, 0.0  ;;  %vm14574_vm3 = vmmov %vm14506_vm0 }
 0x6ac   : > { %v9467_v28 = vadd.f32 %v9466_v7, %v9465_v2  ;;  %9315 = vst.msk [vmem:[#allocation3 + $0xd0] sm:$0xff] %vm14574_vm3, %v10977_v36  ;;  %v9367_v18 = vadd.f32 %v9366_v61, %v9365_v40  ;;  %vm14575_vm4 = vmmov %vm14506_vm0 }
 0x6ad   : > { %v9468_v30 = vsel %vm14575_vm4, %v9414_v22, 0.0  ;;  %vm14576_vm5 = vmmov %vm14506_vm0 }
 0x6ae   : > { %9313 = vst.msk [vmem:[#allocation3 + $0xc0] sm:$0xff] %vm14576_vm5, %v9226_v23  ;;  %vm14577_vm9 = vmmov %vm14506_vm0  ;;  %v9469_v5 = vadd.f32 %v9468_v30, %v9467_v28  ;;  %v10981_v20 = vpop.f32.mrb[28].mxu1 }
 0x6af   : > { %v9368_v10 = vsel %vm14577_vm9, %v9226_v23, 0.0  ;;  %vm14578_vm13 = vmmov %vm14506_vm0  ;;  %v9242_v4 = vpop.f32.mrb[29].mxu1  ;;  %v9421_v11 = vmul.f32 %v10981_v20, %v10981_v20 }
 0x6b0   : > { %v9369_v17 = vadd.f32 %v9368_v10, %v9367_v18  ;;  %9316 = vst.msk [vmem:[#allocation3 + $0xd8] sm:$0xff] %vm14578_vm13, %v10978_v1  ;;  %vm14579_vm14 = vmmov %vm14506_vm0  ;;  %v9419_v37 = vmul.f32 %v9242_v4, %v9242_v4  ;;  %v10982_v58 = vpop.f32.mrb[30].mxu1 }
 0x6b1   : > { %v9470_v0 = vsel %vm14579_vm14, %v9415_v53, 0.0  ;;  %vm14580_vm15 = vmmov %vm14506_vm0  ;;  %v9245_v29 = vpop.f32.mrb[31].mxu1  ;;  %v9422_v60 = vmul.f32 %v10982_v58, %v10982_v58  ;;  %v13905_v53 = vld [vmem:[#allocation3 + $0x10] sm:$0xff] }
 0x6b2   : > { %9314 = vst.msk [vmem:[#allocation3 + $0xc8] sm:$0xff] %vm14580_vm15, %v9229_v55  ;;  %vm14581_vm7 = vmmov %vm14506_vm0  ;;  %v9471_v15 = vadd.f32 %v9470_v0, %v9469_v5  ;;  %v9420_v38 = vmul.f32 %v9245_v29, %v9245_v29  ;;  %v13911_v5 = vld [vmem:[#allocation3 + $0x8] sm:$0xff]  ;;  %v13917_v0 = vld [vmem:[#allocation3 + $0x38] sm:$0xff] }
 0x6b3   : > { %v9370_v34 = vsel %vm14581_vm7, %v9229_v55, 0.0  ;;  %vm14582_vm10 = vmmov %vm14506_vm0  ;;  %v9484_v25 = vsel %vm14506_vm0, %v9422_v60, 0.0  ;;  %v13913_v55 = vld [vmem:[#allocation3 + $0x30] sm:$0xff] }
 0x6b4   : > { %v9371_v16 = vadd.f32 %v9370_v34, %v9369_v17  ;;  %v9472_v26 = vsel %vm14582_vm10, %v9416_v27, 0.0  ;;  %vm14583_vm11 = vmmov %vm14506_vm0  ;;  %v13909_v17 = vld [vmem:[#allocation3 + $0x18] sm:$0xff]  ;;  %v13919_v34 = vld [vmem:[#allocation3 + $0x28] sm:$0xff] }
 0x6b5   : > { %v9473_v42 = vadd.f32 %v9472_v26, %v9471_v15  ;;  %v9474_v43 = vsel %vm14583_vm11, %v9417_v3, 0.0  ;;  %vm14584_vm12 = vmmov %vm14506_vm0  ;;  %v13915_v3 = vld [vmem:[#allocation3 + $0x20] sm:$0xff]  ;;  %v13921_v27 = vld [vmem:[#allocation3 + $0x50] sm:$0xff] }
 0x6b6   : > { %v9373_v56 = vadd.f32 %v9372_v48, %v9371_v16  ;;  %v9374_v63 = vsel %vm14584_vm12, %v10978_v1, 0.0  ;;  %vm14585_vm6 = vmmov %vm14506_vm0  ;;  %v13907_v1 = vld [vmem:[#allocation3] sm:$0xff]  ;;  %v13925_v16 = vld [vmem:[#allocation3 + $0x58] sm:$0xff] }
 0x6b7   : > { %v9475_v45 = vadd.f32 %v9474_v43, %v9473_v42  ;;  %9319 = vst.msk [vmem:[#allocation3 + $0xf0] sm:$0xff] %vm14585_vm6, %v10981_v20  ;;  %vm14586_vm8 = vmmov %vm14506_vm0  ;;  %v13923_v15 = vld [vmem:[#allocation3 + $0x40] sm:$0xff]  ;;  %v13927_v48 = vld [vmem:[#allocation3 + $0x48] sm:$0xff] }
 0x6b8   : > { %v9375_v9 = vadd.f32 %v9374_v63, %v9373_v56  ;;  %v9476_v6 = vsel %vm14586_vm8, %v9418_v39, 0.0  ;;  %vm14587_vm1 = vmmov %vm14506_vm0  ;;  %v13929_v39 = vld [vmem:[#allocation3 + $0x70] sm:$0xff]  ;;  %v13931_v26 = vld [vmem:[#allocation3 + $0x60] sm:$0xff] }
 0x6b9   : > { %9317 = vst.msk [vmem:[#allocation3 + $0xe0] sm:$0xff] %vm14587_vm1, %v9242_v4  ;;  %vm14588_vm2 = vmmov %vm14506_vm0  ;;  %v9477_v49 = vadd.f32 %v9476_v6, %v9475_v45  ;;  %v9513_v45 = vld [vmem:[#allocation3 + $0x68] sm:$0xff] }
 0x6ba   : > { %v9376_v54 = vsel %vm14588_vm2, %v9242_v4, 0.0  ;;  %vm14589_vm3 = vmmov %vm14506_vm0  ;;  %v13943_v4 = vld [vmem:[#allocation3 + $0x90] sm:$0xff] }
 0x6bb   : > { %v9377_v50 = vadd.f32 %v9376_v54, %v9375_v9  ;;  %9320 = vst.msk [vmem:[#allocation3 + $0xf8] sm:$0xff] %vm14589_vm3, %v10982_v58  ;;  %vm14590_vm4 = vmmov %vm14506_vm0 }
 0x6bc   : > { %v9478_v24 = vsel %vm14590_vm4, %v9419_v37, 0.0  ;;  %vm14591_vm5 = vmmov %vm14506_vm0 }
 0x6bd   : > { %9318 = vst.msk [vmem:[#allocation3 + $0xe8] sm:$0xff] %vm14591_vm5, %v9245_v29  ;;  %vm14592_vm9 = vmmov %vm14506_vm0  ;;  %v9479_v51 = vadd.f32 %v9478_v24, %v9477_v49  ;;  %v9517_v49 = vld [vmem:[#allocation3 + $0x88] sm:$0xff] }
 0x6be   : > { %v9378_v12 = vsel %vm14592_vm9, %v9245_v29, 0.0  ;;  %vm14593_vm13 = vmmov %vm14506_vm0 }
 0x6bf   : > { %v9379_v44 = vadd.f32 %v9378_v12, %v9377_v50  ;;  %v9380_v31 = vsel %vm14593_vm13, %v10981_v20, 0.0  ;;  %vm14594_vm14 = vmmov %vm14506_vm0  ;;  %v13941_v20 = vld [vmem:[#allocation3 + $0x78] sm:$0xff] }
 0x6c0   : > { %v9480_v21 = vsel %vm14594_vm14, %v9420_v38, 0.0  ;;  %vm14595_vm15 = vmmov %vm14506_vm0  ;;  %v13953_v50 = vld [vmem:[#allocation3 + $0x98] sm:$0xff]  ;;  %v13963_v38 = vld [vmem:[#allocation3 + $0xb0] sm:$0xff] }
 0x6c1   : > { %v9381_v19 = vadd.f32 %v9380_v31, %v9379_v44  ;;  %v9481_v35 = vadd.f32 %v9480_v21, %v9479_v51  ;;  %v9482_v46 = vsel %vm14595_vm15, %v9421_v11, 0.0  ;;  %vm14596_vm7 = vmmov %vm14506_vm0  ;;  %v9520_v51 = vld [vmem:[#allocation3 + $0xa0] sm:$0xff]  ;;  %v13965_v44 = vld [vmem:[#allocation3 + $0xb8] sm:$0xff] }
 0x6c2   : > { %v9382_v57 = vsel %vm14596_vm7, %v10982_v58, 0.0  ;;  %v9516_v58 = vld [vmem:[#allocation3 + $0x80] sm:$0xff]  ;;  %vm14598_vm10 = vmmov %vm14506_vm0 }
 0x6c3   : > { %v9383_v33 = vadd.f32 %v9382_v57, %v9381_v19  ;;  %v9483_v13 = vadd.f32 %v9482_v46, %v9481_v35  ;;  %v9521_v35 = vld [vmem:[#allocation3 + $0xa8] sm:$0xff]  ;;  %v13974_v46 = vld [vmem:[#allocation3 + $0xd0] sm:$0xff]  ;;  %v9524_v57 = vld [vmem:[#allocation3 + $0xc0] sm:$0xff] }
 0x6c4   : > { %vm14599_vm11 = vmmov %vm14506_vm0 }
 0x6c5   : > { %v9384_v47 = vrot.slane %v9383_v33, 4  ;;  %v9485_v59 = vadd.f32 %v9484_v25, %v9483_v13  ;;  %vm14600_vm12 = vmmov %vm14506_vm0 }
 0x6c6   : > { %vm14601_vm6 = vmmov %vm14506_vm0 }
 0x6c7   : > { %v9385_v52 = vadd.f32 %v9384_v47, %v9383_v33  ;;  %v9486_v14 = vrot.slane %v9485_v59, 4  ;;  %vm14602_vm8 = vmmov %vm14506_vm0 }
 0x6c8   : > { %vm14603_vm1 = vmmov %vm14506_vm0 }
 0x6c9   : > { %v9386_v32 = vrot.slane %v9385_v52, 2  ;;  %v9487_v62 = vadd.f32 %v9486_v14, %v9485_v59  ;;  %v9527_v59 = vld [vmem:[#allocation3 + $0xd8] sm:$0xff]  ;;  %v13982_v14 = vld [vmem:[#allocation3 + $0xf0] sm:$0xff]  ;;  %vm14604_vm2 = vmmov %vm14506_vm0 }
 0x6ca   : > { %vm14605_vm3 = vmmov %vm14506_vm0 }
 0x6cb   : > { %v9387_v8 = vadd.f32 %v9386_v32, %v9385_v52  ;;  %v9488_v22 = vrot.slane %v9487_v62, 2  ;;  %v9525_v52 = vld [vmem:[#allocation3 + $0xc8] sm:$0xff]  ;;  %vm14606_vm4 = vmmov %vm14506_vm0 }
 0x6cc   : > { %vm14607_vm5 = vmmov %vm14506_vm0 }
 0x6cd   : > { %v9388_v41 = vrot.slane %v9387_v8, 1  ;;  %v9489_v40 = vadd.f32 %v9488_v22, %v9487_v62  ;;  %vm14608_vm9 = vmmov %vm14506_vm0 }
 0x6ce   : > { %vm14609_vm13 = vmmov %vm14506_vm0 }
 0x6cf   : > { %v9389_v2 = vadd.f32 %v9388_v41, %v9387_v8  ;;  %v9490_v7 = vrot.slane %v9489_v40, 1  ;;  %v9528_v41 = vld [vmem:[#allocation3 + $0xe0] sm:$0xff]  ;;  %vm14610_vm14 = vmmov %vm14506_vm0 }
 0x6d0   : > { %vm14611_vm15 = vmmov %vm14506_vm0 }
 0x6d1   : > { %v9491_v61 = vadd.f32 %v9490_v7, %v9489_v40  ;;  %v13901_v36 = vmul.f32 0.00390625, %v9389_v2  ;;  %v9531_v40 = vld [vmem:[#allocation3 + $0xf8] sm:$0xff]  ;;  %v9529_v2 = vld [vmem:[#allocation3 + $0xe8] sm:$0xff]  ;;  %vm14612_vm7 = vmmov %vm14506_vm0 }
 0x6d3   : > { %v9494_v28 = vmul.f32 0.00390625, %v9491_v61  ;;  %v9495_v23 = vmul.f32 %v13901_v36, %v13901_v36  ;;  %v9532_v56 = vsub.f32 %v13907_v1, %v13901_v36  ;;  %v9533_v42 = vsub.f32 %v13911_v5, %v13901_v36 }
 0x6d4   : > { %v9534_v43 = vsub.f32 %v13905_v53, %v13901_v36  ;;  %v9535_v63 = vsub.f32 %v13909_v17, %v13901_v36  ;;  %v9536_v9 = vsub.f32 %v13915_v3, %v13901_v36  ;;  %v9537_v6 = vsub.f32 %v13919_v34, %v13901_v36 }
 0x6d5   : > { %v9496_v18 = vsub.f32 %v9494_v28, %v9495_v23  ;;  %v9538_v54 = vsub.f32 %v13913_v55, %v13901_v36  ;;  %v9539_v37 = vsub.f32 %v13917_v0, %v13901_v36  ;;  %v9540_v29 = vsub.f32 %v13923_v15, %v13901_v36 }
 0x6d6   : > { %v9541_v11 = vsub.f32 %v13927_v48, %v13901_v36  ;;  %v9542_v24 = vsub.f32 %v13921_v27, %v13901_v36  ;;  %v9543_v12 = vsub.f32 %v13925_v16, %v13901_v36  ;;  %v9544_v31 = vsub.f32 %v13931_v26, %v13901_v36 }
 0x6d7   : > { %v9497_v30 = vmax.f32 %v9496_v18, 0.0  ;;  %v9545_v60 = vsub.f32 %v9513_v45, %v13901_v36  ;;  %v9546_v21 = vsub.f32 %v13929_v39, %v13901_v36  ;;  %v9547_v19 = vsub.f32 %v13941_v20, %v13901_v36  ;;  %v9597_v20 = vld [vmem:[%s11634_s20 + $0x8] sm:$0xff]  ;;  %v9598_v45 = vld [vmem:[%s11634_s20 + $0x10] sm:$0xff] }
 0x6d8   : > { %v9548_v33 = vsub.f32 %v9516_v58, %v13901_v36  ;;  %v9549_v13 = vsub.f32 %v9517_v49, %v13901_v36  ;;  %v9550_v25 = vsub.f32 %v13943_v4, %v13901_v36  ;;  %v9551_v47 = vsub.f32 %v13953_v50, %v13901_v36  ;;  %v9599_v4 = vld [vmem:[%s11634_s20 + $0x18] sm:$0xff]  ;;  %v9600_v58 = vld [vmem:[%s11634_s20 + $0x20] sm:$0xff]  ;;  %v9601_v50 = vld [vmem:[%s11634_s20 + $0x28] sm:$0xff] }
 0x6d9   : > { %v9498_v10 = vadd.f32 1e-05, %v9497_v30  ;;  %v9552_v32 = vsub.f32 %v9520_v51, %v13901_v36  ;;  %v9553_v62 = vsub.f32 %v9521_v35, %v13901_v36  ;;  %v9554_v8 = vsub.f32 %v13963_v38, %v13901_v36  ;;  %v9602_v49 = vld [vmem:[%s11634_s20 + $0x30] sm:$0xff]  ;;  %v9604_v51 = vld [vmem:[%s11634_s20 + $0x40] sm:$0xff] }
 0x6da   : > { %v9555_v22 = vsub.f32 %v13965_v44, %v13901_v36  ;;  %v9556_v7 = vsub.f32 %v9524_v57, %v13901_v36  ;;  %v9557_v61 = vsub.f32 %v9525_v52, %v13901_v36  ;;  %v9558_v28 = vsub.f32 %v13974_v46, %v13901_v36  ;;  %v9605_v44 = vld [vmem:[%s11634_s20 + $0x48] sm:$0xff]  ;;  %v9607_v46 = vld [vmem:[%s11634_s20 + $0x58] sm:$0xff]  ;;  %v9608_v57 = vld [vmem:[%s11634_s20 + $0x60] sm:$0xff] }
 0x6db   : > { %11530 = vrsqrt.f32 %v9498_v10  ;;  %v9559_v23 = vsub.f32 %v9527_v59, %v13901_v36  ;;  %v9560_v30 = vsub.f32 %v9528_v41, %v13901_v36  ;;  %v9561_v10 = vsub.f32 %v9529_v2, %v13901_v36  ;;  %v9610_v52 = vld [vmem:[%s11634_s20 + $0x70] sm:$0xff] }
 0x6dc   : > { %v9562_v53 = vsub.f32 %v13982_v14, %v13901_v36  ;;  %v9563_v1 = vsub.f32 %v9531_v40, %v13901_v36  ;;  %v9611_v14 = vld [vmem:[%s11634_s20 + $0x78] sm:$0xff] }
 0x6e5   : > { %v11531_v18 = vpop.eup %11530 }
 0x6e6   : > { %v9564_v17 = vmul.f32 %v11531_v18, %v9532_v56  ;;  %v9565_v5 = vmul.f32 %v11531_v18, %v9533_v42  ;;  %v9566_v55 = vmul.f32 %v11531_v18, %v9534_v43  ;;  %v9567_v3 = vmul.f32 %v11531_v18, %v9535_v63  ;;  %v9596_v63 = vld [vmem:[%s11634_s20] sm:$0xff] }
 0x6e7   : > { %v9568_v0 = vmul.f32 %v11531_v18, %v9536_v9  ;;  %v9569_v34 = vmul.f32 %v11531_v18, %v9537_v6  ;;  %v9570_v27 = vmul.f32 %v11531_v18, %v9538_v54  ;;  %v9571_v15 = vmul.f32 %v11531_v18, %v9539_v37 }
 0x6e8   : > { %v9572_v16 = vmul.f32 %v11531_v18, %v9540_v29  ;;  %v9573_v48 = vmul.f32 %v11531_v18, %v9541_v11  ;;  %v9574_v39 = vmul.f32 %v11531_v18, %v9542_v24  ;;  %v9575_v26 = vmul.f32 %v11531_v18, %v9543_v12  ;;  %v9603_v29 = vld [vmem:[%s11634_s20 + $0x38] sm:$0xff] }
 0x6e9   : > { %v14000_v36 = vmul.f32 %v11531_v18, %v9544_v31  ;;  %v14002_v56 = vmul.f32 %v11531_v18, %v9545_v60  ;;  %v14004_v42 = vmul.f32 %v11531_v18, %v9546_v21  ;;  %v14006_v43 = vmul.f32 %v11531_v18, %v9547_v19  ;;  %v9606_v31 = vld [vmem:[%s11634_s20 + $0x50] sm:$0xff] }
 0x6ea   : > { %v14012_v9 = vmul.f32 %v11531_v18, %v9548_v33  ;;  %v14014_v6 = vmul.f32 %v11531_v18, %v9549_v13  ;;  %v14016_v54 = vmul.f32 %v11531_v18, %v9550_v25  ;;  %v14018_v37 = vmul.f32 %v11531_v18, %v9551_v47  ;;  %v9609_v33 = vld [vmem:[%s11634_s20 + $0x68] sm:$0xff] }
 0x6eb   : > { %v14024_v11 = vmul.f32 %v11531_v18, %v9552_v32  ;;  %v14026_v24 = vmul.f32 %v11531_v18, %v9553_v62  ;;  %v14028_v12 = vmul.f32 %v11531_v18, %v9554_v8  ;;  %v14030_v38 = vmul.f32 %v11531_v18, %v9555_v22  ;;  %v9612_v32 = vld [vmem:[%s11634_s20 + $0x80] sm:$0xff]  ;;  %v9613_v62 = vld [vmem:[%s11634_s20 + $0x88] sm:$0xff]  ;;  %v9614_v8 = vld [vmem:[%s11634_s20 + $0x90] sm:$0xff] }
 0x6ec   : > { %v14035_v60 = vmul.f32 %v11531_v18, %v9556_v7  ;;  %v14037_v21 = vmul.f32 %v11531_v18, %v9557_v61  ;;  %v14039_v19 = vmul.f32 %v11531_v18, %v9558_v28  ;;  %v14041_v35 = vmul.f32 %v11531_v18, %v9559_v23  ;;  %v9615_v22 = vld [vmem:[%s11634_s20 + $0x98] sm:$0xff]  ;;  %v9616_v61 = vld [vmem:[%s11634_s20 + $0xa0] sm:$0xff]  ;;  %v9617_v28 = vld [vmem:[%s11634_s20 + $0xa8] sm:$0xff] }
 0x6ed   : > { %v14053_v13 = vmul.f32 %v11531_v18, %v9560_v30  ;;  %v14055_v25 = vmul.f32 %v11531_v18, %v9561_v10  ;;  %v14057_v47 = vmul.f32 %v11531_v18, %v9562_v53  ;;  %v14059_v59 = vmul.f32 %v11531_v18, %v9563_v1  ;;  %v9618_v23 = vld [vmem:[%s11634_s20 + $0xb0] sm:$0xff]  ;;  %v9619_v1 = vld [vmem:[%s11634_s20 + $0xb8] sm:$0xff] }
 0x6ee   : > { %v9628_v41 = vadd.f32 %v9596_v63, %v9564_v17  ;;  %v9629_v40 = vadd.f32 %v9597_v20, %v9565_v5  ;;  %v9630_v2 = vadd.f32 %v9598_v45, %v9566_v55  ;;  %v9631_v7 = vadd.f32 %v9599_v4, %v9567_v3  ;;  %v9621_v17 = vld [vmem:[%s11634_s20 + $0xc8] sm:$0xff] }
 0x6ef   : > { %14597 = vst [vmem:[#allocation4_spill] sm:$0xff] %v14059_v59  ;;  %v9632_v18 = vadd.f32 %v9600_v58, %v9568_v0  ;;  %v9633_v30 = vadd.f32 %v9601_v50, %v9569_v34  ;;  %v9634_v10 = vadd.f32 %v9602_v49, %v9570_v27  ;;  %v9635_v53 = vadd.f32 %v9603_v29, %v9571_v15  ;;  %v9620_v59 = vld [vmem:[%s11634_s20 + $0xc0] sm:$0xff]  ;;  %v9622_v0 = vld [vmem:[%s11634_s20 + $0xd0] sm:$0xff]  ;;  %v9623_v34 = vld [vmem:[%s11634_s20 + $0xd8] sm:$0xff] }
 0x6f0   : > { %v9636_v5 = vadd.f32 %v9604_v51, %v9572_v16  ;;  %v9637_v55 = vadd.f32 %v9605_v44, %v9573_v48  ;;  %v9638_v3 = vadd.f32 %v9606_v31, %v9574_v39  ;;  %v9639_v63 = vadd.f32 %v9607_v46, %v9575_v26  ;;  %9661 = vst.msk [vmem:[%s14051_s22] sm:$0xff] %vm14598_vm10, %v9628_v41  ;;  %v9624_v27 = vld [vmem:[%s11634_s20 + $0xe0] sm:$0xff]  ;;  %v9625_v26 = vld [vmem:[%s11634_s20 + $0xe8] sm:$0xff]  ;;  %vm14613_vm10 = vmmov %vm14506_vm0 }
 0x6f1   : > { %9662 = vst.msk [vmem:[%s14051_s22 + $0x8] sm:$0xff] %vm14599_vm11, %v9629_v40  ;;  %v9640_v15 = vadd.f32 %v9608_v57, %v14000_v36  ;;  %v9641_v16 = vadd.f32 %v9609_v33, %v14002_v56  ;;  %v9642_v48 = vadd.f32 %v9610_v52, %v14004_v42  ;;  %v9643_v39 = vadd.f32 %v9611_v14, %v14006_v43  ;;  %v9626_v36 = vld [vmem:[%s11634_s20 + $0xf0] sm:$0xff]  ;;  %v9627_v56 = vld [vmem:[%s11634_s20 + $0xf8] sm:$0xff]  ;;  %vm14614_vm11 = vmmov %vm14506_vm0 }
 0x6f2   : > { %9663 = vst.msk [vmem:[%s14051_s22 + $0x10] sm:$0xff] %vm14600_vm12, %v9630_v2  ;;  %v9644_v42 = vadd.f32 %v9612_v32, %v14012_v9  ;;  %v9645_v20 = vadd.f32 %v9613_v62, %v14014_v6  ;;  %v9646_v43 = vadd.f32 %v9614_v8, %v14016_v54  ;;  %v9647_v45 = vadd.f32 %v9615_v22, %v14018_v37  ;;  %vm14615_vm12 = vmmov %vm14506_vm0 }
 0x6f3   : > { %9664 = vst.msk [vmem:[%s14051_s22 + $0x18] sm:$0xff] %vm14601_vm6, %v9631_v7  ;;  %v9648_v4 = vadd.f32 %v9616_v61, %v14024_v11  ;;  %v9649_v9 = vadd.f32 %v9617_v28, %v14026_v24  ;;  %v9650_v6 = vadd.f32 %v9618_v23, %v14028_v12  ;;  %v9651_v54 = vadd.f32 %v9619_v1, %v14030_v38  ;;  %vm14616_vm6 = vmmov %vm14506_vm0 }
 0x6f4   : > { %9665 = vst.msk [vmem:[%s14051_s22 + $0x20] sm:$0xff] %vm14602_vm8, %v9632_v18  ;;  %v9652_v37 = vadd.f32 %v9620_v59, %v14035_v60  ;;  %v9653_v58 = vadd.f32 %v9621_v17, %v14037_v21  ;;  %v9654_v50 = vadd.f32 %v9622_v0, %v14039_v19  ;;  %v9655_v49 = vadd.f32 %v9623_v34, %v14041_v35  ;;  %vm14618_vm8 = vmmov %vm14506_vm0 }
 0x6f5   : > { %9666 = vst.msk [vmem:[%s14051_s22 + $0x28] sm:$0xff] %vm14603_vm1, %v9633_v30  ;;  %v9656_v29 = vadd.f32 %v9624_v27, %v14053_v13  ;;  %v9657_v11 = vadd.f32 %v9625_v26, %v14055_v25  ;;  %v9658_v24 = vadd.f32 %v9626_v36, %v14057_v47  ;;  %vm14619_vm1 = vmmov %vm14506_vm0 }
 0x6f6   : > { %9667 = vst.msk [vmem:[%s14051_s22 + $0x30] sm:$0xff] %vm14604_vm2, %v9634_v10  ;;  %v14617_v12 = vld [vmem:[#allocation4_spill] sm:$0xff]  ;;  %vm14620_vm2 = vmmov %vm14506_vm0 }
 0x6f7   : > { %9668 = vst.msk [vmem:[%s14051_s22 + $0x38] sm:$0xff] %vm14605_vm3, %v9635_v53  ;;  %v9659_v38 = vadd.f32 %v9627_v56, %v14617_v12  ;;  %vm14621_vm3 = vmmov %vm14506_vm0 }
 0x6f8   : > { %9669 = vst.msk [vmem:[%s14051_s22 + $0x40] sm:$0xff] %vm14606_vm4, %v9636_v5  ;;  %vm14622_vm4 = vmmov %vm14506_vm0 }
 0x6f9   : > { %9670 = vst.msk [vmem:[%s14051_s22 + $0x48] sm:$0xff] %vm14607_vm5, %v9637_v55  ;;  %vm14623_vm5 = vmmov %vm14506_vm0 }
 0x6fa   : > { %9671 = vst.msk [vmem:[%s14051_s22 + $0x50] sm:$0xff] %vm14608_vm9, %v9638_v3  ;;  %vm14624_vm9 = vmmov %vm14506_vm0 }
 0x6fb   : > { %9672 = vst.msk [vmem:[%s14051_s22 + $0x58] sm:$0xff] %vm14609_vm13, %v9639_v63  ;;  %vm14625_vm13 = vmmov %vm14506_vm0 }
 0x6fc   : > { %9673 = vst.msk [vmem:[%s14051_s22 + $0x60] sm:$0xff] %vm14610_vm14, %v9640_v15  ;;  %vm14626_vm14 = vmmov %vm14506_vm0 }
 0x6fd   : > { %9674 = vst.msk [vmem:[%s14051_s22 + $0x68] sm:$0xff] %vm14611_vm15, %v9641_v16  ;;  %vm14627_vm15 = vmmov %vm14506_vm0 }
 0x6fe   : > { %9675 = vst.msk [vmem:[%s14051_s22 + $0x70] sm:$0xff] %vm14612_vm7, %v9642_v48  ;;  %vm14628_vm7 = vmmov %vm14506_vm0 }
 0x6ff   : > { %9676 = vst.msk [vmem:[%s14051_s22 + $0x78] sm:$0xff] %vm14506_vm0, %v9643_v39  ;;  %9692 = vst.msk [vmem:[%s14051_s22 + $0xf8] sm:$0xff] %vm14506_vm0, %v9659_v38 }
 0x700   : > { %9677 = vst.msk [vmem:[%s14051_s22 + $0x80] sm:$0xff] %vm14613_vm10, %v9644_v42 }
 0x701   : > { %9678 = vst.msk [vmem:[%s14051_s22 + $0x88] sm:$0xff] %vm14614_vm11, %v9645_v20 }
 0x702   : > { %9679 = vst.msk [vmem:[%s14051_s22 + $0x90] sm:$0xff] %vm14615_vm12, %v9646_v43 }
 0x703   : > { %9680 = vst.msk [vmem:[%s14051_s22 + $0x98] sm:$0xff] %vm14616_vm6, %v9647_v45 }
 0x704   : > { %9681 = vst.msk [vmem:[%s14051_s22 + $0xa0] sm:$0xff] %vm14618_vm8, %v9648_v4 }
 0x705   : > { %9682 = vst.msk [vmem:[%s14051_s22 + $0xa8] sm:$0xff] %vm14619_vm1, %v9649_v9 }
 0x706   : > { %9683 = vst.msk [vmem:[%s14051_s22 + $0xb0] sm:$0xff] %vm14620_vm2, %v9650_v6 }
 0x707   : > { %9684 = vst.msk [vmem:[%s14051_s22 + $0xb8] sm:$0xff] %vm14621_vm3, %v9651_v54 }
 0x708   : > { %9685 = vst.msk [vmem:[%s14051_s22 + $0xc0] sm:$0xff] %vm14622_vm4, %v9652_v37 }
 0x709   : > { %9686 = vst.msk [vmem:[%s14051_s22 + $0xc8] sm:$0xff] %vm14623_vm5, %v9653_v58 }
 0x70a   : > { %9687 = vst.msk [vmem:[%s14051_s22 + $0xd0] sm:$0xff] %vm14624_vm9, %v9654_v50 }
 0x70b   : > { %9688 = vst.msk [vmem:[%s14051_s22 + $0xd8] sm:$0xff] %vm14625_vm13, %v9655_v49 }
 0x70c   : > { %9689 = vst.msk [vmem:[%s14051_s22 + $0xe0] sm:$0xff] %vm14626_vm14, %v9656_v29 }
 0x70d   : > { %9690 = vst.msk [vmem:[%s14051_s22 + $0xe8] sm:$0xff] %vm14627_vm15, %v9657_v11 }
 0x70e   : > { %9691 = vst.msk [vmem:[%s14051_s22 + $0xf0] sm:$0xff] %vm14628_vm7, %v9658_v24 }
 0x70f PF: > { %s13_s12 = sadd.s32 1, %s11540_s12  }
 0x710   : > { %p10_p4 = scmp.ge.s32.totalorder %s13_s12, 4  }
 0x712   :  { %12 = sbr.rel (!%p10_p4) target bundleno = 1 (0x1), region = 73 }

</bundles_post_ra>
